<compile_context>
chip_gen: v5e
topology: v5e:2x2
jax: 0.10.0
libtpu: 0.0.40
codegen_flags: <defaults>
</compile_context>

<pallas_src>
import jax
import jax.numpy as jnp
from jax.experimental import pallas as pl
from jax.experimental.pallas import tpu as pltpu

BN_EPS = 1e-5
LANE = 128


# ----------------------------------------------------------------------------
# In-kernel helpers
# ----------------------------------------------------------------------------
def _bn_pool_relu(y, scratch_ref, b, oh, ow, c):
    """BatchNorm2d(affine=False, batch stats) -> AvgPool2d(2,2) -> ReLU.

    y: (b*oh*ow, c) conv output, rows ordered (b, i, j), channels on lanes.
    Returns (b, oh//2, ow//2, c).
    """
    n = y.shape[0]
    inv_n = 1.0 / float(n)
    # one-pass batch statistics per channel (lane dim)
    mean = jnp.sum(y, axis=0, keepdims=True) * inv_n
    mean_sq = jnp.sum(y * y, axis=0, keepdims=True) * inv_n
    var = mean_sq - mean * mean
    scratch_ref[...] = (y - mean) * jax.lax.rsqrt(var + BN_EPS)

    # horizontal 2x: j-even / j-odd pixels are adjacent rows -> strided reads
    half = n // 2
    hsum = (scratch_ref[pl.ds(0, half, 2), :] +
            scratch_ref[pl.ds(1, half, 2), :])          # rows (b, i, q)

    # vertical 2x: rows i=2p / i=2p+1 sit pw apart -> regroup (tile-aligned,
    # 2*pw is a multiple of 8 for both blocks) and add the two halves
    ph, pw = oh // 2, ow // 2
    hsum = hsum.reshape(b * ph, 2 * pw, c)
    pooled = (hsum[:, :pw, :] + hsum[:, pw:, :]) * 0.25  # (b*ph, pw, c)
    return jnp.maximum(pooled, 0.0).reshape(b, ph, pw, c)


# ----------------------------------------------------------------------------
# Fused LeNet-5 kernel
# ----------------------------------------------------------------------------
def lenet5_kernel(p1_ref, w1_ref, w2_ref, w1l_ref, b1_ref, w2l_ref, b2_ref,
                  w3l_ref, b3_ref, out_ref, s1_ref, s2_ref):
    b = out_ref.shape[0]
    c1 = w1_ref.shape[1]           # 6
    c2 = w2_ref.shape[2]           # 16

    # -- block 1: conv1 (im2col matmul) -> bn1 -> pool1 -> relu   28 -> 24 -> 12
    y1 = jnp.dot(p1_ref[...], w1_ref[...], preferred_element_type=jnp.float32)
    f1 = _bn_pool_relu(y1, s1_ref, b, 24, 24, c1)        # (b, 12, 12, 6)

    # -- block 2: conv2 as 25 accumulating dots on resident f1    12 -> 8 -> 4
    y2 = jnp.zeros((b * 8 * 8, c2), jnp.float32)
    for kh in range(5):
        for kw in range(5):
            window = f1[:, kh:kh + 8, kw:kw + 8, :].reshape(b * 8 * 8, c1)
            y2 = y2 + jnp.dot(window, w2_ref[kh * 5 + kw],
                              preferred_element_type=jnp.float32)
    f2 = _bn_pool_relu(y2, s2_ref, b, 8, 8, c2)          # (b, 4, 4, 16)

    # -- MLP head (dims padded to 128 lanes; torch (C,H,W) flatten order is
    #    baked into the pre-permuted linear1 weights)
    nh = w1l_ref.shape[2]
    h = jnp.zeros((b, nh), jnp.float32)
    for s in range(16):
        h = h + jnp.dot(f2[:, s // 4, s % 4, :], w1l_ref[s],
                        preferred_element_type=jnp.float32)
    h = jnp.maximum(h + b1_ref[...], 0.0)
    h = jnp.maximum(jnp.dot(h, w2l_ref[...], preferred_element_type=jnp.float32)
                    + b2_ref[...], 0.0)
    out_ref[...] = (jnp.dot(h, w3l_ref[...], preferred_element_type=jnp.float32)
                    + b3_ref[...])


# ----------------------------------------------------------------------------
# JAX glue (all inside jit): im2col for conv1, weight permutes / lane padding
# ----------------------------------------------------------------------------
def _full_spec(shape):
    return pl.BlockSpec(shape, lambda i, _nd=len(shape): (0,) * _nd)


def _im2col(x_nhwc, k):
    """(B,H,W,C) -> (B*OH*OW, k*k*C), rows (b,i,j), patch flattened (kh,kw,ci)."""
    b, h, w, c = x_nhwc.shape
    oh, ow = h - k + 1, w - k + 1
    cols = jnp.stack(
        [x_nhwc[:, kh:kh + oh, kw:kw + ow, :] for kh in range(k) for kw in range(k)],
        axis=3)                                          # (b, oh, ow, k*k, c)
    return cols.reshape(b * oh * ow, k * k * c)


@jax.jit
def lenet5_forward(x_nchw, params):
    b = x_nchw.shape[0]
    x_nhwc = jnp.transpose(x_nchw, (0, 2, 3, 1)).astype(jnp.float32)

    # conv weights: (Cout, Cin, KH, KW) -> (kh*kw, [ci,] Cout), matching im2col
    w1 = jnp.transpose(params["conv1_w"], (2, 3, 1, 0)).reshape(25, 6)
    w2 = jnp.transpose(params["conv2_w"], (2, 3, 1, 0)).reshape(25, 6, 16)

    # linear1: torch flatten order is (c, h, w); kernel consumes (h, w, c)
    w1l = jnp.transpose(params["l1_w"].reshape(120, 16, 4, 4), (2, 3, 1, 0))
    w1l = jnp.pad(w1l.reshape(16, 16, 120), ((0, 0), (0, 0), (0, LANE - 120)))
    b1 = jnp.pad(params["l1_b"], (0, LANE - 120)).reshape(1, LANE)
    w2l = jnp.pad(params["l2_w"].T, ((0, LANE - 120), (0, LANE - 84)))
    b2 = jnp.pad(params["l2_b"], (0, LANE - 84)).reshape(1, LANE)
    w3l = jnp.pad(params["l3_w"].T, ((0, LANE - 84), (0, LANE - 10)))
    b3 = jnp.pad(params["l3_b"], (0, LANE - 10)).reshape(1, LANE)

    p1 = _im2col(x_nhwc, 5)                              # (b*576, 25)

    args = (p1, w1, w2, w1l, b1, w2l, b2, w3l, b3)
    out_padded = pl.pallas_call(
        lenet5_kernel,
        out_shape=jax.ShapeDtypeStruct((b, LANE), jnp.float32),
        grid=(1,),
        in_specs=[_full_spec(a.shape) for a in args],
        out_specs=_full_spec((b, LANE)),
        scratch_shapes=[pltpu.VMEM((b * 24 * 24, 6), jnp.float32),
                        pltpu.VMEM((b * 8 * 8, 16), jnp.float32)],
        compiler_params=pltpu.CompilerParams(
            dimension_semantics=("arbitrary",)),
    )(*args)
    return out_padded[:, :10]                            # drop lane padding


# ----------------------------------------------------------------------------
def init_params(key):
    ks = jax.random.split(key, 8)
    n = lambda k, shp, s=0.1: (s * jax.random.normal(k, shp)).astype(jnp.float32)
    return {
        "conv1_w": n(ks[0], (6, 1, 5, 5)),
        "conv2_w": n(ks[1], (16, 6, 5, 5)),
        "l1_w": n(ks[2], (120, 256)), "l1_b": n(ks[3], (120,)),
        "l2_w": n(ks[4], (84, 120)),  "l2_b": n(ks[5], (84,)),
        "l3_w": n(ks[6], (10, 84)),   "l3_b": n(ks[7], (10,)),
    }


if __name__ == "__main__":
    key = jax.random.PRNGKey(0)
    k_x, k_p = jax.random.split(key)
    # MNIST-shaped input is required by linear1 (4*4*16 = 256): (B, 1, 28, 28)
    x = jax.random.normal(k_x, (2, 1, 28, 28), dtype=jnp.float32)
    params = init_params(k_p)

    logits = lenet5_forward(x, params)                   # (2, 10)
    jax.block_until_ready(logits)
    assert logits.shape == (2, 10)
    print("KERNEL_OK")
</pallas_src>

<mosaic_0001>
module attributes {stable_mosaic.version = 11 : i64} {
  func.func @lenet5_kernel(%arg0: i32, %arg1: memref<1152x25xf32, #tpu.memory_space<vmem>>, %arg2: memref<25x6xf32, #tpu.memory_space<vmem>>, %arg3: memref<25x6x16xf32, #tpu.memory_space<vmem>>, %arg4: memref<16x16x128xf32, #tpu.memory_space<vmem>>, %arg5: memref<1x128xf32, #tpu.memory_space<vmem>>, %arg6: memref<128x128xf32, #tpu.memory_space<vmem>>, %arg7: memref<1x128xf32, #tpu.memory_space<vmem>>, %arg8: memref<128x128xf32, #tpu.memory_space<vmem>>, %arg9: memref<1x128xf32, #tpu.memory_space<vmem>>, %arg10: memref<2x128xf32, #tpu.memory_space<vmem>>, %arg11: memref<1152x6xf32, #tpu.memory_space<vmem>>, %arg12: memref<128x16xf32, #tpu.memory_space<vmem>>) attributes {dimension_semantics = [#tpu.dimension_semantics<arbitrary>], iteration_bounds = array<i64: 1>, scalar_prefetch = 0 : i64, scratch_operands = 2 : i64, tpu.core_type = #tpu.core_type<tc>, window_params = [{pipeline_mode = #tpu.pipeline_mode<synchronous>, transform_indices = @transform_0, window_bounds = array<i64: 1152, 25>}, {pipeline_mode = #tpu.pipeline_mode<synchronous>, transform_indices = @transform_1, window_bounds = array<i64: 25, 6>}, {pipeline_mode = #tpu.pipeline_mode<synchronous>, transform_indices = @transform_2, window_bounds = array<i64: 25, 6, 16>}, {pipeline_mode = #tpu.pipeline_mode<synchronous>, transform_indices = @transform_3, window_bounds = array<i64: 16, 16, 128>}, {pipeline_mode = #tpu.pipeline_mode<synchronous>, transform_indices = @transform_4, window_bounds = array<i64: 1, 128>}, {pipeline_mode = #tpu.pipeline_mode<synchronous>, transform_indices = @transform_5, window_bounds = array<i64: 128, 128>}, {pipeline_mode = #tpu.pipeline_mode<synchronous>, transform_indices = @transform_6, window_bounds = array<i64: 1, 128>}, {pipeline_mode = #tpu.pipeline_mode<synchronous>, transform_indices = @transform_7, window_bounds = array<i64: 128, 128>}, {pipeline_mode = #tpu.pipeline_mode<synchronous>, transform_indices = @transform_8, window_bounds = array<i64: 1, 128>}, {pipeline_mode = #tpu.pipeline_mode<synchronous>, transform_indices = @transform_9, window_bounds = array<i64: 2, 128>}]} {
    %c0 = arith.constant 0 : index
    %c0_0 = arith.constant 0 : index
    %0 = vector.load %arg1[%c0, %c0_0] : memref<1152x25xf32, #tpu.memory_space<vmem>>, vector<1152x25xf32>
    %c0_1 = arith.constant 0 : index
    %c0_2 = arith.constant 0 : index
    %1 = vector.load %arg2[%c0_1, %c0_2] : memref<25x6xf32, #tpu.memory_space<vmem>>, vector<25x6xf32>
    %cst = arith.constant dense<0.000000e+00> : vector<1152x6xf32>
    %2 = tpu.matmul %0, %1, %cst {dimension_numbers = #tpu.dot_dimension_numbers<[1], [0], [0], [1], [0, 0, 1, 1], [], []>} : vector<1152x25xf32>, vector<25x6xf32>, vector<1152x6xf32> -> vector<1152x6xf32>
    %cst_3 = arith.constant dense<0.000000e+00> : vector<6xf32>
    %3 = vector.multi_reduction <add>, %2, %cst_3 [0] : vector<1152x6xf32> to vector<6xf32>
    %4 = vector.shape_cast %3 : vector<6xf32> to vector<1x6xf32>
    %cst_4 = arith.constant 8.68055562E-4 : f32
    %5 = vector.broadcast %cst_4 : f32 to vector<1x6xf32>
    %6 = arith.mulf %4, %5 : vector<1x6xf32>
    %7 = arith.mulf %2, %2 : vector<1152x6xf32>
    %cst_5 = arith.constant dense<0.000000e+00> : vector<6xf32>
    %8 = vector.multi_reduction <add>, %7, %cst_5 [0] : vector<1152x6xf32> to vector<6xf32>
    %9 = vector.shape_cast %8 : vector<6xf32> to vector<1x6xf32>
    %cst_6 = arith.constant 8.68055562E-4 : f32
    %10 = vector.broadcast %cst_6 : f32 to vector<1x6xf32>
    %11 = arith.mulf %9, %10 : vector<1x6xf32>
    %12 = arith.mulf %6, %6 : vector<1x6xf32>
    %13 = arith.subf %11, %12 : vector<1x6xf32>
    %14 = vector.broadcast %6 : vector<1x6xf32> to vector<1152x6xf32>
    %15 = arith.subf %2, %14 : vector<1152x6xf32>
    %cst_7 = arith.constant 9.99999974E-6 : f32
    %16 = vector.broadcast %cst_7 : f32 to vector<1x6xf32>
    %17 = arith.addf %13, %16 : vector<1x6xf32>
    %18 = math.rsqrt %17 : vector<1x6xf32>
    %19 = vector.broadcast %18 : vector<1x6xf32> to vector<1152x6xf32>
    %20 = arith.mulf %15, %19 : vector<1152x6xf32>
    %c0_8 = arith.constant 0 : index
    %c0_9 = arith.constant 0 : index
    %21 = vector.load %arg11[%c0_8, %c0_9] : memref<1152x6xf32, #tpu.memory_space<vmem>>, vector<1152x6xf32>
    tpu.vector_store %arg11[%c0_8, %c0_9], %20 {strides = array<i32>} : memref<1152x6xf32, #tpu.memory_space<vmem>>, vector<1152x6xf32>,
    %c0_10 = arith.constant 0 : index
    %c0_11 = arith.constant 0 : index
    %22 = tpu.strided_load %arg11[%c0_10, %c0_11] {strides = array<i32: 2, 1>} : memref<1152x6xf32, #tpu.memory_space<vmem>>, vector<576x6xf32>
    %c1 = arith.constant 1 : index
    %c0_12 = arith.constant 0 : index
    %23 = tpu.strided_load %arg11[%c1, %c0_12] {strides = array<i32: 2, 1>} : memref<1152x6xf32, #tpu.memory_space<vmem>>, vector<576x6xf32>
    %24 = arith.addf %22, %23 : vector<576x6xf32>
    %25 = vector.shape_cast %24 : vector<576x6xf32> to vector<24x24x6xf32>
    %26 = vector.extract_strided_slice %25 {offsets = [0, 0, 0], sizes = [24, 12, 6], strides = [1, 1, 1]} : vector<24x24x6xf32> to vector<24x12x6xf32>
    %27 = vector.extract_strided_slice %25 {offsets = [0, 12, 0], sizes = [24, 12, 6], strides = [1, 1, 1]} : vector<24x24x6xf32> to vector<24x12x6xf32>
    %28 = arith.addf %26, %27 : vector<24x12x6xf32>
    %cst_13 = arith.constant 2.500000e-01 : f32
    %29 = vector.broadcast %cst_13 : f32 to vector<24x12x6xf32>
    %30 = arith.mulf %28, %29 : vector<24x12x6xf32>
    %cst_14 = arith.constant 0.000000e+00 : f32
    %31 = vector.broadcast %cst_14 : f32 to vector<24x12x6xf32>
    %32 = arith.maximumf %30, %31 : vector<24x12x6xf32>
    %33 = vector.shape_cast %32 : vector<24x12x6xf32> to vector<2x12x12x6xf32>
    %cst_15 = arith.constant 0.000000e+00 : f32
    %34 = vector.broadcast %cst_15 : f32 to vector<128x16xf32>
    %35 = vector.extract_strided_slice %33 {offsets = [0, 0, 0, 0], sizes = [2, 8, 8, 6], strides = [1, 1, 1, 1]} : vector<2x12x12x6xf32> to vector<2x8x8x6xf32>
    %36 = vector.shape_cast %35 : vector<2x8x8x6xf32> to vector<128x6xf32>
    %c0_16 = arith.constant 0 : index
    %c0_17 = arith.constant 0 : index
    %c0_18 = arith.constant 0 : index
    %37 = vector.load %arg3[%c0_16, %c0_17, %c0_18] : memref<25x6x16xf32, #tpu.memory_space<vmem>>, vector<1x6x16xf32>
    %38 = vector.shape_cast %37 : vector<1x6x16xf32> to vector<6x16xf32>
    %cst_19 = arith.constant dense<0.000000e+00> : vector<128x16xf32>
    %39 = tpu.matmul %36, %38, %cst_19 {dimension_numbers = #tpu.dot_dimension_numbers<[1], [0], [0], [1], [0, 0, 1, 1], [], []>} : vector<128x6xf32>, vector<6x16xf32>, vector<128x16xf32> -> vector<128x16xf32>
    %40 = arith.addf %34, %39 : vector<128x16xf32>
    %41 = vector.extract_strided_slice %33 {offsets = [0, 0, 1, 0], sizes = [2, 8, 8, 6], strides = [1, 1, 1, 1]} : vector<2x12x12x6xf32> to vector<2x8x8x6xf32>
    %42 = vector.shape_cast %41 : vector<2x8x8x6xf32> to vector<128x6xf32>
    %c1_20 = arith.constant 1 : index
    %c0_21 = arith.constant 0 : index
    %c0_22 = arith.constant 0 : index
    %43 = vector.load %arg3[%c1_20, %c0_21, %c0_22] : memref<25x6x16xf32, #tpu.memory_space<vmem>>, vector<1x6x16xf32>
    %44 = vector.shape_cast %43 : vector<1x6x16xf32> to vector<6x16xf32>
    %cst_23 = arith.constant dense<0.000000e+00> : vector<128x16xf32>
    %45 = tpu.matmul %42, %44, %cst_23 {dimension_numbers = #tpu.dot_dimension_numbers<[1], [0], [0], [1], [0, 0, 1, 1], [], []>} : vector<128x6xf32>, vector<6x16xf32>, vector<128x16xf32> -> vector<128x16xf32>
    %46 = arith.addf %40, %45 : vector<128x16xf32>
    %47 = vector.extract_strided_slice %33 {offsets = [0, 0, 2, 0], sizes = [2, 8, 8, 6], strides = [1, 1, 1, 1]} : vector<2x12x12x6xf32> to vector<2x8x8x6xf32>
    %48 = vector.shape_cast %47 : vector<2x8x8x6xf32> to vector<128x6xf32>
    %c2 = arith.constant 2 : index
    %c0_24 = arith.constant 0 : index
    %c0_25 = arith.constant 0 : index
    %49 = vector.load %arg3[%c2, %c0_24, %c0_25] : memref<25x6x16xf32, #tpu.memory_space<vmem>>, vector<1x6x16xf32>
    %50 = vector.shape_cast %49 : vector<1x6x16xf32> to vector<6x16xf32>
    %cst_26 = arith.constant dense<0.000000e+00> : vector<128x16xf32>
    %51 = tpu.matmul %48, %50, %cst_26 {dimension_numbers = #tpu.dot_dimension_numbers<[1], [0], [0], [1], [0, 0, 1, 1], [], []>} : vector<128x6xf32>, vector<6x16xf32>, vector<128x16xf32> -> vector<128x16xf32>
    %52 = arith.addf %46, %51 : vector<128x16xf32>
    %53 = vector.extract_strided_slice %33 {offsets = [0, 0, 3, 0], sizes = [2, 8, 8, 6], strides = [1, 1, 1, 1]} : vector<2x12x12x6xf32> to vector<2x8x8x6xf32>
    %54 = vector.shape_cast %53 : vector<2x8x8x6xf32> to vector<128x6xf32>
    %c3 = arith.constant 3 : index
    %c0_27 = arith.constant 0 : index
    %c0_28 = arith.constant 0 : index
    %55 = vector.load %arg3[%c3, %c0_27, %c0_28] : memref<25x6x16xf32, #tpu.memory_space<vmem>>, vector<1x6x16xf32>
    %56 = vector.shape_cast %55 : vector<1x6x16xf32> to vector<6x16xf32>
    %cst_29 = arith.constant dense<0.000000e+00> : vector<128x16xf32>
    %57 = tpu.matmul %54, %56, %cst_29 {dimension_numbers = #tpu.dot_dimension_numbers<[1], [0], [0], [1], [0, 0, 1, 1], [], []>} : vector<128x6xf32>, vector<6x16xf32>, vector<128x16xf32> -> vector<128x16xf32>
    %58 = arith.addf %52, %57 : vector<128x16xf32>
    %59 = vector.extract_strided_slice %33 {offsets = [0, 0, 4, 0], sizes = [2, 8, 8, 6], strides = [1, 1, 1, 1]} : vector<2x12x12x6xf32> to vector<2x8x8x6xf32>
    %60 = vector.shape_cast %59 : vector<2x8x8x6xf32> to vector<128x6xf32>
    %c4 = arith.constant 4 : index
    %c0_30 = arith.constant 0 : index
    %c0_31 = arith.constant 0 : index
    %61 = vector.load %arg3[%c4, %c0_30, %c0_31] : memref<25x6x16xf32, #tpu.memory_space<vmem>>, vector<1x6x16xf32>
    %62 = vector.shape_cast %61 : vector<1x6x16xf32> to vector<6x16xf32>
    %cst_32 = arith.constant dense<0.000000e+00> : vector<128x16xf32>
    %63 = tpu.matmul %60, %62, %cst_32 {dimension_numbers = #tpu.dot_dimension_numbers<[1], [0], [0], [1], [0, 0, 1, 1], [], []>} : vector<128x6xf32>, vector<6x16xf32>, vector<128x16xf32> -> vector<128x16xf32>
    %64 = arith.addf %58, %63 : vector<128x16xf32>
    %65 = vector.extract_strided_slice %33 {offsets = [0, 1, 0, 0], sizes = [2, 8, 8, 6], strides = [1, 1, 1, 1]} : vector<2x12x12x6xf32> to vector<2x8x8x6xf32>
    %66 = vector.shape_cast %65 : vector<2x8x8x6xf32> to vector<128x6xf32>
    %c5 = arith.constant 5 : index
    %c0_33 = arith.constant 0 : index
    %c0_34 = arith.constant 0 : index
    %67 = vector.load %arg3[%c5, %c0_33, %c0_34] : memref<25x6x16xf32, #tpu.memory_space<vmem>>, vector<1x6x16xf32>
    %68 = vector.shape_cast %67 : vector<1x6x16xf32> to vector<6x16xf32>
    %cst_35 = arith.constant dense<0.000000e+00> : vector<128x16xf32>
    %69 = tpu.matmul %66, %68, %cst_35 {dimension_numbers = #tpu.dot_dimension_numbers<[1], [0], [0], [1], [0, 0, 1, 1], [], []>} : vector<128x6xf32>, vector<6x16xf32>, vector<128x16xf32> -> vector<128x16xf32>
    %70 = arith.addf %64, %69 : vector<128x16xf32>
    %71 = vector.extract_strided_slice %33 {offsets = [0, 1, 1, 0], sizes = [2, 8, 8, 6], strides = [1, 1, 1, 1]} : vector<2x12x12x6xf32> to vector<2x8x8x6xf32>
    %72 = vector.shape_cast %71 : vector<2x8x8x6xf32> to vector<128x6xf32>
    %c6 = arith.constant 6 : index
    %c0_36 = arith.constant 0 : index
    %c0_37 = arith.constant 0 : index
    %73 = vector.load %arg3[%c6, %c0_36, %c0_37] : memref<25x6x16xf32, #tpu.memory_space<vmem>>, vector<1x6x16xf32>
    %74 = vector.shape_cast %73 : vector<1x6x16xf32> to vector<6x16xf32>
    %cst_38 = arith.constant dense<0.000000e+00> : vector<128x16xf32>
    %75 = tpu.matmul %72, %74, %cst_38 {dimension_numbers = #tpu.dot_dimension_numbers<[1], [0], [0], [1], [0, 0, 1, 1], [], []>} : vector<128x6xf32>, vector<6x16xf32>, vector<128x16xf32> -> vector<128x16xf32>
    %76 = arith.addf %70, %75 : vector<128x16xf32>
    %77 = vector.extract_strided_slice %33 {offsets = [0, 1, 2, 0], sizes = [2, 8, 8, 6], strides = [1, 1, 1, 1]} : vector<2x12x12x6xf32> to vector<2x8x8x6xf32>
    %78 = vector.shape_cast %77 : vector<2x8x8x6xf32> to vector<128x6xf32>
    %c7 = arith.constant 7 : index
    %c0_39 = arith.constant 0 : index
    %c0_40 = arith.constant 0 : index
    %79 = vector.load %arg3[%c7, %c0_39, %c0_40] : memref<25x6x16xf32, #tpu.memory_space<vmem>>, vector<1x6x16xf32>
    %80 = vector.shape_cast %79 : vector<1x6x16xf32> to vector<6x16xf32>
    %cst_41 = arith.constant dense<0.000000e+00> : vector<128x16xf32>
    %81 = tpu.matmul %78, %80, %cst_41 {dimension_numbers = #tpu.dot_dimension_numbers<[1], [0], [0], [1], [0, 0, 1, 1], [], []>} : vector<128x6xf32>, vector<6x16xf32>, vector<128x16xf32> -> vector<128x16xf32>
    %82 = arith.addf %76, %81 : vector<128x16xf32>
    %83 = vector.extract_strided_slice %33 {offsets = [0, 1, 3, 0], sizes = [2, 8, 8, 6], strides = [1, 1, 1, 1]} : vector<2x12x12x6xf32> to vector<2x8x8x6xf32>
    %84 = vector.shape_cast %83 : vector<2x8x8x6xf32> to vector<128x6xf32>
    %c8 = arith.constant 8 : index
    %c0_42 = arith.constant 0 : index
    %c0_43 = arith.constant 0 : index
    %85 = vector.load %arg3[%c8, %c0_42, %c0_43] : memref<25x6x16xf32, #tpu.memory_space<vmem>>, vector<1x6x16xf32>
    %86 = vector.shape_cast %85 : vector<1x6x16xf32> to vector<6x16xf32>
    %cst_44 = arith.constant dense<0.000000e+00> : vector<128x16xf32>
    %87 = tpu.matmul %84, %86, %cst_44 {dimension_numbers = #tpu.dot_dimension_numbers<[1], [0], [0], [1], [0, 0, 1, 1], [], []>} : vector<128x6xf32>, vector<6x16xf32>, vector<128x16xf32> -> vector<128x16xf32>
    %88 = arith.addf %82, %87 : vector<128x16xf32>
    %89 = vector.extract_strided_slice %33 {offsets = [0, 1, 4, 0], sizes = [2, 8, 8, 6], strides = [1, 1, 1, 1]} : vector<2x12x12x6xf32> to vector<2x8x8x6xf32>
    %90 = vector.shape_cast %89 : vector<2x8x8x6xf32> to vector<128x6xf32>
    %c9 = arith.constant 9 : index
    %c0_45 = arith.constant 0 : index
    %c0_46 = arith.constant 0 : index
    %91 = vector.load %arg3[%c9, %c0_45, %c0_46] : memref<25x6x16xf32, #tpu.memory_space<vmem>>, vector<1x6x16xf32>
    %92 = vector.shape_cast %91 : vector<1x6x16xf32> to vector<6x16xf32>
    %cst_47 = arith.constant dense<0.000000e+00> : vector<128x16xf32>
    %93 = tpu.matmul %90, %92, %cst_47 {dimension_numbers = #tpu.dot_dimension_numbers<[1], [0], [0], [1], [0, 0, 1, 1], [], []>} : vector<128x6xf32>, vector<6x16xf32>, vector<128x16xf32> -> vector<128x16xf32>
    %94 = arith.addf %88, %93 : vector<128x16xf32>
    %95 = vector.extract_strided_slice %33 {offsets = [0, 2, 0, 0], sizes = [2, 8, 8, 6], strides = [1, 1, 1, 1]} : vector<2x12x12x6xf32> to vector<2x8x8x6xf32>
    %96 = vector.shape_cast %95 : vector<2x8x8x6xf32> to vector<128x6xf32>
    %c10 = arith.constant 10 : index
    %c0_48 = arith.constant 0 : index
    %c0_49 = arith.constant 0 : index
    %97 = vector.load %arg3[%c10, %c0_48, %c0_49] : memref<25x6x16xf32, #tpu.memory_space<vmem>>, vector<1x6x16xf32>
    %98 = vector.shape_cast %97 : vector<1x6x16xf32> to vector<6x16xf32>
    %cst_50 = arith.constant dense<0.000000e+00> : vector<128x16xf32>
    %99 = tpu.matmul %96, %98, %cst_50 {dimension_numbers = #tpu.dot_dimension_numbers<[1], [0], [0], [1], [0, 0, 1, 1], [], []>} : vector<128x6xf32>, vector<6x16xf32>, vector<128x16xf32> -> vector<128x16xf32>
    %100 = arith.addf %94, %99 : vector<128x16xf32>
    %101 = vector.extract_strided_slice %33 {offsets = [0, 2, 1, 0], sizes = [2, 8, 8, 6], strides = [1, 1, 1, 1]} : vector<2x12x12x6xf32> to vector<2x8x8x6xf32>
    %102 = vector.shape_cast %101 : vector<2x8x8x6xf32> to vector<128x6xf32>
    %c11 = arith.constant 11 : index
    %c0_51 = arith.constant 0 : index
    %c0_52 = arith.constant 0 : index
    %103 = vector.load %arg3[%c11, %c0_51, %c0_52] : memref<25x6x16xf32, #tpu.memory_space<vmem>>, vector<1x6x16xf32>
    %104 = vector.shape_cast %103 : vector<1x6x16xf32> to vector<6x16xf32>
    %cst_53 = arith.constant dense<0.000000e+00> : vector<128x16xf32>
    %105 = tpu.matmul %102, %104, %cst_53 {dimension_numbers = #tpu.dot_dimension_numbers<[1], [0], [0], [1], [0, 0, 1, 1], [], []>} : vector<128x6xf32>, vector<6x16xf32>, vector<128x16xf32> -> vector<128x16xf32>
    %106 = arith.addf %100, %105 : vector<128x16xf32>
    %107 = vector.extract_strided_slice %33 {offsets = [0, 2, 2, 0], sizes = [2, 8, 8, 6], strides = [1, 1, 1, 1]} : vector<2x12x12x6xf32> to vector<2x8x8x6xf32>
    %108 = vector.shape_cast %107 : vector<2x8x8x6xf32> to vector<128x6xf32>
    %c12 = arith.constant 12 : index
    %c0_54 = arith.constant 0 : index
    %c0_55 = arith.constant 0 : index
    %109 = vector.load %arg3[%c12, %c0_54, %c0_55] : memref<25x6x16xf32, #tpu.memory_space<vmem>>, vector<1x6x16xf32>
    %110 = vector.shape_cast %109 : vector<1x6x16xf32> to vector<6x16xf32>
    %cst_56 = arith.constant dense<0.000000e+00> : vector<128x16xf32>
    %111 = tpu.matmul %108, %110, %cst_56 {dimension_numbers = #tpu.dot_dimension_numbers<[1], [0], [0], [1], [0, 0, 1, 1], [], []>} : vector<128x6xf32>, vector<6x16xf32>, vector<128x16xf32> -> vector<128x16xf32>
    %112 = arith.addf %106, %111 : vector<128x16xf32>
    %113 = vector.extract_strided_slice %33 {offsets = [0, 2, 3, 0], sizes = [2, 8, 8, 6], strides = [1, 1, 1, 1]} : vector<2x12x12x6xf32> to vector<2x8x8x6xf32>
    %114 = vector.shape_cast %113 : vector<2x8x8x6xf32> to vector<128x6xf32>
    %c13 = arith.constant 13 : index
    %c0_57 = arith.constant 0 : index
    %c0_58 = arith.constant 0 : index
    %115 = vector.load %arg3[%c13, %c0_57, %c0_58] : memref<25x6x16xf32, #tpu.memory_space<vmem>>, vector<1x6x16xf32>
    %116 = vector.shape_cast %115 : vector<1x6x16xf32> to vector<6x16xf32>
    %cst_59 = arith.constant dense<0.000000e+00> : vector<128x16xf32>
    %117 = tpu.matmul %114, %116, %cst_59 {dimension_numbers = #tpu.dot_dimension_numbers<[1], [0], [0], [1], [0, 0, 1, 1], [], []>} : vector<128x6xf32>, vector<6x16xf32>, vector<128x16xf32> -> vector<128x16xf32>
    %118 = arith.addf %112, %117 : vector<128x16xf32>
    %119 = vector.extract_strided_slice %33 {offsets = [0, 2, 4, 0], sizes = [2, 8, 8, 6], strides = [1, 1, 1, 1]} : vector<2x12x12x6xf32> to vector<2x8x8x6xf32>
    %120 = vector.shape_cast %119 : vector<2x8x8x6xf32> to vector<128x6xf32>
    %c14 = arith.constant 14 : index
    %c0_60 = arith.constant 0 : index
    %c0_61 = arith.constant 0 : index
    %121 = vector.load %arg3[%c14, %c0_60, %c0_61] : memref<25x6x16xf32, #tpu.memory_space<vmem>>, vector<1x6x16xf32>
    %122 = vector.shape_cast %121 : vector<1x6x16xf32> to vector<6x16xf32>
    %cst_62 = arith.constant dense<0.000000e+00> : vector<128x16xf32>
    %123 = tpu.matmul %120, %122, %cst_62 {dimension_numbers = #tpu.dot_dimension_numbers<[1], [0], [0], [1], [0, 0, 1, 1], [], []>} : vector<128x6xf32>, vector<6x16xf32>, vector<128x16xf32> -> vector<128x16xf32>
    %124 = arith.addf %118, %123 : vector<128x16xf32>
    %125 = vector.extract_strided_slice %33 {offsets = [0, 3, 0, 0], sizes = [2, 8, 8, 6], strides = [1, 1, 1, 1]} : vector<2x12x12x6xf32> to vector<2x8x8x6xf32>
    %126 = vector.shape_cast %125 : vector<2x8x8x6xf32> to vector<128x6xf32>
    %c15 = arith.constant 15 : index
    %c0_63 = arith.constant 0 : index
    %c0_64 = arith.constant 0 : index
    %127 = vector.load %arg3[%c15, %c0_63, %c0_64] : memref<25x6x16xf32, #tpu.memory_space<vmem>>, vector<1x6x16xf32>
    %128 = vector.shape_cast %127 : vector<1x6x16xf32> to vector<6x16xf32>
    %cst_65 = arith.constant dense<0.000000e+00> : vector<128x16xf32>
    %129 = tpu.matmul %126, %128, %cst_65 {dimension_numbers = #tpu.dot_dimension_numbers<[1], [0], [0], [1], [0, 0, 1, 1], [], []>} : vector<128x6xf32>, vector<6x16xf32>, vector<128x16xf32> -> vector<128x16xf32>
    %130 = arith.addf %124, %129 : vector<128x16xf32>
    %131 = vector.extract_strided_slice %33 {offsets = [0, 3, 1, 0], sizes = [2, 8, 8, 6], strides = [1, 1, 1, 1]} : vector<2x12x12x6xf32> to vector<2x8x8x6xf32>
    %132 = vector.shape_cast %131 : vector<2x8x8x6xf32> to vector<128x6xf32>
    %c16 = arith.constant 16 : index
    %c0_66 = arith.constant 0 : index
    %c0_67 = arith.constant 0 : index
    %133 = vector.load %arg3[%c16, %c0_66, %c0_67] : memref<25x6x16xf32, #tpu.memory_space<vmem>>, vector<1x6x16xf32>
    %134 = vector.shape_cast %133 : vector<1x6x16xf32> to vector<6x16xf32>
    %cst_68 = arith.constant dense<0.000000e+00> : vector<128x16xf32>
    %135 = tpu.matmul %132, %134, %cst_68 {dimension_numbers = #tpu.dot_dimension_numbers<[1], [0], [0], [1], [0, 0, 1, 1], [], []>} : vector<128x6xf32>, vector<6x16xf32>, vector<128x16xf32> -> vector<128x16xf32>
    %136 = arith.addf %130, %135 : vector<128x16xf32>
    %137 = vector.extract_strided_slice %33 {offsets = [0, 3, 2, 0], sizes = [2, 8, 8, 6], strides = [1, 1, 1, 1]} : vector<2x12x12x6xf32> to vector<2x8x8x6xf32>
    %138 = vector.shape_cast %137 : vector<2x8x8x6xf32> to vector<128x6xf32>
    %c17 = arith.constant 17 : index
    %c0_69 = arith.constant 0 : index
    %c0_70 = arith.constant 0 : index
    %139 = vector.load %arg3[%c17, %c0_69, %c0_70] : memref<25x6x16xf32, #tpu.memory_space<vmem>>, vector<1x6x16xf32>
    %140 = vector.shape_cast %139 : vector<1x6x16xf32> to vector<6x16xf32>
    %cst_71 = arith.constant dense<0.000000e+00> : vector<128x16xf32>
    %141 = tpu.matmul %138, %140, %cst_71 {dimension_numbers = #tpu.dot_dimension_numbers<[1], [0], [0], [1], [0, 0, 1, 1], [], []>} : vector<128x6xf32>, vector<6x16xf32>, vector<128x16xf32> -> vector<128x16xf32>
    %142 = arith.addf %136, %141 : vector<128x16xf32>
    %143 = vector.extract_strided_slice %33 {offsets = [0, 3, 3, 0], sizes = [2, 8, 8, 6], strides = [1, 1, 1, 1]} : vector<2x12x12x6xf32> to vector<2x8x8x6xf32>
    %144 = vector.shape_cast %143 : vector<2x8x8x6xf32> to vector<128x6xf32>
    %c18 = arith.constant 18 : index
    %c0_72 = arith.constant 0 : index
    %c0_73 = arith.constant 0 : index
    %145 = vector.load %arg3[%c18, %c0_72, %c0_73] : memref<25x6x16xf32, #tpu.memory_space<vmem>>, vector<1x6x16xf32>
    %146 = vector.shape_cast %145 : vector<1x6x16xf32> to vector<6x16xf32>
    %cst_74 = arith.constant dense<0.000000e+00> : vector<128x16xf32>
    %147 = tpu.matmul %144, %146, %cst_74 {dimension_numbers = #tpu.dot_dimension_numbers<[1], [0], [0], [1], [0, 0, 1, 1], [], []>} : vector<128x6xf32>, vector<6x16xf32>, vector<128x16xf32> -> vector<128x16xf32>
    %148 = arith.addf %142, %147 : vector<128x16xf32>
    %149 = vector.extract_strided_slice %33 {offsets = [0, 3, 4, 0], sizes = [2, 8, 8, 6], strides = [1, 1, 1, 1]} : vector<2x12x12x6xf32> to vector<2x8x8x6xf32>
    %150 = vector.shape_cast %149 : vector<2x8x8x6xf32> to vector<128x6xf32>
    %c19 = arith.constant 19 : index
    %c0_75 = arith.constant 0 : index
    %c0_76 = arith.constant 0 : index
    %151 = vector.load %arg3[%c19, %c0_75, %c0_76] : memref<25x6x16xf32, #tpu.memory_space<vmem>>, vector<1x6x16xf32>
    %152 = vector.shape_cast %151 : vector<1x6x16xf32> to vector<6x16xf32>
    %cst_77 = arith.constant dense<0.000000e+00> : vector<128x16xf32>
    %153 = tpu.matmul %150, %152, %cst_77 {dimension_numbers = #tpu.dot_dimension_numbers<[1], [0], [0], [1], [0, 0, 1, 1], [], []>} : vector<128x6xf32>, vector<6x16xf32>, vector<128x16xf32> -> vector<128x16xf32>
    %154 = arith.addf %148, %153 : vector<128x16xf32>
    %155 = vector.extract_strided_slice %33 {offsets = [0, 4, 0, 0], sizes = [2, 8, 8, 6], strides = [1, 1, 1, 1]} : vector<2x12x12x6xf32> to vector<2x8x8x6xf32>
    %156 = vector.shape_cast %155 : vector<2x8x8x6xf32> to vector<128x6xf32>
    %c20 = arith.constant 20 : index
    %c0_78 = arith.constant 0 : index
    %c0_79 = arith.constant 0 : index
    %157 = vector.load %arg3[%c20, %c0_78, %c0_79] : memref<25x6x16xf32, #tpu.memory_space<vmem>>, vector<1x6x16xf32>
    %158 = vector.shape_cast %157 : vector<1x6x16xf32> to vector<6x16xf32>
    %cst_80 = arith.constant dense<0.000000e+00> : vector<128x16xf32>
    %159 = tpu.matmul %156, %158, %cst_80 {dimension_numbers = #tpu.dot_dimension_numbers<[1], [0], [0], [1], [0, 0, 1, 1], [], []>} : vector<128x6xf32>, vector<6x16xf32>, vector<128x16xf32> -> vector<128x16xf32>
    %160 = arith.addf %154, %159 : vector<128x16xf32>
    %161 = vector.extract_strided_slice %33 {offsets = [0, 4, 1, 0], sizes = [2, 8, 8, 6], strides = [1, 1, 1, 1]} : vector<2x12x12x6xf32> to vector<2x8x8x6xf32>
    %162 = vector.shape_cast %161 : vector<2x8x8x6xf32> to vector<128x6xf32>
    %c21 = arith.constant 21 : index
    %c0_81 = arith.constant 0 : index
    %c0_82 = arith.constant 0 : index
    %163 = vector.load %arg3[%c21, %c0_81, %c0_82] : memref<25x6x16xf32, #tpu.memory_space<vmem>>, vector<1x6x16xf32>
    %164 = vector.shape_cast %163 : vector<1x6x16xf32> to vector<6x16xf32>
    %cst_83 = arith.constant dense<0.000000e+00> : vector<128x16xf32>
    %165 = tpu.matmul %162, %164, %cst_83 {dimension_numbers = #tpu.dot_dimension_numbers<[1], [0], [0], [1], [0, 0, 1, 1], [], []>} : vector<128x6xf32>, vector<6x16xf32>, vector<128x16xf32> -> vector<128x16xf32>
    %166 = arith.addf %160, %165 : vector<128x16xf32>
    %167 = vector.extract_strided_slice %33 {offsets = [0, 4, 2, 0], sizes = [2, 8, 8, 6], strides = [1, 1, 1, 1]} : vector<2x12x12x6xf32> to vector<2x8x8x6xf32>
    %168 = vector.shape_cast %167 : vector<2x8x8x6xf32> to vector<128x6xf32>
    %c22 = arith.constant 22 : index
    %c0_84 = arith.constant 0 : index
    %c0_85 = arith.constant 0 : index
    %169 = vector.load %arg3[%c22, %c0_84, %c0_85] : memref<25x6x16xf32, #tpu.memory_space<vmem>>, vector<1x6x16xf32>
    %170 = vector.shape_cast %169 : vector<1x6x16xf32> to vector<6x16xf32>
    %cst_86 = arith.constant dense<0.000000e+00> : vector<128x16xf32>
    %171 = tpu.matmul %168, %170, %cst_86 {dimension_numbers = #tpu.dot_dimension_numbers<[1], [0], [0], [1], [0, 0, 1, 1], [], []>} : vector<128x6xf32>, vector<6x16xf32>, vector<128x16xf32> -> vector<128x16xf32>
    %172 = arith.addf %166, %171 : vector<128x16xf32>
    %173 = vector.extract_strided_slice %33 {offsets = [0, 4, 3, 0], sizes = [2, 8, 8, 6], strides = [1, 1, 1, 1]} : vector<2x12x12x6xf32> to vector<2x8x8x6xf32>
    %174 = vector.shape_cast %173 : vector<2x8x8x6xf32> to vector<128x6xf32>
    %c23 = arith.constant 23 : index
    %c0_87 = arith.constant 0 : index
    %c0_88 = arith.constant 0 : index
    %175 = vector.load %arg3[%c23, %c0_87, %c0_88] : memref<25x6x16xf32, #tpu.memory_space<vmem>>, vector<1x6x16xf32>
    %176 = vector.shape_cast %175 : vector<1x6x16xf32> to vector<6x16xf32>
    %cst_89 = arith.constant dense<0.000000e+00> : vector<128x16xf32>
    %177 = tpu.matmul %174, %176, %cst_89 {dimension_numbers = #tpu.dot_dimension_numbers<[1], [0], [0], [1], [0, 0, 1, 1], [], []>} : vector<128x6xf32>, vector<6x16xf32>, vector<128x16xf32> -> vector<128x16xf32>
    %178 = arith.addf %172, %177 : vector<128x16xf32>
    %179 = vector.extract_strided_slice %33 {offsets = [0, 4, 4, 0], sizes = [2, 8, 8, 6], strides = [1, 1, 1, 1]} : vector<2x12x12x6xf32> to vector<2x8x8x6xf32>
    %180 = vector.shape_cast %179 : vector<2x8x8x6xf32> to vector<128x6xf32>
    %c24 = arith.constant 24 : index
    %c0_90 = arith.constant 0 : index
    %c0_91 = arith.constant 0 : index
    %181 = vector.load %arg3[%c24, %c0_90, %c0_91] : memref<25x6x16xf32, #tpu.memory_space<vmem>>, vector<1x6x16xf32>
    %182 = vector.shape_cast %181 : vector<1x6x16xf32> to vector<6x16xf32>
    %cst_92 = arith.constant dense<0.000000e+00> : vector<128x16xf32>
    %183 = tpu.matmul %180, %182, %cst_92 {dimension_numbers = #tpu.dot_dimension_numbers<[1], [0], [0], [1], [0, 0, 1, 1], [], []>} : vector<128x6xf32>, vector<6x16xf32>, vector<128x16xf32> -> vector<128x16xf32>
    %184 = arith.addf %178, %183 : vector<128x16xf32>
    %cst_93 = arith.constant dense<0.000000e+00> : vector<16xf32>
    %185 = vector.multi_reduction <add>, %184, %cst_93 [0] : vector<128x16xf32> to vector<16xf32>
    %186 = vector.shape_cast %185 : vector<16xf32> to vector<1x16xf32>
    %cst_94 = arith.constant 7.812500e-03 : f32
    %187 = vector.broadcast %cst_94 : f32 to vector<1x16xf32>
    %188 = arith.mulf %186, %187 : vector<1x16xf32>
    %189 = arith.mulf %184, %184 : vector<128x16xf32>
    %cst_95 = arith.constant dense<0.000000e+00> : vector<16xf32>
    %190 = vector.multi_reduction <add>, %189, %cst_95 [0] : vector<128x16xf32> to vector<16xf32>
    %191 = vector.shape_cast %190 : vector<16xf32> to vector<1x16xf32>
    %cst_96 = arith.constant 7.812500e-03 : f32
    %192 = vector.broadcast %cst_96 : f32 to vector<1x16xf32>
    %193 = arith.mulf %191, %192 : vector<1x16xf32>
    %194 = arith.mulf %188, %188 : vector<1x16xf32>
    %195 = arith.subf %193, %194 : vector<1x16xf32>
    %196 = vector.broadcast %188 : vector<1x16xf32> to vector<128x16xf32>
    %197 = arith.subf %184, %196 : vector<128x16xf32>
    %cst_97 = arith.constant 9.99999974E-6 : f32
    %198 = vector.broadcast %cst_97 : f32 to vector<1x16xf32>
    %199 = arith.addf %195, %198 : vector<1x16xf32>
    %200 = math.rsqrt %199 : vector<1x16xf32>
    %201 = vector.broadcast %200 : vector<1x16xf32> to vector<128x16xf32>
    %202 = arith.mulf %197, %201 : vector<128x16xf32>
    %c0_98 = arith.constant 0 : index
    %c0_99 = arith.constant 0 : index
    %203 = vector.load %arg12[%c0_98, %c0_99] : memref<128x16xf32, #tpu.memory_space<vmem>>, vector<128x16xf32>
    tpu.vector_store %arg12[%c0_98, %c0_99], %202 {strides = array<i32>} : memref<128x16xf32, #tpu.memory_space<vmem>>, vector<128x16xf32>,
    %c0_100 = arith.constant 0 : index
    %c0_101 = arith.constant 0 : index
    %204 = tpu.strided_load %arg12[%c0_100, %c0_101] {strides = array<i32: 2, 1>} : memref<128x16xf32, #tpu.memory_space<vmem>>, vector<64x16xf32>
    %c1_102 = arith.constant 1 : index
    %c0_103 = arith.constant 0 : index
    %205 = tpu.strided_load %arg12[%c1_102, %c0_103] {strides = array<i32: 2, 1>} : memref<128x16xf32, #tpu.memory_space<vmem>>, vector<64x16xf32>
    %206 = arith.addf %204, %205 : vector<64x16xf32>
    %207 = vector.shape_cast %206 : vector<64x16xf32> to vector<8x8x16xf32>
    %208 = vector.extract_strided_slice %207 {offsets = [0, 0, 0], sizes = [8, 4, 16], strides = [1, 1, 1]} : vector<8x8x16xf32> to vector<8x4x16xf32>
    %209 = vector.extract_strided_slice %207 {offsets = [0, 4, 0], sizes = [8, 4, 16], strides = [1, 1, 1]} : vector<8x8x16xf32> to vector<8x4x16xf32>
    %210 = arith.addf %208, %209 : vector<8x4x16xf32>
    %cst_104 = arith.constant 2.500000e-01 : f32
    %211 = vector.broadcast %cst_104 : f32 to vector<8x4x16xf32>
    %212 = arith.mulf %210, %211 : vector<8x4x16xf32>
    %cst_105 = arith.constant 0.000000e+00 : f32
    %213 = vector.broadcast %cst_105 : f32 to vector<8x4x16xf32>
    %214 = arith.maximumf %212, %213 : vector<8x4x16xf32>
    %215 = vector.shape_cast %214 : vector<8x4x16xf32> to vector<2x4x4x16xf32>
    %cst_106 = arith.constant 0.000000e+00 : f32
    %216 = vector.broadcast %cst_106 : f32 to vector<2x128xf32>
    %217 = vector.extract_strided_slice %215 {offsets = [0, 0, 0, 0], sizes = [2, 1, 1, 16], strides = [1, 1, 1, 1]} : vector<2x4x4x16xf32> to vector<2x1x1x16xf32>
    %218 = vector.shape_cast %217 : vector<2x1x1x16xf32> to vector<2x16xf32>
    %c0_107 = arith.constant 0 : index
    %c0_108 = arith.constant 0 : index
    %c0_109 = arith.constant 0 : index
    %219 = vector.load %arg4[%c0_107, %c0_108, %c0_109] : memref<16x16x128xf32, #tpu.memory_space<vmem>>, vector<1x16x128xf32>
    %220 = vector.shape_cast %219 : vector<1x16x128xf32> to vector<16x128xf32>
    %cst_110 = arith.constant dense<0.000000e+00> : vector<2x128xf32>
    %221 = tpu.matmul %218, %220, %cst_110 {dimension_numbers = #tpu.dot_dimension_numbers<[1], [0], [0], [1], [0, 0, 1, 1], [], []>} : vector<2x16xf32>, vector<16x128xf32>, vector<2x128xf32> -> vector<2x128xf32>
    %222 = arith.addf %216, %221 : vector<2x128xf32>
    %223 = vector.extract_strided_slice %215 {offsets = [0, 0, 1, 0], sizes = [2, 1, 1, 16], strides = [1, 1, 1, 1]} : vector<2x4x4x16xf32> to vector<2x1x1x16xf32>
    %224 = vector.shape_cast %223 : vector<2x1x1x16xf32> to vector<2x16xf32>
    %c1_111 = arith.constant 1 : index
    %c0_112 = arith.constant 0 : index
    %c0_113 = arith.constant 0 : index
    %225 = vector.load %arg4[%c1_111, %c0_112, %c0_113] : memref<16x16x128xf32, #tpu.memory_space<vmem>>, vector<1x16x128xf32>
    %226 = vector.shape_cast %225 : vector<1x16x128xf32> to vector<16x128xf32>
    %cst_114 = arith.constant dense<0.000000e+00> : vector<2x128xf32>
    %227 = tpu.matmul %224, %226, %cst_114 {dimension_numbers = #tpu.dot_dimension_numbers<[1], [0], [0], [1], [0, 0, 1, 1], [], []>} : vector<2x16xf32>, vector<16x128xf32>, vector<2x128xf32> -> vector<2x128xf32>
    %228 = arith.addf %222, %227 : vector<2x128xf32>
    %229 = vector.extract_strided_slice %215 {offsets = [0, 0, 2, 0], sizes = [2, 1, 1, 16], strides = [1, 1, 1, 1]} : vector<2x4x4x16xf32> to vector<2x1x1x16xf32>
    %230 = vector.shape_cast %229 : vector<2x1x1x16xf32> to vector<2x16xf32>
    %c2_115 = arith.constant 2 : index
    %c0_116 = arith.constant 0 : index
    %c0_117 = arith.constant 0 : index
    %231 = vector.load %arg4[%c2_115, %c0_116, %c0_117] : memref<16x16x128xf32, #tpu.memory_space<vmem>>, vector<1x16x128xf32>
    %232 = vector.shape_cast %231 : vector<1x16x128xf32> to vector<16x128xf32>
    %cst_118 = arith.constant dense<0.000000e+00> : vector<2x128xf32>
    %233 = tpu.matmul %230, %232, %cst_118 {dimension_numbers = #tpu.dot_dimension_numbers<[1], [0], [0], [1], [0, 0, 1, 1], [], []>} : vector<2x16xf32>, vector<16x128xf32>, vector<2x128xf32> -> vector<2x128xf32>
    %234 = arith.addf %228, %233 : vector<2x128xf32>
    %235 = vector.extract_strided_slice %215 {offsets = [0, 0, 3, 0], sizes = [2, 1, 1, 16], strides = [1, 1, 1, 1]} : vector<2x4x4x16xf32> to vector<2x1x1x16xf32>
    %236 = vector.shape_cast %235 : vector<2x1x1x16xf32> to vector<2x16xf32>
    %c3_119 = arith.constant 3 : index
    %c0_120 = arith.constant 0 : index
    %c0_121 = arith.constant 0 : index
    %237 = vector.load %arg4[%c3_119, %c0_120, %c0_121] : memref<16x16x128xf32, #tpu.memory_space<vmem>>, vector<1x16x128xf32>
    %238 = vector.shape_cast %237 : vector<1x16x128xf32> to vector<16x128xf32>
    %cst_122 = arith.constant dense<0.000000e+00> : vector<2x128xf32>
    %239 = tpu.matmul %236, %238, %cst_122 {dimension_numbers = #tpu.dot_dimension_numbers<[1], [0], [0], [1], [0, 0, 1, 1], [], []>} : vector<2x16xf32>, vector<16x128xf32>, vector<2x128xf32> -> vector<2x128xf32>
    %240 = arith.addf %234, %239 : vector<2x128xf32>
    %241 = vector.extract_strided_slice %215 {offsets = [0, 1, 0, 0], sizes = [2, 1, 1, 16], strides = [1, 1, 1, 1]} : vector<2x4x4x16xf32> to vector<2x1x1x16xf32>
    %242 = vector.shape_cast %241 : vector<2x1x1x16xf32> to vector<2x16xf32>
    %c4_123 = arith.constant 4 : index
    %c0_124 = arith.constant 0 : index
    %c0_125 = arith.constant 0 : index
    %243 = vector.load %arg4[%c4_123, %c0_124, %c0_125] : memref<16x16x128xf32, #tpu.memory_space<vmem>>, vector<1x16x128xf32>
    %244 = vector.shape_cast %243 : vector<1x16x128xf32> to vector<16x128xf32>
    %cst_126 = arith.constant dense<0.000000e+00> : vector<2x128xf32>
    %245 = tpu.matmul %242, %244, %cst_126 {dimension_numbers = #tpu.dot_dimension_numbers<[1], [0], [0], [1], [0, 0, 1, 1], [], []>} : vector<2x16xf32>, vector<16x128xf32>, vector<2x128xf32> -> vector<2x128xf32>
    %246 = arith.addf %240, %245 : vector<2x128xf32>
    %247 = vector.extract_strided_slice %215 {offsets = [0, 1, 1, 0], sizes = [2, 1, 1, 16], strides = [1, 1, 1, 1]} : vector<2x4x4x16xf32> to vector<2x1x1x16xf32>
    %248 = vector.shape_cast %247 : vector<2x1x1x16xf32> to vector<2x16xf32>
    %c5_127 = arith.constant 5 : index
    %c0_128 = arith.constant 0 : index
    %c0_129 = arith.constant 0 : index
    %249 = vector.load %arg4[%c5_127, %c0_128, %c0_129] : memref<16x16x128xf32, #tpu.memory_space<vmem>>, vector<1x16x128xf32>
    %250 = vector.shape_cast %249 : vector<1x16x128xf32> to vector<16x128xf32>
    %cst_130 = arith.constant dense<0.000000e+00> : vector<2x128xf32>
    %251 = tpu.matmul %248, %250, %cst_130 {dimension_numbers = #tpu.dot_dimension_numbers<[1], [0], [0], [1], [0, 0, 1, 1], [], []>} : vector<2x16xf32>, vector<16x128xf32>, vector<2x128xf32> -> vector<2x128xf32>
    %252 = arith.addf %246, %251 : vector<2x128xf32>
    %253 = vector.extract_strided_slice %215 {offsets = [0, 1, 2, 0], sizes = [2, 1, 1, 16], strides = [1, 1, 1, 1]} : vector<2x4x4x16xf32> to vector<2x1x1x16xf32>
    %254 = vector.shape_cast %253 : vector<2x1x1x16xf32> to vector<2x16xf32>
    %c6_131 = arith.constant 6 : index
    %c0_132 = arith.constant 0 : index
    %c0_133 = arith.constant 0 : index
    %255 = vector.load %arg4[%c6_131, %c0_132, %c0_133] : memref<16x16x128xf32, #tpu.memory_space<vmem>>, vector<1x16x128xf32>
    %256 = vector.shape_cast %255 : vector<1x16x128xf32> to vector<16x128xf32>
    %cst_134 = arith.constant dense<0.000000e+00> : vector<2x128xf32>
    %257 = tpu.matmul %254, %256, %cst_134 {dimension_numbers = #tpu.dot_dimension_numbers<[1], [0], [0], [1], [0, 0, 1, 1], [], []>} : vector<2x16xf32>, vector<16x128xf32>, vector<2x128xf32> -> vector<2x128xf32>
    %258 = arith.addf %252, %257 : vector<2x128xf32>
    %259 = vector.extract_strided_slice %215 {offsets = [0, 1, 3, 0], sizes = [2, 1, 1, 16], strides = [1, 1, 1, 1]} : vector<2x4x4x16xf32> to vector<2x1x1x16xf32>
    %260 = vector.shape_cast %259 : vector<2x1x1x16xf32> to vector<2x16xf32>
    %c7_135 = arith.constant 7 : index
    %c0_136 = arith.constant 0 : index
    %c0_137 = arith.constant 0 : index
    %261 = vector.load %arg4[%c7_135, %c0_136, %c0_137] : memref<16x16x128xf32, #tpu.memory_space<vmem>>, vector<1x16x128xf32>
    %262 = vector.shape_cast %261 : vector<1x16x128xf32> to vector<16x128xf32>
    %cst_138 = arith.constant dense<0.000000e+00> : vector<2x128xf32>
    %263 = tpu.matmul %260, %262, %cst_138 {dimension_numbers = #tpu.dot_dimension_numbers<[1], [0], [0], [1], [0, 0, 1, 1], [], []>} : vector<2x16xf32>, vector<16x128xf32>, vector<2x128xf32> -> vector<2x128xf32>
    %264 = arith.addf %258, %263 : vector<2x128xf32>
    %265 = vector.extract_strided_slice %215 {offsets = [0, 2, 0, 0], sizes = [2, 1, 1, 16], strides = [1, 1, 1, 1]} : vector<2x4x4x16xf32> to vector<2x1x1x16xf32>
    %266 = vector.shape_cast %265 : vector<2x1x1x16xf32> to vector<2x16xf32>
    %c8_139 = arith.constant 8 : index
    %c0_140 = arith.constant 0 : index
    %c0_141 = arith.constant 0 : index
    %267 = vector.load %arg4[%c8_139, %c0_140, %c0_141] : memref<16x16x128xf32, #tpu.memory_space<vmem>>, vector<1x16x128xf32>
    %268 = vector.shape_cast %267 : vector<1x16x128xf32> to vector<16x128xf32>
    %cst_142 = arith.constant dense<0.000000e+00> : vector<2x128xf32>
    %269 = tpu.matmul %266, %268, %cst_142 {dimension_numbers = #tpu.dot_dimension_numbers<[1], [0], [0], [1], [0, 0, 1, 1], [], []>} : vector<2x16xf32>, vector<16x128xf32>, vector<2x128xf32> -> vector<2x128xf32>
    %270 = arith.addf %264, %269 : vector<2x128xf32>
    %271 = vector.extract_strided_slice %215 {offsets = [0, 2, 1, 0], sizes = [2, 1, 1, 16], strides = [1, 1, 1, 1]} : vector<2x4x4x16xf32> to vector<2x1x1x16xf32>
    %272 = vector.shape_cast %271 : vector<2x1x1x16xf32> to vector<2x16xf32>
    %c9_143 = arith.constant 9 : index
    %c0_144 = arith.constant 0 : index
    %c0_145 = arith.constant 0 : index
    %273 = vector.load %arg4[%c9_143, %c0_144, %c0_145] : memref<16x16x128xf32, #tpu.memory_space<vmem>>, vector<1x16x128xf32>
    %274 = vector.shape_cast %273 : vector<1x16x128xf32> to vector<16x128xf32>
    %cst_146 = arith.constant dense<0.000000e+00> : vector<2x128xf32>
    %275 = tpu.matmul %272, %274, %cst_146 {dimension_numbers = #tpu.dot_dimension_numbers<[1], [0], [0], [1], [0, 0, 1, 1], [], []>} : vector<2x16xf32>, vector<16x128xf32>, vector<2x128xf32> -> vector<2x128xf32>
    %276 = arith.addf %270, %275 : vector<2x128xf32>
    %277 = vector.extract_strided_slice %215 {offsets = [0, 2, 2, 0], sizes = [2, 1, 1, 16], strides = [1, 1, 1, 1]} : vector<2x4x4x16xf32> to vector<2x1x1x16xf32>
    %278 = vector.shape_cast %277 : vector<2x1x1x16xf32> to vector<2x16xf32>
    %c10_147 = arith.constant 10 : index
    %c0_148 = arith.constant 0 : index
    %c0_149 = arith.constant 0 : index
    %279 = vector.load %arg4[%c10_147, %c0_148, %c0_149] : memref<16x16x128xf32, #tpu.memory_space<vmem>>, vector<1x16x128xf32>
    %280 = vector.shape_cast %279 : vector<1x16x128xf32> to vector<16x128xf32>
    %cst_150 = arith.constant dense<0.000000e+00> : vector<2x128xf32>
    %281 = tpu.matmul %278, %280, %cst_150 {dimension_numbers = #tpu.dot_dimension_numbers<[1], [0], [0], [1], [0, 0, 1, 1], [], []>} : vector<2x16xf32>, vector<16x128xf32>, vector<2x128xf32> -> vector<2x128xf32>
    %282 = arith.addf %276, %281 : vector<2x128xf32>
    %283 = vector.extract_strided_slice %215 {offsets = [0, 2, 3, 0], sizes = [2, 1, 1, 16], strides = [1, 1, 1, 1]} : vector<2x4x4x16xf32> to vector<2x1x1x16xf32>
    %284 = vector.shape_cast %283 : vector<2x1x1x16xf32> to vector<2x16xf32>
    %c11_151 = arith.constant 11 : index
    %c0_152 = arith.constant 0 : index
    %c0_153 = arith.constant 0 : index
    %285 = vector.load %arg4[%c11_151, %c0_152, %c0_153] : memref<16x16x128xf32, #tpu.memory_space<vmem>>, vector<1x16x128xf32>
    %286 = vector.shape_cast %285 : vector<1x16x128xf32> to vector<16x128xf32>
    %cst_154 = arith.constant dense<0.000000e+00> : vector<2x128xf32>
    %287 = tpu.matmul %284, %286, %cst_154 {dimension_numbers = #tpu.dot_dimension_numbers<[1], [0], [0], [1], [0, 0, 1, 1], [], []>} : vector<2x16xf32>, vector<16x128xf32>, vector<2x128xf32> -> vector<2x128xf32>
    %288 = arith.addf %282, %287 : vector<2x128xf32>
    %289 = vector.extract_strided_slice %215 {offsets = [0, 3, 0, 0], sizes = [2, 1, 1, 16], strides = [1, 1, 1, 1]} : vector<2x4x4x16xf32> to vector<2x1x1x16xf32>
    %290 = vector.shape_cast %289 : vector<2x1x1x16xf32> to vector<2x16xf32>
    %c12_155 = arith.constant 12 : index
    %c0_156 = arith.constant 0 : index
    %c0_157 = arith.constant 0 : index
    %291 = vector.load %arg4[%c12_155, %c0_156, %c0_157] : memref<16x16x128xf32, #tpu.memory_space<vmem>>, vector<1x16x128xf32>
    %292 = vector.shape_cast %291 : vector<1x16x128xf32> to vector<16x128xf32>
    %cst_158 = arith.constant dense<0.000000e+00> : vector<2x128xf32>
    %293 = tpu.matmul %290, %292, %cst_158 {dimension_numbers = #tpu.dot_dimension_numbers<[1], [0], [0], [1], [0, 0, 1, 1], [], []>} : vector<2x16xf32>, vector<16x128xf32>, vector<2x128xf32> -> vector<2x128xf32>
    %294 = arith.addf %288, %293 : vector<2x128xf32>
    %295 = vector.extract_strided_slice %215 {offsets = [0, 3, 1, 0], sizes = [2, 1, 1, 16], strides = [1, 1, 1, 1]} : vector<2x4x4x16xf32> to vector<2x1x1x16xf32>
    %296 = vector.shape_cast %295 : vector<2x1x1x16xf32> to vector<2x16xf32>
    %c13_159 = arith.constant 13 : index
    %c0_160 = arith.constant 0 : index
    %c0_161 = arith.constant 0 : index
    %297 = vector.load %arg4[%c13_159, %c0_160, %c0_161] : memref<16x16x128xf32, #tpu.memory_space<vmem>>, vector<1x16x128xf32>
    %298 = vector.shape_cast %297 : vector<1x16x128xf32> to vector<16x128xf32>
    %cst_162 = arith.constant dense<0.000000e+00> : vector<2x128xf32>
    %299 = tpu.matmul %296, %298, %cst_162 {dimension_numbers = #tpu.dot_dimension_numbers<[1], [0], [0], [1], [0, 0, 1, 1], [], []>} : vector<2x16xf32>, vector<16x128xf32>, vector<2x128xf32> -> vector<2x128xf32>
    %300 = arith.addf %294, %299 : vector<2x128xf32>
    %301 = vector.extract_strided_slice %215 {offsets = [0, 3, 2, 0], sizes = [2, 1, 1, 16], strides = [1, 1, 1, 1]} : vector<2x4x4x16xf32> to vector<2x1x1x16xf32>
    %302 = vector.shape_cast %301 : vector<2x1x1x16xf32> to vector<2x16xf32>
    %c14_163 = arith.constant 14 : index
    %c0_164 = arith.constant 0 : index
    %c0_165 = arith.constant 0 : index
    %303 = vector.load %arg4[%c14_163, %c0_164, %c0_165] : memref<16x16x128xf32, #tpu.memory_space<vmem>>, vector<1x16x128xf32>
    %304 = vector.shape_cast %303 : vector<1x16x128xf32> to vector<16x128xf32>
    %cst_166 = arith.constant dense<0.000000e+00> : vector<2x128xf32>
    %305 = tpu.matmul %302, %304, %cst_166 {dimension_numbers = #tpu.dot_dimension_numbers<[1], [0], [0], [1], [0, 0, 1, 1], [], []>} : vector<2x16xf32>, vector<16x128xf32>, vector<2x128xf32> -> vector<2x128xf32>
    %306 = arith.addf %300, %305 : vector<2x128xf32>
    %307 = vector.extract_strided_slice %215 {offsets = [0, 3, 3, 0], sizes = [2, 1, 1, 16], strides = [1, 1, 1, 1]} : vector<2x4x4x16xf32> to vector<2x1x1x16xf32>
    %308 = vector.shape_cast %307 : vector<2x1x1x16xf32> to vector<2x16xf32>
    %c15_167 = arith.constant 15 : index
    %c0_168 = arith.constant 0 : index
    %c0_169 = arith.constant 0 : index
    %309 = vector.load %arg4[%c15_167, %c0_168, %c0_169] : memref<16x16x128xf32, #tpu.memory_space<vmem>>, vector<1x16x128xf32>
    %310 = vector.shape_cast %309 : vector<1x16x128xf32> to vector<16x128xf32>
    %cst_170 = arith.constant dense<0.000000e+00> : vector<2x128xf32>
    %311 = tpu.matmul %308, %310, %cst_170 {dimension_numbers = #tpu.dot_dimension_numbers<[1], [0], [0], [1], [0, 0, 1, 1], [], []>} : vector<2x16xf32>, vector<16x128xf32>, vector<2x128xf32> -> vector<2x128xf32>
    %312 = arith.addf %306, %311 : vector<2x128xf32>
    %c0_171 = arith.constant 0 : index
    %c0_172 = arith.constant 0 : index
    %313 = vector.load %arg5[%c0_171, %c0_172] : memref<1x128xf32, #tpu.memory_space<vmem>>, vector<1x128xf32>
    %314 = vector.broadcast %313 : vector<1x128xf32> to vector<2x128xf32>
    %315 = arith.addf %312, %314 : vector<2x128xf32>
    %cst_173 = arith.constant 0.000000e+00 : f32
    %316 = vector.broadcast %cst_173 : f32 to vector<2x128xf32>
    %317 = arith.maximumf %315, %316 : vector<2x128xf32>
    %c0_174 = arith.constant 0 : index
    %c0_175 = arith.constant 0 : index
    %318 = vector.load %arg6[%c0_174, %c0_175] : memref<128x128xf32, #tpu.memory_space<vmem>>, vector<128x128xf32>
    %cst_176 = arith.constant dense<0.000000e+00> : vector<2x128xf32>
    %319 = tpu.matmul %317, %318, %cst_176 {dimension_numbers = #tpu.dot_dimension_numbers<[1], [0], [0], [1], [0, 0, 1, 1], [], []>} : vector<2x128xf32>, vector<128x128xf32>, vector<2x128xf32> -> vector<2x128xf32>
    %c0_177 = arith.constant 0 : index
    %c0_178 = arith.constant 0 : index
    %320 = vector.load %arg7[%c0_177, %c0_178] : memref<1x128xf32, #tpu.memory_space<vmem>>, vector<1x128xf32>
    %321 = vector.broadcast %320 : vector<1x128xf32> to vector<2x128xf32>
    %322 = arith.addf %319, %321 : vector<2x128xf32>
    %cst_179 = arith.constant 0.000000e+00 : f32
    %323 = vector.broadcast %cst_179 : f32 to vector<2x128xf32>
    %324 = arith.maximumf %322, %323 : vector<2x128xf32>
    %c0_180 = arith.constant 0 : index
    %c0_181 = arith.constant 0 : index
    %325 = vector.load %arg8[%c0_180, %c0_181] : memref<128x128xf32, #tpu.memory_space<vmem>>, vector<128x128xf32>
    %cst_182 = arith.constant dense<0.000000e+00> : vector<2x128xf32>
    %326 = tpu.matmul %324, %325, %cst_182 {dimension_numbers = #tpu.dot_dimension_numbers<[1], [0], [0], [1], [0, 0, 1, 1], [], []>} : vector<2x128xf32>, vector<128x128xf32>, vector<2x128xf32> -> vector<2x128xf32>
    %c0_183 = arith.constant 0 : index
    %c0_184 = arith.constant 0 : index
    %327 = vector.load %arg9[%c0_183, %c0_184] : memref<1x128xf32, #tpu.memory_space<vmem>>, vector<1x128xf32>
    %328 = vector.broadcast %327 : vector<1x128xf32> to vector<2x128xf32>
    %329 = arith.addf %326, %328 : vector<2x128xf32>
    %c0_185 = arith.constant 0 : index
    %c0_186 = arith.constant 0 : index
    %330 = vector.load %arg10[%c0_185, %c0_186] : memref<2x128xf32, #tpu.memory_space<vmem>>, vector<2x128xf32>
    tpu.vector_store %arg10[%c0_185, %c0_186], %329 {strides = array<i32>} : memref<2x128xf32, #tpu.memory_space<vmem>>, vector<2x128xf32>,
    return
  }
  func.func @transform_0(%arg0: i32) -> (i32, i32) {
    %c0_i32 = arith.constant 0 : i32
    %c0_i32_0 = arith.constant 0 : i32
    %c0_i32_1 = arith.constant 0 : i32
    return %c0_i32, %c0_i32_0 : i32, i32
  }
  func.func @transform_1(%arg0: i32) -> (i32, i32) {
    %c0_i32 = arith.constant 0 : i32
    %c0_i32_0 = arith.constant 0 : i32
    %c0_i32_1 = arith.constant 0 : i32
    return %c0_i32, %c0_i32_0 : i32, i32
  }
  func.func @transform_2(%arg0: i32) -> (i32, i32, i32) {
    %c0_i32 = arith.constant 0 : i32
    %c0_i32_0 = arith.constant 0 : i32
    %c0_i32_1 = arith.constant 0 : i32
    %c0_i32_2 = arith.constant 0 : i32
    return %c0_i32, %c0_i32_0, %c0_i32_1 : i32, i32, i32
  }
  func.func @transform_3(%arg0: i32) -> (i32, i32, i32) {
    %c0_i32 = arith.constant 0 : i32
    %c0_i32_0 = arith.constant 0 : i32
    %c0_i32_1 = arith.constant 0 : i32
    %c0_i32_2 = arith.constant 0 : i32
    return %c0_i32, %c0_i32_0, %c0_i32_1 : i32, i32, i32
  }
  func.func @transform_4(%arg0: i32) -> (i32, i32) {
    %c0_i32 = arith.constant 0 : i32
    %c0_i32_0 = arith.constant 0 : i32
    %c0_i32_1 = arith.constant 0 : i32
    return %c0_i32, %c0_i32_0 : i32, i32
  }
  func.func @transform_5(%arg0: i32) -> (i32, i32) {
    %c0_i32 = arith.constant 0 : i32
    %c0_i32_0 = arith.constant 0 : i32
    %c0_i32_1 = arith.constant 0 : i32
    return %c0_i32, %c0_i32_0 : i32, i32
  }
  func.func @transform_6(%arg0: i32) -> (i32, i32) {
    %c0_i32 = arith.constant 0 : i32
    %c0_i32_0 = arith.constant 0 : i32
    %c0_i32_1 = arith.constant 0 : i32
    return %c0_i32, %c0_i32_0 : i32, i32
  }
  func.func @transform_7(%arg0: i32) -> (i32, i32) {
    %c0_i32 = arith.constant 0 : i32
    %c0_i32_0 = arith.constant 0 : i32
    %c0_i32_1 = arith.constant 0 : i32
    return %c0_i32, %c0_i32_0 : i32, i32
  }
  func.func @transform_8(%arg0: i32) -> (i32, i32) {
    %c0_i32 = arith.constant 0 : i32
    %c0_i32_0 = arith.constant 0 : i32
    %c0_i32_1 = arith.constant 0 : i32
    return %c0_i32, %c0_i32_0 : i32, i32
  }
  func.func @transform_9(%arg0: i32) -> (i32, i32) {
    %c0_i32 = arith.constant 0 : i32
    %c0_i32_0 = arith.constant 0 : i32
    %c0_i32_1 = arith.constant 0 : i32
    return %c0_i32, %c0_i32_0 : i32, i32
  }
}

</mosaic_0001>

<bundles_post_ra>
// kernel: lenet5_forward.1
= control target key start
LH: loop header
LB: loop body
LE: loop exit
PB: predicated region body
PF: predicated region fallthrough
CT: control target
= control target key end

     0   :  { %vm614_vm0 = vcmask 1040384   ;;  %s12478_s0 = inlined_call_operand.vmem [shape: f32[1152,25], index: 0, kind: input, shape index: {}]   ;;  %s12479_s1 = inlined_call_operand.vmem [shape: f32[25,6], index: 1, kind: input, shape index: {}]   ;;  %s12480_s2 = inlined_call_operand.vmem [shape: f32[25,6,16], index: 2, kind: input, shape index: {}]   ;;  %s12481_s3 = inlined_call_operand.vmem [shape: f32[16,16,128], index: 3, kind: input, shape index: {}]   ;;  %s12482_s4 = inlined_call_operand.vmem [shape: f32[1,128], index: 4, kind: input, shape index: {}]   ;;  %s12483_s5 = inlined_call_operand.vmem [shape: f32[128,128], index: 5, kind: input, shape index: {}]   ;;  %s12484_s6 = inlined_call_operand.vmem [shape: f32[1,128], index: 6, kind: input, shape index: {}]   ;;  %s12485_s7 = inlined_call_operand.vmem [shape: f32[128,128], index: 7, kind: input, shape index: {}]   ;;  %s12486_s8 = inlined_call_operand.vmem [shape: f32[1,128], index: 8, kind: input, shape index: {}]   ;;  %s12487_s9 = inlined_call_operand.hbm [shape: f32[2,128], index: 9, kind: output, shape index: {}]  }
   0x1   :  { %v180_v0 = vld [vmem:[%s12479_s1 + $0x18] sm:$0x1]  ;;  %v179_v1 = vld [vmem:[%s12479_s1 + $0x10] sm:$0xff]  ;;  %v178_v2 = vld [vmem:[%s12479_s1 + $0x8] sm:$0xff] }
   0x2   :  { %6420 = vmatpush.msk.msra.mxu0 %vm614_vm0, %v180_v0  ;;  %7060 = vmatpush.msk.msra.mxu2 %vm614_vm0, %v180_v0  ;;  %v177_v3 = vld [vmem:[%s12479_s1] sm:$0xff] }
   0x4   :  { %631 = vmatpush.msra.mxu0 %v179_v1  ;;  %7061 = vmatpush.msra.mxu2 %v179_v1 }
   0x5   :  { %14 = vsyncpa [#allocation5], 0  ;;  %v33_v4 = vld [vmem:[%s12478_s0] sm:$0xff]  ;;  %vm181_vm1 = vcmask 203776   ;;  %v34_v5 = vld [vmem:[%s12478_s0 + $0x8] sm:$0xff]  ;;  %vm1067_vm2 = vcmask 48128  }
   0x6   :  { %632 = vmatpush.msra.mxu0 %v178_v2  ;;  %7062 = vmatpush.msra.mxu2 %v178_v2  ;;  %v35_v6 = vld [vmem:[%s12478_s0 + $0x10] sm:$0xff]  ;;  %v36_v7 = vld [vmem:[%s12478_s0 + $0x18] sm:$0xff]  ;;  %v37_v8 = vld [vmem:[%s12478_s0 + $0x20] sm:$0xff]  ;;  %vm3033_vm6 = vcmask 1045504   ;;  %vm2652_vm7 = vcmask 1043456   ;;  %vm2950_vm8 = vcmask 1046528  }
   0x7   :  { %v38_v9 = vld [vmem:[%s12478_s0 + $0x28] sm:$0xff]  ;;  %v39_v10 = vld [vmem:[%s12478_s0 + $0x30] sm:$0xff]  ;;  %v40_v11 = vld [vmem:[%s12478_s0 + $0x38] sm:$0xff]  ;;  %vm3368_vm9 = vcmask 1044480   ;;  %vm5613_vm10 = vcmask 130048   ;;  %vm5862_vm14 = vcmask 1041409  }
   0x8   :  { %633 = vmatpush.msra.mxu0 %v177_v3  ;;  %7063 = vmatpush.msra.mxu2 %v177_v3  ;;  %v41_v12 = vld [vmem:[%s12478_s0 + $0x40] sm:$0xff]  ;;  %v42_v13 = vld [vmem:[%s12478_s0 + $0x48] sm:$0xff]  ;;  %v43_v14 = vld [vmem:[%s12478_s0 + $0x50] sm:$0xff]  ;;  %s7099_s29 = smov [#allocation4]  }
   0x9   :  { %6421 = vmatmul.msk.f32.vlgmr.msra.gmra.mxu0 %vm181_vm1, %v33_v4  ;;  %v44_v15 = vld [vmem:[%s12478_s0 + $0x58] sm:$0xff]  ;;  %v45_v16 = vld [vmem:[%s12478_s0 + $0x60] sm:$0xff]  ;;  %v46_v17 = vld [vmem:[%s12478_s0 + $0x68] sm:$0xff] }
   0xa   :  { %v47_v18 = vld [vmem:[%s12478_s0 + $0x70] sm:$0xff]  ;;  %v48_v19 = vld [vmem:[%s12478_s0 + $0x78] sm:$0xff]  ;;  %v49_v21 = vld [vmem:[%s12478_s0 + $0x80] sm:$0xff] }
   0xb   :  { %v50_v23 = vld [vmem:[%s12478_s0 + $0x88] sm:$0xff]  ;;  %v51_v25 = vld [vmem:[%s12478_s0 + $0x90] sm:$0xff]  ;;  %v52_v27 = vld [vmem:[%s12478_s0 + $0x98] sm:$0xff] }
   0xc   :  { %v53_v29 = vld [vmem:[%s12478_s0 + $0xa0] sm:$0xff]  ;;  %v54_v31 = vld [vmem:[%s12478_s0 + $0xa8] sm:$0xff]  ;;  %v55_v33 = vld [vmem:[%s12478_s0 + $0xb0] sm:$0xff] }
   0xd   :  { %v56_v35 = vld [vmem:[%s12478_s0 + $0xb8] sm:$0xff]  ;;  %v57_v37 = vld [vmem:[%s12478_s0 + $0xc0] sm:$0xff]  ;;  %v58_v39 = vld [vmem:[%s12478_s0 + $0xc8] sm:$0xff] }
   0xe   :  { %v59_v41 = vld [vmem:[%s12478_s0 + $0xd0] sm:$0xff]  ;;  %v60_v43 = vld [vmem:[%s12478_s0 + $0xd8] sm:$0xff]  ;;  %v61_v45 = vld [vmem:[%s12478_s0 + $0xe0] sm:$0xff] }
   0xf   :  { %v62_v47 = vld [vmem:[%s12478_s0 + $0xe8] sm:$0xff]  ;;  %v63_v49 = vld [vmem:[%s12478_s0 + $0xf0] sm:$0xff]  ;;  %v64_v51 = vld [vmem:[%s12478_s0 + $0xf8] sm:$0xff] }
  0x10   :  { %v65_v53 = vld [vmem:[%s12478_s0 + $0x100] sm:$0xff]  ;;  %v66_v55 = vld [vmem:[%s12478_s0 + $0x108] sm:$0xff]  ;;  %v67_v57 = vld [vmem:[%s12478_s0 + $0x110] sm:$0xff] }
  0x11   :  { %6422 = vmatmul.msk.f32.gmra.mxu0 %vm181_vm1, %v34_v5  ;;  %v68_v59 = vld [vmem:[%s12478_s0 + $0x118] sm:$0xff]  ;;  %v69_v61 = vld [vmem:[%s12478_s0 + $0x120] sm:$0xff]  ;;  %v70_v63 = vld [vmem:[%s12478_s0 + $0x128] sm:$0xff] }
  0x12   :  { %v71_v1 = vld [vmem:[%s12478_s0 + $0x130] sm:$0xff]  ;;  %v72_v3 = vld [vmem:[%s12478_s0 + $0x138] sm:$0xff]  ;;  %v73_v5 = vld [vmem:[%s12478_s0 + $0x140] sm:$0xff] }
  0x19   :  { %6423 = vmatmul.msk.f32.gmra.mxu0 %vm181_vm1, %v35_v6 }
  0x21   :  { %6424 = vmatmul.msk.f32.gmra.mxu0 %vm181_vm1, %v36_v7  ;;  %v74_v7 = vld [vmem:[%s12478_s0 + $0x148] sm:$0xff] }
  0x29   :  { %6425 = vmatmul.msk.f32.gmra.mxu0 %vm181_vm1, %v37_v8 }
  0x31   :  { %6426 = vmatmul.msk.f32.gmra.mxu0 %vm181_vm1, %v38_v9  ;;  %v75_v9 = vld [vmem:[%s12478_s0 + $0x150] sm:$0xff] }
  0x39   :  { %6427 = vmatmul.msk.f32.gmra.mxu0 %vm181_vm1, %v39_v10 }
  0x41   :  { %6428 = vmatmul.msk.f32.gmra.mxu0 %vm181_vm1, %v40_v11  ;;  %v76_v11 = vld [vmem:[%s12478_s0 + $0x158] sm:$0xff] }
  0x49   :  { %6429 = vmatmul.msk.f32.gmra.mxu0 %vm181_vm1, %v41_v12 }
  0x51   :  { %6430 = vmatmul.msk.f32.gmra.mxu0 %vm181_vm1, %v42_v13  ;;  %v77_v13 = vld [vmem:[%s12478_s0 + $0x160] sm:$0xff] }
  0x59   :  { %6431 = vmatmul.msk.f32.gmra.mxu0 %vm181_vm1, %v43_v14 }
  0x61   :  { %6432 = vmatmul.msk.f32.gmra.mxu0 %vm181_vm1, %v44_v15  ;;  %v78_v15 = vld [vmem:[%s12478_s0 + $0x168] sm:$0xff] }
  0x69   :  { %6433 = vmatmul.msk.f32.gmra.mxu0 %vm181_vm1, %v45_v16 }
  0x71   :  { %6434 = vmatmul.msk.f32.gmra.mxu0 %vm181_vm1, %v46_v17  ;;  %v79_v17 = vld [vmem:[%s12478_s0 + $0x170] sm:$0xff] }
  0x79   :  { %6435 = vmatmul.msk.f32.gmra.mxu0 %vm181_vm1, %v47_v18 }
  0x81   :  { %6436 = vmatmul.msk.f32.gmra.mxu0 %vm181_vm1, %v48_v19  ;;  %v80_v19 = vld [vmem:[%s12478_s0 + $0x178] sm:$0xff] }
  0x86   :  { %v7226_v20 = vpop.f32.mrf.mxu0 }
  0x87   :  { %12861 = vst [vmem:[#allocation7_spill] sm:$0xff] %v7226_v20 }
  0x89   :  { %6437 = vmatmul.msk.f32.gmra.mxu0 %vm181_vm1, %v49_v21 }
  0x8e   :  { %v7232_v22 = vpop.f32.mrf.mxu0 }
  0x8f   :  { %12862 = vst [vmem:[#allocation8_spill] sm:$0xff] %v7232_v22 }
  0x91   :  { %6438 = vmatmul.msk.f32.gmra.mxu0 %vm181_vm1, %v50_v23  ;;  %v81_v23 = vld [vmem:[%s12478_s0 + $0x180] sm:$0xff] }
  0x96   :  { %v7238_v24 = vpop.f32.mrf.mxu0 }
  0x97   :  { %12863 = vst [vmem:[#allocation9_spill] sm:$0xff] %v7238_v24 }
  0x99   :  { %6439 = vmatmul.msk.f32.gmra.mxu0 %vm181_vm1, %v51_v25 }
  0x9e   :  { %v7244_v26 = vpop.f32.mrf.mxu0 }
  0x9f   :  { %12864 = vst [vmem:[#allocation10_spill] sm:$0xff] %v7244_v26 }
  0xa1   :  { %6440 = vmatmul.msk.f32.gmra.mxu0 %vm181_vm1, %v52_v27  ;;  %v82_v27 = vld [vmem:[%s12478_s0 + $0x188] sm:$0xff] }
  0xa6   :  { %v7250_v28 = vpop.f32.mrf.mxu0 }
  0xa9   :  { %6441 = vmatmul.msk.f32.gmra.mxu0 %vm181_vm1, %v53_v29 }
  0xae   :  { %v7256_v30 = vpop.f32.mrf.mxu0 }
  0xb1   :  { %6442 = vmatmul.msk.f32.gmra.mxu0 %vm181_vm1, %v54_v31  ;;  %v83_v31 = vld [vmem:[%s12478_s0 + $0x190] sm:$0xff] }
  0xb6   :  { %v7262_v32 = vpop.f32.mrf.mxu0 }
  0xb7   :  { %12865 = vst [vmem:[#allocation11_spill] sm:$0xff] %v7262_v32 }
  0xb9   :  { %6443 = vmatmul.msk.f32.gmra.mxu0 %vm181_vm1, %v55_v33 }
  0xbe   :  { %v7268_v34 = vpop.f32.mrf.mxu0 }
  0xc1   :  { %6444 = vmatmul.msk.f32.gmra.mxu0 %vm181_vm1, %v56_v35  ;;  %v84_v35 = vld [vmem:[%s12478_s0 + $0x198] sm:$0xff] }
  0xc6   :  { %v7274_v36 = vpop.f32.mrf.mxu0 }
  0xc9   :  { %6445 = vmatmul.msk.f32.gmra.mxu0 %vm181_vm1, %v57_v37 }
  0xce   :  { %v7280_v38 = vpop.f32.mrf.mxu0 }
  0xd1   :  { %6446 = vmatmul.msk.f32.gmra.mxu0 %vm181_vm1, %v58_v39  ;;  %v85_v39 = vld [vmem:[%s12478_s0 + $0x1a0] sm:$0xff] }
  0xd6   :  { %v7286_v40 = vpop.f32.mrf.mxu0 }
  0xd7   :  { %12866 = vst [vmem:[#allocation12_spill] sm:$0xff] %v7286_v40 }
  0xd9   :  { %6447 = vmatmul.msk.f32.gmra.mxu0 %vm181_vm1, %v59_v41 }
  0xde   :  { %v7292_v42 = vpop.f32.mrf.mxu0 }
  0xe1   :  { %6448 = vmatmul.msk.f32.gmra.mxu0 %vm181_vm1, %v60_v43  ;;  %v86_v43 = vld [vmem:[%s12478_s0 + $0x1a8] sm:$0xff] }
  0xe6   :  { %v7298_v44 = vpop.f32.mrf.mxu0 }
  0xe9   :  { %6449 = vmatmul.msk.f32.gmra.mxu0 %vm181_vm1, %v61_v45 }
  0xee   :  { %v7304_v46 = vpop.f32.mrf.mxu0 }
  0xf1   :  { %6450 = vmatmul.msk.f32.gmra.mxu0 %vm181_vm1, %v62_v47  ;;  %v87_v47 = vld [vmem:[%s12478_s0 + $0x1b0] sm:$0xff] }
  0xf6   :  { %v7310_v48 = vpop.f32.mrf.mxu0 }
  0xf7   :  { %12867 = vst [vmem:[#allocation13_spill] sm:$0xff] %v7310_v48 }
  0xf9   :  { %6451 = vmatmul.msk.f32.gmra.mxu0 %vm181_vm1, %v63_v49 }
  0xfe   :  { %v7316_v50 = vpop.f32.mrf.mxu0 }
 0x101   :  { %6452 = vmatmul.msk.f32.gmra.mxu0 %vm181_vm1, %v64_v51  ;;  %v88_v51 = vld [vmem:[%s12478_s0 + $0x1b8] sm:$0xff] }
 0x106   :  { %v7322_v52 = vpop.f32.mrf.mxu0 }
 0x109   :  { %6453 = vmatmul.msk.f32.gmra.mxu0 %vm181_vm1, %v65_v53 }
 0x10e   :  { %v7328_v54 = vpop.f32.mrf.mxu0 }
 0x111   :  { %6454 = vmatmul.msk.f32.gmra.mxu0 %vm181_vm1, %v66_v55  ;;  %v89_v55 = vld [vmem:[%s12478_s0 + $0x1c0] sm:$0xff] }
 0x116   :  { %v7334_v56 = vpop.f32.mrf.mxu0 }
 0x117   :  { %12868 = vst [vmem:[#allocation14_spill] sm:$0xff] %v7334_v56 }
 0x119   :  { %6455 = vmatmul.msk.f32.gmra.mxu0 %vm181_vm1, %v67_v57 }
 0x11e   :  { %v7340_v58 = vpop.f32.mrf.mxu0 }
 0x121   :  { %6456 = vmatmul.msk.f32.gmra.mxu0 %vm181_vm1, %v68_v59  ;;  %v90_v59 = vld [vmem:[%s12478_s0 + $0x1c8] sm:$0xff] }
 0x126   :  { %v7346_v60 = vpop.f32.mrf.mxu0 }
 0x129   :  { %6457 = vmatmul.msk.f32.gmra.mxu0 %vm181_vm1, %v69_v61 }
 0x12e   :  { %v7352_v62 = vpop.f32.mrf.mxu0 }
 0x131   :  { %6458 = vmatmul.msk.f32.gmra.mxu0 %vm181_vm1, %v70_v63  ;;  %v91_v63 = vld [vmem:[%s12478_s0 + $0x1d0] sm:$0xff] }
 0x136   :  { %v7358_v0 = vpop.f32.mrf.mxu0 }
 0x137   :  { %12869 = vst [vmem:[#allocation15_spill] sm:$0xff] %v7358_v0 }
 0x139   :  { %6459 = vmatmul.msk.f32.gmra.mxu0 %vm181_vm1, %v71_v1 }
 0x13e   :  { %v7364_v2 = vpop.f32.mrf.mxu0 }
 0x141   :  { %6460 = vmatmul.msk.f32.gmra.mxu0 %vm181_vm1, %v72_v3  ;;  %v92_v3 = vld [vmem:[%s12478_s0 + $0x1d8] sm:$0xff] }
 0x146   :  { %v7370_v4 = vpop.f32.mrf.mxu0 }
 0x147   :  { %12870 = vst [vmem:[#allocation16_spill] sm:$0xff] %v7370_v4 }
 0x149   :  { %6461 = vmatmul.msk.f32.gmra.mxu0 %vm181_vm1, %v73_v5 }
 0x14e   :  { %v7376_v6 = vpop.f32.mrf.mxu0 }
 0x14f   :  { %12871 = vst [vmem:[#allocation17_spill] sm:$0xff] %v7376_v6 }
 0x151   :  { %6462 = vmatmul.msk.f32.gmra.mxu0 %vm181_vm1, %v74_v7  ;;  %v93_v7 = vld [vmem:[%s12478_s0 + $0x1e0] sm:$0xff] }
 0x156   :  { %v7382_v8 = vpop.f32.mrf.mxu0 }
 0x157   :  { %12872 = vst [vmem:[#allocation18_spill] sm:$0xff] %v7382_v8 }
 0x159   :  { %6463 = vmatmul.msk.f32.gmra.mxu0 %vm181_vm1, %v75_v9 }
 0x15e   :  { %v7388_v10 = vpop.f32.mrf.mxu0 }
 0x15f   :  { %12873 = vst [vmem:[#allocation19_spill] sm:$0xff] %v7388_v10 }
 0x161   :  { %6464 = vmatmul.msk.f32.gmra.mxu0 %vm181_vm1, %v76_v11  ;;  %v94_v11 = vld [vmem:[%s12478_s0 + $0x1e8] sm:$0xff] }
 0x166   :  { %v7394_v12 = vpop.f32.mrf.mxu0 }
 0x167   :  { %12874 = vst [vmem:[#allocation20_spill] sm:$0xff] %v7394_v12 }
 0x169   :  { %6465 = vmatmul.msk.f32.gmra.mxu0 %vm181_vm1, %v77_v13 }
 0x16e   :  { %v7400_v14 = vpop.f32.mrf.mxu0 }
 0x16f   :  { %12875 = vst [vmem:[#allocation21_spill] sm:$0xff] %v7400_v14 }
 0x171   :  { %6466 = vmatmul.msk.f32.gmra.mxu0 %vm181_vm1, %v78_v15  ;;  %v95_v15 = vld [vmem:[%s12478_s0 + $0x1f0] sm:$0xff] }
 0x176   :  { %v7406_v16 = vpop.f32.mrf.mxu0 }
 0x177   :  { %12876 = vst [vmem:[#allocation22_spill] sm:$0xff] %v7406_v16 }
 0x179   :  { %6467 = vmatmul.msk.f32.gmra.mxu0 %vm181_vm1, %v79_v17 }
 0x17e   :  { %v7412_v18 = vpop.f32.mrf.mxu0 }
 0x17f   :  { %12877 = vst [vmem:[#allocation23_spill] sm:$0xff] %v7412_v18 }
 0x181   :  { %6468 = vmatmul.msk.f32.gmra.mxu0 %vm181_vm1, %v80_v19  ;;  %v96_v19 = vld [vmem:[%s12478_s0 + $0x1f8] sm:$0xff] }
 0x186   :  { %v7418_v21 = vpop.f32.mrf.mxu0 }
 0x187   :  { %12878 = vst [vmem:[#allocation24_spill] sm:$0xff] %v7418_v21 }
 0x189   :  { %6469 = vmatmul.msk.f32.gmra.mxu0 %vm181_vm1, %v81_v23 }
 0x18e   :  { %v7424_v25 = vpop.f32.mrf.mxu0 }
 0x18f   :  { %12879 = vst [vmem:[#allocation25_spill] sm:$0xff] %v7424_v25 }
 0x191   :  { %6470 = vmatmul.msk.f32.gmra.mxu0 %vm181_vm1, %v82_v27  ;;  %v97_v27 = vld [vmem:[%s12478_s0 + $0x200] sm:$0xff] }
 0x196   :  { %v7430_v29 = vpop.f32.mrf.mxu0 }
 0x197   :  { %12880 = vst [vmem:[#allocation26_spill] sm:$0xff] %v7430_v29 }
 0x199   :  { %6471 = vmatmul.msk.f32.gmra.mxu0 %vm181_vm1, %v83_v31 }
 0x19e   :  { %v7436_v33 = vpop.f32.mrf.mxu0 }
 0x19f   :  { %12881 = vst [vmem:[#allocation27_spill] sm:$0xff] %v7436_v33 }
 0x1a1   :  { %6472 = vmatmul.msk.f32.gmra.mxu0 %vm181_vm1, %v84_v35  ;;  %v98_v35 = vld [vmem:[%s12478_s0 + $0x208] sm:$0xff] }
 0x1a6   :  { %v7442_v37 = vpop.f32.mrf.mxu0 }
 0x1a7   :  { %12882 = vst [vmem:[#allocation28_spill] sm:$0xff] %v7442_v37 }
 0x1a9   :  { %6473 = vmatmul.msk.f32.gmra.mxu0 %vm181_vm1, %v85_v39 }
 0x1ae   :  { %v7448_v41 = vpop.f32.mrf.mxu0 }
 0x1af   :  { %12883 = vst [vmem:[#allocation29_spill] sm:$0xff] %v7448_v41 }
 0x1b1   :  { %6474 = vmatmul.msk.f32.gmra.mxu0 %vm181_vm1, %v86_v43  ;;  %v99_v43 = vld [vmem:[%s12478_s0 + $0x210] sm:$0xff] }
 0x1b6   :  { %v7454_v45 = vpop.f32.mrf.mxu0 }
 0x1b7   :  { %12884 = vst [vmem:[#allocation30_spill] sm:$0xff] %v7454_v45 }
 0x1b9   :  { %6475 = vmatmul.msk.f32.gmra.mxu0 %vm181_vm1, %v87_v47 }
 0x1be   :  { %v7460_v49 = vpop.f32.mrf.mxu0 }
 0x1bf   :  { %12885 = vst [vmem:[#allocation31_spill] sm:$0xff] %v7460_v49 }
 0x1c1   :  { %6476 = vmatmul.msk.f32.gmra.mxu0 %vm181_vm1, %v88_v51  ;;  %v100_v51 = vld [vmem:[%s12478_s0 + $0x218] sm:$0xff] }
 0x1c6   :  { %v7466_v53 = vpop.f32.mrf.mxu0 }
 0x1c7   :  { %12886 = vst [vmem:[#allocation32_spill] sm:$0xff] %v7466_v53 }
 0x1c9   :  { %6477 = vmatmul.msk.f32.gmra.mxu0 %vm181_vm1, %v89_v55 }
 0x1ce   :  { %v7472_v57 = vpop.f32.mrf.mxu0 }
 0x1cf   :  { %12887 = vst [vmem:[#allocation33_spill] sm:$0xff] %v7472_v57 }
 0x1d1   :  { %6478 = vmatmul.msk.f32.gmra.mxu0 %vm181_vm1, %v90_v59  ;;  %v101_v59 = vld [vmem:[%s12478_s0 + $0x220] sm:$0xff] }
 0x1d6   :  { %v7478_v61 = vpop.f32.mrf.mxu0 }
 0x1d7   :  { %12888 = vst [vmem:[#allocation34_spill] sm:$0xff] %v7478_v61 }
 0x1d9   :  { %6479 = vmatmul.msk.f32.gmra.mxu0 %vm181_vm1, %v91_v63 }
 0x1de   :  { %v7484_v1 = vpop.f32.mrf.mxu0 }
 0x1df   :  { %12889 = vst [vmem:[#allocation35_spill] sm:$0xff] %v7484_v1 }
 0x1e1   :  { %6480 = vmatmul.msk.f32.gmra.mxu0 %vm181_vm1, %v92_v3  ;;  %v102_v3 = vld [vmem:[%s12478_s0 + $0x228] sm:$0xff] }
 0x1e6   :  { %v7490_v5 = vpop.f32.mrf.mxu0 }
 0x1e7   :  { %12890 = vst [vmem:[#allocation36_spill] sm:$0xff] %v7490_v5 }
 0x1e9   :  { %6481 = vmatmul.msk.f32.gmra.mxu0 %vm181_vm1, %v93_v7 }
 0x1ee   :  { %v7496_v9 = vpop.f32.mrf.mxu0 }
 0x1ef   :  { %12891 = vst [vmem:[#allocation37_spill] sm:$0xff] %v7496_v9 }
 0x1f1   :  { %6482 = vmatmul.msk.f32.gmra.mxu0 %vm181_vm1, %v94_v11  ;;  %v103_v11 = vld [vmem:[%s12478_s0 + $0x230] sm:$0xff] }
 0x1f6   :  { %v7502_v13 = vpop.f32.mrf.mxu0 }
 0x1f7   :  { %12892 = vst [vmem:[#allocation38_spill] sm:$0xff] %v7502_v13 }
 0x1f9   :  { %6483 = vmatmul.msk.f32.gmra.mxu0 %vm181_vm1, %v95_v15 }
 0x1fe   :  { %v7508_v17 = vpop.f32.mrf.mxu0 }
 0x1ff   :  { %12893 = vst [vmem:[#allocation39_spill] sm:$0xff] %v7508_v17 }
 0x201   :  { %6484 = vmatmul.msk.f32.gmra.mxu0 %vm181_vm1, %v96_v19  ;;  %v104_v19 = vld [vmem:[%s12478_s0 + $0x238] sm:$0xff] }
 0x206   :  { %v7514_v23 = vpop.f32.mrf.mxu0 }
 0x207   :  { %12894 = vst [vmem:[#allocation40_spill] sm:$0xff] %v7514_v23 }
 0x209   :  { %6485 = vmatmul.msk.f32.gmra.mxu0 %vm181_vm1, %v97_v27 }
 0x20e   :  { %v7520_v31 = vpop.f32.mrf.mxu0 }
 0x20f   :  { %12895 = vst [vmem:[#allocation41_spill] sm:$0xff] %v7520_v31 }
 0x211   :  { %6486 = vmatmul.msk.f32.gmra.mxu0 %vm181_vm1, %v98_v35  ;;  %v105_v35 = vld [vmem:[%s12478_s0 + $0x240] sm:$0xff] }
 0x216   :  { %v7526_v39 = vpop.f32.mrf.mxu0 }
 0x217   :  { %12896 = vst [vmem:[#allocation42_spill] sm:$0xff] %v7526_v39  ;;  %v1075_v39 = vsel %vm1067_vm2, %v7250_v28, 0.0 }
 0x219   :  { %6487 = vmatmul.msk.f32.gmra.mxu0 %vm181_vm1, %v99_v43 }
 0x21e   :  { %v7532_v47 = vpop.f32.mrf.mxu0 }
 0x21f   :  { %12897 = vst [vmem:[#allocation43_spill] sm:$0xff] %v7532_v47  ;;  %v1366_v47 = vmul.f32 %v7250_v28, %v7250_v28 }
 0x221   :  { %6488 = vmatmul.msk.f32.gmra.mxu0 %vm181_vm1, %v100_v51  ;;  %v106_v51 = vld [vmem:[%s12478_s0 + $0x248] sm:$0xff] }
 0x226   :  { %v7538_v55 = vpop.f32.mrf.mxu0 }
 0x227   :  { %12898 = vst [vmem:[#allocation44_spill] sm:$0xff] %v7538_v55  ;;  %v1073_v55 = vsel %vm1067_vm2, %v7244_v26, 0.0 }
 0x229   :  { %6489 = vmatmul.msk.f32.gmra.mxu0 %vm181_vm1, %v101_v59 }
 0x22e   :  { %v7544_v63 = vpop.f32.mrf.mxu0 }
 0x22f   :  { %12899 = vst [vmem:[#allocation45_spill] sm:$0xff] %v7544_v63 }
 0x231   :  { %6490 = vmatmul.msk.f32.gmra.mxu0 %vm181_vm1, %v102_v3  ;;  %v107_v3 = vld [vmem:[%s12478_s0 + $0x250] sm:$0xff] }
 0x236   :  { %v7550_v7 = vpop.f32.mrf.mxu0 }
 0x237   :  { %12900 = vst [vmem:[#allocation46_spill] sm:$0xff] %v7550_v7 }
 0x239   :  { %6491 = vmatmul.msk.f32.gmra.mxu0 %vm181_vm1, %v103_v11 }
 0x23e   :  { %v7556_v15 = vpop.f32.mrf.mxu0 }
 0x23f   :  { %12901 = vst [vmem:[#allocation47_spill] sm:$0xff] %v7556_v15  ;;  %v1071_v15 = vsel %vm1067_vm2, %v7238_v24, 0.0 }
 0x241   :  { %6492 = vmatmul.msk.f32.gmra.mxu0 %vm181_vm1, %v104_v19  ;;  %v108_v19 = vld [vmem:[%s12478_s0 + $0x258] sm:$0xff] }
 0x246   :  { %v7562_v27 = vpop.f32.mrf.mxu0 }
 0x247   :  { %12902 = vst [vmem:[#allocation48_spill] sm:$0xff] %v7562_v27 }
 0x249   :  { %6493 = vmatmul.msk.f32.gmra.mxu0 %vm181_vm1, %v105_v35 }
 0x24e   :  { %v7568_v43 = vpop.f32.mrf.mxu0 }
 0x24f   :  { %12903 = vst [vmem:[#allocation49_spill] sm:$0xff] %v7568_v43  ;;  %v155_v43 = vld [vmem:[%s12478_s0 + $0x3d0] sm:$0xff] }
 0x251   :  { %6494 = vmatmul.msk.f32.gmra.mxu0 %vm181_vm1, %v106_v51  ;;  %v109_v51 = vld [vmem:[%s12478_s0 + $0x260] sm:$0xff] }
 0x256   :  { %v7574_v59 = vpop.f32.mrf.mxu0 }
 0x257   :  { %12904 = vst [vmem:[#allocation50_spill] sm:$0xff] %v7574_v59 }
 0x259   :  { %6495 = vmatmul.msk.f32.gmra.mxu0 %vm181_vm1, %v107_v3  ;;  %v110_v3 = vld [vmem:[%s12478_s0 + $0x268] sm:$0xff] }
 0x25e   :  { %v7580_v11 = vpop.f32.mrf.mxu0 }
 0x25f   :  { %12905 = vst [vmem:[#allocation51_spill] sm:$0xff] %v7580_v11 }
 0x261   :  { %6496 = vmatmul.msk.f32.gmra.mxu0 %vm181_vm1, %v108_v19  ;;  %v111_v19 = vld [vmem:[%s12478_s0 + $0x270] sm:$0xff] }
 0x266   :  { %v7586_v35 = vpop.f32.mrf.mxu0 }
 0x267   :  { %12906 = vst [vmem:[#allocation52_spill] sm:$0xff] %v7586_v35 }
 0x269   :  { %6497 = vmatmul.msk.f32.gmra.mxu0 %vm181_vm1, %v109_v51  ;;  %v112_v51 = vld [vmem:[%s12478_s0 + $0x278] sm:$0xff] }
 0x26e   :  { %v7592_v59 = vpop.f32.mrf.mxu0 }
 0x26f   :  { %12907 = vst [vmem:[#allocation53_spill] sm:$0xff] %v7592_v59 }
 0x271   :  { %6498 = vmatmul.msk.f32.gmra.mxu0 %vm181_vm1, %v110_v3  ;;  %v113_v3 = vld [vmem:[%s12478_s0 + $0x280] sm:$0xff] }
 0x276   :  { %v7598_v11 = vpop.f32.mrf.mxu0 }
 0x277   :  { %12908 = vst [vmem:[#allocation54_spill] sm:$0xff] %v7598_v11 }
 0x279   :  { %6499 = vmatmul.msk.f32.gmra.mxu0 %vm181_vm1, %v111_v19  ;;  %v114_v19 = vld [vmem:[%s12478_s0 + $0x288] sm:$0xff] }
 0x27e   :  { %v7604_v35 = vpop.f32.mrf.mxu0 }
 0x27f   :  { %12909 = vst [vmem:[#allocation55_spill] sm:$0xff] %v7604_v35 }
 0x281   :  { %6500 = vmatmul.msk.f32.gmra.mxu0 %vm181_vm1, %v112_v51  ;;  %v115_v51 = vld [vmem:[%s12478_s0 + $0x290] sm:$0xff] }
 0x286   :  { %v7610_v59 = vpop.f32.mrf.mxu0 }
 0x287   :  { %12910 = vst [vmem:[#allocation56_spill] sm:$0xff] %v7610_v59 }
 0x289   :  { %6501 = vmatmul.msk.f32.gmra.mxu0 %vm181_vm1, %v113_v3  ;;  %v116_v3 = vld [vmem:[%s12478_s0 + $0x298] sm:$0xff] }
 0x28e   :  { %v7616_v11 = vpop.f32.mrf.mxu0 }
 0x28f   :  { %12911 = vst [vmem:[#allocation57_spill] sm:$0xff] %v7616_v11 }
 0x291   :  { %6502 = vmatmul.msk.f32.gmra.mxu0 %vm181_vm1, %v114_v19  ;;  %v117_v19 = vld [vmem:[%s12478_s0 + $0x2a0] sm:$0xff] }
 0x296   :  { %v7622_v35 = vpop.f32.mrf.mxu0 }
 0x297   :  { %12912 = vst [vmem:[#allocation58_spill] sm:$0xff] %v7622_v35 }
 0x299   :  { %6503 = vmatmul.msk.f32.gmra.mxu0 %vm181_vm1, %v115_v51  ;;  %v118_v51 = vld [vmem:[%s12478_s0 + $0x2a8] sm:$0xff] }
 0x29e   :  { %v7628_v59 = vpop.f32.mrf.mxu0 }
 0x29f   :  { %12913 = vst [vmem:[#allocation59_spill] sm:$0xff] %v7628_v59 }
 0x2a1   :  { %6504 = vmatmul.msk.f32.gmra.mxu0 %vm181_vm1, %v116_v3  ;;  %v119_v3 = vld [vmem:[%s12478_s0 + $0x2b0] sm:$0xff] }
 0x2a6   :  { %v7634_v11 = vpop.f32.mrf.mxu0 }
 0x2a7   :  { %12914 = vst [vmem:[#allocation60_spill] sm:$0xff] %v7634_v11 }
 0x2a9   :  { %6505 = vmatmul.msk.f32.gmra.mxu0 %vm181_vm1, %v117_v19  ;;  %v120_v19 = vld [vmem:[%s12478_s0 + $0x2b8] sm:$0xff] }
 0x2ae   :  { %v7640_v35 = vpop.f32.mrf.mxu0 }
 0x2af   :  { %12915 = vst [vmem:[#allocation61_spill] sm:$0xff] %v7640_v35 }
 0x2b1   :  { %6506 = vmatmul.msk.f32.gmra.mxu0 %vm181_vm1, %v118_v51  ;;  %v121_v51 = vld [vmem:[%s12478_s0 + $0x2c0] sm:$0xff] }
 0x2b6   :  { %v7646_v59 = vpop.f32.mrf.mxu0 }
 0x2b7   :  { %12916 = vst [vmem:[#allocation62_spill] sm:$0xff] %v7646_v59 }
 0x2b9   :  { %6507 = vmatmul.msk.f32.gmra.mxu0 %vm181_vm1, %v119_v3  ;;  %v122_v3 = vld [vmem:[%s12478_s0 + $0x2c8] sm:$0xff] }
 0x2be   :  { %v7652_v11 = vpop.f32.mrf.mxu0 }
 0x2bf   :  { %12917 = vst [vmem:[#allocation63_spill] sm:$0xff] %v7652_v11 }
 0x2c1   :  { %6508 = vmatmul.msk.f32.gmra.mxu0 %vm181_vm1, %v120_v19  ;;  %v123_v19 = vld [vmem:[%s12478_s0 + $0x2d0] sm:$0xff] }
 0x2c6   :  { %v7658_v35 = vpop.f32.mrf.mxu0 }
 0x2c7   :  { %12918 = vst [vmem:[#allocation64_spill] sm:$0xff] %v7658_v35 }
 0x2c9   :  { %6509 = vmatmul.msk.f32.gmra.mxu0 %vm181_vm1, %v121_v51  ;;  %v124_v51 = vld [vmem:[%s12478_s0 + $0x2d8] sm:$0xff] }
 0x2ce   :  { %v7664_v59 = vpop.f32.mrf.mxu0 }
 0x2cf   :  { %12919 = vst [vmem:[#allocation65_spill] sm:$0xff] %v7664_v59 }
 0x2d1   :  { %6510 = vmatmul.msk.f32.gmra.mxu0 %vm181_vm1, %v122_v3  ;;  %v125_v3 = vld [vmem:[%s12478_s0 + $0x2e0] sm:$0xff] }
 0x2d6   :  { %v7670_v11 = vpop.f32.mrf.mxu0 }
 0x2d7   :  { %12920 = vst [vmem:[#allocation66_spill] sm:$0xff] %v7670_v11 }
 0x2d9   :  { %6511 = vmatmul.msk.f32.gmra.mxu0 %vm181_vm1, %v123_v19  ;;  %v126_v19 = vld [vmem:[%s12478_s0 + $0x2e8] sm:$0xff] }
 0x2de   :  { %v7676_v35 = vpop.f32.mrf.mxu0 }
 0x2df   :  { %12921 = vst [vmem:[#allocation67_spill] sm:$0xff] %v7676_v35 }
 0x2e1   :  { %6512 = vmatmul.msk.f32.gmra.mxu0 %vm181_vm1, %v124_v51  ;;  %v127_v51 = vld [vmem:[%s12478_s0 + $0x2f0] sm:$0xff] }
 0x2e6   :  { %v7682_v59 = vpop.f32.mrf.mxu0 }
 0x2e7   :  { %12922 = vst [vmem:[#allocation68_spill] sm:$0xff] %v7682_v59 }
 0x2e9   :  { %6513 = vmatmul.msk.f32.gmra.mxu0 %vm181_vm1, %v125_v3  ;;  %v128_v3 = vld [vmem:[%s12478_s0 + $0x2f8] sm:$0xff] }
 0x2ee   :  { %v7688_v11 = vpop.f32.mrf.mxu0 }
 0x2ef   :  { %12923 = vst [vmem:[#allocation69_spill] sm:$0xff] %v7688_v11 }
 0x2f1   :  { %6514 = vmatmul.msk.f32.gmra.mxu0 %vm181_vm1, %v126_v19  ;;  %v129_v19 = vld [vmem:[%s12478_s0 + $0x300] sm:$0xff] }
 0x2f6   :  { %v7694_v35 = vpop.f32.mrf.mxu0 }
 0x2f7   :  { %12924 = vst [vmem:[#allocation70_spill] sm:$0xff] %v7694_v35 }
 0x2f9   :  { %6515 = vmatmul.msk.f32.gmra.mxu0 %vm181_vm1, %v127_v51  ;;  %v130_v51 = vld [vmem:[%s12478_s0 + $0x308] sm:$0xff] }
 0x2fe   :  { %v7700_v59 = vpop.f32.mrf.mxu0 }
 0x2ff   :  { %12925 = vst [vmem:[#allocation71_spill] sm:$0xff] %v7700_v59 }
 0x301   :  { %6516 = vmatmul.msk.f32.gmra.mxu0 %vm181_vm1, %v128_v3  ;;  %v131_v3 = vld [vmem:[%s12478_s0 + $0x310] sm:$0xff] }
 0x306   :  { %v7706_v11 = vpop.f32.mrf.mxu0 }
 0x307   :  { %12926 = vst [vmem:[#allocation72_spill] sm:$0xff] %v7706_v11 }
 0x309   :  { %6517 = vmatmul.msk.f32.gmra.mxu0 %vm181_vm1, %v129_v19  ;;  %v132_v19 = vld [vmem:[%s12478_s0 + $0x318] sm:$0xff] }
 0x30e   :  { %v7712_v35 = vpop.f32.mrf.mxu0 }
 0x30f   :  { %12927 = vst [vmem:[#allocation73_spill] sm:$0xff] %v7712_v35 }
 0x311   :  { %6518 = vmatmul.msk.f32.gmra.mxu0 %vm181_vm1, %v130_v51  ;;  %v133_v51 = vld [vmem:[%s12478_s0 + $0x320] sm:$0xff] }
 0x316   :  { %v7718_v59 = vpop.f32.mrf.mxu0 }
 0x317   :  { %12928 = vst [vmem:[#allocation74_spill] sm:$0xff] %v7718_v59 }
 0x319   :  { %6519 = vmatmul.msk.f32.gmra.mxu0 %vm181_vm1, %v131_v3  ;;  %v134_v3 = vld [vmem:[%s12478_s0 + $0x328] sm:$0xff] }
 0x31e   :  { %v7724_v11 = vpop.f32.mrf.mxu0 }
 0x31f   :  { %12929 = vst [vmem:[#allocation75_spill] sm:$0xff] %v7724_v11 }
 0x321   :  { %6520 = vmatmul.msk.f32.gmra.mxu0 %vm181_vm1, %v132_v19  ;;  %v135_v19 = vld [vmem:[%s12478_s0 + $0x330] sm:$0xff] }
 0x326   :  { %v7730_v35 = vpop.f32.mrf.mxu0 }
 0x327   :  { %12930 = vst [vmem:[#allocation76_spill] sm:$0xff] %v7730_v35 }
 0x329   :  { %6521 = vmatmul.msk.f32.gmra.mxu0 %vm181_vm1, %v133_v51  ;;  %v136_v51 = vld [vmem:[%s12478_s0 + $0x338] sm:$0xff] }
 0x32e   :  { %v7736_v59 = vpop.f32.mrf.mxu0 }
 0x32f   :  { %12931 = vst [vmem:[#allocation77_spill] sm:$0xff] %v7736_v59 }
 0x331   :  { %6522 = vmatmul.msk.f32.gmra.mxu0 %vm181_vm1, %v134_v3  ;;  %v137_v3 = vld [vmem:[%s12478_s0 + $0x340] sm:$0xff] }
 0x336   :  { %v7742_v11 = vpop.f32.mrf.mxu0 }
 0x337   :  { %12932 = vst [vmem:[#allocation78_spill] sm:$0xff] %v7742_v11 }
 0x339   :  { %6523 = vmatmul.msk.f32.gmra.mxu0 %vm181_vm1, %v135_v19  ;;  %v138_v19 = vld [vmem:[%s12478_s0 + $0x348] sm:$0xff] }
 0x33e   :  { %v7748_v35 = vpop.f32.mrf.mxu0 }
 0x33f   :  { %12933 = vst [vmem:[#allocation79_spill] sm:$0xff] %v7748_v35 }
 0x341   :  { %6524 = vmatmul.msk.f32.gmra.mxu0 %vm181_vm1, %v136_v51  ;;  %v139_v51 = vld [vmem:[%s12478_s0 + $0x350] sm:$0xff] }
 0x346   :  { %v7754_v59 = vpop.f32.mrf.mxu0 }
 0x347   :  { %12934 = vst [vmem:[#allocation80_spill] sm:$0xff] %v7754_v59 }
 0x349   :  { %6525 = vmatmul.msk.f32.gmra.mxu0 %vm181_vm1, %v137_v3  ;;  %v140_v3 = vld [vmem:[%s12478_s0 + $0x358] sm:$0xff] }
 0x34e   :  { %v7760_v11 = vpop.f32.mrf.mxu0 }
 0x34f   :  { %12935 = vst [vmem:[#allocation81_spill] sm:$0xff] %v7760_v11 }
 0x351   :  { %6526 = vmatmul.msk.f32.gmra.mxu0 %vm181_vm1, %v138_v19  ;;  %v141_v19 = vld [vmem:[%s12478_s0 + $0x360] sm:$0xff] }
 0x356   :  { %v7766_v35 = vpop.f32.mrf.mxu0 }
 0x357   :  { %12936 = vst [vmem:[#allocation82_spill] sm:$0xff] %v7766_v35 }
 0x359   :  { %6527 = vmatmul.msk.f32.gmra.mxu0 %vm181_vm1, %v139_v51  ;;  %v142_v51 = vld [vmem:[%s12478_s0 + $0x368] sm:$0xff] }
 0x35e   :  { %v7772_v59 = vpop.f32.mrf.mxu0 }
 0x35f   :  { %12937 = vst [vmem:[#allocation83_spill] sm:$0xff] %v7772_v59 }
 0x361   :  { %6528 = vmatmul.msk.f32.gmra.mxu0 %vm181_vm1, %v140_v3  ;;  %v143_v3 = vld [vmem:[%s12478_s0 + $0x370] sm:$0xff] }
 0x366   :  { %v7778_v11 = vpop.f32.mrf.mxu0 }
 0x367   :  { %12938 = vst [vmem:[#allocation84_spill] sm:$0xff] %v7778_v11 }
 0x369   :  { %6529 = vmatmul.msk.f32.gmra.mxu0 %vm181_vm1, %v141_v19  ;;  %v144_v19 = vld [vmem:[%s12478_s0 + $0x378] sm:$0xff] }
 0x36e   :  { %v7784_v35 = vpop.f32.mrf.mxu0 }
 0x36f   :  { %12939 = vst [vmem:[#allocation85_spill] sm:$0xff] %v7784_v35 }
 0x371   :  { %6530 = vmatmul.msk.f32.gmra.mxu0 %vm181_vm1, %v142_v51  ;;  %v145_v51 = vld [vmem:[%s12478_s0 + $0x380] sm:$0xff] }
 0x376   :  { %v7790_v59 = vpop.f32.mrf.mxu0 }
 0x377   :  { %12940 = vst [vmem:[#allocation86_spill] sm:$0xff] %v7790_v59 }
 0x379   :  { %6531 = vmatmul.msk.f32.gmra.mxu0 %vm181_vm1, %v143_v3  ;;  %v146_v3 = vld [vmem:[%s12478_s0 + $0x388] sm:$0xff] }
 0x37e   :  { %v7796_v11 = vpop.f32.mrf.mxu0 }
 0x37f   :  { %12941 = vst [vmem:[#allocation87_spill] sm:$0xff] %v7796_v11 }
 0x381   :  { %6532 = vmatmul.msk.f32.gmra.mxu0 %vm181_vm1, %v144_v19  ;;  %v147_v19 = vld [vmem:[%s12478_s0 + $0x390] sm:$0xff] }
 0x386   :  { %v7802_v35 = vpop.f32.mrf.mxu0 }
 0x387   :  { %12942 = vst [vmem:[#allocation88_spill] sm:$0xff] %v7802_v35 }
 0x389   :  { %6533 = vmatmul.msk.f32.gmra.mxu0 %vm181_vm1, %v145_v51  ;;  %v148_v51 = vld [vmem:[%s12478_s0 + $0x398] sm:$0xff] }
 0x38e   :  { %v7808_v59 = vpop.f32.mrf.mxu0 }
 0x38f   :  { %12943 = vst [vmem:[#allocation89_spill] sm:$0xff] %v7808_v59 }
 0x391   :  { %6534 = vmatmul.msk.f32.gmra.mxu0 %vm181_vm1, %v146_v3  ;;  %v149_v3 = vld [vmem:[%s12478_s0 + $0x3a0] sm:$0xff] }
 0x396   :  { %v7814_v11 = vpop.f32.mrf.mxu0 }
 0x397   :  { %12944 = vst [vmem:[#allocation90_spill] sm:$0xff] %v7814_v11 }
 0x399   :  { %6535 = vmatmul.msk.f32.gmra.mxu0 %vm181_vm1, %v147_v19  ;;  %v150_v19 = vld [vmem:[%s12478_s0 + $0x3a8] sm:$0xff] }
 0x39e   :  { %v7820_v35 = vpop.f32.mrf.mxu0 }
 0x39f   :  { %12945 = vst [vmem:[#allocation91_spill] sm:$0xff] %v7820_v35 }
 0x3a1   :  { %6536 = vmatmul.msk.f32.gmra.mxu0 %vm181_vm1, %v148_v51  ;;  %v151_v51 = vld [vmem:[%s12478_s0 + $0x3b0] sm:$0xff] }
 0x3a6   :  { %v7826_v59 = vpop.f32.mrf.mxu0 }
 0x3a7   :  { %12946 = vst [vmem:[#allocation92_spill] sm:$0xff] %v7826_v59 }
 0x3a9   :  { %6537 = vmatmul.msk.f32.gmra.mxu0 %vm181_vm1, %v149_v3  ;;  %v152_v3 = vld [vmem:[%s12478_s0 + $0x3b8] sm:$0xff] }
 0x3ae   :  { %v7832_v11 = vpop.f32.mrf.mxu0 }
 0x3af   :  { %12947 = vst [vmem:[#allocation93_spill] sm:$0xff] %v7832_v11 }
 0x3b1   :  { %6538 = vmatmul.msk.f32.gmra.mxu0 %vm181_vm1, %v150_v19  ;;  %v153_v19 = vld [vmem:[%s12478_s0 + $0x3c0] sm:$0xff] }
 0x3b6   :  { %v7838_v35 = vpop.f32.mrf.mxu0 }
 0x3b7   :  { %12948 = vst [vmem:[#allocation94_spill] sm:$0xff] %v7838_v35 }
 0x3b9   :  { %6539 = vmatmul.msk.f32.gmra.mxu0 %vm181_vm1, %v151_v51  ;;  %v154_v51 = vld [vmem:[%s12478_s0 + $0x3c8] sm:$0xff] }
 0x3be   :  { %v7844_v59 = vpop.f32.mrf.mxu0 }
 0x3bf   :  { %12949 = vst [vmem:[#allocation95_spill] sm:$0xff] %v7844_v59  ;;  %v1363_v59 = vmul.f32 %v7232_v22, %v7232_v22 }
 0x3c1   :  { %6540 = vmatmul.msk.f32.gmra.mxu0 %vm181_vm1, %v152_v3  ;;  %v1362_v3 = vmul.f32 %v7226_v20, %v7226_v20  ;;  %v1507_v27 = vsel %vm1067_vm2, %v1363_v59, 0.0 }
 0x3c3   :  { %v1506_v63 = vsel %vm1067_vm2, %v1362_v3, 0.0 }
 0x3c4   :  { %v1508_v59 = vadd.f32 %v1507_v27, %v1506_v63 }
 0x3c6   :  { %v7850_v11 = vpop.f32.mrf.mxu0 }
 0x3c7   :  { %12950 = vst [vmem:[#allocation96_spill] sm:$0xff] %v7850_v11  ;;  %v1069_v11 = vsel %vm1067_vm2, %v7232_v22, 0.0  ;;  %v1365_v22 = vmul.f32 %v7244_v26, %v7244_v26  ;;  %v1077_v26 = vsel %vm1067_vm2, %v7256_v30, 0.0 }
 0x3c9   :  { %6541 = vmatmul.msk.f32.gmra.mxu0 %vm181_vm1, %v153_v19  ;;  %v1364_v19 = vmul.f32 %v7238_v24, %v7238_v24  ;;  %v1511_v24 = vsel %vm1067_vm2, %v1365_v22, 0.0  ;;  %v156_v22 = vld [vmem:[%s12478_s0 + $0x3d8] sm:$0xff] }
 0x3ce   :  { %v7856_v35 = vpop.f32.mrf.mxu0 }
 0x3cf   :  { %12951 = vst [vmem:[#allocation97_spill] sm:$0xff] %v7856_v35 }
 0x3d1   :  { %6542 = vmatmul.msk.f32.gmra.mxu0 %vm181_vm1, %v154_v51  ;;  %v1068_v51 = vsel %vm1067_vm2, %v7226_v20, 0.0 }
 0x3d2   :  { %v1070_v7 = vadd.f32 %v1069_v11, %v1068_v51  ;;  %v1367_v11 = vmul.f32 %v7256_v30, %v7256_v30  ;;  %v1513_v51 = vsel %vm1067_vm2, %v1366_v47, 0.0  ;;  %v1369_v47 = vmul.f32 %v7268_v34, %v7268_v34 }
 0x3d4   :  { %v1072_v20 = vadd.f32 %v1071_v15, %v1070_v7  ;;  %v1515_v27 = vsel %vm1067_vm2, %v1367_v11, 0.0 }
 0x3d6   :  { %v7870_v35 = vpop.f32.mrf.mxu0 }
 0x3d7   :  { %12952 = vst [vmem:[#allocation98_spill] sm:$0xff] %v7870_v35  ;;  %v1509_v35 = vsel %vm1067_vm2, %v1364_v19, 0.0  ;;  %v1074_v19 = vadd.f32 %v1073_v55, %v1072_v20  ;;  %v1079_v20 = vsel %vm1067_vm2, %v7262_v32, 0.0 }
 0x3d8   :  { %v1510_v3 = vadd.f32 %v1509_v35, %v1508_v59 }
 0x3d9   :  { %6543 = vmatmul.msk.f32.gmra.mxu0 %vm181_vm1, %v155_v43  ;;  %v1368_v43 = vmul.f32 %v7262_v32, %v7262_v32  ;;  %v1076_v7 = vadd.f32 %v1075_v39, %v1074_v19  ;;  %v1370_v39 = vmul.f32 %v7274_v36, %v7274_v36  ;;  %v1519_v19 = vsel %vm1067_vm2, %v1369_v47, 0.0  ;;  %v157_v47 = vld [vmem:[%s12478_s0 + $0x3e0] sm:$0xff] }
 0x3da   :  { %v1512_v63 = vadd.f32 %v1511_v24, %v1510_v3  ;;  %v1081_v24 = vsel %vm1067_vm2, %v7268_v34, 0.0  ;;  %v1083_v32 = vsel %vm1067_vm2, %v7274_v36, 0.0 }
 0x3db   :  { %v1078_v35 = vadd.f32 %v1077_v26, %v1076_v7  ;;  %v1517_v59 = vsel %vm1067_vm2, %v1368_v43, 0.0  ;;  %v1371_v26 = vmul.f32 %v7280_v38, %v7280_v38  ;;  %v1085_v7 = vsel %vm1067_vm2, %v7280_v38, 0.0 }
 0x3dc   :  { %v1514_v55 = vadd.f32 %v1513_v51, %v1512_v63  ;;  %v1521_v63 = vsel %vm1067_vm2, %v1370_v39, 0.0 }
 0x3dd   :  { %v1080_v11 = vadd.f32 %v1079_v20, %v1078_v35  ;;  %v1523_v35 = vsel %vm1067_vm2, %v1371_v26, 0.0 }
 0x3de   :  { %v7899_v15 = vpop.f32.mrf.mxu0  ;;  %v1516_v3 = vadd.f32 %v1515_v27, %v1514_v55 }
 0x3df   :  { %12953 = vst [vmem:[#allocation99_spill] sm:$0xff] %v7899_v15  ;;  %v1082_v43 = vadd.f32 %v1081_v24, %v1080_v11  ;;  %v1373_v24 = vmul.f32 %v7292_v42, %v7292_v42 }
 0x3e0   :  { %v1518_v51 = vadd.f32 %v1517_v59, %v1516_v3  ;;  %v1087_v59 = vsel %vm1067_vm2, %v7286_v40, 0.0 }
 0x3e1   :  { %6544 = vmatmul.msk.f32.gmra.mxu0 %vm181_vm1, %v156_v22  ;;  %v1372_v22 = vmul.f32 %v7286_v40, %v7286_v40  ;;  %v1084_v20 = vadd.f32 %v1083_v32, %v1082_v43  ;;  %v1089_v32 = vsel %vm1067_vm2, %v7292_v42, 0.0  ;;  %v1527_v43 = vsel %vm1067_vm2, %v1373_v24, 0.0  ;;  %v158_v24 = vld [vmem:[%s12478_s0 + $0x3e8] sm:$0xff] }
 0x3e2   :  { %v1520_v27 = vadd.f32 %v1519_v19, %v1518_v51  ;;  %v1374_v19 = vmul.f32 %v7298_v44, %v7298_v44  ;;  %v1091_v40 = vsel %vm1067_vm2, %v7298_v44, 0.0 }
 0x3e3   :  { %v1086_v3 = vadd.f32 %v1085_v7, %v1084_v20  ;;  %v1525_v11 = vsel %vm1067_vm2, %v1372_v22, 0.0  ;;  %v1093_v20 = vsel %vm1067_vm2, %v7304_v46, 0.0 }
 0x3e4   :  { %v1522_v39 = vadd.f32 %v1521_v63, %v1520_v27  ;;  %v1375_v63 = vmul.f32 %v7304_v46, %v7304_v46  ;;  %v1529_v27 = vsel %vm1067_vm2, %v1374_v19, 0.0 }
 0x3e5   :  { %v1088_v26 = vadd.f32 %v1087_v59, %v1086_v3 }
 0x3e6   :  { %v7925_v55 = vpop.f32.mrf.mxu0  ;;  %v1524_v51 = vadd.f32 %v1523_v35, %v1522_v39  ;;  %v1531_v3 = vsel %vm1067_vm2, %v1375_v63, 0.0 }
 0x3e7   :  { %v1090_v22 = vadd.f32 %v1089_v32, %v1088_v26  ;;  %v1377_v32 = vmul.f32 %v7316_v50, %v7316_v50 }
 0x3e8   :  { %v1526_v7 = vadd.f32 %v1525_v11, %v1524_v51  ;;  %v1095_v11 = vsel %vm1067_vm2, %v7310_v48, 0.0 }
 0x3e9   :  { %6545 = vmatmul.msk.f32.gmra.mxu0 %vm181_vm1, %v157_v47  ;;  %v1376_v47 = vmul.f32 %v7310_v48, %v7310_v48  ;;  %v1092_v59 = vadd.f32 %v1091_v40, %v1090_v22  ;;  %v1097_v40 = vsel %vm1067_vm2, %v7316_v50, 0.0  ;;  %v1535_v22 = vsel %vm1067_vm2, %v1377_v32, 0.0  ;;  %v159_v32 = vld [vmem:[%s12478_s0 + $0x3f0] sm:$0xff] }
 0x3ea   :  { %v1528_v35 = vadd.f32 %v1527_v43, %v1526_v7  ;;  %v1378_v43 = vmul.f32 %v7322_v52, %v7322_v52  ;;  %v1099_v48 = vsel %vm1067_vm2, %v7322_v52, 0.0 }
 0x3eb   :  { %v1094_v51 = vadd.f32 %v1093_v20, %v1092_v59  ;;  %v1533_v26 = vsel %vm1067_vm2, %v1376_v47, 0.0  ;;  %v1101_v59 = vsel %vm1067_vm2, %v7328_v54, 0.0 }
 0x3ec   :  { %v1530_v19 = vadd.f32 %v1529_v27, %v1528_v35  ;;  %v1379_v27 = vmul.f32 %v7328_v54, %v7328_v54  ;;  %v1537_v35 = vsel %vm1067_vm2, %v1378_v43, 0.0 }
 0x3ed   :  { %v1096_v63 = vadd.f32 %v1095_v11, %v1094_v51 }
 0x3ee   :  { %v7951_v39 = vpop.f32.mrf.mxu0  ;;  %v1532_v7 = vadd.f32 %v1531_v3, %v1530_v19  ;;  %v1539_v51 = vsel %vm1067_vm2, %v1379_v27, 0.0 }
 0x3ef   :  { %v1098_v47 = vadd.f32 %v1097_v40, %v1096_v63  ;;  %v1381_v40 = vmul.f32 %v7340_v58, %v7340_v58 }
 0x3f0   :  { %v1534_v20 = vadd.f32 %v1533_v26, %v1532_v7  ;;  %v1103_v26 = vsel %vm1067_vm2, %v7334_v56, 0.0 }
 0x3f1   :  { %6546 = vmatmul.msk.f32.gmra.mxu0 %vm181_vm1, %v158_v24  ;;  %v1380_v24 = vmul.f32 %v7334_v56, %v7334_v56  ;;  %v1100_v11 = vadd.f32 %v1099_v48, %v1098_v47  ;;  %v1105_v48 = vsel %vm1067_vm2, %v7340_v58, 0.0  ;;  %v1543_v47 = vsel %vm1067_vm2, %v1381_v40, 0.0  ;;  %v160_v40 = vld [vmem:[%s12478_s0 + $0x3f8] sm:$0xff] }
 0x3f2   :  { %v1536_v3 = vadd.f32 %v1535_v22, %v1534_v20  ;;  %v1382_v22 = vmul.f32 %v7346_v60, %v7346_v60  ;;  %v1107_v56 = vsel %vm1067_vm2, %v7346_v60, 0.0 }
 0x3f3   :  { %v1102_v7 = vadd.f32 %v1101_v59, %v1100_v11  ;;  %v1541_v63 = vsel %vm1067_vm2, %v1380_v24, 0.0  ;;  %v1109_v11 = vsel %vm1067_vm2, %v7352_v62, 0.0 }
 0x3f4   :  { %v1538_v43 = vadd.f32 %v1537_v35, %v1536_v3  ;;  %v1383_v35 = vmul.f32 %v7352_v62, %v7352_v62  ;;  %v1545_v3 = vsel %vm1067_vm2, %v1382_v22, 0.0 }
 0x3f5   :  { %v1104_v27 = vadd.f32 %v1103_v26, %v1102_v7 }
 0x3f6   :  { %v7977_v19 = vpop.f32.mrf.mxu0  ;;  %v1540_v20 = vadd.f32 %v1539_v51, %v1538_v43  ;;  %v1547_v7 = vsel %vm1067_vm2, %v1383_v35, 0.0 }
 0x3f7   :  { %12954 = vst [vmem:[#allocation100_spill] sm:$0xff] %v7977_v19  ;;  %v1106_v24 = vadd.f32 %v1105_v48, %v1104_v27  ;;  %v1385_v48 = vmul.f32 %v7364_v2, %v7364_v2 }
 0x3f8   :  { %v1542_v59 = vadd.f32 %v1541_v63, %v1540_v20  ;;  %v1111_v63 = vsel %vm1067_vm2, %v7358_v0, 0.0 }
 0x3f9   :  { %6547 = vmatmul.msk.f32.gmra.mxu0 %vm181_vm1, %v159_v32  ;;  %v1384_v32 = vmul.f32 %v7358_v0, %v7358_v0  ;;  %v1108_v26 = vadd.f32 %v1107_v56, %v1106_v24  ;;  %v1113_v56 = vsel %vm1067_vm2, %v7364_v2, 0.0  ;;  %v1551_v24 = vsel %vm1067_vm2, %v1385_v48, 0.0  ;;  %v161_v48 = vld [vmem:[%s12478_s0 + $0x400] sm:$0xff] }
 0x3fa   :  { %v1544_v51 = vadd.f32 %v1543_v47, %v1542_v59  ;;  %v1386_v47 = vmul.f32 %v7370_v4, %v7370_v4  ;;  %v1115_v0 = vsel %vm1067_vm2, %v7370_v4, 0.0 }
 0x3fb   :  { %v1110_v20 = vadd.f32 %v1109_v11, %v1108_v26  ;;  %v1549_v27 = vsel %vm1067_vm2, %v1384_v32, 0.0  ;;  %v1117_v26 = vsel %vm1067_vm2, %v7376_v6, 0.0 }
 0x3fc   :  { %v1546_v22 = vadd.f32 %v1545_v3, %v1544_v51  ;;  %v1387_v3 = vmul.f32 %v7376_v6, %v7376_v6  ;;  %v1553_v51 = vsel %vm1067_vm2, %v1386_v47, 0.0 }
 0x3fd   :  { %v1112_v35 = vadd.f32 %v1111_v63, %v1110_v20 }
 0x3fe   :  { %v8003_v43 = vpop.f32.mrf.mxu0  ;;  %v1548_v59 = vadd.f32 %v1547_v7, %v1546_v22  ;;  %v1555_v20 = vsel %vm1067_vm2, %v1387_v3, 0.0 }
 0x3ff   :  { %12955 = vst [vmem:[#allocation101_spill] sm:$0xff] %v8003_v43  ;;  %v1114_v32 = vadd.f32 %v1113_v56, %v1112_v35  ;;  %v1389_v56 = vmul.f32 %v7388_v10, %v7388_v10 }
 0x400   :  { %v1550_v11 = vadd.f32 %v1549_v27, %v1548_v59  ;;  %v1119_v27 = vsel %vm1067_vm2, %v7382_v8, 0.0 }
 0x401   :  { %6548 = vmatmul.msk.f32.gmra.mxu0 %vm181_vm1, %v160_v40  ;;  %v1388_v40 = vmul.f32 %v7382_v8, %v7382_v8  ;;  %v1116_v63 = vadd.f32 %v1115_v0, %v1114_v32  ;;  %v1121_v0 = vsel %vm1067_vm2, %v7388_v10, 0.0  ;;  %v1559_v32 = vsel %vm1067_vm2, %v1389_v56, 0.0  ;;  %v162_v56 = vld [vmem:[%s12478_s0 + $0x408] sm:$0xff] }
 0x402   :  { %v1552_v7 = vadd.f32 %v1551_v24, %v1550_v11  ;;  %v1390_v24 = vmul.f32 %v7394_v12, %v7394_v12  ;;  %v1123_v8 = vsel %vm1067_vm2, %v7394_v12, 0.0 }
 0x403   :  { %v1118_v59 = vadd.f32 %v1117_v26, %v1116_v63  ;;  %v1557_v35 = vsel %vm1067_vm2, %v1388_v40, 0.0  ;;  %v1125_v63 = vsel %vm1067_vm2, %v7400_v14, 0.0 }
 0x404   :  { %v1554_v47 = vadd.f32 %v1553_v51, %v1552_v7  ;;  %v1391_v51 = vmul.f32 %v7400_v14, %v7400_v14  ;;  %v1561_v7 = vsel %vm1067_vm2, %v1390_v24, 0.0 }
 0x405   :  { %v1120_v3 = vadd.f32 %v1119_v27, %v1118_v59 }
 0x406   :  { %v8029_v22 = vpop.f32.mrf.mxu0  ;;  %v1556_v11 = vadd.f32 %v1555_v20, %v1554_v47  ;;  %v1563_v59 = vsel %vm1067_vm2, %v1391_v51, 0.0 }
 0x407   :  { %v1122_v40 = vadd.f32 %v1121_v0, %v1120_v3  ;;  %v1393_v0 = vmul.f32 %v7412_v18, %v7412_v18 }
 0x408   :  { %v1558_v26 = vadd.f32 %v1557_v35, %v1556_v11  ;;  %v1127_v35 = vsel %vm1067_vm2, %v7406_v16, 0.0 }
 0x409   :  { %6549 = vmatmul.msk.f32.gmra.mxu0 %vm181_vm1, %v161_v48  ;;  %v1392_v48 = vmul.f32 %v7406_v16, %v7406_v16  ;;  %v1124_v27 = vadd.f32 %v1123_v8, %v1122_v40  ;;  %v1129_v8 = vsel %vm1067_vm2, %v7412_v18, 0.0  ;;  %v1567_v40 = vsel %vm1067_vm2, %v1393_v0, 0.0  ;;  %v163_v0 = vld [vmem:[%s12478_s0 + $0x410] sm:$0xff] }
 0x40a   :  { %v1560_v20 = vadd.f32 %v1559_v32, %v1558_v26  ;;  %v1394_v32 = vmul.f32 %v7418_v21, %v7418_v21  ;;  %v1131_v16 = vsel %vm1067_vm2, %v7418_v21, 0.0 }
 0x40b   :  { %v1126_v11 = vadd.f32 %v1125_v63, %v1124_v27  ;;  %v1565_v3 = vsel %vm1067_vm2, %v1392_v48, 0.0  ;;  %v1133_v27 = vsel %vm1067_vm2, %v7424_v25, 0.0 }
 0x40c   :  { %v1562_v24 = vadd.f32 %v1561_v7, %v1560_v20  ;;  %v1395_v7 = vmul.f32 %v7424_v25, %v7424_v25  ;;  %v1569_v20 = vsel %vm1067_vm2, %v1394_v32, 0.0 }
 0x40d   :  { %v1128_v51 = vadd.f32 %v1127_v35, %v1126_v11 }
 0x40e   :  { %v8055_v47 = vpop.f32.mrf.mxu0  ;;  %v1564_v26 = vadd.f32 %v1563_v59, %v1562_v24  ;;  %v1571_v11 = vsel %vm1067_vm2, %v1395_v7, 0.0 }
 0x40f   :  { %v1130_v48 = vadd.f32 %v1129_v8, %v1128_v51  ;;  %v1397_v8 = vmul.f32 %v7436_v33, %v7436_v33 }
 0x410   :  { %v1566_v63 = vadd.f32 %v1565_v3, %v1564_v26  ;;  %v1135_v3 = vsel %vm1067_vm2, %v7430_v29, 0.0 }
 0x411   :  { %6550 = vmatmul.msk.f32.gmra.mxu0 %vm181_vm1, %v162_v56  ;;  %v1396_v56 = vmul.f32 %v7430_v29, %v7430_v29  ;;  %v1132_v35 = vadd.f32 %v1131_v16, %v1130_v48  ;;  %v1137_v16 = vsel %vm1067_vm2, %v7436_v33, 0.0  ;;  %v1575_v48 = vsel %vm1067_vm2, %v1397_v8, 0.0  ;;  %v164_v8 = vld [vmem:[%s12478_s0 + $0x418] sm:$0xff] }
 0x412   :  { %v1568_v59 = vadd.f32 %v1567_v40, %v1566_v63  ;;  %v1398_v40 = vmul.f32 %v7442_v37, %v7442_v37  ;;  %v1139_v29 = vsel %vm1067_vm2, %v7442_v37, 0.0  ;;  %v12995_v37 = vld [vmem:[#allocation73_spill] sm:$0xff] }
 0x413   :  { %v1134_v26 = vadd.f32 %v1133_v27, %v1132_v35  ;;  %v1573_v51 = vsel %vm1067_vm2, %v1396_v56, 0.0  ;;  %v1141_v35 = vsel %vm1067_vm2, %v7448_v41, 0.0 }
 0x414   :  { %v1570_v32 = vadd.f32 %v1569_v20, %v1568_v59  ;;  %v1399_v20 = vmul.f32 %v7448_v41, %v7448_v41  ;;  %v1577_v59 = vsel %vm1067_vm2, %v1398_v40, 0.0  ;;  %v12990_v41 = vld [vmem:[#allocation69_spill] sm:$0xff] }
 0x415   :  { %v1136_v7 = vadd.f32 %v1135_v3, %v1134_v26 }
 0x416   :  { %v8081_v24 = vpop.f32.mrf.mxu0  ;;  %v1572_v63 = vadd.f32 %v1571_v11, %v1570_v32  ;;  %v1579_v26 = vsel %vm1067_vm2, %v1399_v20, 0.0 }
 0x417   :  { %12956 = vst [vmem:[#allocation102_spill] sm:$0xff] %v8081_v24  ;;  %v1138_v56 = vadd.f32 %v1137_v16, %v1136_v7  ;;  %v1401_v16 = vmul.f32 %v7460_v49, %v7460_v49 }
 0x418   :  { %v1574_v27 = vadd.f32 %v1573_v51, %v1572_v63  ;;  %v1143_v51 = vsel %vm1067_vm2, %v7454_v45, 0.0 }
 0x419   :  { %6551 = vmatmul.msk.f32.gmra.mxu0 %vm181_vm1, %v163_v0  ;;  %v1400_v0 = vmul.f32 %v7454_v45, %v7454_v45  ;;  %v1140_v3 = vadd.f32 %v1139_v29, %v1138_v56  ;;  %v1145_v29 = vsel %vm1067_vm2, %v7460_v49, 0.0  ;;  %v1583_v56 = vsel %vm1067_vm2, %v1401_v16, 0.0  ;;  %v165_v16 = vld [vmem:[%s12478_s0 + $0x420] sm:$0xff]  ;;  %v12985_v49 = vld [vmem:[#allocation65_spill] sm:$0xff] }
 0x41a   :  { %v1576_v11 = vadd.f32 %v1575_v48, %v1574_v27  ;;  %v1402_v48 = vmul.f32 %v7466_v53, %v7466_v53  ;;  %v1147_v45 = vsel %vm1067_vm2, %v7466_v53, 0.0  ;;  %v12980_v53 = vld [vmem:[#allocation61_spill] sm:$0xff] }
 0x41b   :  { %v1142_v63 = vadd.f32 %v1141_v35, %v1140_v3  ;;  %v1581_v7 = vsel %vm1067_vm2, %v1400_v0, 0.0  ;;  %v1149_v3 = vsel %vm1067_vm2, %v7472_v57, 0.0 }
 0x41c   :  { %v1578_v40 = vadd.f32 %v1577_v59, %v1576_v11  ;;  %v1403_v59 = vmul.f32 %v7472_v57, %v7472_v57  ;;  %v1585_v11 = vsel %vm1067_vm2, %v1402_v48, 0.0  ;;  %v12963_v57 = vld [vmem:[#allocation46_spill] sm:$0xff] }
 0x41d   :  { %v1144_v20 = vadd.f32 %v1143_v51, %v1142_v63 }
 0x41e   :  { %v8107_v32 = vpop.f32.mrf.mxu0  ;;  %v1580_v27 = vadd.f32 %v1579_v26, %v1578_v40  ;;  %v1587_v63 = vsel %vm1067_vm2, %v1403_v59, 0.0 }
 0x41f   :  { %12957 = vst [vmem:[#allocation103_spill] sm:$0xff] %v8107_v32  ;;  %v1146_v0 = vadd.f32 %v1145_v29, %v1144_v20  ;;  %v1405_v29 = vmul.f32 %v7484_v1, %v7484_v1 }
 0x420   :  { %v1582_v35 = vadd.f32 %v1581_v7, %v1580_v27  ;;  %v1151_v7 = vsel %vm1067_vm2, %v7478_v61, 0.0 }
 0x421   :  { %6552 = vmatmul.msk.f32.gmra.mxu0 %vm181_vm1, %v164_v8  ;;  %v1404_v8 = vmul.f32 %v7478_v61, %v7478_v61  ;;  %v1148_v51 = vadd.f32 %v1147_v45, %v1146_v0  ;;  %v1153_v45 = vsel %vm1067_vm2, %v7484_v1, 0.0  ;;  %v1591_v0 = vsel %vm1067_vm2, %v1405_v29, 0.0  ;;  %v166_v29 = vld [vmem:[%s12478_s0 + $0x428] sm:$0xff]  ;;  %v12962_v1 = vld [vmem:[#allocation45_spill] sm:$0xff] }
 0x422   :  { %v1584_v26 = vadd.f32 %v1583_v56, %v1582_v35  ;;  %v1406_v56 = vmul.f32 %v7490_v5, %v7490_v5  ;;  %v1155_v61 = vsel %vm1067_vm2, %v7490_v5, 0.0 }
 0x423   :  { %v1150_v27 = vadd.f32 %v1149_v3, %v1148_v51  ;;  %v1589_v20 = vsel %vm1067_vm2, %v1404_v8, 0.0  ;;  %v1157_v51 = vsel %vm1067_vm2, %v7496_v9, 0.0 }
 0x424   :  { %v1586_v48 = vadd.f32 %v1585_v11, %v1584_v26  ;;  %v1407_v11 = vmul.f32 %v7496_v9, %v7496_v9  ;;  %v1593_v26 = vsel %vm1067_vm2, %v1406_v56, 0.0 }
 0x425   :  { %v1152_v59 = vadd.f32 %v1151_v7, %v1150_v27 }
 0x426   :  { %v8133_v40 = vpop.f32.mrf.mxu0  ;;  %v1588_v35 = vadd.f32 %v1587_v63, %v1586_v48  ;;  %v1595_v27 = vsel %vm1067_vm2, %v1407_v11, 0.0 }
 0x427   :  { %v1154_v8 = vadd.f32 %v1153_v45, %v1152_v59  ;;  %v1409_v45 = vmul.f32 %v7508_v17, %v7508_v17 }
 0x428   :  { %v1590_v3 = vadd.f32 %v1589_v20, %v1588_v35  ;;  %v1159_v20 = vsel %vm1067_vm2, %v7502_v13, 0.0 }
 0x429   :  { %6553 = vmatmul.msk.f32.gmra.mxu0 %vm181_vm1, %v165_v16  ;;  %v1408_v16 = vmul.f32 %v7502_v13, %v7502_v13  ;;  %v1156_v7 = vadd.f32 %v1155_v61, %v1154_v8  ;;  %v1161_v61 = vsel %vm1067_vm2, %v7508_v17, 0.0  ;;  %v1599_v8 = vsel %vm1067_vm2, %v1409_v45, 0.0  ;;  %v12958_v17 = vld [vmem:[#allocation42_spill] sm:$0xff]  ;;  %v167_v45 = vld [vmem:[%s12478_s0 + $0x430] sm:$0xff] }
 0x42a   :  { %v1592_v63 = vadd.f32 %v1591_v0, %v1590_v3  ;;  %v1410_v0 = vmul.f32 %v7514_v23, %v7514_v23  ;;  %v1163_v13 = vsel %vm1067_vm2, %v7514_v23, 0.0 }
 0x42b   :  { %v1158_v35 = vadd.f32 %v1157_v51, %v1156_v7  ;;  %v1597_v59 = vsel %vm1067_vm2, %v1408_v16, 0.0  ;;  %v1165_v7 = vsel %vm1067_vm2, %v7520_v31, 0.0 }
 0x42c   :  { %v1594_v56 = vadd.f32 %v1593_v26, %v1592_v63  ;;  %v1411_v26 = vmul.f32 %v7520_v31, %v7520_v31  ;;  %v1601_v63 = vsel %vm1067_vm2, %v1410_v0, 0.0 }
 0x42d   :  { %v1160_v11 = vadd.f32 %v1159_v20, %v1158_v35 }
 0x42e   :  { %v8159_v48 = vpop.f32.mrf.mxu0  ;;  %v1596_v3 = vadd.f32 %v1595_v27, %v1594_v56  ;;  %v1603_v35 = vsel %vm1067_vm2, %v1411_v26, 0.0 }
 0x42f   :  { %v1162_v16 = vadd.f32 %v1161_v61, %v1160_v11  ;;  %v12960_v61 = vld [vmem:[#allocation43_spill] sm:$0xff] }
 0x430   :  { %v1598_v51 = vadd.f32 %v1597_v59, %v1596_v3  ;;  %v1167_v59 = vsel %vm1067_vm2, %v12958_v17, 0.0  ;;  %v1413_v0 = vmul.f32 %v12960_v61, %v12960_v61 }
 0x431   :  { %6554 = vmatmul.msk.f32.gmra.mxu0 %vm181_vm1, %v166_v29  ;;  %v1412_v29 = vmul.f32 %v12958_v17, %v12958_v17  ;;  %v1164_v20 = vadd.f32 %v1163_v13, %v1162_v16  ;;  %v1169_v13 = vsel %vm1067_vm2, %v12960_v61, 0.0  ;;  %v12966_v61 = vld [vmem:[#allocation49_spill] sm:$0xff] }
 0x432   :  { %v1600_v27 = vadd.f32 %v1599_v8, %v1598_v51  ;;  %v12961_v8 = vld [vmem:[#allocation44_spill] sm:$0xff]  ;;  %v1607_v9 = vsel %vm1067_vm2, %v1413_v0, 0.0  ;;  %v168_v0 = vld [vmem:[%s12478_s0 + $0x438] sm:$0xff] }
 0x433   :  { %v1166_v11 = vadd.f32 %v1165_v7, %v1164_v20  ;;  %v1605_v23 = vsel %vm1067_vm2, %v1412_v29, 0.0  ;;  %v1414_v51 = vmul.f32 %v12961_v8, %v12961_v8  ;;  %v1171_v5 = vsel %vm1067_vm2, %v12961_v8, 0.0 }
 0x434   :  { %v1602_v3 = vadd.f32 %v1601_v63, %v1600_v27  ;;  %v1415_v63 = vmul.f32 %v12962_v1, %v12962_v1  ;;  %v1173_v20 = vsel %vm1067_vm2, %v12962_v1, 0.0 }
 0x435   :  { %v1168_v26 = vadd.f32 %v1167_v59, %v1166_v11  ;;  %v1609_v27 = vsel %vm1067_vm2, %v1414_v51, 0.0 }
 0x436   :  { %v8185_v56 = vpop.f32.mrf.mxu0  ;;  %v1604_v16 = vadd.f32 %v1603_v35, %v1602_v3  ;;  %v1611_v11 = vsel %vm1067_vm2, %v1415_v63, 0.0 }
 0x437   :  { %12959 = vst [vmem:[#allocation104_spill] sm:$0xff] %v8185_v56  ;;  %v1170_v29 = vadd.f32 %v1169_v13, %v1168_v26  ;;  %v12964_v13 = vld [vmem:[#allocation47_spill] sm:$0xff] }
 0x438   :  { %v1606_v7 = vadd.f32 %v1605_v23, %v1604_v16  ;;  %v1175_v23 = vsel %vm1067_vm2, %v12963_v57, 0.0  ;;  %v1417_v51 = vmul.f32 %v12964_v13, %v12964_v13 }
 0x439   :  { %6555 = vmatmul.msk.f32.gmra.mxu0 %vm181_vm1, %v167_v45  ;;  %v1416_v45 = vmul.f32 %v12963_v57, %v12963_v57  ;;  %v1172_v59 = vadd.f32 %v1171_v5, %v1170_v29  ;;  %v1177_v5 = vsel %vm1067_vm2, %v12964_v13, 0.0  ;;  %v12967_v13 = vld [vmem:[#allocation50_spill] sm:$0xff] }
 0x43a   :  { %v1608_v35 = vadd.f32 %v1607_v9, %v1606_v7  ;;  %v12965_v9 = vld [vmem:[#allocation48_spill] sm:$0xff]  ;;  %v1615_v8 = vsel %vm1067_vm2, %v1417_v51, 0.0  ;;  %v169_v51 = vld [vmem:[%s12478_s0 + $0x440] sm:$0xff] }
 0x43b   :  { %v1174_v26 = vadd.f32 %v1173_v20, %v1172_v59  ;;  %v1613_v1 = vsel %vm1067_vm2, %v1416_v45, 0.0  ;;  %v1418_v7 = vmul.f32 %v12965_v9, %v12965_v9  ;;  %v1179_v57 = vsel %vm1067_vm2, %v12965_v9, 0.0 }
 0x43c   :  { %v1610_v16 = vadd.f32 %v1609_v27, %v1608_v35  ;;  %v1419_v27 = vmul.f32 %v12966_v61, %v12966_v61  ;;  %v1181_v59 = vsel %vm1067_vm2, %v12966_v61, 0.0 }
 0x43d   :  { %v1176_v63 = vadd.f32 %v1175_v23, %v1174_v26  ;;  %v1617_v35 = vsel %vm1067_vm2, %v1418_v7, 0.0  ;;  %v12969_v7 = vld [vmem:[#allocation51_spill] sm:$0xff] }
 0x43e   :  { %v8211_v3 = vpop.f32.mrf.mxu0  ;;  %v1612_v29 = vadd.f32 %v1611_v11, %v1610_v16  ;;  %v1619_v26 = vsel %vm1067_vm2, %v1419_v27, 0.0 }
 0x43f   :  { %v1178_v45 = vadd.f32 %v1177_v5, %v1176_v63  ;;  %v1183_v5 = vsel %vm1067_vm2, %v12967_v13, 0.0 }
 0x440   :  { %v1614_v20 = vadd.f32 %v1613_v1, %v1612_v29  ;;  %v175_v1 = vld [vmem:[%s12478_s0 + $0x470] sm:$0xff]  ;;  %v1421_v29 = vmul.f32 %v12969_v7, %v12969_v7 }
 0x441   :  { %6556 = vmatmul.msk.f32.gmra.mxu0 %vm181_vm1, %v168_v0  ;;  %v1420_v0 = vmul.f32 %v12967_v13, %v12967_v13  ;;  %v1180_v23 = vadd.f32 %v1179_v57, %v1178_v45  ;;  %6563 = vmatmul.msk.f32.vlgmr.msra.gmra.mxu2 %vm181_vm1, %v175_v1  ;;  %v12970_v45 = vld [vmem:[#allocation52_spill] sm:$0xff]  ;;  %v12971_v1 = vld [vmem:[#allocation53_spill] sm:$0xff] }
 0x442   :  { %v1616_v11 = vadd.f32 %v1615_v8, %v1614_v20  ;;  %v1185_v20 = vsel %vm1067_vm2, %v12969_v7, 0.0  ;;  %v1422_v61 = vmul.f32 %v12970_v45, %v12970_v45  ;;  %v1623_v13 = vsel %vm1067_vm2, %v1421_v29, 0.0  ;;  %v12972_v7 = vld [vmem:[#allocation54_spill] sm:$0xff]  ;;  %v170_v29 = vld [vmem:[%s12478_s0 + $0x448] sm:$0xff] }
 0x443   :  { %v1182_v8 = vadd.f32 %v1181_v59, %v1180_v23  ;;  %v1621_v63 = vsel %vm1067_vm2, %v1420_v0, 0.0  ;;  %v1187_v17 = vsel %vm1067_vm2, %v12970_v45, 0.0  ;;  %v1189_v23 = vsel %vm1067_vm2, %v12971_v1, 0.0 }
 0x444   :  { %v1618_v57 = vadd.f32 %v1617_v35, %v1616_v11  ;;  %v1423_v35 = vmul.f32 %v12971_v1, %v12971_v1  ;;  %v1625_v11 = vsel %vm1067_vm2, %v1422_v61, 0.0 }
 0x445   :  { %v1184_v9 = vadd.f32 %v1183_v5, %v1182_v8  ;;  %v1191_v8 = vsel %vm1067_vm2, %v12972_v7, 0.0 }
 0x446   :  { %v8237_v16 = vpop.f32.mrf.mxu0  ;;  %v1620_v27 = vadd.f32 %v1619_v26, %v1618_v57  ;;  %v1627_v61 = vsel %vm1067_vm2, %v1423_v35, 0.0 }
 0x447   :  { %12968 = vst [vmem:[#allocation105_spill] sm:$0xff] %v8237_v16  ;;  %v1186_v0 = vadd.f32 %v1185_v20, %v1184_v9  ;;  %v176_v9 = vld [vmem:[%s12478_s0 + $0x478] sm:$0xff] }
 0x448   :  { %v1622_v59 = vadd.f32 %v1621_v63, %v1620_v27  ;;  %v12973_v63 = vld [vmem:[#allocation55_spill] sm:$0xff] }
 0x449   :  { %6557 = vmatmul.msk.f32.gmra.mxu0 %vm181_vm1, %v169_v51  ;;  %v1424_v51 = vmul.f32 %v12972_v7, %v12972_v7  ;;  %v1188_v5 = vadd.f32 %v1187_v17, %v1186_v0  ;;  %v1425_v20 = vmul.f32 %v12973_v63, %v12973_v63  ;;  %6564 = vmatmul.msk.f32.gmra.mxu2 %vm181_vm1, %v176_v9  ;;  %v12974_v0 = vld [vmem:[#allocation56_spill] sm:$0xff]  ;;  %v12975_v9 = vld [vmem:[#allocation57_spill] sm:$0xff] }
 0x44a   :  { %v1624_v26 = vadd.f32 %v1623_v13, %v1622_v59  ;;  %v1193_v59 = vsel %vm1067_vm2, %v12973_v63, 0.0  ;;  %v1426_v1 = vmul.f32 %v12974_v0, %v12974_v0  ;;  %v1195_v31 = vsel %vm1067_vm2, %v12974_v0, 0.0  ;;  %v12976_v63 = vld [vmem:[#allocation58_spill] sm:$0xff] }
 0x44b   :  { %v1190_v13 = vadd.f32 %v1189_v23, %v1188_v5  ;;  %v1629_v27 = vsel %vm1067_vm2, %v1424_v51, 0.0  ;;  %v1631_v7 = vsel %vm1067_vm2, %v1425_v20, 0.0  ;;  %v1197_v5 = vsel %vm1067_vm2, %v12975_v9, 0.0  ;;  %v171_v20 = vld [vmem:[%s12478_s0 + $0x450] sm:$0xff] }
 0x44c   :  { %v1626_v17 = vadd.f32 %v1625_v11, %v1624_v26  ;;  %v1427_v11 = vmul.f32 %v12975_v9, %v12975_v9  ;;  %v1633_v26 = vsel %vm1067_vm2, %v1426_v1, 0.0  ;;  %v12978_v1 = vld [vmem:[#allocation59_spill] sm:$0xff] }
 0x44d   :  { %v1192_v45 = vadd.f32 %v1191_v8, %v1190_v13 }
 0x44e   :  { %v8267_v57 = vpop.f32.mrf.mxu0  ;;  %v1628_v35 = vadd.f32 %v1627_v61, %v1626_v17  ;;  %v1635_v13 = vsel %vm1067_vm2, %v1427_v11, 0.0 }
 0x44f   :  { %v1194_v51 = vadd.f32 %v1193_v59, %v1192_v45  ;;  %v1199_v45 = vsel %vm1067_vm2, %v12976_v63, 0.0 }
 0x450   :  { %v1630_v23 = vadd.f32 %v1629_v27, %v1628_v35  ;;  %v1429_v27 = vmul.f32 %v12978_v1, %v12978_v1 }
 0x451   :  { %6558 = vmatmul.msk.f32.gmra.mxu0 %vm181_vm1, %v170_v29  ;;  %v1428_v29 = vmul.f32 %v12976_v63, %v12976_v63  ;;  %v1196_v8 = vadd.f32 %v1195_v31, %v1194_v51  ;;  %v1201_v31 = vsel %vm1067_vm2, %v12978_v1, 0.0  ;;  %v12981_v1 = vld [vmem:[#allocation62_spill] sm:$0xff] }
 0x452   :  { %v1632_v61 = vadd.f32 %v1631_v7, %v1630_v23  ;;  %v12979_v7 = vld [vmem:[#allocation60_spill] sm:$0xff]  ;;  %v1639_v0 = vsel %vm1067_vm2, %v1429_v27, 0.0  ;;  %v172_v27 = vld [vmem:[%s12478_s0 + $0x458] sm:$0xff] }
 0x453   :  { %v1198_v35 = vadd.f32 %v1197_v5, %v1196_v8  ;;  %v1637_v9 = vsel %vm1067_vm2, %v1428_v29, 0.0  ;;  %v1430_v23 = vmul.f32 %v12979_v7, %v12979_v7  ;;  %v1203_v63 = vsel %vm1067_vm2, %v12979_v7, 0.0 }
 0x454   :  { %v1634_v59 = vadd.f32 %v1633_v26, %v1632_v61  ;;  %v1431_v26 = vmul.f32 %v12980_v53, %v12980_v53  ;;  %v1205_v8 = vsel %vm1067_vm2, %v12980_v53, 0.0 }
 0x455   :  { %v1200_v11 = vadd.f32 %v1199_v45, %v1198_v35  ;;  %v1641_v61 = vsel %vm1067_vm2, %v1430_v23, 0.0 }
 0x456   :  { %v8297_v17 = vpop.f32.mrf.mxu0  ;;  %v1636_v51 = vadd.f32 %v1635_v13, %v1634_v59  ;;  %v1643_v35 = vsel %vm1067_vm2, %v1431_v26, 0.0 }
 0x457   :  { %12977 = vst [vmem:[#allocation106_spill] sm:$0xff] %v8297_v17  ;;  %v1202_v29 = vadd.f32 %v1201_v31, %v1200_v11  ;;  %v12983_v31 = vld [vmem:[#allocation63_spill] sm:$0xff] }
 0x458   :  { %v1638_v5 = vadd.f32 %v1637_v9, %v1636_v51  ;;  %v1207_v9 = vsel %vm1067_vm2, %v12981_v1, 0.0  ;;  %v1433_v23 = vmul.f32 %v12983_v31, %v12983_v31 }
 0x459   :  { %6559 = vmatmul.msk.f32.gmra.mxu0 %vm181_vm1, %v171_v20  ;;  %v1432_v20 = vmul.f32 %v12981_v1, %v12981_v1  ;;  %v1204_v45 = vadd.f32 %v1203_v63, %v1202_v29  ;;  %v1209_v63 = vsel %vm1067_vm2, %v12983_v31, 0.0  ;;  %v12986_v31 = vld [vmem:[#allocation66_spill] sm:$0xff] }
 0x45a   :  { %v1640_v13 = vadd.f32 %v1639_v0, %v1638_v5  ;;  %v12984_v0 = vld [vmem:[#allocation64_spill] sm:$0xff]  ;;  %v1647_v7 = vsel %vm1067_vm2, %v1433_v23, 0.0  ;;  %v173_v23 = vld [vmem:[%s12478_s0 + $0x460] sm:$0xff] }
 0x45b   :  { %v1206_v11 = vadd.f32 %v1205_v8, %v1204_v45  ;;  %v1645_v53 = vsel %vm1067_vm2, %v1432_v20, 0.0  ;;  %v1434_v5 = vmul.f32 %v12984_v0, %v12984_v0  ;;  %v1211_v1 = vsel %vm1067_vm2, %v12984_v0, 0.0 }
 0x45c   :  { %v1642_v51 = vadd.f32 %v1641_v61, %v1640_v13  ;;  %v1435_v61 = vmul.f32 %v12985_v49, %v12985_v49  ;;  %v1213_v45 = vsel %vm1067_vm2, %v12985_v49, 0.0 }
 0x45d   :  { %v1208_v26 = vadd.f32 %v1207_v9, %v1206_v11  ;;  %v1649_v13 = vsel %vm1067_vm2, %v1434_v5, 0.0 }
 0x45e   :  { %v8323_v59 = vpop.f32.mrf.mxu0  ;;  %v1644_v29 = vadd.f32 %v1643_v35, %v1642_v51  ;;  %v1651_v11 = vsel %vm1067_vm2, %v1435_v61, 0.0 }
 0x45f   :  { %12982 = vst [vmem:[#allocation107_spill] sm:$0xff] %v8323_v59  ;;  %v1210_v20 = vadd.f32 %v1209_v63, %v1208_v26  ;;  %v12988_v63 = vld [vmem:[#allocation67_spill] sm:$0xff] }
 0x460   :  { %v1646_v8 = vadd.f32 %v1645_v53, %v1644_v29  ;;  %v1215_v53 = vsel %vm1067_vm2, %v12986_v31, 0.0  ;;  %v1437_v5 = vmul.f32 %v12988_v63, %v12988_v63 }
 0x461   :  { %6560 = vmatmul.msk.f32.gmra.mxu0 %vm181_vm1, %v172_v27  ;;  %v1436_v27 = vmul.f32 %v12986_v31, %v12986_v31  ;;  %v1212_v9 = vadd.f32 %v1211_v1, %v1210_v20  ;;  %v1217_v1 = vsel %vm1067_vm2, %v12988_v63, 0.0  ;;  %v12991_v63 = vld [vmem:[#allocation70_spill] sm:$0xff] }
 0x462   :  { %v1648_v35 = vadd.f32 %v1647_v7, %v1646_v8  ;;  %v12989_v7 = vld [vmem:[#allocation68_spill] sm:$0xff]  ;;  %v1655_v0 = vsel %vm1067_vm2, %v1437_v5, 0.0 }
 0x463   :  { %v1214_v26 = vadd.f32 %v1213_v45, %v1212_v9  ;;  %v1653_v49 = vsel %vm1067_vm2, %v1436_v27, 0.0  ;;  %v1438_v8 = vmul.f32 %v12989_v7, %v12989_v7  ;;  %v1219_v31 = vsel %vm1067_vm2, %v12989_v7, 0.0  ;;  %v174_v5 = vld [vmem:[%s12478_s0 + $0x468] sm:$0xff] }
 0x464   :  { %v1650_v29 = vadd.f32 %v1649_v13, %v1648_v35  ;;  %v1439_v13 = vmul.f32 %v12990_v41, %v12990_v41  ;;  %v1221_v9 = vsel %vm1067_vm2, %v12990_v41, 0.0 }
 0x465   :  { %v1216_v61 = vadd.f32 %v1215_v53, %v1214_v26  ;;  %v1657_v35 = vsel %vm1067_vm2, %v1438_v8, 0.0 }
 0x466   :  { %v8349_v51 = vpop.f32.mrf.mxu0  ;;  %v1652_v20 = vadd.f32 %v1651_v11, %v1650_v29  ;;  %v1659_v26 = vsel %vm1067_vm2, %v1439_v13, 0.0 }
 0x467   :  { %12987 = vst [vmem:[#allocation108_spill] sm:$0xff] %v8349_v51  ;;  %v1218_v27 = vadd.f32 %v1217_v1, %v1216_v61  ;;  %v12993_v1 = vld [vmem:[#allocation71_spill] sm:$0xff] }
 0x468   :  { %v1654_v45 = vadd.f32 %v1653_v49, %v1652_v20  ;;  %v1223_v49 = vsel %vm1067_vm2, %v12991_v63, 0.0  ;;  %v1441_v8 = vmul.f32 %v12993_v1, %v12993_v1 }
 0x469   :  { %6561 = vmatmul.msk.f32.gmra.mxu0 %vm181_vm1, %v173_v23  ;;  %v1440_v23 = vmul.f32 %v12991_v63, %v12991_v63  ;;  %v1220_v53 = vadd.f32 %v1219_v31, %v1218_v27  ;;  %v1225_v31 = vsel %vm1067_vm2, %v12993_v1, 0.0  ;;  %v12996_v1 = vld [vmem:[#allocation74_spill] sm:$0xff] }
 0x46a   :  { %v1656_v11 = vadd.f32 %v1655_v0, %v1654_v45  ;;  %v12994_v0 = vld [vmem:[#allocation72_spill] sm:$0xff]  ;;  %v1663_v7 = vsel %vm1067_vm2, %v1441_v8, 0.0 }
 0x46b   :  { %v1222_v61 = vadd.f32 %v1221_v9, %v1220_v53  ;;  %v1661_v41 = vsel %vm1067_vm2, %v1440_v23, 0.0  ;;  %v1442_v45 = vmul.f32 %v12994_v0, %v12994_v0  ;;  %v1227_v63 = vsel %vm1067_vm2, %v12994_v0, 0.0  ;;  %v12998_v0 = vld [vmem:[#allocation75_spill] sm:$0xff] }
 0x46c   :  { %v1658_v20 = vadd.f32 %v1657_v35, %v1656_v11  ;;  %v1443_v35 = vmul.f32 %v12995_v37, %v12995_v37  ;;  %v1229_v53 = vsel %vm1067_vm2, %v12995_v37, 0.0  ;;  %v12999_v37 = vld [vmem:[#allocation76_spill] sm:$0xff] }
 0x46d   :  { %v1224_v13 = vadd.f32 %v1223_v49, %v1222_v61  ;;  %v1665_v11 = vsel %vm1067_vm2, %v1442_v45, 0.0  ;;  %v1231_v61 = vsel %vm1067_vm2, %v12996_v1, 0.0 }
 0x46e   :  { %v8375_v29 = vpop.f32.mrf.mxu0  ;;  %v1660_v27 = vadd.f32 %v1659_v26, %v1658_v20  ;;  %v1667_v8 = vsel %vm1067_vm2, %v1443_v35, 0.0 }
 0x46f   :  { %12992 = vst [vmem:[#allocation109_spill] sm:$0xff] %v8375_v29  ;;  %v1226_v23 = vadd.f32 %v1225_v31, %v1224_v13  ;;  %v1233_v13 = vsel %vm1067_vm2, %v12998_v0, 0.0 }
 0x470   :  { %v1662_v9 = vadd.f32 %v1661_v41, %v1660_v27  ;;  %v1445_v41 = vmul.f32 %v12998_v0, %v12998_v0 }
 0x471   :  { %6562 = vmatmul.msk.f32.gmra.mxu0 %vm181_vm1, %v174_v5  ;;  %v1444_v5 = vmul.f32 %v12996_v1, %v12996_v1  ;;  %v1228_v49 = vadd.f32 %v1227_v63, %v1226_v23  ;;  %v1446_v63 = vmul.f32 %v12999_v37, %v12999_v37  ;;  %v1235_v23 = vsel %vm1067_vm2, %v12999_v37, 0.0  ;;  %v13000_v1 = vld [vmem:[#allocation77_spill] sm:$0xff]  ;;  %v13003_v37 = vld [vmem:[#allocation79_spill] sm:$0xff] }
 0x472   :  { %v1664_v26 = vadd.f32 %v1663_v7, %v1662_v9  ;;  %v1671_v35 = vsel %vm1067_vm2, %v1445_v41, 0.0  ;;  %v1447_v33 = vmul.f32 %v13000_v1, %v13000_v1 }
 0x473   :  { %v1230_v45 = vadd.f32 %v1229_v53, %v1228_v49  ;;  %v1669_v27 = vsel %vm1067_vm2, %v1444_v5, 0.0  ;;  %v1673_v5 = vsel %vm1067_vm2, %v1446_v63, 0.0  ;;  %v13001_v49 = vld [vmem:[#allocation78_spill] sm:$0xff] }
 0x474   :  { %v1666_v31 = vadd.f32 %v1665_v11, %v1664_v26  ;;  %v1237_v26 = vsel %vm1067_vm2, %v13000_v1, 0.0  ;;  %v1448_v0 = vmul.f32 %v13001_v49, %v13001_v49  ;;  %v1675_v41 = vsel %vm1067_vm2, %v1447_v33, 0.0  ;;  %v13004_v1 = vld [vmem:[#allocation80_spill] sm:$0xff] }
 0x475   :  { %v1232_v9 = vadd.f32 %v1231_v61, %v1230_v45  ;;  %v1239_v45 = vsel %vm1067_vm2, %v13001_v49, 0.0  ;;  %v13005_v49 = vld [vmem:[#allocation81_spill] sm:$0xff] }
 0x476   :  { %v8401_v20 = vpop.f32.mrf.mxu0  ;;  %v1668_v7 = vadd.f32 %v1667_v8, %v1666_v31  ;;  %v1451_v25 = vmul.f32 %v13005_v49, %v13005_v49 }
 0x477   :  { %12997 = vst [vmem:[#allocation110_spill] sm:$0xff] %v8401_v20  ;;  %v1234_v53 = vadd.f32 %v1233_v13, %v1232_v9  ;;  %v1241_v9 = vsel %vm1067_vm2, %v13003_v37, 0.0 }
 0x478   :  { %v1670_v11 = vadd.f32 %v1669_v27, %v1668_v7  ;;  %v1449_v27 = vmul.f32 %v13003_v37, %v13003_v37  ;;  %v1677_v7 = vsel %vm1067_vm2, %v1448_v0, 0.0 }
 0x479   :  { %v1236_v61 = vadd.f32 %v1235_v23, %v1234_v53  ;;  %v1243_v53 = vsel %vm1067_vm2, %v13004_v1, 0.0 }
 0x47a   :  { %v1672_v8 = vadd.f32 %v1671_v35, %v1670_v11  ;;  %v1450_v35 = vmul.f32 %v13004_v1, %v13004_v1  ;;  %v1679_v33 = vsel %vm1067_vm2, %v1449_v27, 0.0  ;;  %v1683_v27 = vsel %vm1067_vm2, %v1451_v25, 0.0  ;;  %v13007_v1 = vld [vmem:[#allocation83_spill] sm:$0xff] }
 0x47b   :  { %v1238_v63 = vadd.f32 %v1237_v26, %v1236_v61  ;;  %v13006_v61 = vld [vmem:[#allocation82_spill] sm:$0xff] }
 0x47c   :  { %v1674_v13 = vadd.f32 %v1673_v5, %v1672_v8  ;;  %v1681_v0 = vsel %vm1067_vm2, %v1450_v35, 0.0  ;;  %v1245_v8 = vsel %vm1067_vm2, %v13005_v49, 0.0  ;;  %v1452_v37 = vmul.f32 %v13006_v61, %v13006_v61  ;;  %v13008_v49 = vld [vmem:[#allocation84_spill] sm:$0xff] }
 0x47d   :  { %v1240_v11 = vadd.f32 %v1239_v45, %v1238_v63  ;;  %v1247_v63 = vsel %vm1067_vm2, %v13006_v61, 0.0  ;;  %v13009_v61 = vld [vmem:[#allocation85_spill] sm:$0xff] }
 0x47e   :  { %v8423_v31 = vpop.f32.mrf.mxu0  ;;  %v1676_v23 = vadd.f32 %v1675_v41, %v1674_v13  ;;  %v1455_v21 = vmul.f32 %v13009_v61, %v13009_v61 }
 0x47f   :  { %13002 = vst [vmem:[#allocation111_spill] sm:$0xff] %v8423_v31  ;;  %v1242_v26 = vadd.f32 %v1241_v9, %v1240_v11  ;;  %v1249_v11 = vsel %vm1067_vm2, %v13007_v1, 0.0 }
 0x480   :  { %v1678_v5 = vadd.f32 %v1677_v7, %v1676_v23  ;;  %v1453_v7 = vmul.f32 %v13007_v1, %v13007_v1  ;;  %v1685_v23 = vsel %vm1067_vm2, %v1452_v37, 0.0 }
 0x481   :  { %v1244_v45 = vadd.f32 %v1243_v53, %v1242_v26  ;;  %v1251_v26 = vsel %vm1067_vm2, %v13008_v49, 0.0 }
 0x482   :  { %v1680_v41 = vadd.f32 %v1679_v33, %v1678_v5  ;;  %v1454_v33 = vmul.f32 %v13008_v49, %v13008_v49  ;;  %v1687_v25 = vsel %vm1067_vm2, %v1453_v7, 0.0  ;;  %v1691_v7 = vsel %vm1067_vm2, %v1455_v21, 0.0  ;;  %v13012_v49 = vld [vmem:[#allocation87_spill] sm:$0xff] }
 0x483   :  { %v1246_v35 = vadd.f32 %v1245_v8, %v1244_v45  ;;  %v13010_v45 = vld [vmem:[#allocation86_spill] sm:$0xff] }
 0x484   :  { %v1682_v9 = vadd.f32 %v1681_v0, %v1680_v41  ;;  %v1689_v37 = vsel %vm1067_vm2, %v1454_v33, 0.0  ;;  %v1253_v41 = vsel %vm1067_vm2, %v13009_v61, 0.0  ;;  %v1456_v1 = vmul.f32 %v13010_v45, %v13010_v45  ;;  %v13013_v61 = vld [vmem:[#allocation88_spill] sm:$0xff] }
 0x485   :  { %v1248_v5 = vadd.f32 %v1247_v63, %v1246_v35  ;;  %v1255_v35 = vsel %vm1067_vm2, %v13010_v45, 0.0  ;;  %v13014_v45 = vld [vmem:[#allocation89_spill] sm:$0xff] }
 0x486   :  { %v8445_v13 = vpop.f32.mrf.mxu0  ;;  %v1684_v53 = vadd.f32 %v1683_v27, %v1682_v9  ;;  %v1459_v18 = vmul.f32 %v13014_v45, %v13014_v45 }
 0x487   :  { %v1250_v8 = vadd.f32 %v1249_v11, %v1248_v5  ;;  %v1257_v5 = vsel %vm1067_vm2, %v13012_v49, 0.0 }
 0x488   :  { %v1686_v0 = vadd.f32 %v1685_v23, %v1684_v53  ;;  %v1457_v23 = vmul.f32 %v13012_v49, %v13012_v49  ;;  %v1693_v53 = vsel %vm1067_vm2, %v1456_v1, 0.0 }
 0x489   :  { %v1252_v63 = vadd.f32 %v1251_v26, %v1250_v8  ;;  %v1259_v8 = vsel %vm1067_vm2, %v13013_v61, 0.0 }
 0x48a   :  { %v1688_v27 = vadd.f32 %v1687_v25, %v1686_v0  ;;  %v1458_v25 = vmul.f32 %v13013_v61, %v13013_v61  ;;  %v1695_v21 = vsel %vm1067_vm2, %v1457_v23, 0.0  ;;  %v1699_v23 = vsel %vm1067_vm2, %v1459_v18, 0.0  ;;  %v13017_v61 = vld [vmem:[#allocation91_spill] sm:$0xff] }
 0x48b   :  { %v1254_v33 = vadd.f32 %v1253_v41, %v1252_v63  ;;  %v13015_v63 = vld [vmem:[#allocation90_spill] sm:$0xff] }
 0x48c   :  { %v1690_v11 = vadd.f32 %v1689_v37, %v1688_v27  ;;  %v1697_v1 = vsel %vm1067_vm2, %v1458_v25, 0.0  ;;  %v1261_v27 = vsel %vm1067_vm2, %v13014_v45, 0.0  ;;  %v1460_v49 = vmul.f32 %v13015_v63, %v13015_v63  ;;  %v13018_v45 = vld [vmem:[#allocation92_spill] sm:$0xff] }
 0x48d   :  { %v1256_v0 = vadd.f32 %v1255_v35, %v1254_v33  ;;  %v1263_v33 = vsel %vm1067_vm2, %v13015_v63, 0.0  ;;  %v13019_v63 = vld [vmem:[#allocation93_spill] sm:$0xff] }
 0x48e   :  { %v8467_v9 = vpop.f32.mrf.mxu0  ;;  %v1692_v26 = vadd.f32 %v1691_v7, %v1690_v11  ;;  %v1463_v14 = vmul.f32 %v13019_v63, %v13019_v63 }
 0x48f   :  { %13011 = vst [vmem:[#allocation112_spill] sm:$0xff] %v8467_v9  ;;  %v1258_v41 = vadd.f32 %v1257_v5, %v1256_v0  ;;  %v1265_v0 = vsel %vm1067_vm2, %v13017_v61, 0.0 }
 0x490   :  { %v1694_v37 = vadd.f32 %v1693_v53, %v1692_v26  ;;  %v1461_v53 = vmul.f32 %v13017_v61, %v13017_v61  ;;  %v1701_v26 = vsel %vm1067_vm2, %v1460_v49, 0.0 }
 0x491   :  { %v1260_v35 = vadd.f32 %v1259_v8, %v1258_v41  ;;  %v1267_v41 = vsel %vm1067_vm2, %v13018_v45, 0.0 }
 0x492   :  { %v1696_v7 = vadd.f32 %v1695_v21, %v1694_v37  ;;  %v1462_v21 = vmul.f32 %v13018_v45, %v13018_v45  ;;  %v1703_v18 = vsel %vm1067_vm2, %v1461_v53, 0.0  ;;  %v1707_v53 = vsel %vm1067_vm2, %v1463_v14, 0.0  ;;  %v13022_v45 = vld [vmem:[#allocation95_spill] sm:$0xff] }
 0x493   :  { %v1262_v25 = vadd.f32 %v1261_v27, %v1260_v35  ;;  %v13020_v35 = vld [vmem:[#allocation94_spill] sm:$0xff] }
 0x494   :  { %v1698_v5 = vadd.f32 %v1697_v1, %v1696_v7  ;;  %v1705_v49 = vsel %vm1067_vm2, %v1462_v21, 0.0  ;;  %v1269_v7 = vsel %vm1067_vm2, %v13019_v63, 0.0  ;;  %v1464_v61 = vmul.f32 %v13020_v35, %v13020_v35  ;;  %v13023_v63 = vld [vmem:[#allocation96_spill] sm:$0xff] }
 0x495   :  { %v1264_v37 = vadd.f32 %v1263_v33, %v1262_v25  ;;  %v1271_v25 = vsel %vm1067_vm2, %v13020_v35, 0.0  ;;  %v13024_v35 = vld [vmem:[#allocation97_spill] sm:$0xff] }
 0x496   :  { %v8489_v11 = vpop.f32.mrf.mxu0  ;;  %v1700_v8 = vadd.f32 %v1699_v23, %v1698_v5  ;;  %v1467_v12 = vmul.f32 %v13024_v35, %v13024_v35 }
 0x497   :  { %13016 = vst [vmem:[#allocation113_spill] sm:$0xff] %v8489_v11  ;;  %v1266_v27 = vadd.f32 %v1265_v0, %v1264_v37  ;;  %v1273_v37 = vsel %vm1067_vm2, %v13022_v45, 0.0 }
 0x498   :  { %v1702_v1 = vadd.f32 %v1701_v26, %v1700_v8  ;;  %v1465_v26 = vmul.f32 %v13022_v45, %v13022_v45  ;;  %v1709_v8 = vsel %vm1067_vm2, %v1464_v61, 0.0 }
 0x499   :  { %v1268_v33 = vadd.f32 %v1267_v41, %v1266_v27  ;;  %v1275_v27 = vsel %vm1067_vm2, %v13023_v63, 0.0 }
 0x49a   :  { %v1704_v23 = vadd.f32 %v1703_v18, %v1702_v1  ;;  %v1466_v18 = vmul.f32 %v13023_v63, %v13023_v63  ;;  %v1711_v14 = vsel %vm1067_vm2, %v1465_v26, 0.0  ;;  %v1715_v26 = vsel %vm1067_vm2, %v1467_v12, 0.0 }
 0x49b   :  { %v1270_v21 = vadd.f32 %v1269_v7, %v1268_v33  ;;  %v13025_v33 = vld [vmem:[#allocation98_spill] sm:$0xff] }
 0x49c   :  { %v1706_v0 = vadd.f32 %v1705_v49, %v1704_v23  ;;  %v1713_v61 = vsel %vm1067_vm2, %v1466_v18, 0.0  ;;  %v1277_v23 = vsel %vm1067_vm2, %v13024_v35, 0.0  ;;  %v1468_v45 = vmul.f32 %v13025_v33, %v13025_v33 }
 0x49d   :  { %v1272_v1 = vadd.f32 %v1271_v25, %v1270_v21  ;;  %v1279_v21 = vsel %vm1067_vm2, %v13025_v33, 0.0  ;;  %v1471_v33 = vmul.f32 %v7951_v39, %v7951_v39 }
 0x49e   :  { %v8511_v5 = vpop.f32.mrf.mxu0  ;;  %v1708_v41 = vadd.f32 %v1707_v53, %v1706_v0 }
 0x49f   :  { %13021 = vst [vmem:[#allocation114_spill] sm:$0xff] %v8511_v5  ;;  %v1274_v7 = vadd.f32 %v1273_v37, %v1272_v1  ;;  %v1281_v1 = vsel %vm1067_vm2, %v7899_v15, 0.0 }
 0x4a0   :  { %v1710_v49 = vadd.f32 %v1709_v8, %v1708_v41  ;;  %v1469_v8 = vmul.f32 %v7899_v15, %v7899_v15  ;;  %v1717_v41 = vsel %vm1067_vm2, %v1468_v45, 0.0 }
 0x4a1   :  { %v1276_v25 = vadd.f32 %v1275_v27, %v1274_v7  ;;  %v1283_v7 = vsel %vm1067_vm2, %v7925_v55, 0.0 }
 0x4a2   :  { %v1712_v53 = vadd.f32 %v1711_v14, %v1710_v49  ;;  %v1470_v14 = vmul.f32 %v7925_v55, %v7925_v55  ;;  %v1719_v12 = vsel %vm1067_vm2, %v1469_v8, 0.0  ;;  %v1723_v8 = vsel %vm1067_vm2, %v1471_v33, 0.0 }
 0x4a3   :  { %v1278_v18 = vadd.f32 %v1277_v23, %v1276_v25  ;;  %v1472_v25 = vmul.f32 %v7977_v19, %v7977_v19 }
 0x4a4   :  { %v1714_v37 = vadd.f32 %v1713_v61, %v1712_v53  ;;  %v1721_v45 = vsel %vm1067_vm2, %v1470_v14, 0.0  ;;  %v1285_v53 = vsel %vm1067_vm2, %v7951_v39, 0.0 }
 0x4a5   :  { %v1280_v49 = vadd.f32 %v1279_v21, %v1278_v18  ;;  %v1287_v18 = vsel %vm1067_vm2, %v7977_v19, 0.0  ;;  %v1475_v19 = vmul.f32 %v8055_v47, %v8055_v47 }
 0x4a6   :  { %v8533_v0 = vpop.f32.mrf.mxu0  ;;  %v1716_v27 = vadd.f32 %v1715_v26, %v1714_v37 }
 0x4a7   :  { %13026 = vst [vmem:[#allocation96_spill] sm:$0xff] %v8533_v0  ;;  %v1282_v23 = vadd.f32 %v1281_v1, %v1280_v49  ;;  %v1289_v49 = vsel %vm1067_vm2, %v8003_v43, 0.0 }
 0x4a8   :  { %v1718_v61 = vadd.f32 %v1717_v41, %v1716_v27  ;;  %v1473_v41 = vmul.f32 %v8003_v43, %v8003_v43  ;;  %v1725_v27 = vsel %vm1067_vm2, %v1472_v25, 0.0 }
 0x4a9   :  { %v1284_v21 = vadd.f32 %v1283_v7, %v1282_v23  ;;  %v1291_v23 = vsel %vm1067_vm2, %v8029_v22, 0.0 }
 0x4aa   :  { %v1720_v26 = vadd.f32 %v1719_v12, %v1718_v61  ;;  %v1474_v12 = vmul.f32 %v8029_v22, %v8029_v22  ;;  %v1727_v33 = vsel %vm1067_vm2, %v1473_v41, 0.0  ;;  %v1731_v41 = vsel %vm1067_vm2, %v1475_v19, 0.0 }
 0x4ab   :  { %v1286_v14 = vadd.f32 %v1285_v53, %v1284_v21  ;;  %v1476_v21 = vmul.f32 %v8081_v24, %v8081_v24 }
 0x4ac   :  { %v1722_v1 = vadd.f32 %v1721_v45, %v1720_v26  ;;  %v1729_v25 = vsel %vm1067_vm2, %v1474_v12, 0.0  ;;  %v1293_v26 = vsel %vm1067_vm2, %v8055_v47, 0.0 }
 0x4ad   :  { %v1288_v61 = vadd.f32 %v1287_v18, %v1286_v14  ;;  %v1295_v14 = vsel %vm1067_vm2, %v8081_v24, 0.0  ;;  %v1479_v24 = vmul.f32 %v8159_v48, %v8159_v48 }
 0x4ae   :  { %v8555_v37 = vpop.f32.mrf.mxu0  ;;  %v1724_v7 = vadd.f32 %v1723_v8, %v1722_v1 }
 0x4af   :  { %13027 = vst [vmem:[#allocation97_spill] sm:$0xff] %v8555_v37  ;;  %v1290_v53 = vadd.f32 %v1289_v49, %v1288_v61  ;;  %v1297_v61 = vsel %vm1067_vm2, %v8107_v32, 0.0 }
 0x4b0   :  { %v1726_v45 = vadd.f32 %v1725_v27, %v1724_v7  ;;  %v1477_v27 = vmul.f32 %v8107_v32, %v8107_v32  ;;  %v1733_v7 = vsel %vm1067_vm2, %v1476_v21, 0.0 }
 0x4b1   :  { %v1292_v18 = vadd.f32 %v1291_v23, %v1290_v53  ;;  %v1299_v53 = vsel %vm1067_vm2, %v8133_v40, 0.0 }
 0x4b2   :  { %v1728_v8 = vadd.f32 %v1727_v33, %v1726_v45  ;;  %v1478_v33 = vmul.f32 %v8133_v40, %v8133_v40  ;;  %v1735_v19 = vsel %vm1067_vm2, %v1477_v27, 0.0  ;;  %v1739_v27 = vsel %vm1067_vm2, %v1479_v24, 0.0 }
 0x4b3   :  { %v1294_v12 = vadd.f32 %v1293_v26, %v1292_v18  ;;  %v1480_v18 = vmul.f32 %v8185_v56, %v8185_v56 }
 0x4b4   :  { %v1730_v49 = vadd.f32 %v1729_v25, %v1728_v8  ;;  %v1737_v21 = vsel %vm1067_vm2, %v1478_v33, 0.0  ;;  %v1301_v8 = vsel %vm1067_vm2, %v8159_v48, 0.0 }
 0x4b5   :  { %v1296_v45 = vadd.f32 %v1295_v14, %v1294_v12  ;;  %v1303_v12 = vsel %vm1067_vm2, %v8185_v56, 0.0  ;;  %v1483_v56 = vmul.f32 %v8267_v57, %v8267_v57 }
 0x4b6   :  { %v8577_v1 = vpop.f32.mrf.mxu0  ;;  %v1732_v23 = vadd.f32 %v1731_v41, %v1730_v49 }
 0x4b7   :  { %13028 = vst [vmem:[#allocation115_spill] sm:$0xff] %v8577_v1  ;;  %v1298_v26 = vadd.f32 %v1297_v61, %v1296_v45  ;;  %v1305_v45 = vsel %vm1067_vm2, %v8211_v3, 0.0 }
 0x4b8   :  { %v1734_v25 = vadd.f32 %v1733_v7, %v1732_v23  ;;  %v1481_v7 = vmul.f32 %v8211_v3, %v8211_v3  ;;  %v1741_v23 = vsel %vm1067_vm2, %v1480_v18, 0.0 }
 0x4b9   :  { %v1300_v14 = vadd.f32 %v1299_v53, %v1298_v26  ;;  %v1307_v26 = vsel %vm1067_vm2, %v8237_v16, 0.0 }
 0x4ba   :  { %v1736_v41 = vadd.f32 %v1735_v19, %v1734_v25  ;;  %v1482_v19 = vmul.f32 %v8237_v16, %v8237_v16  ;;  %v1743_v24 = vsel %vm1067_vm2, %v1481_v7, 0.0  ;;  %v1747_v7 = vsel %vm1067_vm2, %v1483_v56, 0.0 }
 0x4bb   :  { %v1302_v33 = vadd.f32 %v1301_v8, %v1300_v14  ;;  %v1484_v14 = vmul.f32 %v8297_v17, %v8297_v17 }
 0x4bc   :  { %v1738_v61 = vadd.f32 %v1737_v21, %v1736_v41  ;;  %v1745_v18 = vsel %vm1067_vm2, %v1482_v19, 0.0  ;;  %v1309_v41 = vsel %vm1067_vm2, %v8267_v57, 0.0 }
 0x4bd   :  { %v1304_v53 = vadd.f32 %v1303_v12, %v1302_v33  ;;  %v1311_v33 = vsel %vm1067_vm2, %v8297_v17, 0.0  ;;  %v1487_v17 = vmul.f32 %v8375_v29, %v8375_v29 }
 0x4be   :  { %v8599_v49 = vpop.f32.mrf.mxu0  ;;  %v1740_v25 = vadd.f32 %v1739_v27, %v1738_v61 }
 0x4bf   :  { %13029 = vst [vmem:[#allocation116_spill] sm:$0xff] %v8599_v49  ;;  %v1306_v8 = vadd.f32 %v1305_v45, %v1304_v53  ;;  %v1749_v53 = vsel %vm1067_vm2, %v1484_v14, 0.0 }
 0x4c0   :  { %v1742_v21 = vadd.f32 %v1741_v23, %v1740_v25  ;;  %v1485_v23 = vmul.f32 %v8323_v59, %v8323_v59  ;;  %v1313_v25 = vsel %vm1067_vm2, %v8323_v59, 0.0 }
 0x4c1   :  { %v1308_v27 = vadd.f32 %v1307_v26, %v1306_v8  ;;  %v1315_v8 = vsel %vm1067_vm2, %v8349_v51, 0.0 }
 0x4c2   :  { %v1744_v12 = vadd.f32 %v1743_v24, %v1742_v21  ;;  %v1486_v24 = vmul.f32 %v8349_v51, %v8349_v51  ;;  %v1751_v56 = vsel %vm1067_vm2, %v1485_v23, 0.0  ;;  %v1755_v23 = vsel %vm1067_vm2, %v1487_v17, 0.0 }
 0x4c3   :  { %v1310_v19 = vadd.f32 %v1309_v41, %v1308_v27  ;;  %v1488_v27 = vmul.f32 %v8401_v20, %v8401_v20 }
 0x4c4   :  { %v1746_v45 = vadd.f32 %v1745_v18, %v1744_v12  ;;  %v1753_v14 = vsel %vm1067_vm2, %v1486_v24, 0.0  ;;  %v1317_v12 = vsel %vm1067_vm2, %v8375_v29, 0.0 }
 0x4c5   :  { %v1312_v21 = vadd.f32 %v1311_v33, %v1310_v19  ;;  %v1319_v19 = vsel %vm1067_vm2, %v8401_v20, 0.0  ;;  %v1491_v20 = vmul.f32 %v8467_v9, %v8467_v9 }
 0x4c6   :  { %v8621_v61 = vpop.f32.mrf.mxu0  ;;  %v1748_v26 = vadd.f32 %v1747_v7, %v1746_v45 }
 0x4c7   :  { %13030 = vst [vmem:[#allocation117_spill] sm:$0xff] %v8621_v61  ;;  %v1314_v41 = vadd.f32 %v1313_v25, %v1312_v21  ;;  %v1321_v21 = vsel %vm1067_vm2, %v8423_v31, 0.0 }
 0x4c8   :  { %v1750_v18 = vadd.f32 %v1749_v53, %v1748_v26  ;;  %v1489_v53 = vmul.f32 %v8423_v31, %v8423_v31  ;;  %v1757_v26 = vsel %vm1067_vm2, %v1488_v27, 0.0  ;;  %v13185_v31 = vld [vmem:[#allocation28_spill] sm:$0xff] }
 0x4c9   :  { %v1316_v33 = vadd.f32 %v1315_v8, %v1314_v41  ;;  %v1323_v41 = vsel %vm1067_vm2, %v8445_v13, 0.0 }
 0x4ca   :  { %v1752_v7 = vadd.f32 %v1751_v56, %v1750_v18  ;;  %v1490_v56 = vmul.f32 %v8445_v13, %v8445_v13  ;;  %v1759_v17 = vsel %vm1067_vm2, %v1489_v53, 0.0  ;;  %v1763_v53 = vsel %vm1067_vm2, %v1491_v20, 0.0 }
 0x4cb   :  { %v1318_v24 = vadd.f32 %v1317_v12, %v1316_v33  ;;  %v1492_v33 = vmul.f32 %v8489_v11, %v8489_v11 }
 0x4cc   :  { %v1754_v25 = vadd.f32 %v1753_v14, %v1752_v7  ;;  %v1761_v27 = vsel %vm1067_vm2, %v1490_v56, 0.0  ;;  %v1325_v7 = vsel %vm1067_vm2, %v8467_v9, 0.0 }
 0x4cd   :  { %v1320_v18 = vadd.f32 %v1319_v19, %v1318_v24  ;;  %v1327_v24 = vsel %vm1067_vm2, %v8489_v11, 0.0  ;;  %v1495_v11 = vmul.f32 %v8555_v37, %v8555_v37 }
 0x4ce   :  { %v8643_v45 = vpop.f32.mrf.mxu0  ;;  %v1756_v8 = vadd.f32 %v1755_v23, %v1754_v25 }
 0x4cf   :  { %13031 = vst [vmem:[#allocation118_spill] sm:$0xff] %v8643_v45  ;;  %v1322_v12 = vadd.f32 %v1321_v21, %v1320_v18  ;;  %v1329_v18 = vsel %vm1067_vm2, %v8511_v5, 0.0 }
 0x4d0   :  { %v1758_v14 = vadd.f32 %v1757_v26, %v1756_v8  ;;  %v1493_v26 = vmul.f32 %v8511_v5, %v8511_v5  ;;  %v1765_v8 = vsel %vm1067_vm2, %v1492_v33, 0.0 }
 0x4d1   :  { %v1324_v19 = vadd.f32 %v1323_v41, %v1322_v12  ;;  %v1331_v12 = vsel %vm1067_vm2, %v8533_v0, 0.0 }
 0x4d2   :  { %v1760_v23 = vadd.f32 %v1759_v17, %v1758_v14  ;;  %v1494_v17 = vmul.f32 %v8533_v0, %v8533_v0  ;;  %v1767_v20 = vsel %vm1067_vm2, %v1493_v26, 0.0  ;;  %v1771_v26 = vsel %vm1067_vm2, %v1495_v11, 0.0 }
 0x4d3   :  { %v1326_v56 = vadd.f32 %v1325_v7, %v1324_v19  ;;  %v1496_v19 = vmul.f32 %v8577_v1, %v8577_v1 }
 0x4d4   :  { %v1762_v21 = vadd.f32 %v1761_v27, %v1760_v23  ;;  %v1769_v33 = vsel %vm1067_vm2, %v1494_v17, 0.0  ;;  %v1333_v23 = vsel %vm1067_vm2, %v8555_v37, 0.0 }
 0x4d5   :  { %v1328_v14 = vadd.f32 %v1327_v24, %v1326_v56  ;;  %v1335_v56 = vsel %vm1067_vm2, %v8577_v1, 0.0  ;;  %v1339_v1 = vsel %vm1067_vm2, %v8621_v61, 0.0 }
 0x4d6   :  { %v8665_v25 = vpop.f32.mrf.mxu0  ;;  %v1764_v41 = vadd.f32 %v1763_v53, %v1762_v21 }
 0x4d7   :  { %13032 = vst [vmem:[#allocation119_spill] sm:$0xff] %v8665_v25  ;;  %v1330_v7 = vadd.f32 %v1329_v18, %v1328_v14  ;;  %v1337_v14 = vsel %vm1067_vm2, %v8599_v49, 0.0 }
 0x4d8   :  { %v1766_v27 = vadd.f32 %v1765_v8, %v1764_v41  ;;  %v1497_v8 = vmul.f32 %v8599_v49, %v8599_v49  ;;  %v1773_v41 = vsel %vm1067_vm2, %v1496_v19, 0.0 }
 0x4d9   :  { %v1332_v24 = vadd.f32 %v1331_v12, %v1330_v7  ;;  %v8699_v7 = vpop.f32.mrf.mxu2 }
 0x4da   :  { %v1768_v53 = vadd.f32 %v1767_v20, %v1766_v27  ;;  %v1498_v20 = vmul.f32 %v8621_v61, %v8621_v61  ;;  %13034 = vst [vmem:[#allocation121_spill] sm:$0xff] %v8699_v7  ;;  %v1775_v11 = vsel %vm1067_vm2, %v1497_v8, 0.0  ;;  %v1343_v61 = vsel %vm1067_vm2, %v8665_v25, 0.0 }
 0x4db   :  { %v1334_v17 = vadd.f32 %v1333_v23, %v1332_v24  ;;  %v1341_v24 = vsel %vm1067_vm2, %v8643_v45, 0.0 }
 0x4dc   :  { %v1770_v18 = vadd.f32 %v1769_v33, %v1768_v53  ;;  %v1499_v33 = vmul.f32 %v8643_v45, %v8643_v45  ;;  %v1777_v53 = vsel %vm1067_vm2, %v1498_v20, 0.0 }
 0x4dd   :  { %v1336_v27 = vadd.f32 %v1335_v56, %v1334_v17 }
 0x4de   :  { %v8687_v21 = vpop.f32.mrf.mxu0  ;;  %v1772_v12 = vadd.f32 %v1771_v26, %v1770_v18  ;;  %v1500_v26 = vmul.f32 %v8665_v25, %v8665_v25  ;;  %v1779_v8 = vsel %vm1067_vm2, %v1499_v33, 0.0 }
 0x4df   :  { %13033 = vst [vmem:[#allocation120_spill] sm:$0xff] %v8687_v21  ;;  %v1338_v19 = vadd.f32 %v1337_v14, %v1336_v27  ;;  %v1345_v27 = vsel %vm1067_vm2, %v8687_v21, 0.0 }
 0x4e0   :  { %v1774_v23 = vadd.f32 %v1773_v41, %v1772_v12  ;;  %v1501_v41 = vmul.f32 %v8687_v21, %v8687_v21  ;;  %v1781_v12 = vsel %vm1067_vm2, %v1500_v26, 0.0 }
 0x4e1   :  { %v1340_v18 = vadd.f32 %v1339_v1, %v1338_v19  ;;  %v8726_v49 = vpop.f32.mrf.mxu2 }
 0x4e2   :  { %v1776_v56 = vadd.f32 %v1775_v11, %v1774_v23  ;;  %v1783_v33 = vsel %vm1067_vm2, %v1501_v41, 0.0  ;;  %v1505_v41 = vmul.f32 %v8726_v49, %v8726_v49 }
 0x4e3   :  { %v1342_v20 = vadd.f32 %v1341_v24, %v1340_v18  ;;  %v1504_v18 = vmul.f32 %v8699_v7, %v8699_v7 }
 0x4e4   :  { %v1778_v14 = vadd.f32 %v1777_v53, %v1776_v56 }
 0x4e5   :  { %v1344_v23 = vadd.f32 %v1343_v61, %v1342_v20 }
 0x4e6   :  { %v8711_v17 = vpop.f32.mrf.mxu0  ;;  %v1780_v11 = vadd.f32 %v1779_v8, %v1778_v14 }
 0x4e7   :  { %13035 = vst [vmem:[#allocation122_spill] sm:$0xff] %v8711_v17  ;;  %v1502_v1 = vmul.f32 %v8711_v17, %v8711_v17  ;;  %v1347_v19 = vsel %vm1067_vm2, %v8711_v17, 0.0  ;;  %v1346_v45 = vadd.f32 %v1345_v27, %v1344_v23  ;;  %v1791_v23 = vsel %vm1067_vm2, %v1505_v41, 0.0 }
 0x4e8   :  { %v1782_v25 = vadd.f32 %v1781_v12, %v1780_v11  ;;  %v1353_v12 = vsel %vm1067_vm2, %v8726_v49, 0.0  ;;  %v1789_v11 = vsel %vm1067_vm2, %v1504_v18, 0.0 }
 0x4e9   :  { %v1785_v53 = vsel %vm1067_vm2, %v1502_v1, 0.0  ;;  %v1348_v26 = vadd.f32 %v1347_v19, %v1346_v45 }
 0x4ea   :  { %v1784_v24 = vadd.f32 %v1783_v33, %v1782_v25  ;;  %v1351_v25 = vsel %vm1067_vm2, %v8699_v7, 0.0 }
 0x4ec   :  { %v1786_v14 = vadd.f32 %v1785_v53, %v1784_v24 }
 0x4ee   :  { %v8729_v56 = vpop.f32.mrf.mxu0 }
 0x4ef   :  { %13036 = vst [vmem:[#allocation123_spill] sm:$0xff] %v8729_v56  ;;  %v1349_v61 = vsel %vm1067_vm2, %v8729_v56, 0.0  ;;  %v1503_v8 = vmul.f32 %v8729_v56, %v8729_v56 }
 0x4f0   :  { %v1350_v20 = vadd.f32 %v1349_v61, %v1348_v26 }
 0x4f1   :  { %v1787_v45 = vsel %vm1067_vm2, %v1503_v8, 0.0 }
 0x4f2   :  { %v1352_v27 = vadd.f32 %v1351_v25, %v1350_v20  ;;  %v1788_v1 = vadd.f32 %v1787_v45, %v1786_v14 }
 0x4f4   :  { %v1790_v33 = vadd.f32 %v1789_v11, %v1788_v1  ;;  %v1354_v19 = vadd.f32 %v1353_v12, %v1352_v27  ;;  %v13040_v12 = vld [vmem:[#allocation10_spill] sm:$0xff]  ;;  %v13112_v1 = vld [vmem:[#allocation92_spill] sm:$0xff] }
 0x4f6   :  { %v1355_v17 = vrot.slane %v1354_v19, 4  ;;  %v1792_v21 = vadd.f32 %v1791_v23, %v1790_v33  ;;  %v13041_v23 = vld [vmem:[#allocation11_spill] sm:$0xff] }
 0x4f8   :  { %v1356_v53 = vadd.f32 %v1355_v17, %v1354_v19  ;;  %v1793_v24 = vrot.slane %v1792_v21, 4  ;;  %v13109_v19 = vld [vmem:[#allocation89_spill] sm:$0xff] }
 0x4fa   :  { %v1357_v26 = vrot.slane %v1356_v53, 2  ;;  %v1794_v61 = vadd.f32 %v1793_v24, %v1792_v21  ;;  %v13037_v21 = vld [vmem:[#allocation7_spill] sm:$0xff]  ;;  %v13068_v24 = vld [vmem:[#allocation49_spill] sm:$0xff] }
 0x4fc   :  { %v1358_v7 = vadd.f32 %v1357_v26, %v1356_v53  ;;  %v1795_v37 = vrot.slane %v1794_v61, 2  ;;  %v13042_v26 = vld [vmem:[#allocation12_spill] sm:$0xff]  ;;  %v13045_v53 = vld [vmem:[#allocation15_spill] sm:$0xff] }
 0x4fe   :  { %v1359_v8 = vrot.slane %v1358_v7, 1  ;;  %v1796_v0 = vadd.f32 %v1795_v37, %v1794_v61  ;;  %v13069_v61 = vld [vmem:[#allocation50_spill] sm:$0xff] }
 0x500   :  { %v1360_v5 = vadd.f32 %v1359_v8, %v1358_v7  ;;  %v1797_v56 = vrot.slane %v1796_v0, 1  ;;  %v13038_v7 = vld [vmem:[#allocation8_spill] sm:$0xff]  ;;  %v13044_v8 = vld [vmem:[#allocation14_spill] sm:$0xff] }
 0x502   :  { %v8746_v20 = vmul.f32 0.00086805556, %v1360_v5  ;;  %v1798_v14 = vadd.f32 %v1797_v56, %v1796_v0  ;;  %v13039_v0 = vld [vmem:[#allocation9_spill] sm:$0xff]  ;;  %v13075_v56 = vld [vmem:[#allocation56_spill] sm:$0xff]  ;;  %v13114_v5 = vld [vmem:[#allocation94_spill] sm:$0xff] }
 0x504   :  { %v1799_v18 = vmul.f32 0.00086805556, %v1798_v14  ;;  %v1800_v41 = vmul.f32 %v8746_v20, %v8746_v20  ;;  %v13082_v6 = vsub.f32 %v8726_v49, %v8746_v20  ;;  %v13124_v59 = vsub.f32 %v13037_v21, %v8746_v20 }
 0x505   :  { %v13126_v11 = vsub.f32 %v13038_v7, %v8746_v20  ;;  %v13127_v51 = vsub.f32 %v13039_v0, %v8746_v20  ;;  %v13128_v21 = vsub.f32 %v13040_v12, %v8746_v20  ;;  %v13136_v15 = vsub.f32 %v7256_v30, %v8746_v20  ;;  %v13173_v30 = vld [vmem:[#allocation23_spill] sm:$0xff]  ;;  %v13175_v12 = vld [vmem:[#allocation24_spill] sm:$0xff] }
 0x506   :  { %v1801_v25 = vsub.f32 %v1799_v18, %v1800_v41  ;;  %v13043_v41 = vld [vmem:[#allocation13_spill] sm:$0xff]  ;;  %v13140_v9 = vsub.f32 %v13041_v23, %v8746_v20  ;;  %v13143_v7 = vsub.f32 %v7274_v36, %v8746_v20  ;;  %v13144_v23 = vsub.f32 %v7280_v38, %v8746_v20 }
 0x507   :  { %v13113_v18 = vld [vmem:[#allocation93_spill] sm:$0xff]  ;;  %v13147_v36 = vsub.f32 %v7298_v44, %v8746_v20  ;;  %v13148_v38 = vsub.f32 %v7304_v46, %v8746_v20  ;;  %v13151_v44 = vsub.f32 %v7322_v52, %v8746_v20  ;;  %v13152_v46 = vsub.f32 %v7328_v54, %v8746_v20 }
 0x508   :  { %v8750_v45 = vadd.f32 1e-05, %v1801_v25  ;;  %v13120_v25 = vld [vmem:[#allocation106_spill] sm:$0xff] }
 0x50a   :  { %7069 = vrsqrt.f32 %v8750_v45  ;;  %vm1953_vm3 = vweird.f32 %v8750_v45 }
 0x510   :  { %v7070_v33 = vpop.eup %7069 }
 0x511   :  { %v1948_v14 = vmul.f32 %v7070_v33, %v8750_v45  ;;  %vm1954_vm4 = vweird.f32 %v7070_v33  ;;  %v13117_v45 = vld [vmem:[#allocation100_spill] sm:$0xff] }
 0x512   :  { %vm1955_vm5 = vmor %vm1953_vm3, %vm1954_vm4 }
 0x513   :  { %v1949_v4 = vmul.f32 %v7070_v33, %v1948_v14  ;;  %v13119_v14 = vld [vmem:[#allocation104_spill] sm:$0xff] }
 0x515   :  { %v1950_v17 = vmul.f32 0.5, %v1949_v4 }
 0x517   :  { %v1951_v4 = vsub.f32 1.5, %v1950_v17  ;;  %v13083_v17 = vld [vmem:[#allocation63_spill] sm:$0xff] }
 0x519   :  { %v1952_v37 = vmul.f32 %v7070_v33, %v1951_v4  ;;  %v13116_v4 = vld [vmem:[#allocation98_spill] sm:$0xff] }
 0x51b   :  { %v8880_v10 = vsel %vm1955_vm5, %v7070_v33, %v1952_v37  ;;  %v13118_v37 = vld [vmem:[#allocation102_spill] sm:$0xff] }
 0x51c   :  { %v2100_v27 = vmul.f32 %v8880_v10, %v13082_v6  ;;  %v2917_v6 = vld [vmem:[%s12480_s2] sm:$0x3f]  ;;  %v1957_v16 = vmul.f32 %v8880_v10, %v13124_v59  ;;  %v1958_v32 = vmul.f32 %v8880_v10, %v13126_v11  ;;  %v1959_v29 = vmul.f32 %v8880_v10, %v13127_v51 }
 0x51d   :  { %v13121_v33 = vld [vmem:[#allocation110_spill] sm:$0xff]  ;;  %6583 = vmatpush.msk.msrb.mxu2 %vm3033_vm6, %v2917_v6  ;;  %v1960_v59 = vmul.f32 %v8880_v10, %v13128_v21  ;;  %v13130_v6 = vld [vmem:[#allocation97_spill] sm:$0xff]  ;;  %v13132_v11 = vsub.f32 %v7250_v28, %v8746_v20  ;;  %v1962_v49 = vmul.f32 %v8880_v10, %v13136_v15  ;;  %v1963_v43 = vmul.f32 %v8880_v10, %v13140_v9  ;;  %v13182_v28 = vld [vmem:[#allocation27_spill] sm:$0xff] }
 0x51e   :  { %2244 = vst.msk [vmem:[#allocation2 + $0x478] sm:$0xff] %vm1067_vm2, %v2100_v27  ;;  %v13110_v27 = vld [vmem:[#allocation90_spill] sm:$0xff]  ;;  %v13134_v21 = vld [vmem:[#allocation117_spill] sm:$0xff]  ;;  %v1965_v51 = vmul.f32 %v8880_v10, %v13143_v7  ;;  %v1966_v9 = vmul.f32 %v8880_v10, %v13144_v23  ;;  %v1969_v7 = vmul.f32 %v8880_v10, %v13147_v36 }
 0x51f   :  { %v1961_v0 = vmul.f32 %v8880_v10, %v13132_v11  ;;  %2101 = vst.msk [vmem:[#allocation2] sm:$0xff] %vm1067_vm2, %v1957_v16  ;;  %v13177_v16 = vld [vmem:[#allocation25_spill] sm:$0xff] }
 0x520   :  { %2102 = vst.msk [vmem:[#allocation2 + $0x8] sm:$0xff] %vm1067_vm2, %v1958_v32  ;;  %v13142_v32 = vsub.f32 %v7268_v34, %v8746_v20  ;;  %v13146_v34 = vsub.f32 %v7292_v42, %v8746_v20  ;;  %v13150_v42 = vsub.f32 %v7316_v50, %v8746_v20  ;;  %v13154_v50 = vsub.f32 %v7340_v58, %v8746_v20 }
 0x521   :  { %2103 = vst.msk [vmem:[#allocation2 + $0x10] sm:$0xff] %vm1067_vm2, %v1959_v29  ;;  %v13145_v29 = vsub.f32 %v13042_v26, %v8746_v20  ;;  %v13149_v26 = vsub.f32 %v13043_v41, %v8746_v20  ;;  %v13153_v41 = vsub.f32 %v13044_v8, %v8746_v20  ;;  %v13157_v58 = vsub.f32 %v13045_v53, %v8746_v20 }
 0x522   :  { %v1964_v11 = vmul.f32 %v8880_v10, %v13142_v32  ;;  %2104 = vst.msk [vmem:[#allocation2 + $0x18] sm:$0xff] %vm1067_vm2, %v1960_v59  ;;  %v1968_v32 = vmul.f32 %v8880_v10, %v13146_v34  ;;  %v1970_v59 = vmul.f32 %v8880_v10, %v13148_v38  ;;  %v1973_v34 = vmul.f32 %v8880_v10, %v13151_v44  ;;  %v13159_v44 = vld [vmem:[#allocation16_spill] sm:$0xff] }
 0x523   :  { %v1967_v15 = vmul.f32 %v8880_v10, %v13145_v29  ;;  %2105 = vst.msk [vmem:[#allocation2 + $0x20] sm:$0xff] %vm1067_vm2, %v1961_v0  ;;  %v1971_v23 = vmul.f32 %v8880_v10, %v13149_v26  ;;  %v1972_v29 = vmul.f32 %v8880_v10, %v13150_v42  ;;  %v1974_v0 = vmul.f32 %v8880_v10, %v13152_v46 }
 0x524   :  { %2106 = vst.msk [vmem:[#allocation2 + $0x28] sm:$0xff] %vm1067_vm2, %v1962_v49  ;;  %v9123_v36 = vmul.f32 %v8880_v10, %v13153_v41  ;;  %v9129_v52 = vmul.f32 %v8880_v10, %v13154_v50  ;;  %v13155_v38 = vsub.f32 %v7346_v60, %v8746_v20  ;;  %v13156_v49 = vsub.f32 %v7352_v62, %v8746_v20  ;;  %v13161_v41 = vld [vmem:[#allocation17_spill] sm:$0xff]  ;;  %v13163_v50 = vld [vmem:[#allocation18_spill] sm:$0xff] }
 0x525   :  { %2107 = vst.msk [vmem:[#allocation2 + $0x30] sm:$0xff] %vm1067_vm2, %v1963_v43  ;;  %v9148_v26 = vmul.f32 %v8880_v10, %v13157_v58  ;;  %v13158_v60 = vsub.f32 %v7364_v2, %v8746_v20  ;;  %v13160_v62 = vsub.f32 %v13159_v44, %v8746_v20  ;;  %v13162_v43 = vsub.f32 %v13161_v41, %v8746_v20  ;;  %v13167_v44 = vld [vmem:[#allocation20_spill] sm:$0xff] }
 0x526   :  { %v9135_v54 = vmul.f32 %v8880_v10, %v13155_v38  ;;  %v9141_v8 = vmul.f32 %v8880_v10, %v13156_v49  ;;  %2108 = vst.msk [vmem:[#allocation2 + $0x38] sm:$0xff] %vm1067_vm2, %v1964_v11  ;;  %v13164_v2 = vsub.f32 %v13163_v50, %v8746_v20  ;;  %v13165_v49 = vld [vmem:[#allocation19_spill] sm:$0xff] }
 0x527   :  { %v9154_v42 = vmul.f32 %v8880_v10, %v13158_v60  ;;  %v9160_v46 = vmul.f32 %v8880_v10, %v13160_v62  ;;  %v9166_v53 = vmul.f32 %v8880_v10, %v13162_v43  ;;  %v13166_v58 = vsub.f32 %v13165_v49, %v8746_v20  ;;  %v13169_v43 = vld [vmem:[#allocation21_spill] sm:$0xff]  ;;  %2109 = vst.msk [vmem:[#allocation2 + $0x40] sm:$0xff] %vm1067_vm2, %v1965_v51 }
 0x528   :  { %v9173_v38 = vmul.f32 %v8880_v10, %v13164_v2  ;;  %v13168_v62 = vsub.f32 %v13167_v44, %v8746_v20  ;;  %v13170_v11 = vsub.f32 %v13169_v43, %v8746_v20  ;;  %v13171_v2 = vld [vmem:[#allocation22_spill] sm:$0xff]  ;;  %v13174_v44 = vsub.f32 %v13173_v30, %v8746_v20  ;;  %2110 = vst.msk [vmem:[#allocation2 + $0x48] sm:$0xff] %vm1067_vm2, %v1966_v9 }
 0x529   :  { %v9179_v60 = vmul.f32 %v8880_v10, %v13166_v58  ;;  %v13172_v49 = vsub.f32 %v13171_v2, %v8746_v20  ;;  %v13176_v43 = vsub.f32 %v13175_v12, %v8746_v20  ;;  %v13178_v51 = vsub.f32 %v13177_v16, %v8746_v20  ;;  %2111 = vst.msk [vmem:[#allocation2 + $0x50] sm:$0xff] %vm1067_vm2, %v1967_v15 }
 0x52a   :  { %v9185_v41 = vmul.f32 %v8880_v10, %v13168_v62  ;;  %v9191_v50 = vmul.f32 %v8880_v10, %v13170_v11  ;;  %v9204_v62 = vmul.f32 %v8880_v10, %v13174_v44  ;;  %v13183_v12 = vsub.f32 %v13182_v28, %v8746_v20  ;;  %2112 = vst.msk [vmem:[#allocation2 + $0x58] sm:$0xff] %vm1067_vm2, %v1968_v32 }
 0x52b   :  { %v9198_v58 = vmul.f32 %v8880_v10, %v13172_v49  ;;  %v9210_v11 = vmul.f32 %v8880_v10, %v13176_v43  ;;  %v9216_v2 = vmul.f32 %v8880_v10, %v13178_v51  ;;  %v13180_v49 = vld [vmem:[#allocation26_spill] sm:$0xff]  ;;  %v13186_v16 = vsub.f32 %v13185_v31, %v8746_v20  ;;  %2113 = vst.msk [vmem:[#allocation2 + $0x60] sm:$0xff] %vm1067_vm2, %v1969_v7 }
 0x52c   :  { %v13181_v30 = vsub.f32 %v13180_v49, %v8746_v20  ;;  %v9229_v43 = vmul.f32 %v8880_v10, %v13183_v12  ;;  %2114 = vst.msk [vmem:[#allocation2 + $0x68] sm:$0xff] %vm1067_vm2, %v1970_v59  ;;  %v13227_v59 = vsub.f32 %v13075_v56, %v8746_v20 }
 0x52d   :  { %13179 = vst [vmem:[#allocation7_spill] sm:$0xff] %v9216_v2  ;;  %v9235_v51 = vmul.f32 %v8880_v10, %v13186_v16  ;;  %v13188_v2 = vld [vmem:[#allocation29_spill] sm:$0xff] }
 0x52e   :  { %v9223_v44 = vmul.f32 %v8880_v10, %v13181_v30  ;;  %13184 = vst [vmem:[#allocation8_spill] sm:$0xff] %v9229_v43  ;;  %v13189_v9 = vsub.f32 %v13188_v2, %v8746_v20  ;;  %v13191_v30 = vld [vmem:[#allocation41_spill] sm:$0xff]  ;;  %v13193_v43 = vld [vmem:[#allocation42_spill] sm:$0xff] }
 0x52f   :  { %13187 = vst [vmem:[#allocation9_spill] sm:$0xff] %v9235_v51  ;;  %v13192_v28 = vsub.f32 %v13191_v30, %v8746_v20  ;;  %v13194_v31 = vsub.f32 %v13193_v43, %v8746_v20  ;;  %v13196_v51 = vld [vmem:[#allocation43_spill] sm:$0xff] }
 0x530   :  { %v9241_v49 = vmul.f32 %v8880_v10, %v13189_v9  ;;  %v13197_v2 = vsub.f32 %v13196_v51, %v8746_v20  ;;  %2115 = vst.msk [vmem:[#allocation2 + $0x70] sm:$0xff] %vm1067_vm2, %v1971_v23 }
 0x531   :  { %v9248_v12 = vmul.f32 %v8880_v10, %v13192_v28  ;;  %v9254_v16 = vmul.f32 %v8880_v10, %v13194_v31  ;;  %v13202_v28 = vld [vmem:[#allocation45_spill] sm:$0xff]  ;;  %2116 = vst.msk [vmem:[#allocation2 + $0x78] sm:$0xff] %vm1067_vm2, %v1972_v29 }
 0x532   :  { %13190 = vst [vmem:[#allocation10_spill] sm:$0xff] %v9241_v49  ;;  %v9260_v9 = vmul.f32 %v8880_v10, %v13197_v2  ;;  %v13199_v49 = vld [vmem:[#allocation44_spill] sm:$0xff]  ;;  %v13203_v43 = vsub.f32 %v13202_v28, %v8746_v20 }
 0x533   :  { %13195 = vst [vmem:[#allocation11_spill] sm:$0xff] %v9254_v16  ;;  %v13200_v15 = vsub.f32 %v13199_v49, %v8746_v20  ;;  %v13204_v16 = vld [vmem:[#allocation46_spill] sm:$0xff] }
 0x534   :  { %13198 = vst [vmem:[#allocation12_spill] sm:$0xff] %v9260_v9  ;;  %v9273_v31 = vmul.f32 %v8880_v10, %v13203_v43  ;;  %v13205_v51 = vsub.f32 %v13204_v16, %v8746_v20  ;;  %v13206_v9 = vld [vmem:[#allocation47_spill] sm:$0xff]  ;;  %v13211_v16 = vsub.f32 %v13068_v24, %v8746_v20 }
 0x535   :  { %v9266_v30 = vmul.f32 %v8880_v10, %v13200_v15  ;;  %v13207_v49 = vsub.f32 %v13206_v9, %v8746_v20  ;;  %v13212_v9 = vsub.f32 %v13069_v61, %v8746_v20  ;;  %2117 = vst.msk [vmem:[#allocation2 + $0x80] sm:$0xff] %vm1067_vm2, %v1973_v34 }
 0x536   :  { %v9279_v2 = vmul.f32 %v8880_v10, %v13205_v51  ;;  %v9298_v43 = vmul.f32 %v8880_v10, %v13211_v16  ;;  %v13219_v16 = vld [vmem:[#allocation53_spill] sm:$0xff]  ;;  %2118 = vst.msk [vmem:[#allocation2 + $0x88] sm:$0xff] %vm1067_vm2, %v1974_v0 }
 0x537   :  { %13201 = vst [vmem:[#allocation13_spill] sm:$0xff] %v9266_v30  ;;  %v9285_v15 = vmul.f32 %v8880_v10, %v13207_v49  ;;  %v13208_v30 = vld [vmem:[#allocation48_spill] sm:$0xff]  ;;  %v9304_v51 = vmul.f32 %v8880_v10, %v13212_v9  ;;  %v13214_v49 = vld [vmem:[#allocation51_spill] sm:$0xff]  ;;  %v13220_v61 = vsub.f32 %v13219_v16, %v8746_v20  ;;  %v9341_v16 = vmul.f32 %v8880_v10, %v13227_v59 }
 0x538   :  { %v13209_v32 = vsub.f32 %v13208_v30, %v8746_v20  ;;  %v13215_v30 = vsub.f32 %v13214_v49, %v8746_v20  ;;  %2119 = vst.msk [vmem:[#allocation2 + $0x90] sm:$0xff] %vm1067_vm2, %v9123_v36 }
 0x539   :  { %13213 = vst [vmem:[#allocation15_spill] sm:$0xff] %v9304_v51  ;;  %v9323_v9 = vmul.f32 %v8880_v10, %v13220_v61  ;;  %v13221_v51 = vld [vmem:[#allocation54_spill] sm:$0xff]  ;;  %v13229_v61 = vld [vmem:[#allocation57_spill] sm:$0xff] }
 0x53a   :  { %v9291_v28 = vmul.f32 %v8880_v10, %v13209_v32  ;;  %v9310_v32 = vmul.f32 %v8880_v10, %v13215_v30  ;;  %v13222_v49 = vsub.f32 %v13221_v51, %v8746_v20  ;;  %13228 = vst [vmem:[#allocation63_spill] sm:$0xff] %v9341_v16  ;;  %v13230_v51 = vsub.f32 %v13229_v61, %v8746_v20  ;;  %v13236_v16 = vld [vmem:[#allocation60_spill] sm:$0xff] }
 0x53b   :  { %v13237_v23 = vsub.f32 %v13236_v16, %v8746_v20  ;;  %v13244_v16 = vsub.f32 %v13083_v17, %v8746_v20  ;;  %2120 = vst.msk [vmem:[#allocation2 + $0x98] sm:$0xff] %vm1067_vm2, %v9129_v52 }
 0x53c   :  { %13210 = vst [vmem:[#allocation14_spill] sm:$0xff] %v9291_v28  ;;  %v13217_v28 = vld [vmem:[#allocation52_spill] sm:$0xff]  ;;  %v9329_v30 = vmul.f32 %v8880_v10, %v13222_v49  ;;  %v9348_v49 = vmul.f32 %v8880_v10, %v13230_v51  ;;  %v13239_v51 = vld [vmem:[#allocation61_spill] sm:$0xff] }
 0x53d   :  { %13216 = vst [vmem:[#allocation49_spill] sm:$0xff] %v9310_v32  ;;  %v13218_v7 = vsub.f32 %v13217_v28, %v8746_v20  ;;  %v13224_v32 = vld [vmem:[#allocation55_spill] sm:$0xff]  ;;  %v9366_v61 = vmul.f32 %v8880_v10, %v13237_v23  ;;  %v9385_v23 = vmul.f32 %v8880_v10, %v13244_v16 }
 0x53e   :  { %13223 = vst [vmem:[#allocation50_spill] sm:$0xff] %v9329_v30  ;;  %v13225_v28 = vsub.f32 %v13224_v32, %v8746_v20  ;;  %v13231_v30 = vld [vmem:[#allocation58_spill] sm:$0xff] }
 0x53f   :  { %v9316_v24 = vmul.f32 %v8880_v10, %v13218_v7  ;;  %v13232_v32 = vsub.f32 %v13231_v30, %v8746_v20  ;;  %13238 = vst [vmem:[#allocation90_spill] sm:$0xff] %v9366_v61  ;;  %v13240_v30 = vsub.f32 %v13239_v51, %v8746_v20  ;;  %v13246_v61 = vld [vmem:[#allocation64_spill] sm:$0xff] }
 0x540   :  { %v9335_v7 = vmul.f32 %v8880_v10, %v13225_v28  ;;  %13245 = vst [vmem:[#allocation93_spill] sm:$0xff] %v9385_v23  ;;  %v13247_v29 = vsub.f32 %v13246_v61, %v8746_v20  ;;  %v13254_v23 = vld [vmem:[#allocation67_spill] sm:$0xff] }
 0x541   :  { %v9354_v28 = vmul.f32 %v8880_v10, %v13232_v32  ;;  %v9373_v32 = vmul.f32 %v8880_v10, %v13240_v30  ;;  %v13249_v30 = vld [vmem:[#allocation65_spill] sm:$0xff]  ;;  %v13255_v61 = vsub.f32 %v13254_v23, %v8746_v20  ;;  %2121 = vst.msk [vmem:[#allocation2 + $0xa0] sm:$0xff] %vm1067_vm2, %v9135_v54 }
 0x542   :  { %13226 = vst [vmem:[#allocation56_spill] sm:$0xff] %v9335_v7  ;;  %v13234_v7 = vld [vmem:[#allocation59_spill] sm:$0xff]  ;;  %v9391_v51 = vmul.f32 %v8880_v10, %v13247_v29 }
 0x543   :  { %13233 = vst [vmem:[#allocation89_spill] sm:$0xff] %v9354_v28  ;;  %v13235_v56 = vsub.f32 %v13234_v7, %v8746_v20  ;;  %v13241_v28 = vld [vmem:[#allocation62_spill] sm:$0xff]  ;;  %v9410_v29 = vmul.f32 %v8880_v10, %v13255_v61 }
 0x544   :  { %v13242_v7 = vsub.f32 %v13241_v28, %v8746_v20  ;;  %13248 = vst [vmem:[#allocation94_spill] sm:$0xff] %v9391_v51  ;;  %v13250_v28 = vsub.f32 %v13249_v30, %v8746_v20  ;;  %v13257_v51 = vld [vmem:[#allocation68_spill] sm:$0xff] }
 0x545   :  { %v9360_v59 = vmul.f32 %v8880_v10, %v13235_v56  ;;  %13256 = vst [vmem:[#allocation100_spill] sm:$0xff] %v9410_v29  ;;  %v13258_v34 = vsub.f32 %v13257_v51, %v8746_v20  ;;  %v13265_v29 = vld [vmem:[#allocation71_spill] sm:$0xff] }
 0x546   :  { %v9379_v56 = vmul.f32 %v8880_v10, %v13242_v7  ;;  %v9398_v7 = vmul.f32 %v8880_v10, %v13250_v28  ;;  %v13260_v28 = vld [vmem:[#allocation69_spill] sm:$0xff]  ;;  %v13266_v51 = vsub.f32 %v13265_v29, %v8746_v20  ;;  %2122 = vst.msk [vmem:[#allocation2 + $0xa8] sm:$0xff] %vm1067_vm2, %v9141_v8 }
 0x547   :  { %v9416_v30 = vmul.f32 %v8880_v10, %v13258_v34  ;;  %2123 = vst.msk [vmem:[#allocation2 + $0xb0] sm:$0xff] %vm1067_vm2, %v9148_v26  ;;  %v13316_v26 = vsub.f32 %v13112_v1, %v8746_v20 }
 0x548   :  { %13243 = vst [vmem:[#allocation92_spill] sm:$0xff] %v9379_v56  ;;  %v13251_v56 = vld [vmem:[#allocation66_spill] sm:$0xff]  ;;  %v9435_v34 = vmul.f32 %v8880_v10, %v13266_v51 }
 0x549   :  { %v13252_v17 = vsub.f32 %v13251_v56, %v8746_v20  ;;  %13259 = vst [vmem:[#allocation102_spill] sm:$0xff] %v9416_v30  ;;  %v13261_v56 = vsub.f32 %v13260_v28, %v8746_v20  ;;  %v13268_v30 = vld [vmem:[#allocation72_spill] sm:$0xff] }
 0x54a   :  { %13267 = vst [vmem:[#allocation106_spill] sm:$0xff] %v9435_v34  ;;  %v13269_v0 = vsub.f32 %v13268_v30, %v8746_v20  ;;  %v13276_v34 = vld [vmem:[#allocation75_spill] sm:$0xff] }
 0x54b   :  { %v9404_v16 = vmul.f32 %v8880_v10, %v13252_v17  ;;  %v9423_v17 = vmul.f32 %v8880_v10, %v13261_v56  ;;  %v13271_v56 = vld [vmem:[#allocation73_spill] sm:$0xff]  ;;  %v13277_v30 = vsub.f32 %v13276_v34, %v8746_v20  ;;  %2124 = vst.msk [vmem:[#allocation2 + $0xb8] sm:$0xff] %vm1067_vm2, %v9154_v42  ;;  %v13321_v42 = vsub.f32 %v13023_v63, %v8746_v20 }
 0x54c   :  { %v9441_v28 = vmul.f32 %v8880_v10, %v13269_v0  ;;  %2125 = vst.msk [vmem:[#allocation2 + $0xc0] sm:$0xff] %vm1067_vm2, %v9160_v46  ;;  %v13326_v46 = vsub.f32 %v7925_v55, %v8746_v20 }
 0x54d   :  { %13253 = vst [vmem:[#allocation98_spill] sm:$0xff] %v9404_v16  ;;  %v13262_v16 = vld [vmem:[#allocation70_spill] sm:$0xff]  ;;  %v9461_v0 = vmul.f32 %v8880_v10, %v13277_v30 }
 0x54e   :  { %v13263_v23 = vsub.f32 %v13262_v16, %v8746_v20  ;;  %13270 = vst [vmem:[#allocation110_spill] sm:$0xff] %v9441_v28  ;;  %v13272_v16 = vsub.f32 %v13271_v56, %v8746_v20  ;;  %v13279_v28 = vld [vmem:[#allocation76_spill] sm:$0xff] }
 0x54f   :  { %13278 = vst [vmem:[#allocation117_spill] sm:$0xff] %v9461_v0  ;;  %v13280_v36 = vsub.f32 %v13279_v28, %v8746_v20  ;;  %v13287_v0 = vld [vmem:[#allocation79_spill] sm:$0xff] }
 0x550   :  { %v9429_v61 = vmul.f32 %v8880_v10, %v13263_v23  ;;  %v9449_v23 = vmul.f32 %v8880_v10, %v13272_v16  ;;  %v13282_v16 = vld [vmem:[#allocation77_spill] sm:$0xff]  ;;  %v13288_v28 = vsub.f32 %v13287_v0, %v8746_v20  ;;  %2126 = vst.msk [vmem:[#allocation2 + $0xc8] sm:$0xff] %vm1067_vm2, %v9166_v53  ;;  %v13331_v53 = vsub.f32 %v8029_v22, %v8746_v20 }
 0x551   :  { %v9467_v56 = vmul.f32 %v8880_v10, %v13280_v36  ;;  %2127 = vst.msk [vmem:[#allocation2 + $0xd0] sm:$0xff] %vm1067_vm2, %v9173_v38  ;;  %v13336_v38 = vsub.f32 %v8133_v40, %v8746_v20  ;;  %v13340_v40 = vsub.f32 %v8211_v3, %v8746_v20  ;;  %v13347_v3 = vsub.f32 %v13120_v25, %v8746_v20 }
 0x552   :  { %13264 = vst [vmem:[#allocation104_spill] sm:$0xff] %v9429_v61  ;;  %v13273_v61 = vld [vmem:[#allocation74_spill] sm:$0xff]  ;;  %v9487_v36 = vmul.f32 %v8880_v10, %v13288_v28 }
 0x553   :  { %v13274_v29 = vsub.f32 %v13273_v61, %v8746_v20  ;;  %13281 = vst [vmem:[#allocation16_spill] sm:$0xff] %v9467_v56  ;;  %v13283_v61 = vsub.f32 %v13282_v16, %v8746_v20  ;;  %v13290_v56 = vld [vmem:[#allocation80_spill] sm:$0xff] }
 0x554   :  { %13289 = vst [vmem:[#allocation18_spill] sm:$0xff] %v9487_v36  ;;  %v13291_v52 = vsub.f32 %v13290_v56, %v8746_v20  ;;  %v13298_v36 = vld [vmem:[#allocation83_spill] sm:$0xff] }
 0x555   :  { %v9455_v51 = vmul.f32 %v8880_v10, %v13274_v29  ;;  %v9475_v29 = vmul.f32 %v8880_v10, %v13283_v61  ;;  %v13293_v61 = vld [vmem:[#allocation81_spill] sm:$0xff]  ;;  %v13299_v56 = vsub.f32 %v13298_v36, %v8746_v20  ;;  %2128 = vst.msk [vmem:[#allocation2 + $0xd8] sm:$0xff] %vm1067_vm2, %v9179_v60 }
 0x556   :  { %v9493_v16 = vmul.f32 %v8880_v10, %v13291_v52  ;;  %2129 = vst.msk [vmem:[#allocation2 + $0xe0] sm:$0xff] %vm1067_vm2, %v9185_v41 }
 0x557   :  { %13275 = vst [vmem:[#allocation97_spill] sm:$0xff] %v9455_v51  ;;  %v13284_v51 = vld [vmem:[#allocation78_spill] sm:$0xff]  ;;  %v9513_v52 = vmul.f32 %v8880_v10, %v13299_v56 }
 0x558   :  { %v13285_v34 = vsub.f32 %v13284_v51, %v8746_v20  ;;  %13292 = vst [vmem:[#allocation19_spill] sm:$0xff] %v9493_v16  ;;  %v13294_v51 = vsub.f32 %v13293_v61, %v8746_v20  ;;  %v13301_v16 = vld [vmem:[#allocation84_spill] sm:$0xff] }
 0x559   :  { %13300 = vst [vmem:[#allocation21_spill] sm:$0xff] %v9513_v52  ;;  %v13302_v54 = vsub.f32 %v13301_v16, %v8746_v20  ;;  %v13308_v52 = vld [vmem:[#allocation87_spill] sm:$0xff] }
 0x55a   :  { %v9481_v30 = vmul.f32 %v8880_v10, %v13285_v34  ;;  %v9501_v34 = vmul.f32 %v8880_v10, %v13294_v51  ;;  %v13304_v51 = vld [vmem:[#allocation85_spill] sm:$0xff]  ;;  %v13309_v16 = vsub.f32 %v13308_v52, %v8746_v20  ;;  %v13313_v52 = vsub.f32 %v13110_v27, %v8746_v20  ;;  %2130 = vst.msk [vmem:[#allocation2 + $0xe8] sm:$0xff] %vm1067_vm2, %v9191_v50 }
 0x55b   :  { %v9519_v61 = vmul.f32 %v8880_v10, %v13302_v54  ;;  %v13317_v27 = vsub.f32 %v13113_v18, %v8746_v20  ;;  %v9597_v18 = vmul.f32 %v8880_v10, %v13321_v42  ;;  %v13363_v50 = vsub.f32 %v8445_v13, %v8746_v20  ;;  %2131 = vst.msk [vmem:[#allocation2 + $0xf0] sm:$0xff] %vm1067_vm2, %v9198_v58 }
 0x55c   :  { %13286 = vst [vmem:[#allocation17_spill] sm:$0xff] %v9481_v30  ;;  %v13295_v30 = vld [vmem:[#allocation82_spill] sm:$0xff]  ;;  %v9539_v54 = vmul.f32 %v8880_v10, %v13309_v16  ;;  %v13314_v16 = vld [vmem:[#allocation91_spill] sm:$0xff] }
 0x55d   :  { %v13296_v0 = vsub.f32 %v13295_v30, %v8746_v20  ;;  %13303 = vst [vmem:[#allocation22_spill] sm:$0xff] %v9519_v61  ;;  %v13305_v30 = vsub.f32 %v13304_v51, %v8746_v20  ;;  %v13310_v61 = vld [vmem:[#allocation88_spill] sm:$0xff] }
 0x55e   :  { %v13311_v8 = vsub.f32 %v13310_v61, %v8746_v20  ;;  %v13315_v61 = vsub.f32 %v13314_v16, %v8746_v20  ;;  %2132 = vst.msk [vmem:[#allocation2 + $0xf8] sm:$0xff] %vm1067_vm2, %v9204_v62  ;;  %v13385_v62 = vsub.f32 %v13134_v21, %v8746_v20  ;;  %v13393_v21 = vld [vmem:[#allocation120_spill] sm:$0xff] }
 0x55f   :  { %v9507_v28 = vmul.f32 %v8880_v10, %v13296_v0  ;;  %v9527_v0 = vmul.f32 %v8880_v10, %v13305_v30  ;;  %2133 = vst.msk [vmem:[#allocation2 + $0x100] sm:$0xff] %vm1067_vm2, %v9210_v11 }
 0x560   :  { %v9545_v51 = vmul.f32 %v8880_v10, %v13311_v8  ;;  %v9565_v8 = vmul.f32 %v8880_v10, %v13315_v61  ;;  %v13319_v61 = vld [vmem:[#allocation95_spill] sm:$0xff]  ;;  %2135 = vst.msk [vmem:[#allocation2 + $0x110] sm:$0xff] %vm1067_vm2, %v9223_v44 }
 0x561   :  { %13297 = vst [vmem:[#allocation20_spill] sm:$0xff] %v9507_v28  ;;  %v13306_v28 = vld [vmem:[#allocation86_spill] sm:$0xff]  ;;  %v13320_v1 = vsub.f32 %v13319_v61, %v8746_v20 }
 0x562   :  { %v13307_v36 = vsub.f32 %v13306_v28, %v8746_v20  ;;  %v13312_v28 = vsub.f32 %v13109_v19, %v8746_v20  ;;  %v9571_v19 = vmul.f32 %v8880_v10, %v13316_v26  ;;  %2150 = vst.msk [vmem:[#allocation2 + $0x188] sm:$0xff] %vm1067_vm2, %v9248_v12  ;;  %v13427_v12 = vld [vmem:[#allocation15_spill] sm:$0xff] }
 0x563   :  { %v9591_v26 = vmul.f32 %v8880_v10, %v13320_v1  ;;  %v13324_v1 = vld [vmem:[#allocation99_spill] sm:$0xff]  ;;  %2154 = vst.msk [vmem:[#allocation2 + $0x1a8] sm:$0xff] %vm1067_vm2, %v9273_v31  ;;  %v13429_v31 = vld [vmem:[#allocation50_spill] sm:$0xff] }
 0x564   :  { %v9533_v56 = vmul.f32 %v8880_v10, %v13307_v36  ;;  %v9553_v30 = vmul.f32 %v8880_v10, %v13312_v28  ;;  %v9559_v36 = vmul.f32 %v8880_v10, %v13313_v52  ;;  %v9579_v28 = vmul.f32 %v8880_v10, %v13317_v27  ;;  %2155 = vst.msk [vmem:[#allocation2 + $0x1b0] sm:$0xff] %vm1067_vm2, %v9279_v2  ;;  %v13430_v2 = vld [vmem:[#allocation56_spill] sm:$0xff] }
 0x565   :  { %v13318_v52 = vsub.f32 %v13114_v5, %v8746_v20  ;;  %v13322_v5 = vsub.f32 %v13024_v35, %v8746_v20  ;;  %v13325_v63 = vsub.f32 %v13324_v1, %v8746_v20  ;;  %v9623_v35 = vmul.f32 %v8880_v10, %v13326_v46  ;;  %2156 = vst.msk [vmem:[#allocation2 + $0x1b8] sm:$0xff] %vm1067_vm2, %v9285_v15  ;;  %v13431_v15 = vld [vmem:[#allocation63_spill] sm:$0xff] }
 0x566   :  { %2158 = vst.msk [vmem:[#allocation2 + $0x1c8] sm:$0xff] %vm1067_vm2, %v9298_v43  ;;  %v13432_v43 = vld [vmem:[#allocation89_spill] sm:$0xff] }
 0x567   :  { %v9585_v16 = vmul.f32 %v8880_v10, %v13318_v52  ;;  %v9605_v27 = vmul.f32 %v8880_v10, %v13322_v5  ;;  %v13323_v52 = vsub.f32 %v13116_v4, %v8746_v20  ;;  %v9617_v42 = vmul.f32 %v8880_v10, %v13325_v63  ;;  %v13329_v63 = vld [vmem:[#allocation101_spill] sm:$0xff]  ;;  %2159 = vst.msk [vmem:[#allocation2 + $0x1d0] sm:$0xff] %vm1067_vm2, %v13427_v12 }
 0x568   :  { %v13327_v4 = vsub.f32 %v7951_v39, %v8746_v20  ;;  %v13330_v55 = vsub.f32 %v13329_v63, %v8746_v20  ;;  %v9649_v39 = vmul.f32 %v8880_v10, %v13331_v53  ;;  %2161 = vst.msk [vmem:[#allocation2 + $0x1e0] sm:$0xff] %vm1067_vm2, %v9316_v24  ;;  %v13433_v24 = vld [vmem:[#allocation90_spill] sm:$0xff] }
 0x569   :  { %v9611_v61 = vmul.f32 %v8880_v10, %v13323_v52  ;;  %v13328_v52 = vsub.f32 %v13117_v45, %v8746_v20  ;;  %v13332_v45 = vsub.f32 %v8055_v47, %v8746_v20  ;;  %v9675_v47 = vmul.f32 %v8880_v10, %v13336_v38  ;;  %v13342_v38 = vld [vmem:[#allocation105_spill] sm:$0xff]  ;;  %2162 = vst.msk [vmem:[#allocation2 + $0x1e8] sm:$0xff] %vm1067_vm2, %v9323_v9  ;;  %v13434_v9 = vld [vmem:[#allocation92_spill] sm:$0xff] }
 0x56a   :  { %v9631_v5 = vmul.f32 %v8880_v10, %v13327_v4  ;;  %v9643_v46 = vmul.f32 %v8880_v10, %v13330_v55  ;;  %v13334_v55 = vld [vmem:[#allocation103_spill] sm:$0xff]  ;;  %v13343_v60 = vsub.f32 %v13342_v38, %v8746_v20  ;;  %2163 = vst.msk [vmem:[#allocation2 + $0x1f0] sm:$0xff] %vm1067_vm2, %v13429_v31  ;;  %v2255_v31 = vld [vmem:[#allocation2 + $0x50] ss:$2 sm:$0xff] }
 0x56b   :  { %v9637_v1 = vmul.f32 %v8880_v10, %v13328_v52  ;;  %v9657_v4 = vmul.f32 %v8880_v10, %v13332_v45  ;;  %v13333_v52 = vsub.f32 %v13118_v37, %v8746_v20  ;;  %v13335_v22 = vsub.f32 %v13334_v55, %v8746_v20  ;;  %2164 = vst.msk [vmem:[#allocation2 + $0x1f8] sm:$0xff] %vm1067_vm2, %v13430_v2 }
 0x56c   :  { %v13337_v37 = vsub.f32 %v8159_v48, %v8746_v20  ;;  %v9701_v48 = vmul.f32 %v8880_v10, %v13343_v60  ;;  %2165 = vst.msk [vmem:[#allocation2 + $0x200] sm:$0xff] %vm1067_vm2, %v13431_v15 }
 0x56d   :  { %v9663_v63 = vmul.f32 %v8880_v10, %v13333_v52  ;;  %v9669_v53 = vmul.f32 %v8880_v10, %v13335_v22  ;;  %v13338_v52 = vsub.f32 %v13119_v14, %v8746_v20  ;;  %v9695_v22 = vmul.f32 %v8880_v10, %v13340_v40  ;;  %v13349_v40 = vld [vmem:[#allocation107_spill] sm:$0xff]  ;;  %2166 = vst.msk [vmem:[#allocation2 + $0x208] sm:$0xff] %vm1067_vm2, %v9348_v49  ;;  %v13437_v49 = vld [vmem:[#allocation98_spill] sm:$0xff] }
 0x56e   :  { %v9683_v45 = vmul.f32 %v8880_v10, %v13337_v37  ;;  %13344 = vst [vmem:[#allocation25_spill] sm:$0xff] %v9701_v48  ;;  %v13345_v14 = vsub.f32 %v8267_v57, %v8746_v20  ;;  %v13350_v38 = vsub.f32 %v13349_v40, %v8746_v20  ;;  %v13352_v48 = vld [vmem:[#allocation108_spill] sm:$0xff]  ;;  %v13358_v40 = vsub.f32 %v13121_v33, %v8746_v20 }
 0x56f   :  { %v9689_v55 = vmul.f32 %v8880_v10, %v13338_v52  ;;  %13341 = vst [vmem:[#allocation24_spill] sm:$0xff] %v9695_v22  ;;  %v9715_v52 = vmul.f32 %v8880_v10, %v13347_v3  ;;  %v13353_v41 = vsub.f32 %v13352_v48, %v8746_v20 }
 0x570   :  { %v9709_v37 = vmul.f32 %v8880_v10, %v13345_v14  ;;  %v9721_v60 = vmul.f32 %v8880_v10, %v13350_v38  ;;  %v13355_v14 = vld [vmem:[#allocation109_spill] sm:$0xff]  ;;  %v9741_v38 = vmul.f32 %v8880_v10, %v13358_v40  ;;  %2167 = vst.msk [vmem:[#allocation2 + $0x210] sm:$0xff] %vm1067_vm2, %v13432_v43  ;;  %v2397_v43 = vld [vmem:[#allocation2 + $0x41] ss:$2 sm:$0xff] }
 0x571   :  { %13339 = vst [vmem:[#allocation23_spill] sm:$0xff] %v9689_v55  ;;  %v9727_v57 = vmul.f32 %v8880_v10, %v13353_v41  ;;  %v13356_v25 = vsub.f32 %v13355_v14, %v8746_v20  ;;  %v9753_v14 = vmul.f32 %v8880_v10, %v13363_v50 }
 0x572   :  { %13346 = vst [vmem:[#allocation26_spill] sm:$0xff] %v9709_v37 }
 0x573   :  { %13348 = vst [vmem:[#allocation27_spill] sm:$0xff] %v9715_v52  ;;  %v9735_v3 = vmul.f32 %v8880_v10, %v13356_v25  ;;  %v13365_v25 = vld [vmem:[#allocation112_spill] sm:$0xff]  ;;  %v13417_v52 = vld [vmem:[#allocation10_spill] sm:$0xff] }
 0x574   :  { %13351 = vst [vmem:[#allocation28_spill] sm:$0xff] %v9721_v60  ;;  %v13360_v60 = vld [vmem:[#allocation111_spill] sm:$0xff]  ;;  %v13366_v33 = vsub.f32 %v13365_v25, %v8746_v20 }
 0x575   :  { %13354 = vst [vmem:[#allocation29_spill] sm:$0xff] %v9727_v57  ;;  %v13361_v48 = vsub.f32 %v13360_v60, %v8746_v20 }
 0x576   :  { %13357 = vst [vmem:[#allocation41_spill] sm:$0xff] %v9735_v3  ;;  %v9761_v40 = vmul.f32 %v8880_v10, %v13366_v33  ;;  %v2247_v33 = vld [vmem:[#allocation2 + $0x10] ss:$2 sm:$0xff]  ;;  %v2389_v3 = vld [vmem:[#allocation2 + $0x1] ss:$2 sm:$0xff] }
 0x577   :  { %13359 = vst [vmem:[#allocation42_spill] sm:$0xff] %v9741_v38  ;;  %v9747_v41 = vmul.f32 %v8880_v10, %v13361_v48  ;;  %v13368_v38 = vld [vmem:[#allocation113_spill] sm:$0xff] }
 0x578   :  { %13364 = vst [vmem:[#allocation44_spill] sm:$0xff] %v9753_v14  ;;  %v13369_v60 = vsub.f32 %v13368_v38, %v8746_v20  ;;  %v13374_v14 = vld [vmem:[#allocation96_spill] sm:$0xff]  ;;  %v13377_v38 = vsub.f32 %v13130_v6, %v8746_v20  ;;  %v9805_v6 = vmul.f32 %v8880_v10, %v13385_v62  ;;  %v13394_v62 = vsub.f32 %v13393_v21, %v8746_v20 }
 0x579   :  { %13362 = vst [vmem:[#allocation43_spill] sm:$0xff] %v9747_v41  ;;  %v13371_v41 = vld [vmem:[#allocation114_spill] sm:$0xff]  ;;  %v13375_v58 = vsub.f32 %v13374_v14, %v8746_v20  ;;  %v13382_v14 = vld [vmem:[#allocation116_spill] sm:$0xff] }
 0x57a   :  { %13367 = vst [vmem:[#allocation45_spill] sm:$0xff] %v9761_v40  ;;  %v9767_v48 = vmul.f32 %v8880_v10, %v13369_v60  ;;  %v13372_v13 = vsub.f32 %v13371_v41, %v8746_v20  ;;  %v2391_v40 = vld [vmem:[#allocation2 + $0x11] ss:$2 sm:$0xff]  ;;  %v9787_v60 = vmul.f32 %v8880_v10, %v13377_v38  ;;  %v13379_v41 = vld [vmem:[#allocation115_spill] sm:$0xff] }
 0x57b   :  { %v9779_v25 = vmul.f32 %v8880_v10, %v13375_v58  ;;  %v13383_v58 = vsub.f32 %v13382_v14, %v8746_v20  ;;  %13386 = vst [vmem:[#allocation54_spill] sm:$0xff] %v9805_v6  ;;  %v2249_v38 = vld [vmem:[#allocation2 + $0x20] ss:$2 sm:$0xff]  ;;  %v9825_v6 = vmul.f32 %v8880_v10, %v13394_v62 }
 0x57c   :  { %13370 = vst [vmem:[#allocation46_spill] sm:$0xff] %v9767_v48  ;;  %v9773_v50 = vmul.f32 %v8880_v10, %v13372_v13  ;;  %v13380_v13 = vsub.f32 %v13379_v41, %v8746_v20  ;;  %v13387_v41 = vld [vmem:[#allocation118_spill] sm:$0xff]  ;;  %v13390_v14 = vld [vmem:[#allocation119_spill] sm:$0xff] }
 0x57d   :  { %13376 = vst [vmem:[#allocation48_spill] sm:$0xff] %v9779_v25  ;;  %v9799_v25 = vmul.f32 %v8880_v10, %v13383_v58  ;;  %v13391_v58 = vsub.f32 %v13390_v14, %v8746_v20  ;;  %v13396_v48 = vld [vmem:[#allocation122_spill] sm:$0xff] }
 0x57e   :  { %13373 = vst [vmem:[#allocation47_spill] sm:$0xff] %v9773_v50  ;;  %v9793_v50 = vmul.f32 %v8880_v10, %v13380_v13  ;;  %v13388_v13 = vsub.f32 %v13387_v41, %v8746_v20  ;;  %v13397_v11 = vsub.f32 %v13396_v48, %v8746_v20 }
 0x57f   :  { %13378 = vst [vmem:[#allocation51_spill] sm:$0xff] %v9787_v60  ;;  %v2393_v60 = vld [vmem:[#allocation2 + $0x21] ss:$2 sm:$0xff] }
 0x580   :  { %13381 = vst [vmem:[#allocation52_spill] sm:$0xff] %v9793_v50  ;;  %v9813_v50 = vmul.f32 %v8880_v10, %v13388_v13  ;;  %v9831_v41 = vmul.f32 %v8880_v10, %v13397_v11  ;;  %v13399_v13 = vld [vmem:[#allocation7_spill] sm:$0xff]  ;;  %v9861_v57 = vadd.f32 %v2393_v60, %v2249_v38 }
 0x581   :  { %13384 = vst [vmem:[#allocation53_spill] sm:$0xff] %v9799_v25  ;;  %v9819_v25 = vmul.f32 %v8880_v10, %v13391_v58  ;;  %v13416_v60 = vld [vmem:[#allocation35_spill] sm:$0xff] }
 0x582   :  { %13389 = vst [vmem:[#allocation55_spill] sm:$0xff] %v9813_v50  ;;  %v13400_v50 = vld [vmem:[#allocation30_spill] sm:$0xff]  ;;  %v1845_v38 = vsub.f32 %v13416_v60, %v8746_v20 }
 0x583   :  { %13392 = vst [vmem:[#allocation57_spill] sm:$0xff] %v9819_v25  ;;  %v13401_v14 = vsub.f32 %v13400_v50, %v8746_v20  ;;  %v13402_v25 = vld [vmem:[#allocation123_spill] sm:$0xff]  ;;  %v13408_v50 = vld [vmem:[#allocation33_spill] sm:$0xff] }
 0x584   :  { %13395 = vst [vmem:[#allocation58_spill] sm:$0xff] %v9825_v6  ;;  %v13403_v21 = vsub.f32 %v13402_v25, %v8746_v20  ;;  %v13405_v6 = vld [vmem:[#allocation121_spill] sm:$0xff]  ;;  %v2000_v60 = vmul.f32 %v8880_v10, %v1845_v38  ;;  %v13422_v38 = vld [vmem:[#allocation40_spill] sm:$0xff] }
 0x585   :  { %13398 = vst [vmem:[#allocation59_spill] sm:$0xff] %v9831_v41  ;;  %v1995_v58 = vmul.f32 %v8880_v10, %v13401_v14  ;;  %v13406_v48 = vsub.f32 %v13405_v6, %v8746_v20  ;;  %v9851_v41 = vadd.f32 %v2391_v40, %v2247_v33  ;;  %v13409_v14 = vld [vmem:[#allocation31_spill] sm:$0xff]  ;;  %v13411_v6 = vld [vmem:[#allocation8_spill] sm:$0xff]  ;;  %v13412_v40 = vld [vmem:[#allocation34_spill] sm:$0xff] }
 0x586   :  { %2134 = vst.msk [vmem:[#allocation2 + $0x108] sm:$0xff] %vm1067_vm2, %v13399_v13  ;;  %v9843_v62 = vmul.f32 %v8880_v10, %v13403_v21  ;;  %v1843_v13 = vsub.f32 %v13408_v50, %v8746_v20  ;;  %v13410_v25 = vsub.f32 %v13409_v14, %v8746_v20  ;;  %v1844_v33 = vsub.f32 %v13412_v40, %v8746_v20  ;;  %v13418_v40 = vld [vmem:[#allocation36_spill] sm:$0xff] }
 0x587   :  { %v9849_v11 = vmul.f32 %v8880_v10, %v13406_v48  ;;  %2136 = vst.msk [vmem:[#allocation2 + $0x118] sm:$0xff] %vm1067_vm2, %v13411_v6  ;;  %v13413_v48 = vld [vmem:[#allocation32_spill] sm:$0xff]  ;;  %v2653_v14 = vrot.slane %v9851_v41, 4  ;;  %v2654_v6 = vrot.slane %v9861_v57, 4 }
 0x588   :  { %13404 = vst [vmem:[#allocation60_spill] sm:$0xff] %v9843_v62  ;;  %v1996_v21 = vmul.f32 %v8880_v10, %v13410_v25  ;;  %v2245_v62 = vld [vmem:[#allocation2] ss:$2 sm:$0xff]  ;;  %v13414_v44 = vsub.f32 %v13413_v48, %v8746_v20  ;;  %v1998_v25 = vmul.f32 %v8880_v10, %v1843_v13  ;;  %v1846_v48 = vsub.f32 %v13418_v40, %v8746_v20 }
 0x589   :  { %13407 = vst [vmem:[#allocation61_spill] sm:$0xff] %v9849_v11  ;;  %v13415_v11 = vld [vmem:[#allocation9_spill] sm:$0xff]  ;;  %v2532_v37 = vadd.f32 %v2389_v3, %v2245_v62  ;;  %v2655_v13 = vsel %vm2652_vm7, %v2653_v14, %v2654_v6  ;;  %v13421_v3 = vld [vmem:[#allocation39_spill] sm:$0xff]  ;;  %v1850_v14 = vsub.f32 %v13422_v38, %v8746_v20 }
 0x58a   :  { %v1997_v50 = vmul.f32 %v8880_v10, %v13414_v44  ;;  %2137 = vst.msk [vmem:[#allocation2 + $0x120] sm:$0xff] %vm1067_vm2, %v13415_v11  ;;  %v1999_v44 = vmul.f32 %v8880_v10, %v1844_v33  ;;  %v13419_v11 = vld [vmem:[#allocation37_spill] sm:$0xff]  ;;  %v2001_v40 = vmul.f32 %v8880_v10, %v1846_v48 }
 0x58b   :  { %2138 = vst.msk [vmem:[#allocation2 + $0x128] sm:$0xff] %vm1067_vm2, %v13417_v52  ;;  %v1847_v22 = vsub.f32 %v13419_v11, %v8746_v20  ;;  %v13420_v52 = vld [vmem:[#allocation38_spill] sm:$0xff]  ;;  %v2773_v33 = vadd.f32 %v2655_v13, %v2532_v37  ;;  %v2005_v37 = vmul.f32 %v8880_v10, %v1850_v14  ;;  %v13450_v38 = vld [vmem:[#allocation21_spill] sm:$0xff] }
 0x58c   :  { %2139 = vst.msk [vmem:[#allocation2 + $0x130] sm:$0xff] %vm1067_vm2, %v1995_v58  ;;  %v1848_v55 = vsub.f32 %v13420_v52, %v8746_v20  ;;  %v1849_v58 = vsub.f32 %v13421_v3, %v8746_v20  ;;  %v13423_v20 = vld [vmem:[#allocation11_spill] sm:$0xff]  ;;  %v13439_v13 = vld [vmem:[#allocation102_spill] sm:$0xff]  ;;  %v13445_v3 = vld [vmem:[#allocation16_spill] sm:$0xff] }
 0x58d   :  { %2140 = vst.msk [vmem:[#allocation2 + $0x138] sm:$0xff] %vm1067_vm2, %v1996_v21  ;;  %v2002_v62 = vmul.f32 %v8880_v10, %v1847_v22  ;;  %v2821_v11 = vmul.f32 0.25, %v2773_v33  ;;  %v13426_v22 = vld [vmem:[#allocation14_spill] sm:$0xff]  ;;  %v13444_v33 = vld [vmem:[#allocation117_spill] sm:$0xff] }
 0x58e   :  { %2141 = vst.msk [vmem:[#allocation2 + $0x140] sm:$0xff] %vm1067_vm2, %v1997_v50  ;;  %v2003_v21 = vmul.f32 %v8880_v10, %v1848_v55  ;;  %v2004_v48 = vmul.f32 %v8880_v10, %v1849_v58  ;;  %v13424_v10 = vld [vmem:[#allocation12_spill] sm:$0xff]  ;;  %v13425_v55 = vld [vmem:[#allocation13_spill] sm:$0xff]  ;;  %v13441_v52 = vld [vmem:[#allocation106_spill] sm:$0xff] }
 0x58f   :  { %2142 = vst.msk [vmem:[#allocation2 + $0x148] sm:$0xff] %vm1067_vm2, %v1998_v25  ;;  %v9906_v50 = vmax.f32 %v2821_v11, 0.0  ;;  %v13428_v25 = vld [vmem:[#allocation49_spill] sm:$0xff]  ;;  %v13447_v58 = vld [vmem:[#allocation18_spill] sm:$0xff] }
 0x590   :  { %2143 = vst.msk [vmem:[#allocation2 + $0x150] sm:$0xff] %vm1067_vm2, %v1999_v44  ;;  %v13435_v44 = vld [vmem:[#allocation93_spill] sm:$0xff]  ;;  %v13451_v14 = vld [vmem:[#allocation22_spill] sm:$0xff] }
 0x591   :  { %2144 = vst.msk [vmem:[#allocation2 + $0x158] sm:$0xff] %vm1067_vm2, %v2000_v60  ;;  %6584 = vmatmul.msk.f32.vlgmr.msrb.gmra.mxu2 %vm1067_vm2, %v9906_v50  ;;  %v13436_v60 = vld [vmem:[#allocation94_spill] sm:$0xff] }
 0x592   :  { %2145 = vst.msk [vmem:[#allocation2 + $0x160] sm:$0xff] %vm1067_vm2, %v2001_v40  ;;  %v13442_v40 = vld [vmem:[#allocation110_spill] sm:$0xff] }
 0x593   :  { %2146 = vst.msk [vmem:[#allocation2 + $0x168] sm:$0xff] %vm1067_vm2, %v2002_v62  ;;  %v13448_v62 = vld [vmem:[#allocation19_spill] sm:$0xff]  ;;  %v13473_v2 = vld [vmem:[#allocation58_spill] sm:$0xff] }
 0x594   :  { %2147 = vst.msk [vmem:[#allocation2 + $0x170] sm:$0xff] %vm1067_vm2, %v2003_v21 }
 0x595   :  { %2148 = vst.msk [vmem:[#allocation2 + $0x178] sm:$0xff] %vm1067_vm2, %v2004_v48  ;;  %v6618_v48 = vld [vmem:[%s12480_s2 + $0x18] sm:$0x3f] }
 0x596   :  { %2149 = vst.msk [vmem:[#allocation2 + $0x180] sm:$0xff] %vm1067_vm2, %v2005_v37  ;;  %v13471_v37 = vld [vmem:[#allocation55_spill] sm:$0xff] }
 0x597   :  { %2151 = vst.msk [vmem:[#allocation2 + $0x190] sm:$0xff] %vm1067_vm2, %v13423_v20 }
 0x598   :  { %2152 = vst.msk [vmem:[#allocation2 + $0x198] sm:$0xff] %vm1067_vm2, %v13424_v10 }
 0x599   :  { %2153 = vst.msk [vmem:[#allocation2 + $0x1a0] sm:$0xff] %vm1067_vm2, %v13425_v55  ;;  %v2253_v55 = vld [vmem:[#allocation2 + $0x40] ss:$2 sm:$0xff] }
 0x59a   :  { %2157 = vst.msk [vmem:[#allocation2 + $0x1c0] sm:$0xff] %vm1067_vm2, %v13426_v22  ;;  %v13472_v22 = vld [vmem:[#allocation57_spill] sm:$0xff] }
 0x59b   :  { %2160 = vst.msk [vmem:[#allocation2 + $0x1d8] sm:$0xff] %vm1067_vm2, %v13428_v25  ;;  %v2251_v25 = vld [vmem:[#allocation2 + $0x30] ss:$2 sm:$0xff] }
 0x59c   :  { %2168 = vst.msk [vmem:[#allocation2 + $0x218] sm:$0xff] %vm1067_vm2, %v9360_v59  ;;  %v13438_v59 = vld [vmem:[#allocation100_spill] sm:$0xff] }
 0x59d   :  { %2169 = vst.msk [vmem:[#allocation2 + $0x220] sm:$0xff] %vm1067_vm2, %v13433_v24  ;;  %v2399_v24 = vld [vmem:[#allocation2 + $0x51] ss:$2 sm:$0xff] }
 0x59e   :  { %2170 = vst.msk [vmem:[#allocation2 + $0x228] sm:$0xff] %vm1067_vm2, %v9373_v32  ;;  %v13440_v32 = vld [vmem:[#allocation104_spill] sm:$0xff] }
 0x59f   :  { %2171 = vst.msk [vmem:[#allocation2 + $0x230] sm:$0xff] %vm1067_vm2, %v13434_v9  ;;  %v13474_v9 = vld [vmem:[#allocation59_spill] sm:$0xff] }
 0x5a0   :  { %2172 = vst.msk [vmem:[#allocation2 + $0x238] sm:$0xff] %vm1067_vm2, %v13435_v44  ;;  %v2271_v44 = vld [vmem:[#allocation2 + $0xd0] ss:$2 sm:$0xff] }
 0x5a1   :  { %2173 = vst.msk [vmem:[#allocation2 + $0x240] sm:$0xff] %vm1067_vm2, %v13436_v60  ;;  %v2415_v60 = vld [vmem:[#allocation2 + $0xd1] ss:$2 sm:$0xff] }
 0x5a2   :  { %2174 = vst.msk [vmem:[#allocation2 + $0x248] sm:$0xff] %vm1067_vm2, %v9398_v7  ;;  %v13443_v7 = vld [vmem:[#allocation97_spill] sm:$0xff] }
 0x5a3   :  { %2175 = vst.msk [vmem:[#allocation2 + $0x250] sm:$0xff] %vm1067_vm2, %v13437_v49 }
 0x5a4   :  { %2176 = vst.msk [vmem:[#allocation2 + $0x258] sm:$0xff] %vm1067_vm2, %v13438_v59  ;;  %v2395_v59 = vld [vmem:[#allocation2 + $0x31] ss:$2 sm:$0xff] }
 0x5a5   :  { %2177 = vst.msk [vmem:[#allocation2 + $0x260] sm:$0xff] %vm1067_vm2, %v13439_v13  ;;  %v2536_v13 = vadd.f32 %v2397_v43, %v2253_v55  ;;  %v2407_v55 = vld [vmem:[#allocation2 + $0x91] ss:$2 sm:$0xff] }
 0x5a6   :  { %2178 = vst.msk [vmem:[#allocation2 + $0x268] sm:$0xff] %vm1067_vm2, %v9423_v17  ;;  %v13446_v17 = vld [vmem:[#allocation17_spill] sm:$0xff] }
 0x5a7   :  { %2179 = vst.msk [vmem:[#allocation2 + $0x270] sm:$0xff] %vm1067_vm2, %v13440_v32  ;;  %v2537_v32 = vadd.f32 %v2399_v24, %v2255_v31 }
 0x5a8   :  { %2180 = vst.msk [vmem:[#allocation2 + $0x278] sm:$0xff] %vm1067_vm2, %v13441_v52  ;;  %v6600_v52 = vld [vmem:[%s12480_s2 + $0x10] sm:$0x3f] }
 0x5a9   :  { %2181 = vst.msk [vmem:[#allocation2 + $0x280] sm:$0xff] %vm1067_vm2, %v13442_v40  ;;  %v13475_v40 = vld [vmem:[#allocation60_spill] sm:$0xff] }
 0x5aa   :  { %2182 = vst.msk [vmem:[#allocation2 + $0x288] sm:$0xff] %vm1067_vm2, %v9449_v23  ;;  %v13449_v23 = vld [vmem:[#allocation20_spill] sm:$0xff] }
 0x5ab   :  { %2183 = vst.msk [vmem:[#allocation2 + $0x290] sm:$0xff] %vm1067_vm2, %v13443_v7  ;;  %v2273_v7 = vld [vmem:[#allocation2 + $0xe0] ss:$2 sm:$0xff] }
 0x5ac   :  { %2184 = vst.msk [vmem:[#allocation2 + $0x298] sm:$0xff] %vm1067_vm2, %v13444_v33  ;;  %v2417_v33 = vld [vmem:[#allocation2 + $0xe1] ss:$2 sm:$0xff] }
 0x5ad   :  { %2185 = vst.msk [vmem:[#allocation2 + $0x2a0] sm:$0xff] %vm1067_vm2, %v13445_v3 }
 0x5ae   :  { %2186 = vst.msk [vmem:[#allocation2 + $0x2a8] sm:$0xff] %vm1067_vm2, %v9475_v29  ;;  %v2774_v29 = vadd.f32 %v2654_v6, %v9851_v41  ;;  %v13470_v6 = vld [vmem:[#allocation54_spill] sm:$0xff] }
 0x5af   :  { %2187 = vst.msk [vmem:[#allocation2 + $0x2b0] sm:$0xff] %vm1067_vm2, %v13446_v17 }
 0x5b0   :  { %2188 = vst.msk [vmem:[#allocation2 + $0x2b8] sm:$0xff] %vm1067_vm2, %v13447_v58  ;;  %v2259_v58 = vld [vmem:[#allocation2 + $0x70] ss:$2 sm:$0xff] }
 0x5b1   :  { %2189 = vst.msk [vmem:[#allocation2 + $0x2c0] sm:$0xff] %vm1067_vm2, %v13448_v62  ;;  %v13476_v62 = vld [vmem:[#allocation61_spill] sm:$0xff] }
 0x5b2   :  { %2190 = vst.msk [vmem:[#allocation2 + $0x2c8] sm:$0xff] %vm1067_vm2, %v9501_v34  ;;  %v13452_v34 = vld [vmem:[#allocation23_spill] sm:$0xff] }
 0x5b3   :  { %2191 = vst.msk [vmem:[#allocation2 + $0x2d0] sm:$0xff] %vm1067_vm2, %v13449_v23 }
 0x5b4   :  { %2192 = vst.msk [vmem:[#allocation2 + $0x2d8] sm:$0xff] %vm1067_vm2, %v13450_v38  ;;  %v2656_v38 = vrot.slane %v2536_v13, 4 }
 0x5b5   :  { %2193 = vst.msk [vmem:[#allocation2 + $0x2e0] sm:$0xff] %vm1067_vm2, %v13451_v14  ;;  %v2657_v14 = vrot.slane %v2537_v32, 4  ;;  %v2423_v32 = vld [vmem:[#allocation2 + $0x111] ss:$2 sm:$0xff] }
 0x5b6   :  { %2194 = vst.msk [vmem:[#allocation2 + $0x2e8] sm:$0xff] %vm1067_vm2, %v9527_v0  ;;  %v13453_v0 = vld [vmem:[#allocation24_spill] sm:$0xff] }
 0x5b7   :  { %2195 = vst.msk [vmem:[#allocation2 + $0x2f0] sm:$0xff] %vm1067_vm2, %v9533_v56  ;;  %v2822_v56 = vmul.f32 0.25, %v2774_v29  ;;  %v2261_v29 = vld [vmem:[#allocation2 + $0x80] ss:$2 sm:$0xff] }
 0x5b8   :  { %2196 = vst.msk [vmem:[#allocation2 + $0x2f8] sm:$0xff] %vm1067_vm2, %v9539_v54  ;;  %v13454_v54 = vld [vmem:[#allocation25_spill] sm:$0xff] }
 0x5b9   :  { %2197 = vst.msk [vmem:[#allocation2 + $0x300] sm:$0xff] %vm1067_vm2, %v9545_v51  ;;  %v13455_v51 = vld [vmem:[#allocation26_spill] sm:$0xff] }
 0x5ba   :  { %2198 = vst.msk [vmem:[#allocation2 + $0x308] sm:$0xff] %vm1067_vm2, %v9553_v30  ;;  %v13456_v30 = vld [vmem:[#allocation27_spill] sm:$0xff] }
 0x5bb   :  { %2199 = vst.msk [vmem:[#allocation2 + $0x310] sm:$0xff] %vm1067_vm2, %v9559_v36  ;;  %v13457_v36 = vld [vmem:[#allocation28_spill] sm:$0xff] }
 0x5bc   :  { %2200 = vst.msk [vmem:[#allocation2 + $0x318] sm:$0xff] %vm1067_vm2, %v9565_v8  ;;  %v10068_v8 = vmax.f32 %v2822_v56, 0.0  ;;  %v2403_v56 = vld [vmem:[#allocation2 + $0x71] ss:$2 sm:$0xff] }
 0x5bd   :  { %2201 = vst.msk [vmem:[#allocation2 + $0x320] sm:$0xff] %vm1067_vm2, %v9571_v19  ;;  %v13458_v19 = vld [vmem:[#allocation29_spill] sm:$0xff] }
 0x5be   :  { %2202 = vst.msk [vmem:[#allocation2 + $0x328] sm:$0xff] %vm1067_vm2, %v9579_v28  ;;  %v13459_v28 = vld [vmem:[#allocation41_spill] sm:$0xff] }
 0x5bf   :  { %2203 = vst.msk [vmem:[#allocation2 + $0x330] sm:$0xff] %vm1067_vm2, %v9585_v16  ;;  %v13460_v16 = vld [vmem:[#allocation42_spill] sm:$0xff] }
 0x5c0   :  { %2204 = vst.msk [vmem:[#allocation2 + $0x338] sm:$0xff] %vm1067_vm2, %v9591_v26  ;;  %v13461_v26 = vld [vmem:[#allocation43_spill] sm:$0xff] }
 0x5c1   :  { %2205 = vst.msk [vmem:[#allocation2 + $0x340] sm:$0xff] %vm1067_vm2, %v9597_v18  ;;  %v2951_v18 = vrot.slane %v9906_v50, 1 }
 0x5c2   :  { %2206 = vst.msk [vmem:[#allocation2 + $0x348] sm:$0xff] %vm1067_vm2, %v9605_v27  ;;  %v2952_v27 = vrot.slane %v10068_v8, 1 }
 0x5c3   :  { %2207 = vst.msk [vmem:[#allocation2 + $0x350] sm:$0xff] %vm1067_vm2, %v9611_v61  ;;  %v13462_v61 = vld [vmem:[#allocation44_spill] sm:$0xff] }
 0x5c4   :  { %2208 = vst.msk [vmem:[#allocation2 + $0x358] sm:$0xff] %vm1067_vm2, %v9617_v42  ;;  %v13463_v42 = vld [vmem:[#allocation45_spill] sm:$0xff] }
 0x5c5   :  { %2209 = vst.msk [vmem:[#allocation2 + $0x360] sm:$0xff] %vm1067_vm2, %v9623_v35  ;;  %v13464_v35 = vld [vmem:[#allocation46_spill] sm:$0xff] }
 0x5c6   :  { %2210 = vst.msk [vmem:[#allocation2 + $0x368] sm:$0xff] %vm1067_vm2, %v9631_v5  ;;  %v13465_v5 = vld [vmem:[#allocation47_spill] sm:$0xff] }
 0x5c7   :  { %2211 = vst.msk [vmem:[#allocation2 + $0x370] sm:$0xff] %vm1067_vm2, %v9637_v1  ;;  %v2953_v1 = vsel %vm2950_vm8, %v2951_v18, %v2952_v27 }
 0x5c8   :  { %2212 = vst.msk [vmem:[#allocation2 + $0x378] sm:$0xff] %vm1067_vm2, %v9643_v46  ;;  %v13466_v46 = vld [vmem:[#allocation48_spill] sm:$0xff] }
 0x5c9   :  { %2213 = vst.msk [vmem:[#allocation2 + $0x380] sm:$0xff] %vm1067_vm2, %v9649_v39  ;;  %v6565_v39 = vld [vmem:[%s12480_s2 + $0x8] sm:$0x3f] }
 0x5ca   :  { %2214 = vst.msk [vmem:[#allocation2 + $0x388] sm:$0xff] %vm1067_vm2, %v9657_v4  ;;  %v13467_v4 = vld [vmem:[#allocation51_spill] sm:$0xff]  ;;  %6566 = vmatpush.msk.msra.mxu1 %vm3033_vm6, %v6565_v39  ;;  %7064 = vmatpush.msk.msra.mxu3 %vm3033_vm6, %v6565_v39 }
 0x5cb   :  { %2215 = vst.msk [vmem:[#allocation2 + $0x390] sm:$0xff] %vm1067_vm2, %v9663_v63  ;;  %v13468_v63 = vld [vmem:[#allocation52_spill] sm:$0xff]  ;;  %6567 = vmatmul.msk.f32.vlgmr.msra.gmra.mxu1 %vm1067_vm2, %v2953_v1 }
 0x5cc   :  { %2216 = vst.msk [vmem:[#allocation2 + $0x398] sm:$0xff] %vm1067_vm2, %v9669_v53  ;;  %6619 = vmatpush.msk.msrb.mxu1 %vm3033_vm6, %v6618_v48  ;;  %6601 = vmatpush.msk.msrb.mxu3 %vm3033_vm6, %v6600_v52 }
 0x5cd   :  { %2217 = vst.msk [vmem:[#allocation2 + $0x3a0] sm:$0xff] %vm1067_vm2, %v9675_v47 }
 0x5ce   :  { %2218 = vst.msk [vmem:[#allocation2 + $0x3a8] sm:$0xff] %vm1067_vm2, %v9683_v45  ;;  %v13469_v45 = vld [vmem:[#allocation53_spill] sm:$0xff] }
 0x5cf   :  { %2219 = vst.msk [vmem:[#allocation2 + $0x3b0] sm:$0xff] %vm1067_vm2, %v13452_v34 }
 0x5d0   :  { %2220 = vst.msk [vmem:[#allocation2 + $0x3b8] sm:$0xff] %vm1067_vm2, %v13453_v0  ;;  %v2535_v0 = vadd.f32 %v2395_v59, %v2251_v25 }
 0x5d1   :  { %2221 = vst.msk [vmem:[#allocation2 + $0x3c0] sm:$0xff] %vm1067_vm2, %v13454_v54  ;;  %v2405_v54 = vld [vmem:[#allocation2 + $0x81] ss:$2 sm:$0xff] }
 0x5d2   :  { %2222 = vst.msk [vmem:[#allocation2 + $0x3c8] sm:$0xff] %vm1067_vm2, %v13455_v51 }
 0x5d3   :  { %2223 = vst.msk [vmem:[#allocation2 + $0x3d0] sm:$0xff] %vm1067_vm2, %v13456_v30  ;;  %v2359_v57 = vld [vmem:[#allocation2 + $0x390] ss:$2 sm:$0xff]  ;;  %v2503_v20 = vld [vmem:[#allocation2 + $0x391] ss:$2 sm:$0xff]  ;;  %v2658_v30 = vsel %vm2652_vm7, %v2656_v38, %v2657_v14 }
 0x5d4   :  { %2224 = vst.msk [vmem:[#allocation2 + $0x3d8] sm:$0xff] %vm1067_vm2, %v13457_v36  ;;  %v2589_v49 = vadd.f32 %v2503_v20, %v2359_v57  ;;  %v2776_v36 = vadd.f32 %v2657_v14, %v2536_v13  ;;  %v2775_v27 = vadd.f32 %v2658_v30, %v2535_v0  ;;  %v2421_v13 = vld [vmem:[#allocation2 + $0x101] ss:$2 sm:$0xff] }
 0x5d5   :  { %2225 = vst.msk [vmem:[#allocation2 + $0x3e0] sm:$0xff] %vm1067_vm2, %v13458_v19  ;;  %v2361_v53 = vld [vmem:[#allocation2 + $0x3a0] ss:$2 sm:$0xff]  ;;  %v2505_v41 = vld [vmem:[#allocation2 + $0x3a1] ss:$2 sm:$0xff] }
 0x5d6   :  { %2226 = vst.msk [vmem:[#allocation2 + $0x3e8] sm:$0xff] %vm1067_vm2, %v13459_v28  ;;  %v2590_v11 = vadd.f32 %v2505_v41, %v2361_v53  ;;  %v2257_v19 = vld [vmem:[#allocation2 + $0x60] ss:$2 sm:$0xff]  ;;  %v2539_v28 = vadd.f32 %v2403_v56, %v2259_v58  ;;  %v2823_v53 = vmul.f32 0.25, %v2775_v27  ;;  %v2413_v38 = vld [vmem:[#allocation2 + $0xc1] ss:$2 sm:$0xff] }
 0x5d7   :  { %2227 = vst.msk [vmem:[#allocation2 + $0x3f0] sm:$0xff] %vm1067_vm2, %v13460_v16  ;;  %v2363_v47 = vld [vmem:[#allocation2 + $0x3b0] ss:$2 sm:$0xff]  ;;  %v2507_v21 = vld [vmem:[#allocation2 + $0x3b1] ss:$2 sm:$0xff] }
 0x5d8   :  { %2228 = vst.msk [vmem:[#allocation2 + $0x3f8] sm:$0xff] %vm1067_vm2, %v13461_v26  ;;  %v2591_v10 = vadd.f32 %v2507_v21, %v2363_v47  ;;  %v2710_v12 = vrot.slane %v2590_v11, 4  ;;  %v2265_v16 = vld [vmem:[#allocation2 + $0xa0] ss:$2 sm:$0xff]  ;;  %v10127_v26 = vadd.f32 %v2415_v60, %v2271_v44  ;;  %v2659_v39 = vrot.slane %v2539_v28, 4 }
 0x5d9   :  { %2229 = vst.msk [vmem:[#allocation2 + $0x400] sm:$0xff] %vm1067_vm2, %v13462_v61  ;;  %v2401_v61 = vld [vmem:[#allocation2 + $0x61] ss:$2 sm:$0xff]  ;;  %v10139_v48 = vmax.f32 %v2823_v53, 0.0 }
 0x5da   :  { %2230 = vst.msk [vmem:[#allocation2 + $0x408] sm:$0xff] %vm1067_vm2, %v13463_v42  ;;  %v2711_v15 = vrot.slane %v2591_v10, 4  ;;  %v2540_v42 = vadd.f32 %v2405_v54, %v2261_v29  ;;  %v2538_v21 = vadd.f32 %v2401_v61, %v2257_v19  ;;  %v2263_v10 = vld [vmem:[#allocation2 + $0x90] ss:$2 sm:$0xff]  ;;  %v2665_v44 = vrot.slane %v10127_v26, 4 }
 0x5db   :  { %2231 = vst.msk [vmem:[#allocation2 + $0x410] sm:$0xff] %vm1067_vm2, %v13464_v35  ;;  %v2267_v35 = vld [vmem:[#allocation2 + $0xb0] ss:$2 sm:$0xff]  ;;  %6585 = vmatmul.msk.f32.gmra.mxu2 %vm1067_vm2, %v10139_v48  ;;  %v2541_v59 = vadd.f32 %v2407_v55, %v2263_v10 }
 0x5dc   :  { %2232 = vst.msk [vmem:[#allocation2 + $0x418] sm:$0xff] %vm1067_vm2, %v13465_v5  ;;  %v2712_v3 = vsel %vm2652_vm7, %v2710_v12, %v2711_v15  ;;  %v2812_v17 = vadd.f32 %v2711_v15, %v2590_v11  ;;  %v10131_v5 = vadd.f32 %v2417_v33, %v2273_v7  ;;  %v2660_v47 = vrot.slane %v2540_v42, 4  ;;  %v2283_v19 = vld [vmem:[#allocation2 + $0x130] ss:$2 sm:$0xff]  ;;  %v2427_v42 = vld [vmem:[#allocation2 + $0x131] ss:$2 sm:$0xff] }
 0x5dd   :  { %2233 = vst.msk [vmem:[#allocation2 + $0x420] sm:$0xff] %vm1067_vm2, %v13466_v46  ;;  %v2811_v23 = vadd.f32 %v2712_v3, %v2589_v49  ;;  %v2824_v46 = vmul.f32 0.25, %v2776_v36  ;;  %v2954_v15 = vrot.slane %v10139_v48, 1  ;;  %v3203_v3 = vrot.slane %v10068_v8, 2 }
 0x5de   :  { %2234 = vst.msk [vmem:[#allocation2 + $0x428] sm:$0xff] %vm1067_vm2, %v13467_v4  ;;  %v2860_v34 = vmul.f32 0.25, %v2812_v17  ;;  %v2409_v4 = vld [vmem:[#allocation2 + $0xa1] ss:$2 sm:$0xff]  ;;  %v2778_v20 = vadd.f32 %v2660_v47, %v2539_v28  ;;  %v2666_v60 = vrot.slane %v10131_v5, 4 }
 0x5df   :  { %2235 = vst.msk [vmem:[#allocation2 + $0x430] sm:$0xff] %vm1067_vm2, %v13468_v63  ;;  %v2859_v51 = vmul.f32 0.25, %v2811_v23  ;;  %v2542_v57 = vadd.f32 %v2409_v4, %v2265_v16  ;;  %v2269_v23 = vld [vmem:[#allocation2 + $0xc0] ss:$2 sm:$0xff] }
 0x5e0   :  { %2236 = vst.msk [vmem:[#allocation2 + $0x438] sm:$0xff] %vm1067_vm2, %v13469_v45  ;;  %v10129_v18 = vmax.f32 %v2860_v34, 0.0  ;;  %v2411_v45 = vld [vmem:[#allocation2 + $0xb1] ss:$2 sm:$0xff]  ;;  %v2826_v43 = vmul.f32 0.25, %v2778_v20  ;;  %v2667_v34 = vsel %vm2652_vm7, %v2665_v44, %v2666_v60  ;;  %v2544_v30 = vadd.f32 %v2413_v38, %v2269_v23 }
 0x5e1   :  { %2237 = vst.msk [vmem:[#allocation2 + $0x440] sm:$0xff] %vm1067_vm2, %v13470_v6  ;;  %v10133_v1 = vmax.f32 %v2859_v51, 0.0  ;;  %v10137_v6 = vmax.f32 %v2824_v46, 0.0  ;;  %v2543_v11 = vadd.f32 %v2411_v45, %v2267_v35  ;;  %v2285_v28 = vld [vmem:[#allocation2 + $0x140] ss:$2 sm:$0xff]  ;;  %v2782_v4 = vadd.f32 %v2666_v60, %v10127_v26 }
 0x5e2   :  { %2238 = vst.msk [vmem:[#allocation2 + $0x448] sm:$0xff] %vm1067_vm2, %v13471_v37  ;;  %v2997_v63 = vrot.slane %v10129_v18, 1  ;;  %v2661_v37 = vsel %vm2652_vm7, %v2659_v39, %v2660_v47  ;;  %v10157_v7 = vmax.f32 %v2826_v43, 0.0  ;;  %v2781_v61 = vadd.f32 %v2667_v34, %v2544_v30  ;;  %v2429_v35 = vld [vmem:[#allocation2 + $0x141] ss:$2 sm:$0xff] }
 0x5e3   :  { %2239 = vst.msk [vmem:[#allocation2 + $0x450] sm:$0xff] %vm1067_vm2, %v13472_v22  ;;  %v2996_v41 = vrot.slane %v10133_v1, 1  ;;  %v2662_v22 = vrot.slane %v2542_v57, 4  ;;  %v2955_v25 = vrot.slane %v10137_v6, 1  ;;  %v2777_v31 = vadd.f32 %v2661_v37, %v2538_v21  ;;  %v2275_v47 = vld [vmem:[#allocation2 + $0xf0] ss:$2 sm:$0xff] }
 0x5e4   :  { %2240 = vst.msk [vmem:[#allocation2 + $0x458] sm:$0xff] %vm1067_vm2, %v13473_v2  ;;  %v2277_v2 = vld [vmem:[#allocation2 + $0x100] ss:$2 sm:$0xff]  ;;  %v2663_v24 = vrot.slane %v2543_v11, 4  ;;  %v2958_v56 = vrot.slane %v10157_v7, 1  ;;  %v3206_v53 = vrot.slane %v10137_v6, 2 }
 0x5e5   :  { %2241 = vst.msk [vmem:[#allocation2 + $0x460] sm:$0xff] %vm1067_vm2, %v13474_v9  ;;  %v10143_v12 = vsel %vm2950_vm8, %v2996_v41, %v2997_v63  ;;  %v2279_v9 = vld [vmem:[#allocation2 + $0x110] ss:$2 sm:$0xff]  ;;  %v2825_v49 = vmul.f32 0.25, %v2777_v31  ;;  %v10154_v52 = vsel %vm2950_vm8, %v2954_v15, %v2955_v25  ;;  %v2548_v14 = vadd.f32 %v2421_v13, %v2277_v2  ;;  %v2419_v45 = vld [vmem:[#allocation2 + $0xf1] ss:$2 sm:$0xff] }
 0x5e6   :  { %2242 = vst.msk [vmem:[#allocation2 + $0x468] sm:$0xff] %vm1067_vm2, %v13475_v40  ;;  %6582 = vmatmul.msk.f32.vlgmr.msra.gmra.mxu3 %vm1067_vm2, %v10143_v12  ;;  %v3202_v40 = vrot.slane %v9906_v50, 2  ;;  %v2664_v33 = vsel %vm2652_vm7, %v2662_v22, %v2663_v24  ;;  %6568 = vmatmul.msk.f32.gmra.mxu1 %vm1067_vm2, %v10154_v52  ;;  %v2549_v29 = vadd.f32 %v2423_v32, %v2279_v9  ;;  %v3205_v63 = vrot.slane %v10139_v48, 2  ;;  %v2289_v22 = vld [vmem:[#allocation2 + $0x160] ss:$2 sm:$0xff] }
 0x5e7   :  { %2243 = vst.msk [vmem:[#allocation2 + $0x470] sm:$0xff] %vm1067_vm2, %v13476_v62  ;;  %v10163_v17 = vmax.f32 %v2825_v49, 0.0  ;;  %v2779_v58 = vadd.f32 %v2664_v33, %v2541_v59  ;;  %v2780_v62 = vadd.f32 %v2663_v24, %v2542_v57  ;;  %v2668_v16 = vrot.slane %v2548_v14, 4  ;;  %v2291_v25 = vld [vmem:[#allocation2 + $0x170] ss:$2 sm:$0xff] }
 0x5e8   :  { %13477 = vst [vmem:[#allocation62_spill] sm:$0xff] %v10143_v12  ;;  %v3204_v36 = vsel %vm3033_vm6, %v3202_v40, %v3203_v3  ;;  %v2669_v27 = vrot.slane %v2549_v29, 4  ;;  %v2551_v57 = vadd.f32 %v2427_v42, %v2283_v19  ;;  %v2552_v41 = vadd.f32 %v2429_v35, %v2285_v28  ;;  %v2433_v43 = vld [vmem:[#allocation2 + $0x161] ss:$2 sm:$0xff]  ;;  %v2435_v24 = vld [vmem:[#allocation2 + $0x171] ss:$2 sm:$0xff] }
 0x5e9   :  { %13478 = vst [vmem:[#allocation64_spill] sm:$0xff] %v10163_v17  ;;  %v2957_v0 = vrot.slane %v10163_v17, 1  ;;  %v2827_v54 = vmul.f32 0.25, %v2779_v58  ;;  %v2828_v51 = vmul.f32 0.25, %v2780_v62  ;;  %6586 = vmatmul.msk.f32.gmra.mxu2 %vm1067_vm2, %v10163_v17  ;;  %v2829_v20 = vmul.f32 0.25, %v2781_v61 }
 0x5ea   :  { %v2670_v21 = vsel %vm2652_vm7, %v2668_v16, %v2669_v27  ;;  %v2830_v10 = vmul.f32 0.25, %v2782_v4  ;;  %v2547_v26 = vadd.f32 %v2419_v45, %v2275_v47  ;;  %v10188_v55 = vsel %vm3033_vm6, %v3205_v63, %v3206_v53  ;;  %v2281_v32 = vld [vmem:[#allocation2 + $0x120] ss:$2 sm:$0xff]  ;;  %v2425_v40 = vld [vmem:[#allocation2 + $0x121] ss:$2 sm:$0xff] }
 0x5eb   :  { %v10173_v5 = vsel %vm2950_vm8, %v2957_v0, %v2958_v56  ;;  %v10175_v46 = vmax.f32 %v2827_v54, 0.0  ;;  %v10177_v39 = vmax.f32 %v2828_v51, 0.0  ;;  %v2671_v31 = vrot.slane %v2551_v57, 4  ;;  %v2287_v51 = vld [vmem:[#allocation2 + $0x150] ss:$2 sm:$0xff] }
 0x5ec   :  { %v2672_v2 = vrot.slane %v2552_v41, 4  ;;  %v2783_v15 = vadd.f32 %v2670_v21, %v2547_v26  ;;  %v10197_v44 = vmax.f32 %v2829_v20, 0.0  ;;  %v10199_v60 = vmax.f32 %v2830_v10, 0.0  ;;  %v2431_v16 = vld [vmem:[#allocation2 + $0x151] ss:$2 sm:$0xff] }
 0x5ed   :  { %13479 = vst [vmem:[#allocation65_spill] sm:$0xff] %v10175_v46  ;;  %v2960_v11 = vrot.slane %v10175_v46, 1  ;;  %v2961_v37 = vrot.slane %v10177_v39, 1  ;;  %v2784_v49 = vadd.f32 %v2669_v27, %v2548_v14  ;;  %v3208_v59 = vrot.slane %v10163_v17, 2  ;;  %v2319_v42 = vld [vmem:[#allocation2 + $0x250] ss:$2 sm:$0xff] }
 0x5ee   :  { %6602 = vmatmul.msk.f32.vlgmr.msrb.gmra.mxu3 %vm1067_vm2, %v3204_v36  ;;  %6569 = vmatmul.msk.f32.gmra.mxu1 %vm1067_vm2, %v10173_v5  ;;  %13481 = vst [vmem:[#allocation67_spill] sm:$0xff] %v10197_v44  ;;  %v3209_v13 = vrot.slane %v10157_v7, 2  ;;  %v2554_v33 = vadd.f32 %v2433_v43, %v2289_v22  ;;  %v2555_v3 = vadd.f32 %v2435_v24, %v2291_v25  ;;  %v2963_v62 = vrot.slane %v10197_v44, 1  ;;  %v2321_v35 = vld [vmem:[#allocation2 + $0x260] ss:$2 sm:$0xff] }
 0x5ef   :  { %v10195_v9 = vsel %vm2950_vm8, %v2960_v11, %v2961_v37  ;;  %v2673_v58 = vsel %vm2652_vm7, %v2671_v31, %v2672_v2  ;;  %v2964_v23 = vrot.slane %v10199_v60, 1  ;;  %v2831_v38 = vmul.f32 0.25, %v2783_v15  ;;  %v2463_v4 = vld [vmem:[#allocation2 + $0x251] ss:$2 sm:$0xff]  ;;  %v2465_v63 = vld [vmem:[#allocation2 + $0x261] ss:$2 sm:$0xff] }
 0x5f0   :  { %13480 = vst [vmem:[#allocation66_spill] sm:$0xff] %v10195_v9  ;;  %v2832_v29 = vmul.f32 0.25, %v2784_v49  ;;  %v2550_v14 = vadd.f32 %v2425_v40, %v2281_v32  ;;  %v10209_v34 = vsel %vm3033_vm6, %v3208_v59, %v3209_v13  ;;  %v2674_v0 = vrot.slane %v2554_v33, 4  ;;  %v2327_v15 = vld [vmem:[#allocation2 + $0x290] ss:$2 sm:$0xff] }
 0x5f1   :  { %6587 = vmatmul.msk.f32.gmra.mxu2 %vm1067_vm2, %v10175_v46  ;;  %v2786_v54 = vadd.f32 %v2672_v2, %v2551_v57  ;;  %v2675_v30 = vrot.slane %v2555_v3, 4  ;;  %v10216_v36 = vsel %vm2950_vm8, %v2963_v62, %v2964_v23  ;;  %v10218_v19 = vmax.f32 %v2831_v38, 0.0  ;;  %v2325_v2 = vld [vmem:[#allocation2 + $0x280] ss:$2 sm:$0xff]  ;;  %v2469_v43 = vld [vmem:[#allocation2 + $0x281] ss:$2 sm:$0xff] }
 0x5f2   :  { %v2785_v56 = vadd.f32 %v2673_v58, %v2550_v14  ;;  %13482 = vst [vmem:[#allocation68_spill] sm:$0xff] %v10216_v36  ;;  %v10220_v28 = vmax.f32 %v2832_v29, 0.0  ;;  %v3211_v27 = vrot.slane %v10175_v46, 2  ;;  %v3212_v61 = vrot.slane %v10177_v39, 2  ;;  %v2471_v32 = vld [vmem:[#allocation2 + $0x291] ss:$2 sm:$0xff] }
 0x5f3   :  { %13483 = vst [vmem:[#allocation69_spill] sm:$0xff] %v10218_v19  ;;  %v2834_v47 = vmul.f32 0.25, %v2786_v54  ;;  %v2966_v45 = vrot.slane %v10218_v19, 1  ;;  %v2676_v41 = vsel %vm2652_vm7, %v2674_v0, %v2675_v30  ;;  %v2553_v21 = vadd.f32 %v2431_v16, %v2287_v51  ;;  %v2317_v40 = vld [vmem:[#allocation2 + $0x240] ss:$2 sm:$0xff] }
 0x5f4   :  { %v2833_v53 = vmul.f32 0.25, %v2785_v56  ;;  %v2967_v57 = vrot.slane %v10220_v28, 1  ;;  %v10230_v11 = vsel %vm3033_vm6, %v3211_v27, %v3212_v61  ;;  %v2569_v37 = vadd.f32 %v2463_v4, %v2319_v42  ;;  %v2461_v23 = vld [vmem:[#allocation2 + $0x241] ss:$2 sm:$0xff]  ;;  %v2475_v4 = vld [vmem:[#allocation2 + $0x2b1] ss:$2 sm:$0xff] }
 0x5f5   :  { %v2570_v20 = vadd.f32 %v2465_v63, %v2321_v35  ;;  %v10238_v26 = vmax.f32 %v2834_v47, 0.0  ;;  %v2787_v22 = vadd.f32 %v2676_v41, %v2553_v21  ;;  %v2788_v25 = vadd.f32 %v2675_v30, %v2554_v33  ;;  %v2331_v35 = vld [vmem:[#allocation2 + $0x2b0] ss:$2 sm:$0xff]  ;;  %v2333_v47 = vld [vmem:[#allocation2 + $0x2c0] ss:$2 sm:$0xff] }
 0x5f6   :  { %6603 = vmatmul.msk.f32.gmra.mxu3 %vm1067_vm2, %v10188_v55  ;;  %6570 = vmatmul.msk.f32.gmra.mxu1 %vm1067_vm2, %v10195_v9  ;;  %v10236_v10 = vmax.f32 %v2833_v53, 0.0  ;;  %v10241_v31 = vsel %vm2950_vm8, %v2966_v45, %v2967_v57  ;;  %v3214_v24 = vrot.slane %v10197_v44, 2  ;;  %v3215_v49 = vrot.slane %v10199_v60, 2  ;;  %v2477_v45 = vld [vmem:[#allocation2 + $0x2c1] ss:$2 sm:$0xff] }
 0x5f7   :  { %13485 = vst [vmem:[#allocation71_spill] sm:$0xff] %v10241_v31  ;;  %v2689_v59 = vrot.slane %v2569_v37, 4  ;;  %v2690_v13 = vrot.slane %v2570_v20, 4  ;;  %v2970_v33 = vrot.slane %v10238_v26, 1  ;;  %v2835_v58 = vmul.f32 0.25, %v2787_v22 }
 0x5f8   :  { %13484 = vst [vmem:[#allocation70_spill] sm:$0xff] %v10236_v10  ;;  %v2969_v3 = vrot.slane %v10236_v10, 1  ;;  %v2836_v62 = vmul.f32 0.25, %v2788_v25  ;;  %v2572_v38 = vadd.f32 %v2469_v43, %v2325_v2  ;;  %v2573_v29 = vadd.f32 %v2471_v32, %v2327_v15  ;;  %v2323_v57 = vld [vmem:[#allocation2 + $0x270] ss:$2 sm:$0xff] }
 0x5f9   :  { %6588 = vmatmul.msk.f32.gmra.mxu2 %vm1067_vm2, %v10197_v44  ;;  %v10250_v14 = vsel %vm3033_vm6, %v3214_v24, %v3215_v49  ;;  %v2691_v0 = vsel %vm2652_vm7, %v2689_v59, %v2690_v13  ;;  %v2568_v56 = vadd.f32 %v2461_v23, %v2317_v40  ;;  %v10260_v51 = vmax.f32 %v2835_v58, 0.0  ;;  %v2467_v41 = vld [vmem:[#allocation2 + $0x271] ss:$2 sm:$0xff]  ;;  %v2337_v58 = vld [vmem:[#allocation2 + $0x2e0] ss:$2 sm:$0xff] }
 0x5fa   :  { %13486 = vst [vmem:[#allocation72_spill] sm:$0xff] %v10250_v14  ;;  %v10258_v54 = vsel %vm2950_vm8, %v2969_v3, %v2970_v33  ;;  %v10262_v30 = vmax.f32 %v2836_v62, 0.0  ;;  %v2798_v27 = vadd.f32 %v2690_v13, %v2569_v37  ;;  %v2692_v61 = vrot.slane %v2572_v38, 4  ;;  %v2329_v3 = vld [vmem:[#allocation2 + $0x2a0] ss:$2 sm:$0xff] }
 0x5fb   :  { %13487 = vst [vmem:[#allocation73_spill] sm:$0xff] %v10258_v54  ;;  %v2797_v16 = vadd.f32 %v2691_v0, %v2568_v56  ;;  %v2693_v42 = vrot.slane %v2573_v29, 4  ;;  %v3217_v63 = vrot.slane %v10218_v19, 2  ;;  %v3218_v53 = vrot.slane %v10220_v28, 2  ;;  %v2473_v33 = vld [vmem:[#allocation2 + $0x2a1] ss:$2 sm:$0xff] }
 0x5fc   :  { %13488 = vst [vmem:[#allocation74_spill] sm:$0xff] %v10260_v51  ;;  %v2972_v21 = vrot.slane %v10260_v51, 1  ;;  %v2973_v20 = vrot.slane %v10262_v30, 1  ;;  %v2575_v37 = vadd.f32 %v2475_v4, %v2331_v35  ;;  %v2846_v25 = vmul.f32 0.25, %v2798_v27  ;;  %v2481_v56 = vld [vmem:[#allocation2 + $0x2e1] ss:$2 sm:$0xff] }
 0x5fd   :  { %v2845_v22 = vmul.f32 0.25, %v2797_v16  ;;  %v2694_v2 = vsel %vm2652_vm7, %v2692_v61, %v2693_v42  ;;  %v2576_v15 = vadd.f32 %v2477_v45, %v2333_v47  ;;  %v10272_v43 = vsel %vm3033_vm6, %v3217_v63, %v3218_v53  ;;  %v2339_v61 = vld [vmem:[#allocation2 + $0x2f0] ss:$2 sm:$0xff]  ;;  %v2483_v35 = vld [vmem:[#allocation2 + $0x2f1] ss:$2 sm:$0xff] }
 0x5fe   :  { %6604 = vmatmul.msk.f32.gmra.mxu3 %vm1067_vm2, %v10209_v34  ;;  %6571 = vmatmul.msk.f32.gmra.mxu1 %vm1067_vm2, %v10216_v36  ;;  %13489 = vst [vmem:[#allocation75_spill] sm:$0xff] %v10272_v43  ;;  %v2571_v24 = vadd.f32 %v2467_v41, %v2323_v57  ;;  %v3220_v49 = vrot.slane %v10236_v10, 2  ;;  %v3221_v59 = vrot.slane %v10238_v26, 2  ;;  %v10281_v13 = vsel %vm2950_vm8, %v2972_v21, %v2973_v20  ;;  %v2493_v12 = vld [vmem:[#allocation2 + $0x341] ss:$2 sm:$0xff] }
 0x5ff   :  { %13490 = vst [vmem:[#allocation76_spill] sm:$0xff] %v10281_v13  ;;  %v2800_v40 = vadd.f32 %v2693_v42, %v2572_v38  ;;  %v10283_v62 = vmax.f32 %v2845_v22, 0.0  ;;  %v10285_v23 = vmax.f32 %v2846_v25, 0.0  ;;  %v2695_v29 = vrot.slane %v2575_v37, 4 }
 0x600   :  { %v2799_v32 = vadd.f32 %v2694_v2, %v2571_v24  ;;  %v2696_v0 = vrot.slane %v2576_v15, 4  ;;  %v10290_v16 = vsel %vm3033_vm6, %v3220_v49, %v3221_v59  ;;  %v2574_v27 = vadd.f32 %v2473_v33, %v2329_v3  ;;  %v2343_v24 = vld [vmem:[#allocation2 + $0x310] ss:$2 sm:$0xff] }
 0x601   :  { %6589 = vmatmul.msk.f32.gmra.mxu2 %vm1067_vm2, %v10218_v19  ;;  %13491 = vst [vmem:[#allocation77_spill] sm:$0xff] %v10290_v16  ;;  %v2848_v42 = vmul.f32 0.25, %v2800_v40  ;;  %v2578_v4 = vadd.f32 %v2481_v56, %v2337_v58  ;;  %v2975_v63 = vrot.slane %v10283_v62, 1  ;;  %v2976_v53 = vrot.slane %v10285_v23, 1  ;;  %v2297_v40 = vld [vmem:[#allocation2 + $0x1a0] ss:$2 sm:$0xff] }
 0x602   :  { %v2847_v38 = vmul.f32 0.25, %v2799_v32  ;;  %v2697_v47 = vsel %vm2652_vm7, %v2695_v29, %v2696_v0  ;;  %v3393_v45 = vrot.slane %v10283_v62, 3  ;;  %v2579_v57 = vadd.f32 %v2483_v35, %v2339_v61  ;;  %v2441_v29 = vld [vmem:[#allocation2 + $0x1a1] ss:$2 sm:$0xff]  ;;  %v2487_v56 = vld [vmem:[#allocation2 + $0x311] ss:$2 sm:$0xff] }
 0x603   :  { %v3394_v41 = vrot.slane %v10285_v23, 3  ;;  %v3559_v21 = vrot.slane %v10283_v62, 4  ;;  %v3560_v20 = vrot.slane %v10285_v23, 4  ;;  %v2801_v22 = vadd.f32 %v2697_v47, %v2574_v27  ;;  %v2489_v27 = vld [vmem:[#allocation2 + $0x321] ss:$2 sm:$0xff] }
 0x604   :  { %v2802_v25 = vadd.f32 %v2696_v0, %v2575_v37  ;;  %v2977_v49 = vsel %vm2950_vm8, %v2975_v63, %v2976_v53  ;;  %v10310_v59 = vmax.f32 %v2847_v38, 0.0  ;;  %v10312_v32 = vmax.f32 %v2848_v42, 0.0  ;;  %v2345_v0 = vld [vmem:[#allocation2 + $0x320] ss:$2 sm:$0xff]  ;;  %v2335_v63 = vld [vmem:[#allocation2 + $0x2d0] ss:$2 sm:$0xff] }
 0x605   :  { %v10304_v2 = vsel %vm3368_vm9, %v3393_v45, %v3394_v41  ;;  %v10307_v15 = vsel %vm2652_vm7, %v3559_v21, %v3560_v20  ;;  %v3223_v3 = vrot.slane %v10260_v51, 2  ;;  %v3224_v37 = vrot.slane %v10262_v30, 2  ;;  %v2479_v38 = vld [vmem:[#allocation2 + $0x2d1] ss:$2 sm:$0xff]  ;;  %v2349_v20 = vld [vmem:[#allocation2 + $0x340] ss:$2 sm:$0xff] }
 0x606   :  { %6605 = vmatmul.msk.f32.gmra.mxu3 %vm1067_vm2, %v10230_v11  ;;  %6572 = vmatmul.msk.f32.gmra.mxu1 %vm1067_vm2, %v10241_v31  ;;  %v2698_v33 = vrot.slane %v2578_v4, 4  ;;  %v2699_v58 = vrot.slane %v2579_v57, 4  ;;  %v2849_v61 = vmul.f32 0.25, %v2801_v22  ;;  %v2850_v35 = vmul.f32 0.25, %v2802_v25  ;;  %v2495_v22 = vld [vmem:[#allocation2 + $0x351] ss:$2 sm:$0xff] }
 0x607   :  { %v2978_v42 = vrot.slane %v10310_v59, 1  ;;  %v2979_v53 = vrot.slane %v10312_v32, 1  ;;  %v10319_v47 = vadd.f32 %v2441_v29, %v2297_v40  ;;  %v2581_v45 = vadd.f32 %v2487_v56, %v2343_v24  ;;  %v2295_v29 = vld [vmem:[#allocation2 + $0x190] ss:$2 sm:$0xff] }
 0x608   :  { %v2582_v41 = vadd.f32 %v2489_v27, %v2345_v0  ;;  %v10322_v21 = vsel %vm3033_vm6, %v3223_v3, %v3224_v37  ;;  %v2700_v57 = vsel %vm2652_vm7, %v2698_v33, %v2699_v58  ;;  %v2577_v25 = vadd.f32 %v2479_v38, %v2335_v63  ;;  %v2439_v3 = vld [vmem:[#allocation2 + $0x191] ss:$2 sm:$0xff]  ;;  %v2369_v27 = vld [vmem:[#allocation2 + $0x3e0] ss:$2 sm:$0xff]  ;;  %v2367_v63 = vld [vmem:[#allocation2 + $0x3d0] ss:$2 sm:$0xff] }
 0x609   :  { %6590 = vmatmul.msk.f32.gmra.mxu2 %vm1067_vm2, %v10236_v10  ;;  %13492 = vst [vmem:[#allocation78_spill] sm:$0xff] %v10322_v21  ;;  %v10329_v40 = vmax.f32 %v2849_v61, 0.0  ;;  %v10331_v24 = vmax.f32 %v2850_v35, 0.0  ;;  %v10334_v37 = vsel %vm2950_vm8, %v2978_v42, %v2979_v53  ;;  %v2804_v0 = vadd.f32 %v2699_v58, %v2578_v4  ;;  %v2511_v38 = vld [vmem:[#allocation2 + $0x3d1] ss:$2 sm:$0xff] }
 0x60a   :  { %13494 = vst [vmem:[#allocation80_spill] sm:$0xff] %v10334_v37  ;;  %v2803_v33 = vadd.f32 %v2700_v57, %v2577_v25  ;;  %v3226_v61 = vrot.slane %v10283_v62, 2  ;;  %v3227_v35 = vrot.slane %v10285_v23, 2  ;;  %v2341_v42 = vld [vmem:[#allocation2 + $0x300] ss:$2 sm:$0xff]  ;;  %v2584_v4 = vadd.f32 %v2493_v12, %v2349_v20 }
 0x60b   :  { %13493 = vst [vmem:[#allocation79_spill] sm:$0xff] %v10329_v40  ;;  %v2485_v53 = vld [vmem:[#allocation2 + $0x301] ss:$2 sm:$0xff]  ;;  %v2982_v57 = vrot.slane %v10331_v24, 1 }
 0x60c   :  { %v2851_v56 = vmul.f32 0.25, %v2803_v33  ;;  %v2580_v20 = vadd.f32 %v2485_v53, %v2341_v42  ;;  %v2704_v33 = vrot.slane %v2584_v4, 4 }
 0x60e   :  { %6606 = vmatmul.msk.f32.gmra.mxu3 %vm1067_vm2, %v10250_v14  ;;  %6573 = vmatmul.msk.f32.gmra.mxu1 %vm1067_vm2, %v10258_v54  ;;  %v10341_v54 = vadd.f32 %v2439_v3, %v2295_v29  ;;  %v3228_v29 = vsel %vm3033_vm6, %v3226_v61, %v3227_v35  ;;  %v2499_v61 = vld [vmem:[#allocation2 + $0x371] ss:$2 sm:$0xff]  ;;  %v2501_v35 = vld [vmem:[#allocation2 + $0x381] ss:$2 sm:$0xff] }
 0x611   :  { %6591 = vmatmul.msk.f32.gmra.mxu2 %vm1067_vm2, %v10260_v51 }
 0x616   :  { %6607 = vmatmul.msk.f32.gmra.mxu3 %vm1067_vm2, %v10272_v43  ;;  %6574 = vmatmul.msk.f32.gmra.mxu1 %vm1067_vm2, %v10281_v13  ;;  %v2513_v13 = vld [vmem:[#allocation2 + $0x3e1] ss:$2 sm:$0xff]  ;;  %v10354_v43 = vadd.f32 %v2511_v38, %v2367_v63  ;;  %v10372_v38 = vmax.f32 %v2851_v56, 0.0 }
 0x617   :  { %v10344_v25 = vadd.f32 %v2513_v13, %v2369_v27  ;;  %v6636_v13 = vld [vmem:[%s12480_s2 + $0x20] sm:$0x3f] }
 0x618   :  { %6637 = vmatpush.msk.msra.mxu2 %vm3033_vm6, %v6636_v13  ;;  %13498 = vst [vmem:[#allocation83_spill] sm:$0xff] %v10372_v38 }
 0x619   :  { %6592 = vmatmul.msk.f32.gmra.mxu2 %vm1067_vm2, %v10283_v62  ;;  %v13495_v62 = vrot.slane %v10319_v47, 4  ;;  %v12717_v12 = vrot.slane %v10344_v25, 4 }
 0x61b   :  { %v10350_v23 = vadd.f32 %v13495_v62, %v10341_v54  ;;  %v2491_v62 = vld [vmem:[#allocation2 + $0x331] ss:$2 sm:$0xff] }
 0x61e   :  { %6608 = vmatmul.msk.f32.gmra.mxu3 %vm1067_vm2, %v10290_v16  ;;  %6575 = vmatmul.msk.f32.gmra.mxu1 %vm1067_vm2, %v2977_v49  ;;  %v2351_v49 = vld [vmem:[#allocation2 + $0x350] ss:$2 sm:$0xff]  ;;  %v2702_v16 = vrot.slane %v2582_v41, 4  ;;  %v2981_v41 = vrot.slane %v10329_v40, 1 }
 0x61f   :  { %v2585_v58 = vadd.f32 %v2495_v22, %v2351_v49  ;;  %v2355_v49 = vld [vmem:[#allocation2 + $0x370] ss:$2 sm:$0xff]  ;;  %v2357_v22 = vld [vmem:[#allocation2 + $0x380] ss:$2 sm:$0xff] }
 0x620   :  { %v2806_v27 = vadd.f32 %v2702_v16, %v2581_v45  ;;  %v10370_v63 = vsel %vm2950_vm8, %v2981_v41, %v2982_v57  ;;  %v2588_v13 = vadd.f32 %v2501_v35, %v2357_v22  ;;  %v2984_v57 = vrot.slane %v10372_v38, 1 }
 0x621   :  { %6593 = vmatmul.msk.f32.gmra.mxu2 %vm1067_vm2, %v10310_v59  ;;  %13497 = vst [vmem:[#allocation82_spill] sm:$0xff] %v10370_v63 }
 0x622   :  { %v2854_v41 = vmul.f32 0.25, %v2806_v27 }
 0x626   :  { %6609 = vmatmul.msk.f32.gmra.mxu3 %vm1067_vm2, %v10322_v21  ;;  %v2701_v21 = vrot.slane %v2581_v45, 4  ;;  %6576 = vmatmul.msk.f32.gmra.mxu1 %vm1067_vm2, %v10334_v37  ;;  %v2852_v37 = vmul.f32 0.25, %v2804_v0  ;;  %v2705_v0 = vrot.slane %v2585_v58, 4  ;;  %v3230_v45 = vrot.slane %v10312_v32, 2  ;;  %v2347_v58 = vld [vmem:[#allocation2 + $0x330] ss:$2 sm:$0xff] }
 0x628   :  { %v2703_v3 = vsel %vm2652_vm7, %v2701_v21, %v2702_v16  ;;  %v10367_v21 = vadd.f32 %v12717_v12, %v10354_v43  ;;  %v10374_v42 = vmax.f32 %v2852_v37, 0.0  ;;  %v3229_v16 = vrot.slane %v10310_v59, 2 }
 0x629   :  { %6594 = vmatmul.msk.f32.gmra.mxu2 %vm1067_vm2, %v10329_v40  ;;  %v2805_v53 = vadd.f32 %v2703_v3, %v2580_v20  ;;  %v2706_v12 = vsel %vm2652_vm7, %v2704_v33, %v2705_v0  ;;  %v2583_v3 = vadd.f32 %v2491_v62, %v2347_v58  ;;  %v2708_v33 = vrot.slane %v2588_v13, 4  ;;  %v2353_v62 = vld [vmem:[#allocation2 + $0x360] ss:$2 sm:$0xff]  ;;  %v2497_v13 = vld [vmem:[#allocation2 + $0x361] ss:$2 sm:$0xff] }
 0x62a   :  { %13496 = vst [vmem:[#allocation81_spill] sm:$0xff] %v10367_v21  ;;  %v2985_v56 = vrot.slane %v10374_v42, 1  ;;  %v10384_v20 = vsel %vm3033_vm6, %v3229_v16, %v3230_v45  ;;  %v2808_v16 = vadd.f32 %v2705_v0, %v2584_v4  ;;  %v3232_v45 = vrot.slane %v10329_v40, 2  ;;  %v6672_v0 = vld [vmem:[%s12480_s2 + $0x30] sm:$0x3f] }
 0x62b   :  { %v2853_v37 = vmul.f32 0.25, %v2805_v53  ;;  %v10399_v53 = vmax.f32 %v2854_v41, 0.0  ;;  %v3233_v58 = vrot.slane %v10331_v24, 2  ;;  %v2586_v41 = vadd.f32 %v2497_v13, %v2353_v62  ;;  %6673 = vmatpush.msk.msra.mxu1 %vm3033_vm6, %v6672_v0 }
 0x62c   :  { %v10395_v27 = vsel %vm2950_vm8, %v2984_v57, %v2985_v56  ;;  %v3236_v62 = vrot.slane %v10374_v42, 2 }
 0x62d   :  { %13499 = vst [vmem:[#allocation84_spill] sm:$0xff] %v10395_v27  ;;  %v10397_v35 = vmax.f32 %v2853_v37, 0.0  ;;  %v2988_v57 = vrot.slane %v10399_v53, 1  ;;  %v2856_v37 = vmul.f32 0.25, %v2808_v16  ;;  %v10409_v4 = vsel %vm3033_vm6, %v3232_v45, %v3233_v58 }
 0x62e   :  { %6610 = vmatmul.msk.f32.gmra.mxu3 %vm1067_vm2, %v3228_v29  ;;  %6577 = vmatmul.msk.f32.gmra.mxu1 %vm1067_vm2, %v10370_v63  ;;  %v2587_v29 = vadd.f32 %v2499_v61, %v2355_v49  ;;  %v6654_v49 = vld [vmem:[%s12480_s2 + $0x28] sm:$0x3f]  ;;  %v2807_v61 = vadd.f32 %v2706_v12, %v2583_v3  ;;  %13501 = vst [vmem:[#allocation86_spill] sm:$0xff] %v10409_v4  ;;  %v3235_v58 = vrot.slane %v10372_v38, 2  ;;  %v3239_v21 = vrot.slane %v10399_v53, 2 }
 0x62f   :  { %6655 = vmatpush.msk.msra.mxu3 %vm3033_vm6, %v6654_v49  ;;  %13500 = vst [vmem:[#allocation85_spill] sm:$0xff] %v10397_v35  ;;  %v2987_v3 = vrot.slane %v10397_v35, 1  ;;  %v10424_v16 = vmax.f32 %v2856_v37, 0.0 }
 0x630   :  { %v2707_v22 = vrot.slane %v2587_v29, 4  ;;  %v2855_v56 = vmul.f32 0.25, %v2807_v61  ;;  %v2810_v45 = vadd.f32 %v2708_v33, %v2587_v29 }
 0x631   :  { %6595 = vmatmul.msk.f32.gmra.mxu2 %vm1067_vm2, %v10372_v38 }
 0x632   :  { %v2709_v12 = vsel %vm2652_vm7, %v2707_v22, %v2708_v33  ;;  %v10420_v22 = vsel %vm2950_vm8, %v2987_v3, %v2988_v57  ;;  %v10422_v61 = vmax.f32 %v2855_v56, 0.0  ;;  %v2858_v0 = vmul.f32 0.25, %v2810_v45  ;;  %v2315_v57 = vld [vmem:[#allocation2 + $0x230] ss:$2 sm:$0xff]  ;;  %v2459_v56 = vld [vmem:[#allocation2 + $0x231] ss:$2 sm:$0xff] }
 0x633   :  { %v2809_v49 = vadd.f32 %v2709_v12, %v2586_v41  ;;  %13502 = vst [vmem:[#allocation87_spill] sm:$0xff] %v10420_v22  ;;  %v2991_v41 = vrot.slane %v10424_v16, 1  ;;  %v10433_v3 = vsel %vm3033_vm6, %v3235_v58, %v3236_v62  ;;  %v2387_v45 = vld [vmem:[#allocation2 + $0x470] ss:$2 sm:$0xff]  ;;  %v2531_v58 = vld [vmem:[#allocation2 + $0x471] ss:$2 sm:$0xff] }
 0x634   :  { %13503 = vst [vmem:[#allocation88_spill] sm:$0xff] %v10422_v61  ;;  %v2990_v12 = vrot.slane %v10422_v61, 1  ;;  %v10444_v37 = vmax.f32 %v2858_v0, 0.0  ;;  %v3238_v62 = vrot.slane %v10397_v35, 2  ;;  %v2385_v0 = vld [vmem:[#allocation2 + $0x460] ss:$2 sm:$0xff] }
 0x635   :  { %v2857_v13 = vmul.f32 0.25, %v2809_v49  ;;  %13504 = vst [vmem:[#allocation91_spill] sm:$0xff] %v10433_v3  ;;  %v10446_v49 = vadd.f32 %v2459_v56, %v2315_v57  ;;  %v2529_v57 = vld [vmem:[#allocation2 + $0x461] ss:$2 sm:$0xff] }
 0x636   :  { %6611 = vmatmul.msk.f32.gmra.mxu3 %vm1067_vm2, %v10384_v20  ;;  %6578 = vmatmul.msk.f32.gmra.mxu1 %vm1067_vm2, %v10395_v27  ;;  %v10442_v33 = vsel %vm2950_vm8, %v2990_v12, %v2991_v41  ;;  %v10453_v27 = vadd.f32 %v2531_v58, %v2387_v45  ;;  %v2994_v12 = vrot.slane %v10444_v37, 1  ;;  %v10458_v56 = vsel %vm3033_vm6, %v3238_v62, %v3239_v21 }
 0x637   :  { %v10439_v29 = vmax.f32 %v2857_v13, 0.0  ;;  %13506 = vst [vmem:[#allocation99_spill] sm:$0xff] %v10442_v33  ;;  %v2313_v13 = vld [vmem:[#allocation2 + $0x220] ss:$2 sm:$0xff]  ;;  %v12728_v41 = vrot.slane %v10446_v49, 4  ;;  %v3241_v62 = vrot.slane %v10422_v61, 2 }
 0x638   :  { %13507 = vst [vmem:[#allocation101_spill] sm:$0xff] %v10446_v49  ;;  %v12729_v45 = vrot.slane %v10453_v27, 4 }
 0x639   :  { %6596 = vmatmul.msk.f32.gmra.mxu2 %vm1067_vm2, %v10397_v35  ;;  %13505 = vst [vmem:[#allocation95_spill] sm:$0xff] %v10439_v29 }
 0x63a   :  { %13508 = vst [vmem:[#allocation103_spill] sm:$0xff] %v10453_v27  ;;  %v3373_v27 = vrot.slane %v10137_v6, 3 }
 0x63b   :  { %13509 = vst [vmem:[#allocation105_spill] sm:$0xff] %v10458_v56 }
 0x63e   :  { %6612 = vmatmul.msk.f32.gmra.mxu3 %vm1067_vm2, %v10409_v4  ;;  %6579 = vmatmul.msk.f32.gmra.mxu1 %vm1067_vm2, %v10420_v22  ;;  %v2993_v22 = vrot.slane %v10439_v29, 1  ;;  %v10466_v4 = vadd.f32 %v2529_v57, %v2385_v0 }
 0x640   :  { %13511 = vst [vmem:[#allocation108_spill] sm:$0xff] %v10466_v4  ;;  %v10470_v58 = vsel %vm2950_vm8, %v2993_v22, %v2994_v12  ;;  %v3369_v22 = vrot.slane %v9906_v50, 3  ;;  %v3370_v12 = vrot.slane %v10068_v8, 3 }
 0x641   :  { %6597 = vmatmul.msk.f32.gmra.mxu2 %vm1067_vm2, %v10422_v61  ;;  %13512 = vst [vmem:[#allocation109_spill] sm:$0xff] %v10470_v58 }
 0x642   :  { %v3371_v57 = vsel %vm3368_vm9, %v3369_v22, %v3370_v12  ;;  %v10512_v12 = vpop.f32.mrf.mxu2 }
 0x646   :  { %6613 = vmatmul.msk.f32.gmra.mxu3 %vm1067_vm2, %v10433_v3  ;;  %6580 = vmatmul.msk.f32.gmra.mxu1 %vm1067_vm2, %v10442_v33  ;;  %v2457_v3 = vld [vmem:[#allocation2 + $0x221] ss:$2 sm:$0xff] }
 0x647   :  { %v10464_v33 = vadd.f32 %v2457_v3, %v2313_v13  ;;  %v3242_v3 = vrot.slane %v10424_v16, 2  ;;  %v10484_v13 = vadd.f32 %v12729_v45, %v10466_v4  ;;  %v3245_v45 = vrot.slane %v10444_v37, 2 }
 0x649   :  { %6598 = vmatmul.msk.f32.gmra.mxu2 %vm1067_vm2, %v10439_v29  ;;  %13510 = vst [vmem:[#allocation107_spill] sm:$0xff] %v10464_v33  ;;  %v10475_v21 = vadd.f32 %v12728_v41, %v10464_v33  ;;  %v10489_v0 = vsel %vm3033_vm6, %v3241_v62, %v3242_v3  ;;  %v3244_v41 = vrot.slane %v10439_v29, 2  ;;  %v10501_v62 = vpop.f32.mrf.mxu1  ;;  %v3372_v3 = vrot.slane %v10139_v48, 3 }
 0x64a   :  { %13514 = vst [vmem:[#allocation112_spill] sm:$0xff] %v10484_v13  ;;  %v3535_v13 = vrot.slane %v9906_v50, 4 }
 0x64b   :  { %13513 = vst [vmem:[#allocation111_spill] sm:$0xff] %v10475_v21  ;;  %v3536_v21 = vrot.slane %v10068_v8, 4  ;;  %v10506_v4 = vsel %vm3033_vm6, %v3244_v41, %v3245_v45  ;;  %v10515_v50 = vsel %vm3368_vm9, %v3372_v3, %v3373_v27  ;;  %v3247_v8 = vrot.slane %v10133_v1, 2 }
 0x64c   :  { %13515 = vst [vmem:[#allocation113_spill] sm:$0xff] %v10489_v0  ;;  %v3538_v41 = vrot.slane %v10139_v48, 4  ;;  %v3539_v45 = vrot.slane %v10137_v6, 4 }
 0x64d   :  { %13516 = vst [vmem:[#allocation114_spill] sm:$0xff] %v10506_v4  ;;  %v3537_v22 = vsel %vm2652_vm7, %v3535_v13, %v3536_v21  ;;  %v3375_v21 = vrot.slane %v10163_v17, 3  ;;  %v3376_v13 = vrot.slane %v10157_v7, 3 }
 0x64e   :  { %6614 = vmatmul.msk.f32.gmra.mxu3 %vm1067_vm2, %v10458_v56  ;;  %6581 = vmatmul.msk.f32.gmra.mxu1 %vm1067_vm2, %v10470_v58  ;;  %v10529_v27 = vsel %vm2652_vm7, %v3538_v41, %v3539_v45  ;;  %v3378_v45 = vrot.slane %v10175_v46, 3 }
 0x64f   :  { %13518 = vst [vmem:[#allocation115_spill] sm:$0xff] %v10529_v27  ;;  %v10536_v49 = vsel %vm3368_vm9, %v3375_v21, %v3376_v13 }
 0x651   :  { %6599 = vmatmul.msk.f32.gmra.mxu2 %vm1067_vm2, %v10133_v1 }
 0x656   :  { %6615 = vmatmul.msk.f32.gmra.mxu3 %vm1067_vm2, %v10489_v0  ;;  %6620 = vmatmul.msk.f32.vlgmr.msrb.gmra.mxu1 %vm1067_vm2, %v3371_v57  ;;  %v3248_v57 = vrot.slane %v10129_v18, 2  ;;  %v3385_v0 = vrot.slane %v10220_v28, 3 }
 0x659   :  { %6638 = vmatmul.msk.f32.vlgmr.msra.gmra.mxu2 %vm1067_vm2, %v3537_v22  ;;  %v10526_v22 = vsel %vm3033_vm6, %v3247_v8, %v3248_v57  ;;  %v3541_v8 = vrot.slane %v10163_v17, 4  ;;  %v3542_v57 = vrot.slane %v10157_v7, 4 }
 0x65a   :  { %13517 = vst [vmem:[#allocation96_spill] sm:$0xff] %v10526_v22 }
 0x65e   :  { %6616 = vmatmul.msk.f32.gmra.mxu3 %vm1067_vm2, %v10506_v4  ;;  %6621 = vmatmul.msk.f32.gmra.mxu1 %vm1067_vm2, %v10515_v50  ;;  %v3157_v33 = vpop.f32.mrf.mxu2 }
 0x661   :  { %6639 = vmatmul.msk.f32.gmra.mxu2 %vm1067_vm2, %v10529_v27  ;;  %v10547_v27 = vsel %vm2652_vm7, %v3541_v8, %v3542_v57  ;;  %v3382_v57 = vrot.slane %v10199_v60, 3 }
 0x662   :  { %13519 = vst [vmem:[#allocation116_spill] sm:$0xff] %v10547_v27 }
 0x663   :  { %v3057_v3 = vpop.f32.mrf.mxu1 }
 0x664   :  { %v3158_v41 = vadd.f32 %v3157_v33, %v3057_v3  ;;  %v3544_v33 = vrot.slane %v10175_v46, 4  ;;  %v3545_v3 = vrot.slane %v10177_v39, 4 }
 0x666   :  { %6617 = vmatmul.msk.f32.gmra.mxu3 %vm1067_vm2, %v10526_v22  ;;  %6622 = vmatmul.msk.f32.gmra.mxu1 %vm1067_vm2, %v10536_v49  ;;  %v3379_v22 = vrot.slane %v10177_v39, 3 }
 0x668   :  { %v10554_v13 = vsel %vm3368_vm9, %v3378_v45, %v3379_v22 }
 0x669   :  { %v10538_v6 = vpop.f32.mrf.mxu3  ;;  %6640 = vmatmul.msk.f32.gmra.mxu2 %vm1067_vm2, %v10547_v27  ;;  %v10565_v27 = vsel %vm2652_vm7, %v3544_v33, %v3545_v3 }
 0x66a   :  { %13520 = vst [vmem:[#allocation118_spill] sm:$0xff] %v10565_v27 }
 0x66b   :  { %v3060_v21 = vpop.f32.mrf.mxu1 }
 0x66c   :  { %v3160_v7 = vpop.f32.mrf.mxu2 }
 0x66d   :  { %v3161_v8 = vadd.f32 %v3160_v7, %v3060_v21  ;;  %v3547_v21 = vrot.slane %v10197_v44, 4  ;;  %v3548_v7 = vrot.slane %v10199_v60, 4 }
 0x66e   :  { %6656 = vmatmul.msk.f32.vlgmr.msra.gmra.mxu3 %vm1067_vm2, %v10139_v48  ;;  %6623 = vmatmul.msk.f32.gmra.mxu1 %vm1067_vm2, %v10554_v13  ;;  %v3381_v48 = vrot.slane %v10197_v44, 3 }
 0x670   :  { %v10572_v45 = vsel %vm3368_vm9, %v3381_v48, %v3382_v57 }
 0x671   :  { %v10556_v4 = vpop.f32.mrf.mxu3  ;;  %6641 = vmatmul.msk.f32.gmra.mxu2 %vm1067_vm2, %v10565_v27  ;;  %v10583_v27 = vsel %vm2652_vm7, %v3547_v21, %v3548_v7  ;;  %v3387_v7 = vrot.slane %v10236_v10, 3 }
 0x672   :  { %13521 = vst [vmem:[#allocation119_spill] sm:$0xff] %v10583_v27 }
 0x673   :  { %v3063_v22 = vpop.f32.mrf.mxu1 }
 0x674   :  { %v3163_v39 = vpop.f32.mrf.mxu2 }
 0x675   :  { %v3164_v3 = vadd.f32 %v3163_v39, %v3063_v22  ;;  %v3551_v22 = vrot.slane %v10220_v28, 4 }
 0x676   :  { %6657 = vmatmul.msk.f32.gmra.mxu3 %vm1067_vm2, %v10163_v17  ;;  %6624 = vmatmul.msk.f32.gmra.mxu1 %vm1067_vm2, %v10572_v45  ;;  %v3384_v17 = vrot.slane %v10218_v19, 3 }
 0x678   :  { %v10590_v57 = vsel %vm3368_vm9, %v3384_v17, %v3385_v0 }
 0x679   :  { %v3307_v58 = vpop.f32.mrf.mxu3  ;;  %6642 = vmatmul.msk.f32.gmra.mxu2 %vm1067_vm2, %v10583_v27 }
 0x67a   :  { %v10578_v33 = vadd.f32 %v3307_v58, %v3158_v41  ;;  %v3550_v41 = vrot.slane %v10218_v19, 4 }
 0x67b   :  { %v3066_v48 = vpop.f32.mrf.mxu1 }
 0x67c   :  { %v3166_v58 = vpop.f32.mrf.mxu2  ;;  %v10601_v27 = vsel %vm2652_vm7, %v3550_v41, %v3551_v22  ;;  %v3390_v22 = vrot.slane %v10260_v51, 3 }
 0x67d   :  { %v3167_v21 = vadd.f32 %v3166_v58, %v3066_v48  ;;  %13522 = vst [vmem:[#allocation120_spill] sm:$0xff] %v10601_v27  ;;  %v3553_v48 = vrot.slane %v10236_v10, 4 }
 0x67e   :  { %6658 = vmatmul.msk.f32.gmra.mxu3 %vm1067_vm2, %v10175_v46  ;;  %6625 = vmatmul.msk.f32.gmra.mxu1 %vm1067_vm2, %v10590_v57  ;;  %v3388_v46 = vrot.slane %v10238_v26, 3 }
 0x680   :  { %v10608_v0 = vsel %vm3368_vm9, %v3387_v7, %v3388_v46 }
 0x681   :  { %v3310_v60 = vpop.f32.mrf.mxu3  ;;  %6643 = vmatmul.msk.f32.gmra.mxu2 %vm1067_vm2, %v10601_v27  ;;  %13523 = vst [vmem:[#allocation122_spill] sm:$0xff] %v10608_v0 }
 0x682   :  { %v10596_v39 = vadd.f32 %v3310_v60, %v3161_v8  ;;  %v3554_v60 = vrot.slane %v10238_v26, 4 }
 0x683   :  { %v3069_v17 = vpop.f32.mrf.mxu1 }
 0x684   :  { %v3169_v8 = vpop.f32.mrf.mxu2  ;;  %v10619_v27 = vsel %vm2652_vm7, %v3553_v48, %v3554_v60 }
 0x685   :  { %v3170_v41 = vadd.f32 %v3169_v8, %v3069_v17  ;;  %13524 = vst [vmem:[#allocation7_spill] sm:$0xff] %v10619_v27  ;;  %v3556_v17 = vrot.slane %v10260_v51, 4 }
 0x686   :  { %6659 = vmatmul.msk.f32.gmra.mxu3 %vm1067_vm2, %v10197_v44  ;;  %6626 = vmatmul.msk.f32.gmra.mxu1 %vm1067_vm2, %v10608_v0  ;;  %v3391_v44 = vrot.slane %v10262_v30, 3 }
 0x688   :  { %v10626_v7 = vsel %vm3368_vm9, %v3390_v22, %v3391_v44  ;;  %v2293_v22 = vld [vmem:[#allocation2 + $0x180] ss:$2 sm:$0xff] }
 0x689   :  { %v3313_v28 = vpop.f32.mrf.mxu3  ;;  %6644 = vmatmul.msk.f32.gmra.mxu2 %vm1067_vm2, %v10619_v27  ;;  %13525 = vst [vmem:[#allocation30_spill] sm:$0xff] %v10626_v7  ;;  %v2677_v27 = vrot.slane %v10341_v54, 4 }
 0x68a   :  { %v10614_v58 = vadd.f32 %v3313_v28, %v3164_v3  ;;  %v3557_v28 = vrot.slane %v10262_v30, 4  ;;  %v13527_v30 = vrot.slane %v10319_v47, 4 }
 0x68b   :  { %v3072_v46 = vpop.f32.mrf.mxu1 }
 0x68c   :  { %v3172_v3 = vpop.f32.mrf.mxu2  ;;  %v10635_v60 = vsel %vm2652_vm7, %v3556_v17, %v3557_v28  ;;  %v3397_v17 = vrot.slane %v10312_v32, 3 }
 0x68d   :  { %v3173_v48 = vadd.f32 %v3172_v3, %v3072_v46  ;;  %13526 = vst [vmem:[#allocation123_spill] sm:$0xff] %v10635_v60  ;;  %v3396_v3 = vrot.slane %v10310_v59, 3 }
 0x68e   :  { %6660 = vmatmul.msk.f32.gmra.mxu3 %vm1067_vm2, %v10218_v19  ;;  %6627 = vmatmul.msk.f32.gmra.mxu1 %vm1067_vm2, %v10626_v7  ;;  %v2437_v19 = vld [vmem:[#allocation2 + $0x181] ss:$2 sm:$0xff] }
 0x691   :  { %v3316_v26 = vpop.f32.mrf.mxu3  ;;  %6645 = vmatmul.msk.f32.gmra.mxu2 %vm1067_vm2, %v10635_v60 }
 0x692   :  { %v10632_v8 = vadd.f32 %v3316_v26, %v3167_v21  ;;  %v2679_v21 = vsel %vm2652_vm7, %v2677_v27, %v13527_v30  ;;  %v2556_v26 = vadd.f32 %v2437_v19, %v2293_v22  ;;  %v3562_v19 = vrot.slane %v10310_v59, 4 }
 0x693   :  { %v3075_v44 = vpop.f32.mrf.mxu1  ;;  %v3400_v30 = vrot.slane %v10331_v24, 3 }
 0x694   :  { %v3175_v63 = vpop.f32.mrf.mxu2  ;;  %v2789_v28 = vadd.f32 %v2679_v21, %v2556_v26 }
 0x695   :  { %v3176_v54 = vadd.f32 %v3175_v63, %v3075_v44  ;;  %v3563_v63 = vrot.slane %v10312_v32, 4 }
 0x696   :  { %6661 = vmatmul.msk.f32.gmra.mxu3 %vm1067_vm2, %v10236_v10  ;;  %6628 = vmatmul.msk.f32.gmra.mxu1 %vm1067_vm2, %v10304_v2  ;;  %v10656_v2 = vsel %vm3368_vm9, %v3396_v3, %v3397_v17  ;;  %v2837_v47 = vmul.f32 0.25, %v2789_v28  ;;  %v3565_v3 = vrot.slane %v10329_v40, 4  ;;  %v3566_v17 = vrot.slane %v10331_v24, 4 }
 0x697   :  { %v10669_v21 = vsel %vm2652_vm7, %v3562_v19, %v3563_v63 }
 0x698   :  { %v10664_v22 = vmax.f32 %v2837_v47, 0.0  ;;  %13529 = vst [vmem:[#allocation33_spill] sm:$0xff] %v10669_v21  ;;  %v10687_v19 = vsel %vm2652_vm7, %v3565_v3, %v3566_v17  ;;  %v3405_v3 = vrot.slane %v10397_v35, 3  ;;  %v3406_v17 = vrot.slane %v10399_v53, 3 }
 0x699   :  { %v3319_v56 = vpop.f32.mrf.mxu3  ;;  %6646 = vmatmul.msk.f32.gmra.mxu2 %vm1067_vm2, %v10307_v15  ;;  %v3399_v15 = vrot.slane %v10329_v40, 3  ;;  %13531 = vst [vmem:[#allocation8_spill] sm:$0xff] %v10687_v19 }
 0x69a   :  { %v10647_v46 = vadd.f32 %v3319_v56, %v3170_v41  ;;  %13528 = vst [vmem:[#allocation121_spill] sm:$0xff] %v10664_v22 }
 0x69b   :  { %v3078_v60 = vpop.f32.mrf.mxu1  ;;  %v10676_v32 = vsel %vm3368_vm9, %v3399_v15, %v3400_v30  ;;  %v3568_v30 = vrot.slane %v10372_v38, 4 }
 0x69c   :  { %v3178_v27 = vpop.f32.mrf.mxu2  ;;  %13530 = vst [vmem:[#allocation31_spill] sm:$0xff] %v10676_v32 }
 0x69d   :  { %v3179_v44 = vadd.f32 %v3178_v27, %v3078_v60  ;;  %v3403_v27 = vrot.slane %v10374_v42, 3 }
 0x69e   :  { %6662 = vmatmul.msk.f32.gmra.mxu3 %vm1067_vm2, %v10260_v51  ;;  %6629 = vmatmul.msk.f32.gmra.mxu1 %vm1067_vm2, %v10656_v2 }
 0x6a1   :  { %v3322_v56 = vpop.f32.mrf.mxu3  ;;  %6647 = vmatmul.msk.f32.gmra.mxu2 %vm1067_vm2, %v10669_v21 }
 0x6a2   :  { %v10662_v41 = vadd.f32 %v3322_v56, %v3173_v48  ;;  %v3402_v56 = vrot.slane %v10372_v38, 3 }
 0x6a3   :  { %v3081_v26 = vpop.f32.mrf.mxu1 }
 0x6a4   :  { %v3181_v60 = vpop.f32.mrf.mxu2  ;;  %v10694_v15 = vsel %vm3368_vm9, %v3402_v56, %v3403_v27  ;;  %v10720_v27 = vsel %vm3368_vm9, %v3405_v3, %v3406_v17 }
 0x6a5   :  { %v3182_v47 = vadd.f32 %v3181_v60, %v3081_v26  ;;  %13532 = vst [vmem:[#allocation34_spill] sm:$0xff] %v10694_v15  ;;  %v3569_v26 = vrot.slane %v10374_v42, 4 }
 0x6a6   :  { %6663 = vmatmul.msk.f32.gmra.mxu3 %vm1067_vm2, %v10664_v22  ;;  %6630 = vmatmul.msk.f32.gmra.mxu1 %vm1067_vm2, %v10676_v32  ;;  %13534 = vst [vmem:[#allocation9_spill] sm:$0xff] %v10720_v27 }
 0x6a7   :  { %v10709_v56 = vsel %vm2652_vm7, %v3568_v30, %v3569_v26  ;;  %v3572_v30 = vrot.slane %v10399_v53, 4  ;;  %v6726_v53 = vld [vmem:[%s12480_s2 + $0x48] sm:$0x3f] }
 0x6a8   :  { %13533 = vst [vmem:[#allocation32_spill] sm:$0xff] %v10709_v56  ;;  %6727 = vmatpush.msk.msrb.mxu1 %vm3033_vm6, %v6726_v53 }
 0x6a9   :  { %v3325_v48 = vpop.f32.mrf.mxu3  ;;  %6648 = vmatmul.msk.f32.gmra.mxu2 %vm1067_vm2, %v10687_v19  ;;  %v3409_v19 = vrot.slane %v10424_v16, 3 }
 0x6aa   :  { %v10682_v28 = vadd.f32 %v3325_v48, %v3176_v54 }
 0x6ab   :  { %v3084_v63 = vpop.f32.mrf.mxu1 }
 0x6ac   :  { %v3184_v54 = vpop.f32.mrf.mxu2 }
 0x6ad   :  { %v3185_v60 = vadd.f32 %v3184_v54, %v3084_v63  ;;  %v3571_v54 = vrot.slane %v10397_v35, 4 }
 0x6ae   :  { %6664 = vmatmul.msk.f32.gmra.mxu3 %vm1067_vm2, %v10310_v59  ;;  %6631 = vmatmul.msk.f32.gmra.mxu1 %vm1067_vm2, %v10694_v15  ;;  %v6690_v59 = vld [vmem:[%s12480_s2 + $0x38] sm:$0x3f] }
 0x6af   :  { %6691 = vmatpush.msk.msrb.mxu2 %vm3033_vm6, %v6690_v59 }
 0x6b1   :  { %v3328_v24 = vpop.f32.mrf.mxu3  ;;  %6649 = vmatmul.msk.f32.gmra.mxu2 %vm1067_vm2, %v10709_v56  ;;  %v3408_v56 = vrot.slane %v10422_v61, 3 }
 0x6b2   :  { %v10700_v48 = vadd.f32 %v3328_v24, %v3179_v44  ;;  %v6708_v44 = vld [vmem:[%s12480_s2 + $0x40] sm:$0x3f] }
 0x6b3   :  { %v3087_v42 = vpop.f32.mrf.mxu1  ;;  %6709 = vmatpush.msk.msrb.mxu3 %vm3033_vm6, %v6708_v44  ;;  %v10731_v44 = vsel %vm2652_vm7, %v3571_v54, %v3572_v30 }
 0x6b4   :  { %v3187_v24 = vpop.f32.mrf.mxu2  ;;  %13535 = vst [vmem:[#allocation35_spill] sm:$0xff] %v10731_v44 }
 0x6b5   :  { %v3188_v59 = vadd.f32 %v3187_v24, %v3087_v42  ;;  %v3575_v24 = vrot.slane %v10424_v16, 4 }
 0x6b6   :  { %6665 = vmatmul.msk.f32.gmra.mxu3 %vm1067_vm2, %v10329_v40  ;;  %6632 = vmatmul.msk.f32.gmra.mxu1 %vm1067_vm2, %v10720_v27 }
 0x6b9   :  { %v3331_v63 = vpop.f32.mrf.mxu3  ;;  %6650 = vmatmul.msk.f32.gmra.mxu2 %vm1067_vm2, %v10731_v44  ;;  %v3411_v44 = vrot.slane %v10439_v29, 3 }
 0x6ba   :  { %v10726_v26 = vadd.f32 %v3331_v63, %v3182_v47  ;;  %v10742_v47 = vsel %vm3368_vm9, %v3408_v56, %v3409_v19  ;;  %v3574_v63 = vrot.slane %v10422_v61, 4 }
 0x6bb   :  { %v3090_v3 = vpop.f32.mrf.mxu1  ;;  %13536 = vst [vmem:[#allocation10_spill] sm:$0xff] %v10742_v47 }
 0x6bc   :  { %v3190_v42 = vpop.f32.mrf.mxu2  ;;  %v10753_v53 = vsel %vm2652_vm7, %v3574_v63, %v3575_v24  ;;  %v3414_v24 = vrot.slane %v10133_v1, 3 }
 0x6bd   :  { %v3191_v30 = vadd.f32 %v3190_v42, %v3090_v3  ;;  %13537 = vst [vmem:[#allocation36_spill] sm:$0xff] %v10753_v53  ;;  %v3577_v3 = vrot.slane %v10439_v29, 4 }
 0x6be   :  { %6666 = vmatmul.msk.f32.gmra.mxu3 %vm1067_vm2, %v10372_v38  ;;  %6633 = vmatmul.msk.f32.gmra.mxu1 %vm1067_vm2, %v10742_v47  ;;  %v3412_v38 = vrot.slane %v10444_v37, 3 }
 0x6c0   :  { %v10760_v56 = vsel %vm3368_vm9, %v3411_v44, %v3412_v38 }
 0x6c1   :  { %v3334_v17 = vpop.f32.mrf.mxu3  ;;  %6651 = vmatmul.msk.f32.gmra.mxu2 %vm1067_vm2, %v10753_v53  ;;  %13538 = vst [vmem:[#allocation37_spill] sm:$0xff] %v10760_v56 }
 0x6c2   :  { %v10748_v54 = vadd.f32 %v3334_v17, %v3185_v60  ;;  %v3578_v17 = vrot.slane %v10444_v37, 4 }
 0x6c3   :  { %v3093_v19 = vpop.f32.mrf.mxu1 }
 0x6c4   :  { %v3193_v60 = vpop.f32.mrf.mxu2  ;;  %v10771_v53 = vsel %vm2652_vm7, %v3577_v3, %v3578_v17 }
 0x6c5   :  { %v3194_v63 = vadd.f32 %v3193_v60, %v3093_v19  ;;  %13539 = vst [vmem:[#allocation38_spill] sm:$0xff] %v10771_v53  ;;  %v3580_v19 = vrot.slane %v10133_v1, 4 }
 0x6c6   :  { %6667 = vmatmul.msk.f32.gmra.mxu3 %vm1067_vm2, %v10397_v35  ;;  %6634 = vmatmul.msk.f32.gmra.mxu1 %vm1067_vm2, %v10760_v56  ;;  %v3415_v35 = vrot.slane %v10129_v18, 3 }
 0x6c8   :  { %v10778_v44 = vsel %vm3368_vm9, %v3414_v24, %v3415_v35  ;;  %v2365_v24 = vld [vmem:[#allocation2 + $0x3c0] ss:$2 sm:$0xff] }
 0x6c9   :  { %v3337_v16 = vpop.f32.mrf.mxu3  ;;  %6652 = vmatmul.msk.f32.gmra.mxu2 %vm1067_vm2, %v10771_v53  ;;  %13540 = vst [vmem:[#allocation39_spill] sm:$0xff] %v10778_v44  ;;  %v2713_v53 = vrot.slane %v10354_v43, 4 }
 0x6ca   :  { %v10766_v42 = vadd.f32 %v3337_v16, %v3188_v59  ;;  %v3581_v16 = vrot.slane %v10129_v18, 4  ;;  %v13542_v18 = vrot.slane %v10344_v25, 4 }
 0x6cb   :  { %v3096_v38 = vpop.f32.mrf.mxu1 }
 0x6cc   :  { %v3196_v59 = vpop.f32.mrf.mxu2  ;;  %v10787_v17 = vsel %vm2652_vm7, %v3580_v19, %v3581_v16 }
 0x6cd   :  { %v3197_v3 = vadd.f32 %v3196_v59, %v3096_v38  ;;  %13541 = vst [vmem:[#allocation40_spill] sm:$0xff] %v10787_v17 }
 0x6ce   :  { %6668 = vmatmul.msk.f32.gmra.mxu3 %vm1067_vm2, %v10422_v61  ;;  %6635 = vmatmul.msk.f32.gmra.mxu1 %vm1067_vm2, %v10778_v44  ;;  %v2509_v61 = vld [vmem:[#allocation2 + $0x3c1] ss:$2 sm:$0xff] }
 0x6cf   :  { %v2592_v43 = vadd.f32 %v2509_v61, %v2365_v24 }
 0x6d1   :  { %v3340_v37 = vpop.f32.mrf.mxu3  ;;  %6653 = vmatmul.msk.f32.gmra.mxu2 %vm1067_vm2, %v10787_v17 }
 0x6d2   :  { %v10784_v60 = vadd.f32 %v3340_v37, %v3191_v30  ;;  %v2715_v30 = vsel %vm2652_vm7, %v2713_v53, %v13542_v18  ;;  %v3155_v37 = vadd.f32 %v10512_v12, %v10501_v62 }
 0x6d3   :  { %v3471_v35 = vpop.f32.mrf.mxu1  ;;  %v2813_v59 = vadd.f32 %v2715_v30, %v2592_v43 }
 0x6d4   :  { %v3199_v21 = vpop.f32.mrf.mxu2  ;;  %v3352_v19 = vadd.f32 %v10556_v4, %v3155_v37 }
 0x6d5   :  { %v2861_v25 = vmul.f32 0.25, %v2813_v59 }
 0x6d6   :  { %6669 = vmatmul.msk.f32.gmra.mxu3 %vm1067_vm2, %v10439_v29  ;;  %6674 = vmatmul.msk.f32.vlgmr.msra.gmra.mxu1 %vm1067_vm2, %v10154_v52  ;;  %v3519_v52 = vadd.f32 %v3471_v35, %v3352_v19 }
 0x6d7   :  { %v10812_v62 = vmax.f32 %v2861_v25, 0.0 }
 0x6d9   :  { %v3343_v40 = vpop.f32.mrf.mxu3  ;;  %6692 = vmatmul.msk.f32.vlgmr.msrb.gmra.mxu2 %vm1067_vm2, %v10188_v55  ;;  %v3200_v55 = vadd.f32 %v3199_v21, %v10538_v6 }
 0x6da   :  { %v10799_v38 = vadd.f32 %v3343_v40, %v3194_v63 }
 0x6db   :  { %v3474_v16 = vpop.f32.mrf.mxu1 }
 0x6dc   :  { %v3637_v53 = vpop.f32.mrf.mxu2  ;;  %v3520_v12 = vadd.f32 %v3474_v16, %v10578_v33 }
 0x6dd   :  { %v3685_v61 = vadd.f32 %v3637_v53, %v3519_v52  ;;  %v13543_v52 = vld [vmem:[#allocation75_spill] sm:$0xff] }
 0x6de   :  { %6670 = vmatmul.msk.f32.gmra.mxu3 %vm1067_vm2, %v10133_v1  ;;  %6675 = vmatmul.msk.f32.gmra.mxu1 %vm1067_vm2, %v10173_v5 }
 0x6e1   :  { %v3346_v17 = vpop.f32.mrf.mxu3  ;;  %6693 = vmatmul.msk.f32.gmra.mxu2 %vm1067_vm2, %v10209_v34 }
 0x6e2   :  { %v10810_v40 = vadd.f32 %v3346_v17, %v3197_v3 }
 0x6e3   :  { %v3477_v4 = vpop.f32.mrf.mxu1 }
 0x6e4   :  { %v3640_v35 = vpop.f32.mrf.mxu2  ;;  %v3521_v18 = vadd.f32 %v3477_v4, %v10596_v39 }
 0x6e5   :  { %v3686_v17 = vadd.f32 %v3640_v35, %v3520_v12  ;;  %v2838_v12 = vmul.f32 0.25, %v10350_v23  ;;  %v13545_v35 = vld [vmem:[#allocation77_spill] sm:$0xff]  ;;  %v3795_v23 = vrot.slane %v10664_v22, 1 }
 0x6e6   :  { %6671 = vmatmul.msk.f32.gmra.mxu3 %vm1067_vm2, %v10812_v62  ;;  %6676 = vmatmul.msk.f32.gmra.mxu1 %vm1067_vm2, %v10195_v9 }
 0x6e9   :  { %v3349_v63 = vpop.f32.mrf.mxu3  ;;  %6694 = vmatmul.msk.f32.gmra.mxu2 %vm1067_vm2, %v10230_v11 }
 0x6ea   :  { %v10822_v3 = vadd.f32 %v3349_v63, %v3200_v55 }
 0x6eb   :  { %v3480_v24 = vpop.f32.mrf.mxu1 }
 0x6ec   :  { %v3643_v21 = vpop.f32.mrf.mxu2 }
 0x6ed   :  { %v3687_v30 = vadd.f32 %v3643_v21, %v3521_v18 }
 0x6ee   :  { %6710 = vmatmul.msk.f32.vlgmr.msrb.gmra.mxu3 %vm1067_vm2, %v10515_v50  ;;  %6677 = vmatmul.msk.f32.gmra.mxu1 %vm1067_vm2, %v10216_v36  ;;  %v3522_v50 = vadd.f32 %v3480_v24, %v10614_v58  ;;  %v13544_v58 = vld [vmem:[#allocation73_spill] sm:$0xff] }
 0x6f1   :  { %v3729_v6 = vpop.f32.mrf.mxu3  ;;  %6695 = vmatmul.msk.f32.gmra.mxu2 %vm1067_vm2, %v10250_v14 }
 0x6f2   :  { %v10831_v33 = vadd.f32 %v3729_v6, %v3685_v61  ;;  %v13546_v6 = vld [vmem:[#allocation76_spill] sm:$0xff] }
 0x6f3   :  { %v3483_v43 = vpop.f32.mrf.mxu1 }
 0x6f4   :  { %v3646_v59 = vpop.f32.mrf.mxu2  ;;  %v3523_v25 = vadd.f32 %v3483_v43, %v10632_v8  ;;  %v10857_v8 = vmax.f32 %v2838_v12, 0.0 }
 0x6f5   :  { %v3688_v19 = vadd.f32 %v3646_v59, %v3522_v50 }
 0x6f6   :  { %6711 = vmatmul.msk.f32.gmra.mxu3 %vm1067_vm2, %v10536_v49  ;;  %6678 = vmatmul.msk.f32.gmra.mxu1 %vm1067_vm2, %v10241_v31  ;;  %v3796_v43 = vrot.slane %v10857_v8, 1 }
 0x6f8   :  { %v10871_v59 = vsel %vm2950_vm8, %v3795_v23, %v3796_v43  ;;  %v13550_v23 = vld [vmem:[#allocation80_spill] sm:$0xff] }
 0x6f9   :  { %v3732_v37 = vpop.f32.mrf.mxu3  ;;  %6696 = vmatmul.msk.f32.gmra.mxu2 %vm1067_vm2, %v13543_v52  ;;  %13548 = vst [vmem:[#allocation11_spill] sm:$0xff] %v10871_v59 }
 0x6fa   :  { %v10840_v39 = vadd.f32 %v3732_v37, %v3686_v17  ;;  %v13547_v37 = vld [vmem:[#allocation78_spill] sm:$0xff] }
 0x6fb   :  { %v3486_v16 = vpop.f32.mrf.mxu1 }
 0x6fc   :  { %v3649_v61 = vpop.f32.mrf.mxu2  ;;  %v3524_v17 = vadd.f32 %v3486_v16, %v10647_v46 }
 0x6fd   :  { %v3689_v55 = vadd.f32 %v3649_v61, %v3523_v25  ;;  %v3891_v25 = vrot.slane %v10664_v22, 2 }
 0x6fe   :  { %6712 = vmatmul.msk.f32.gmra.mxu3 %vm1067_vm2, %v10554_v13  ;;  %6679 = vmatmul.msk.f32.gmra.mxu1 %vm1067_vm2, %v13544_v58 }
 0x701   :  { %v3735_v53 = vpop.f32.mrf.mxu3  ;;  %6697 = vmatmul.msk.f32.gmra.mxu2 %vm1067_vm2, %v13545_v35 }
 0x702   :  { %v10849_v4 = vadd.f32 %v3735_v53, %v3687_v30  ;;  %v3892_v53 = vrot.slane %v10857_v8, 2 }
 0x703   :  { %v3489_v63 = vpop.f32.mrf.mxu1 }
 0x704   :  { %v3652_v18 = vpop.f32.mrf.mxu2  ;;  %v3525_v46 = vadd.f32 %v3489_v63, %v10662_v41 }
 0x705   :  { %v3690_v30 = vadd.f32 %v3652_v18, %v3524_v17  ;;  %v10880_v17 = vsel %vm3033_vm6, %v3891_v25, %v3892_v53 }
 0x706   :  { %6713 = vmatmul.msk.f32.gmra.mxu3 %vm1067_vm2, %v10572_v45  ;;  %6680 = vmatmul.msk.f32.gmra.mxu1 %vm1067_vm2, %v13546_v6  ;;  %13549 = vst [vmem:[#allocation12_spill] sm:$0xff] %v10880_v17 }
 0x709   :  { %v3738_v24 = vpop.f32.mrf.mxu3  ;;  %6698 = vmatmul.msk.f32.gmra.mxu2 %vm1067_vm2, %v13547_v37  ;;  %v13576_v37 = vld [vmem:[#allocation7_spill] sm:$0xff] }
 0x70a   :  { %v10861_v21 = vadd.f32 %v3738_v24, %v3688_v19 }
 0x70b   :  { %v3492_v50 = vpop.f32.mrf.mxu1 }
 0x70c   :  { %v3655_v19 = vpop.f32.mrf.mxu2  ;;  %v3526_v63 = vadd.f32 %v3492_v50, %v10682_v28  ;;  %v13551_v28 = vld [vmem:[#allocation82_spill] sm:$0xff]  ;;  %v3987_v50 = vrot.slane %v10664_v22, 3 }
 0x70d   :  { %v3691_v12 = vadd.f32 %v3655_v19, %v3525_v46 }
 0x70e   :  { %6714 = vmatmul.msk.f32.gmra.mxu3 %vm1067_vm2, %v10590_v57  ;;  %6681 = vmatmul.msk.f32.gmra.mxu1 %vm1067_vm2, %v10871_v59 }
 0x711   :  { %v3741_v16 = vpop.f32.mrf.mxu3  ;;  %6699 = vmatmul.msk.f32.gmra.mxu2 %vm1067_vm2, %v10880_v17  ;;  %v13554_v17 = vld [vmem:[#allocation84_spill] sm:$0xff] }
 0x712   :  { %v10877_v61 = vadd.f32 %v3741_v16, %v3689_v55 }
 0x713   :  { %v3495_v41 = vpop.f32.mrf.mxu1 }
 0x714   :  { %v3658_v18 = vpop.f32.mrf.mxu2  ;;  %v3527_v16 = vadd.f32 %v3495_v41, %v10700_v48  ;;  %v13553_v48 = vld [vmem:[#allocation86_spill] sm:$0xff] }
 0x715   :  { %v3692_v43 = vadd.f32 %v3658_v18, %v3526_v63 }
 0x716   :  { %6715 = vmatmul.msk.f32.gmra.mxu3 %vm1067_vm2, %v10608_v0  ;;  %6682 = vmatmul.msk.f32.gmra.mxu1 %vm1067_vm2, %v13550_v23 }
 0x719   :  { %v3744_v24 = vpop.f32.mrf.mxu3  ;;  %6700 = vmatmul.msk.f32.gmra.mxu2 %vm1067_vm2, %v10384_v20 }
 0x71a   :  { %v10889_v55 = vadd.f32 %v3744_v24, %v3690_v30  ;;  %v3988_v30 = vrot.slane %v10857_v8, 3 }
 0x71b   :  { %v3498_v46 = vpop.f32.mrf.mxu1 }
 0x71c   :  { %v3661_v25 = vpop.f32.mrf.mxu2  ;;  %v10903_v24 = vsel %vm3368_vm9, %v3987_v50, %v3988_v30  ;;  %v3528_v41 = vadd.f32 %v3498_v46, %v10726_v26  ;;  %v13556_v26 = vld [vmem:[#allocation87_spill] sm:$0xff] }
 0x71d   :  { %v3693_v63 = vadd.f32 %v3661_v25, %v3527_v16  ;;  %13552 = vst [vmem:[#allocation13_spill] sm:$0xff] %v10903_v24  ;;  %v13555_v25 = vld [vmem:[#allocation91_spill] sm:$0xff] }
 0x71e   :  { %6716 = vmatmul.msk.f32.gmra.mxu3 %vm1067_vm2, %v10626_v7  ;;  %6683 = vmatmul.msk.f32.gmra.mxu1 %vm1067_vm2, %v13551_v28  ;;  %v13563_v7 = vld [vmem:[#allocation62_spill] sm:$0xff] }
 0x721   :  { %v3747_v19 = vpop.f32.mrf.mxu3  ;;  %6701 = vmatmul.msk.f32.gmra.mxu2 %vm1067_vm2, %v13553_v48 }
 0x722   :  { %v10900_v53 = vadd.f32 %v3747_v19, %v3691_v12 }
 0x723   :  { %v3501_v20 = vpop.f32.mrf.mxu1 }
 0x724   :  { %v3664_v23 = vpop.f32.mrf.mxu2  ;;  %v3529_v50 = vadd.f32 %v3501_v20, %v10748_v54  ;;  %v6762_v54 = vld [vmem:[%s12480_s2 + $0x58] sm:$0x3f] }
 0x725   :  { %v3694_v16 = vadd.f32 %v3664_v23, %v3528_v41  ;;  %v13557_v41 = vld [vmem:[#allocation105_spill] sm:$0xff]  ;;  %6763 = vmatpush.msk.msra.mxu3 %vm3033_vm6, %v6762_v54  ;;  %v6780_v54 = vld [vmem:[%s12480_s2 + $0x60] sm:$0x3f] }
 0x726   :  { %6717 = vmatmul.msk.f32.gmra.mxu3 %vm1067_vm2, %v10903_v24  ;;  %6684 = vmatmul.msk.f32.gmra.mxu1 %vm1067_vm2, %v13554_v17 }
 0x727   :  { %6781 = vmatpush.msk.msra.mxu1 %vm3033_vm6, %v6780_v54 }
 0x729   :  { %v3750_v18 = vpop.f32.mrf.mxu3  ;;  %6702 = vmatmul.msk.f32.gmra.mxu2 %vm1067_vm2, %v13555_v25  ;;  %v13562_v25 = vld [vmem:[#allocation114_spill] sm:$0xff] }
 0x72a   :  { %v10912_v12 = vadd.f32 %v3750_v18, %v3692_v43  ;;  %v6744_v43 = vld [vmem:[%s12480_s2 + $0x50] sm:$0x3f]  ;;  %v13558_v18 = vld [vmem:[#allocation99_spill] sm:$0xff] }
 0x72b   :  { %v3504_v19 = vpop.f32.mrf.mxu1  ;;  %6745 = vmatpush.msk.msra.mxu2 %vm3033_vm6, %v6744_v43  ;;  %v13559_v43 = vld [vmem:[#allocation113_spill] sm:$0xff] }
 0x72c   :  { %v3667_v48 = vpop.f32.mrf.mxu2 }
 0x72d   :  { %v3695_v24 = vadd.f32 %v3667_v48, %v3529_v50 }
 0x72e   :  { %6718 = vmatmul.msk.f32.gmra.mxu3 %vm1067_vm2, %v10656_v2  ;;  %6685 = vmatmul.msk.f32.gmra.mxu1 %vm1067_vm2, %v13556_v26 }
 0x731   :  { %v3753_v30 = vpop.f32.mrf.mxu3  ;;  %6703 = vmatmul.msk.f32.gmra.mxu2 %vm1067_vm2, %v13557_v41 }
 0x732   :  { %v10921_v46 = vadd.f32 %v3753_v30, %v3693_v63  ;;  %v3530_v63 = vadd.f32 %v3504_v19, %v10766_v42 }
 0x733   :  { %v3507_v2 = vpop.f32.mrf.mxu1 }
 0x734   :  { %v3670_v48 = vpop.f32.mrf.mxu2  ;;  %v3531_v42 = vadd.f32 %v3507_v2, %v10784_v60 }
 0x735   :  { %v3696_v50 = vadd.f32 %v3670_v48, %v3530_v63  ;;  %v13561_v48 = vld [vmem:[#allocation81_spill] sm:$0xff] }
 0x736   :  { %6719 = vmatmul.msk.f32.gmra.mxu3 %vm1067_vm2, %v10676_v32  ;;  %6686 = vmatmul.msk.f32.gmra.mxu1 %vm1067_vm2, %v13558_v18 }
 0x739   :  { %v3756_v20 = vpop.f32.mrf.mxu3  ;;  %6704 = vmatmul.msk.f32.gmra.mxu2 %vm1067_vm2, %v13559_v43 }
 0x73a   :  { %v10938_v23 = vadd.f32 %v3756_v20, %v3694_v16  ;;  %v13560_v16 = vld [vmem:[#allocation109_spill] sm:$0xff] }
 0x73b   :  { %v3510_v30 = vpop.f32.mrf.mxu1 }
 0x73c   :  { %v3673_v41 = vpop.f32.mrf.mxu2  ;;  %v3532_v54 = vadd.f32 %v3510_v30, %v10799_v38 }
 0x73d   :  { %v3697_v20 = vadd.f32 %v3673_v41, %v3531_v42  ;;  %v3798_v42 = vrot.slane %v10812_v62, 1 }
 0x73e   :  { %6720 = vmatmul.msk.f32.gmra.mxu3 %vm1067_vm2, %v10694_v15  ;;  %6687 = vmatmul.msk.f32.gmra.mxu1 %vm1067_vm2, %v13560_v16  ;;  %v2862_v15 = vmul.f32 0.25, %v13561_v48 }
 0x740   :  { %v10959_v60 = vmax.f32 %v2862_v15, 0.0 }
 0x741   :  { %v3759_v19 = vpop.f32.mrf.mxu3  ;;  %6705 = vmatmul.msk.f32.gmra.mxu2 %vm1067_vm2, %v13562_v25  ;;  %v13564_v25 = vld [vmem:[#allocation96_spill] sm:$0xff] }
 0x742   :  { %v10951_v63 = vadd.f32 %v3759_v19, %v3695_v24  ;;  %v3799_v19 = vrot.slane %v10959_v60, 1 }
 0x743   :  { %v3513_v43 = vpop.f32.mrf.mxu1 }
 0x744   :  { %v3676_v32 = vpop.f32.mrf.mxu2  ;;  %v3533_v15 = vadd.f32 %v3513_v43, %v10810_v40  ;;  %v10973_v38 = vsel %vm2950_vm8, %v3798_v42, %v3799_v19 }
 0x745   :  { %v3698_v41 = vadd.f32 %v3676_v32, %v3532_v54  ;;  %v3894_v32 = vrot.slane %v10812_v62, 2  ;;  %v3895_v54 = vrot.slane %v10959_v60, 2 }
 0x746   :  { %6721 = vmatmul.msk.f32.gmra.mxu3 %vm1067_vm2, %v10720_v27  ;;  %6688 = vmatmul.msk.f32.gmra.mxu1 %vm1067_vm2, %v13563_v7 }
 0x747   :  { %v10982_v27 = vsel %vm3033_vm6, %v3894_v32, %v3895_v54 }
 0x748   :  { %13565 = vst [vmem:[#allocation14_spill] sm:$0xff] %v10982_v27 }
 0x749   :  { %v3762_v2 = vpop.f32.mrf.mxu3  ;;  %6706 = vmatmul.msk.f32.gmra.mxu2 %vm1067_vm2, %v13564_v25  ;;  %v13566_v25 = vld [vmem:[#allocation115_spill] sm:$0xff] }
 0x74a   :  { %v10963_v24 = vadd.f32 %v3762_v2, %v3696_v50 }
 0x74b   :  { %v3516_v48 = vpop.f32.mrf.mxu1 }
 0x74c   :  { %v3679_v50 = vpop.f32.mrf.mxu2  ;;  %v3534_v43 = vadd.f32 %v3516_v48, %v10822_v3  ;;  %v3990_v3 = vrot.slane %v10812_v62, 3  ;;  %v3991_v48 = vrot.slane %v10959_v60, 3 }
 0x74e   :  { %6722 = vmatmul.msk.f32.gmra.mxu3 %vm1067_vm2, %v10742_v47  ;;  %6689 = vmatmul.msk.f32.gmra.mxu1 %vm1067_vm2, %v10973_v38  ;;  %v3699_v47 = vadd.f32 %v3679_v50, %v3533_v15  ;;  %v13567_v50 = vld [vmem:[#allocation64_spill] sm:$0xff] }
 0x751   :  { %v3765_v30 = vpop.f32.mrf.mxu3  ;;  %6707 = vmatmul.msk.f32.gmra.mxu2 %vm1067_vm2, %v10982_v27 }
 0x752   :  { %v10979_v2 = vadd.f32 %v3765_v30, %v3697_v20 }
 0x753   :  { %v3827_v40 = vpop.f32.mrf.mxu1 }
 0x754   :  { %v3682_v19 = vpop.f32.mrf.mxu2  ;;  %v3875_v32 = vadd.f32 %v3827_v40, %v10831_v33  ;;  %v13570_v33 = vld [vmem:[#allocation65_spill] sm:$0xff] }
 0x755   :  { %v3700_v15 = vadd.f32 %v3682_v19, %v3534_v43  ;;  %v11005_v43 = vsel %vm3368_vm9, %v3990_v3, %v3991_v48 }
 0x756   :  { %6723 = vmatmul.msk.f32.gmra.mxu3 %vm1067_vm2, %v10760_v56  ;;  %6728 = vmatmul.msk.f32.vlgmr.msrb.gmra.mxu1 %vm1067_vm2, %v13566_v25  ;;  %v13568_v56 = vld [vmem:[#allocation116_spill] sm:$0xff]  ;;  %13569 = vst [vmem:[#allocation15_spill] sm:$0xff] %v11005_v43 }
 0x759   :  { %v3768_v42 = vpop.f32.mrf.mxu3  ;;  %6746 = vmatmul.msk.f32.vlgmr.msra.gmra.mxu2 %vm1067_vm2, %v13567_v50 }
 0x75a   :  { %v10991_v20 = vadd.f32 %v3768_v42, %v3698_v41 }
 0x75b   :  { %v3830_v30 = vpop.f32.mrf.mxu1 }
 0x75c   :  { %v3923_v27 = vpop.f32.mrf.mxu2  ;;  %v3876_v40 = vadd.f32 %v3830_v30, %v10840_v39  ;;  %v13573_v39 = vld [vmem:[#allocation119_spill] sm:$0xff] }
 0x75d   :  { %v3971_v41 = vadd.f32 %v3923_v27, %v3875_v32 }
 0x75e   :  { %6724 = vmatmul.msk.f32.gmra.mxu3 %vm1067_vm2, %v10778_v44  ;;  %6729 = vmatmul.msk.f32.gmra.mxu1 %vm1067_vm2, %v13568_v56  ;;  %v13571_v44 = vld [vmem:[#allocation118_spill] sm:$0xff] }
 0x761   :  { %v3771_v54 = vpop.f32.mrf.mxu3  ;;  %6747 = vmatmul.msk.f32.gmra.mxu2 %vm1067_vm2, %v13570_v33 }
 0x762   :  { %v11002_v25 = vadd.f32 %v3771_v54, %v3699_v47  ;;  %v13572_v54 = vld [vmem:[#allocation67_spill] sm:$0xff] }
 0x763   :  { %v3833_v42 = vpop.f32.mrf.mxu1 }
 0x764   :  { %v3926_v50 = vpop.f32.mrf.mxu2  ;;  %v3877_v3 = vadd.f32 %v3833_v42, %v10849_v4  ;;  %v13575_v4 = vld [vmem:[#allocation120_spill] sm:$0xff] }
 0x765   :  { %v3972_v27 = vadd.f32 %v3926_v50, %v3876_v40  ;;  %v13574_v40 = vld [vmem:[#allocation69_spill] sm:$0xff] }
 0x766   :  { %6725 = vmatmul.msk.f32.gmra.mxu3 %vm1067_vm2, %v11005_v43  ;;  %6730 = vmatmul.msk.f32.gmra.mxu1 %vm1067_vm2, %v13571_v44 }
 0x769   :  { %v3774_v19 = vpop.f32.mrf.mxu3  ;;  %6748 = vmatmul.msk.f32.gmra.mxu2 %vm1067_vm2, %v13572_v54 }
 0x76a   :  { %v11014_v47 = vadd.f32 %v3774_v19, %v3700_v15 }
 0x76b   :  { %v3836_v32 = vpop.f32.mrf.mxu1 }
 0x76c   :  { %v3929_v33 = vpop.f32.mrf.mxu2 }
 0x76d   :  { %v3973_v43 = vadd.f32 %v3929_v33, %v3877_v3  ;;  %v2303_v3 = vld [vmem:[#allocation2 + $0x1d0] ss:$2 sm:$0xff] }
 0x76e   :  { %6764 = vmatmul.msk.f32.vlgmr.msra.gmra.mxu3 %vm1067_vm2, %v10173_v5  ;;  %6731 = vmatmul.msk.f32.gmra.mxu1 %vm1067_vm2, %v13573_v39  ;;  %v3878_v5 = vadd.f32 %v3836_v32, %v10861_v21 }
 0x771   :  { %v4019_v48 = vpop.f32.mrf.mxu3  ;;  %6749 = vmatmul.msk.f32.gmra.mxu2 %vm1067_vm2, %v13574_v40  ;;  %v2447_v40 = vld [vmem:[#allocation2 + $0x1d1] ss:$2 sm:$0xff] }
 0x772   :  { %v11023_v30 = vadd.f32 %v4019_v48, %v3971_v41  ;;  %v2301_v41 = vld [vmem:[#allocation2 + $0x1c0] ss:$2 sm:$0xff]  ;;  %v2445_v48 = vld [vmem:[#allocation2 + $0x1c1] ss:$2 sm:$0xff] }
 0x773   :  { %v3839_v15 = vpop.f32.mrf.mxu1 }
 0x774   :  { %v3932_v50 = vpop.f32.mrf.mxu2  ;;  %v3879_v21 = vadd.f32 %v3839_v15, %v10877_v61  ;;  %v2299_v61 = vld [vmem:[#allocation2 + $0x1b0] ss:$2 sm:$0xff]  ;;  %v2443_v15 = vld [vmem:[#allocation2 + $0x1b1] ss:$2 sm:$0xff] }
 0x775   :  { %v3974_v54 = vadd.f32 %v3932_v50, %v3878_v5  ;;  %v2561_v5 = vadd.f32 %v2447_v40, %v2303_v3  ;;  %v2559_v3 = vadd.f32 %v2443_v15, %v2299_v61 }
 0x776   :  { %6765 = vmatmul.msk.f32.gmra.mxu3 %vm1067_vm2, %v10195_v9  ;;  %6732 = vmatmul.msk.f32.gmra.mxu1 %vm1067_vm2, %v13575_v4 }
 0x777   :  { %v2681_v4 = vrot.slane %v2561_v5, 4 }
 0x779   :  { %v4022_v19 = vpop.f32.mrf.mxu3  ;;  %6750 = vmatmul.msk.f32.gmra.mxu2 %vm1067_vm2, %v10236_v10 }
 0x77a   :  { %v11032_v42 = vadd.f32 %v4022_v19, %v3972_v27  ;;  %v2560_v27 = vadd.f32 %v2445_v48, %v2301_v41  ;;  %v13577_v41 = vld [vmem:[#allocation123_spill] sm:$0xff]  ;;  %v4083_v48 = vrot.slane %v10664_v22, 4 }
 0x77b   :  { %v3842_v33 = vpop.f32.mrf.mxu1 }
 0x77c   :  { %v3935_v9 = vpop.f32.mrf.mxu2  ;;  %v3880_v0 = vadd.f32 %v3842_v33, %v10889_v55  ;;  %v2792_v61 = vadd.f32 %v2681_v4, %v2560_v27 }
 0x77d   :  { %v3975_v50 = vadd.f32 %v3935_v9, %v3879_v21  ;;  %v4084_v21 = vrot.slane %v10857_v8, 4 }
 0x77e   :  { %6766 = vmatmul.msk.f32.gmra.mxu3 %vm1067_vm2, %v10216_v36  ;;  %6733 = vmatmul.msk.f32.gmra.mxu1 %vm1067_vm2, %v13576_v37  ;;  %v2680_v36 = vrot.slane %v2560_v27, 4  ;;  %v13580_v27 = vld [vmem:[#allocation79_spill] sm:$0xff] }
 0x780   :  { %v2682_v9 = vsel %vm2652_vm7, %v2680_v36, %v2681_v4  ;;  %v11061_v36 = vsel %vm2652_vm7, %v4083_v48, %v4084_v21 }
 0x781   :  { %v4025_v32 = vpop.f32.mrf.mxu3  ;;  %6751 = vmatmul.msk.f32.gmra.mxu2 %vm1067_vm2, %v10260_v51  ;;  %13578 = vst [vmem:[#allocation49_spill] sm:$0xff] %v11061_v36 }
 0x782   :  { %v11041_v19 = vadd.f32 %v4025_v32, %v3973_v43  ;;  %v2791_v32 = vadd.f32 %v2682_v9, %v2559_v3  ;;  %v13579_v3 = vld [vmem:[#allocation33_spill] sm:$0xff] }
 0x783   :  { %v3845_v10 = vpop.f32.mrf.mxu1 }
 0x784   :  { %v3938_v37 = vpop.f32.mrf.mxu2  ;;  %v3881_v33 = vadd.f32 %v3845_v10, %v10900_v53 }
 0x785   :  { %v3976_v40 = vadd.f32 %v3938_v37, %v3880_v0 }
 0x786   :  { %6767 = vmatmul.msk.f32.gmra.mxu3 %vm1067_vm2, %v10241_v31  ;;  %6734 = vmatmul.msk.f32.gmra.mxu1 %vm1067_vm2, %v13577_v41 }
 0x789   :  { %v4028_v39 = vpop.f32.mrf.mxu3  ;;  %6752 = vmatmul.msk.f32.gmra.mxu2 %vm1067_vm2, %v10664_v22 }
 0x78a   :  { %v11051_v43 = vadd.f32 %v4028_v39, %v3974_v54  ;;  %v2839_v54 = vmul.f32 0.25, %v2791_v32 }
 0x78b   :  { %v3848_v55 = vpop.f32.mrf.mxu1 }
 0x78c   :  { %v3941_v37 = vpop.f32.mrf.mxu2  ;;  %v11067_v5 = vmax.f32 %v2839_v54, 0.0  ;;  %v3882_v10 = vadd.f32 %v3848_v55, %v10912_v12  ;;  %v13581_v54 = vld [vmem:[#allocation8_spill] sm:$0xff] }
 0x78d   :  { %v3977_v39 = vadd.f32 %v3941_v37, %v3881_v33 }
 0x78e   :  { %6768 = vmatmul.msk.f32.gmra.mxu3 %vm1067_vm2, %v13544_v58  ;;  %6735 = vmatmul.msk.f32.gmra.mxu1 %vm1067_vm2, %v11061_v36 }
 0x791   :  { %v4031_v0 = vpop.f32.mrf.mxu3  ;;  %6753 = vmatmul.msk.f32.gmra.mxu2 %vm1067_vm2, %v11067_v5 }
 0x792   :  { %v11065_v8 = vadd.f32 %v4031_v0, %v3975_v50  ;;  %v2840_v50 = vmul.f32 0.25, %v2792_v61 }
 0x793   :  { %v3851_v15 = vpop.f32.mrf.mxu1 }
 0x794   :  { %v3944_v9 = vpop.f32.mrf.mxu2  ;;  %v11078_v32 = vmax.f32 %v2840_v50, 0.0  ;;  %v3883_v12 = vadd.f32 %v3851_v15, %v10921_v46  ;;  %v13583_v46 = vld [vmem:[#allocation83_spill] sm:$0xff]  ;;  %v13584_v50 = vld [vmem:[#allocation32_spill] sm:$0xff] }
 0x795   :  { %v3978_v21 = vadd.f32 %v3944_v9, %v3882_v10 }
 0x796   :  { %6769 = vmatmul.msk.f32.gmra.mxu3 %vm1067_vm2, %v13546_v6  ;;  %6736 = vmatmul.msk.f32.gmra.mxu1 %vm1067_vm2, %v13579_v3  ;;  %v4274_v0 = vrot.slane %v11078_v32, 1 }
 0x799   :  { %v4034_v53 = vpop.f32.mrf.mxu3  ;;  %6754 = vmatmul.msk.f32.gmra.mxu2 %vm1067_vm2, %v13580_v27 }
 0x79a   :  { %v11076_v48 = vadd.f32 %v4034_v53, %v3976_v40  ;;  %v4273_v40 = vrot.slane %v11067_v5, 1 }
 0x79b   :  { %v3854_v4 = vpop.f32.mrf.mxu1 }
 0x79c   :  { %v3947_v33 = vpop.f32.mrf.mxu2  ;;  %v11092_v10 = vsel %vm2950_vm8, %v4273_v40, %v4274_v0  ;;  %v3884_v15 = vadd.f32 %v3854_v4, %v10938_v23  ;;  %v13586_v23 = vld [vmem:[#allocation35_spill] sm:$0xff] }
 0x79d   :  { %v3979_v61 = vadd.f32 %v3947_v33, %v3883_v12  ;;  %13582 = vst [vmem:[#allocation50_spill] sm:$0xff] %v11092_v10 }
 0x79e   :  { %6770 = vmatmul.msk.f32.gmra.mxu3 %vm1067_vm2, %v10871_v59  ;;  %6737 = vmatmul.msk.f32.gmra.mxu1 %vm1067_vm2, %v13581_v54 }
 0x7a1   :  { %v4037_v55 = vpop.f32.mrf.mxu3  ;;  %6755 = vmatmul.msk.f32.gmra.mxu2 %vm1067_vm2, %v13583_v46 }
 0x7a2   :  { %v11089_v37 = vadd.f32 %v4037_v55, %v3977_v39  ;;  %v13585_v55 = vld [vmem:[#allocation85_spill] sm:$0xff] }
 0x7a3   :  { %v3857_v53 = vpop.f32.mrf.mxu1 }
 0x7a4   :  { %v3950_v3 = vpop.f32.mrf.mxu2  ;;  %v3885_v33 = vadd.f32 %v3857_v53, %v10951_v63  ;;  %v6816_v63 = vld [vmem:[%s12480_s2 + $0x70] sm:$0x3f] }
 0x7a5   :  { %v3980_v27 = vadd.f32 %v3950_v3, %v3884_v15  ;;  %v13587_v15 = vld [vmem:[#allocation88_spill] sm:$0xff]  ;;  %6817 = vmatpush.msk.msrb.mxu3 %vm3033_vm6, %v6816_v63 }
 0x7a6   :  { %6771 = vmatmul.msk.f32.gmra.mxu3 %vm1067_vm2, %v11092_v10  ;;  %6738 = vmatmul.msk.f32.gmra.mxu1 %vm1067_vm2, %v13584_v50  ;;  %v13588_v3 = vld [vmem:[#allocation36_spill] sm:$0xff] }
 0x7a7   :  { %v2517_v63 = vld [vmem:[#allocation2 + $0x401] ss:$2 sm:$0xff] }
 0x7a9   :  { %v4040_v9 = vpop.f32.mrf.mxu3  ;;  %6756 = vmatmul.msk.f32.gmra.mxu2 %vm1067_vm2, %v13585_v55  ;;  %v2519_v55 = vld [vmem:[#allocation2 + $0x411] ss:$2 sm:$0xff] }
 0x7aa   :  { %v11101_v39 = vadd.f32 %v4040_v9, %v3978_v21  ;;  %v6798_v21 = vld [vmem:[%s12480_s2 + $0x68] sm:$0x3f] }
 0x7ab   :  { %v3860_v12 = vpop.f32.mrf.mxu1  ;;  %6799 = vmatpush.msk.msrb.mxu2 %vm3033_vm6, %v6798_v21  ;;  %v2375_v21 = vld [vmem:[#allocation2 + $0x410] ss:$2 sm:$0xff] }
 0x7ac   :  { %v3953_v0 = vpop.f32.mrf.mxu2 }
 0x7ad   :  { %v3981_v46 = vadd.f32 %v3953_v0, %v3885_v33  ;;  %v2373_v0 = vld [vmem:[#allocation2 + $0x400] ss:$2 sm:$0xff] }
 0x7ae   :  { %6772 = vmatmul.msk.f32.gmra.mxu3 %vm1067_vm2, %v13551_v28  ;;  %6739 = vmatmul.msk.f32.gmra.mxu1 %vm1067_vm2, %v13586_v23 }
 0x7b1   :  { %v4043_v40 = vpop.f32.mrf.mxu3  ;;  %6757 = vmatmul.msk.f32.gmra.mxu2 %vm1067_vm2, %v13587_v15 }
 0x7b2   :  { %v11110_v4 = vadd.f32 %v4043_v40, %v3979_v61  ;;  %v3886_v61 = vadd.f32 %v3860_v12, %v10963_v24  ;;  %v6834_v24 = vld [vmem:[%s12480_s2 + $0x78] sm:$0x3f] }
 0x7b3   :  { %v3863_v28 = vpop.f32.mrf.mxu1  ;;  %6835 = vmatpush.msk.msrb.mxu1 %vm3033_vm6, %v6834_v24 }
 0x7b4   :  { %v3956_v9 = vpop.f32.mrf.mxu2 }
 0x7b5   :  { %v3982_v40 = vadd.f32 %v3956_v9, %v3886_v61  ;;  %v2596_v9 = vadd.f32 %v2517_v63, %v2373_v0  ;;  %v13590_v0 = vld [vmem:[#allocation40_spill] sm:$0xff]  ;;  %v4086_v63 = vrot.slane %v10812_v62, 4 }
 0x7b6   :  { %6773 = vmatmul.msk.f32.gmra.mxu3 %vm1067_vm2, %v13554_v17  ;;  %6740 = vmatmul.msk.f32.gmra.mxu1 %vm1067_vm2, %v13588_v3 }
 0x7b7   :  { %v2716_v10 = vrot.slane %v2596_v9, 4 }
 0x7b9   :  { %v4046_v53 = vpop.f32.mrf.mxu3  ;;  %6758 = vmatmul.msk.f32.gmra.mxu2 %vm1067_vm2, %v10439_v29 }
 0x7ba   :  { %v11127_v33 = vadd.f32 %v4046_v53, %v3980_v27  ;;  %v3887_v27 = vadd.f32 %v3863_v28, %v10979_v2  ;;  %v13589_v53 = vld [vmem:[#allocation38_spill] sm:$0xff] }
 0x7bb   :  { %v3866_v15 = vpop.f32.mrf.mxu1  ;;  %v2371_v2 = vld [vmem:[#allocation2 + $0x3f0] ss:$2 sm:$0xff]  ;;  %v2515_v28 = vld [vmem:[#allocation2 + $0x3f1] ss:$2 sm:$0xff] }
 0x7bc   :  { %v3959_v61 = vpop.f32.mrf.mxu2  ;;  %v3888_v24 = vadd.f32 %v3866_v15, %v10991_v20 }
 0x7bd   :  { %v3983_v29 = vadd.f32 %v3959_v61, %v3887_v27  ;;  %v4087_v27 = vrot.slane %v10959_v60, 4 }
 0x7be   :  { %6774 = vmatmul.msk.f32.gmra.mxu3 %vm1067_vm2, %v13556_v26  ;;  %6741 = vmatmul.msk.f32.gmra.mxu1 %vm1067_vm2, %v13589_v53  ;;  %v2597_v26 = vadd.f32 %v2519_v55, %v2375_v21  ;;  %v2595_v21 = vadd.f32 %v2515_v28, %v2371_v2 }
 0x7c0   :  { %v2717_v59 = vrot.slane %v2597_v26, 4 }
 0x7c1   :  { %v4049_v12 = vpop.f32.mrf.mxu3  ;;  %6759 = vmatmul.msk.f32.gmra.mxu2 %vm1067_vm2, %v10133_v1 }
 0x7c2   :  { %v11140_v17 = vadd.f32 %v4049_v12, %v3981_v46  ;;  %v2718_v46 = vsel %vm2652_vm7, %v2716_v10, %v2717_v59  ;;  %v11160_v10 = vsel %vm2652_vm7, %v4086_v63, %v4087_v27  ;;  %v2816_v28 = vadd.f32 %v2717_v59, %v2596_v9 }
 0x7c3   :  { %v3869_v22 = vpop.f32.mrf.mxu1  ;;  %v2815_v12 = vadd.f32 %v2718_v46, %v2595_v21  ;;  %13591 = vst [vmem:[#allocation56_spill] sm:$0xff] %v11160_v10 }
 0x7c4   :  { %v3962_v51 = vpop.f32.mrf.mxu2  ;;  %v3889_v15 = vadd.f32 %v3869_v22, %v11002_v25 }
 0x7c5   :  { %v3984_v26 = vadd.f32 %v3962_v51, %v3888_v24 }
 0x7c6   :  { %6775 = vmatmul.msk.f32.gmra.mxu3 %vm1067_vm2, %v13558_v18  ;;  %6742 = vmatmul.msk.f32.gmra.mxu1 %vm1067_vm2, %v13590_v0 }
 0x7c9   :  { %v4052_v6 = vpop.f32.mrf.mxu3  ;;  %6760 = vmatmul.msk.f32.gmra.mxu2 %vm1067_vm2, %v10812_v62 }
 0x7ca   :  { %v11150_v55 = vadd.f32 %v4052_v6, %v3982_v40  ;;  %v2863_v6 = vmul.f32 0.25, %v2815_v12 }
 0x7cb   :  { %v3872_v20 = vpop.f32.mrf.mxu1 }
 0x7cc   :  { %v3965_v40 = vpop.f32.mrf.mxu2  ;;  %v11166_v2 = vmax.f32 %v2863_v6, 0.0  ;;  %v3890_v22 = vadd.f32 %v3872_v20, %v11014_v47 }
 0x7cd   :  { %v3985_v61 = vadd.f32 %v3965_v40, %v3889_v15 }
 0x7ce   :  { %6776 = vmatmul.msk.f32.gmra.mxu3 %vm1067_vm2, %v13560_v16  ;;  %6743 = vmatmul.msk.f32.gmra.mxu1 %vm1067_vm2, %v11160_v10  ;;  %v4276_v20 = vrot.slane %v11166_v2, 1 }
 0x7d1   :  { %v4055_v51 = vpop.f32.mrf.mxu3  ;;  %6761 = vmatmul.msk.f32.gmra.mxu2 %vm1067_vm2, %v11166_v2 }
 0x7d2   :  { %v11164_v60 = vadd.f32 %v4055_v51, %v3983_v29  ;;  %v2864_v29 = vmul.f32 0.25, %v2816_v28 }
 0x7d3   :  { %v4115_v24 = vpop.f32.mrf.mxu1 }
 0x7d4   :  { %v3968_v46 = vpop.f32.mrf.mxu2  ;;  %v11177_v27 = vmax.f32 %v2864_v29, 0.0  ;;  %v4163_v47 = vadd.f32 %v4115_v24, %v11023_v30 }
 0x7d5   :  { %v3986_v63 = vadd.f32 %v3968_v46, %v3890_v22 }
 0x7d6   :  { %6777 = vmatmul.msk.f32.gmra.mxu3 %vm1067_vm2, %v13563_v7  ;;  %6782 = vmatmul.msk.f32.vlgmr.msra.gmra.mxu1 %vm1067_vm2, %v10209_v34  ;;  %v4277_v34 = vrot.slane %v11177_v27, 1 }
 0x7d8   :  { %v11191_v6 = vsel %vm2950_vm8, %v4276_v20, %v4277_v34  ;;  %v13593_v34 = vld [vmem:[#allocation122_spill] sm:$0xff] }
 0x7d9   :  { %v4058_v25 = vpop.f32.mrf.mxu3  ;;  %6800 = vmatmul.msk.f32.vlgmr.msrb.gmra.mxu2 %vm1067_vm2, %v10536_v49 }
 0x7da   :  { %v11175_v21 = vadd.f32 %v4058_v25, %v3984_v26 }
 0x7db   :  { %v4118_v59 = vpop.f32.mrf.mxu1 }
 0x7dc   :  { %v4207_v12 = vpop.f32.mrf.mxu2  ;;  %v4164_v30 = vadd.f32 %v4118_v59, %v11032_v42 }
 0x7dd   :  { %v4255_v15 = vadd.f32 %v4207_v12, %v4163_v47  ;;  %v13592_v12 = vld [vmem:[#allocation119_spill] sm:$0xff] }
 0x7de   :  { %6778 = vmatmul.msk.f32.gmra.mxu3 %vm1067_vm2, %v10973_v38  ;;  %6783 = vmatmul.msk.f32.gmra.mxu1 %vm1067_vm2, %v10230_v11 }
 0x7e1   :  { %v4061_v9 = vpop.f32.mrf.mxu3  ;;  %6801 = vmatmul.msk.f32.gmra.mxu2 %vm1067_vm2, %v10554_v13 }
 0x7e2   :  { %v11188_v26 = vadd.f32 %v4061_v9, %v3985_v61 }
 0x7e3   :  { %v4121_v49 = vpop.f32.mrf.mxu1 }
 0x7e4   :  { %v4210_v40 = vpop.f32.mrf.mxu2  ;;  %v4165_v22 = vadd.f32 %v4121_v49, %v11041_v19 }
 0x7e5   :  { %v4256_v28 = vadd.f32 %v4210_v40, %v4164_v30 }
 0x7e6   :  { %6779 = vmatmul.msk.f32.gmra.mxu3 %vm1067_vm2, %v11191_v6  ;;  %6784 = vmatmul.msk.f32.gmra.mxu1 %vm1067_vm2, %v10250_v14 }
 0x7e9   :  { %v4064_v51 = vpop.f32.mrf.mxu3  ;;  %6802 = vmatmul.msk.f32.gmra.mxu2 %vm1067_vm2, %v10572_v45 }
 0x7ea   :  { %v11200_v61 = vadd.f32 %v4064_v51, %v3986_v63 }
 0x7eb   :  { %v4124_v24 = vpop.f32.mrf.mxu1 }
 0x7ec   :  { %v4213_v46 = vpop.f32.mrf.mxu2 }
 0x7ed   :  { %v4257_v29 = vadd.f32 %v4213_v46, %v4165_v22  ;;  %v13596_v22 = vld [vmem:[#allocation30_spill] sm:$0xff] }
 0x7ee   :  { %6818 = vmatmul.msk.f32.vlgmr.msrb.gmra.mxu3 %vm1067_vm2, %v13568_v56  ;;  %6785 = vmatmul.msk.f32.gmra.mxu1 %vm1067_vm2, %v13543_v52  ;;  %v4166_v56 = vadd.f32 %v4124_v24, %v11051_v43  ;;  %v13594_v43 = vld [vmem:[#allocation78_spill] sm:$0xff] }
 0x7f1   :  { %v4305_v25 = vpop.f32.mrf.mxu3  ;;  %6803 = vmatmul.msk.f32.gmra.mxu2 %vm1067_vm2, %v10590_v57 }
 0x7f2   :  { %v11209_v42 = vadd.f32 %v4305_v25, %v4255_v15 }
 0x7f3   :  { %v4127_v63 = vpop.f32.mrf.mxu1 }
 0x7f4   :  { %v4216_v47 = vpop.f32.mrf.mxu2  ;;  %v4167_v15 = vadd.f32 %v4127_v63, %v11065_v8  ;;  %v13597_v8 = vld [vmem:[#allocation12_spill] sm:$0xff] }
 0x7f5   :  { %v4258_v9 = vadd.f32 %v4216_v47, %v4166_v56  ;;  %v4370_v47 = vrot.slane %v11078_v32, 2 }
 0x7f6   :  { %6819 = vmatmul.msk.f32.gmra.mxu3 %vm1067_vm2, %v13571_v44  ;;  %6786 = vmatmul.msk.f32.gmra.mxu1 %vm1067_vm2, %v13545_v35 }
 0x7f9   :  { %v4308_v59 = vpop.f32.mrf.mxu3  ;;  %6804 = vmatmul.msk.f32.gmra.mxu2 %vm1067_vm2, %v13593_v34 }
 0x7fa   :  { %v11218_v19 = vadd.f32 %v4308_v59, %v4256_v28  ;;  %v13595_v28 = vld [vmem:[#allocation120_spill] sm:$0xff] }
 0x7fb   :  { %v4130_v20 = vpop.f32.mrf.mxu1 }
 0x7fc   :  { %v4219_v30 = vpop.f32.mrf.mxu2  ;;  %v4168_v25 = vadd.f32 %v4130_v20, %v11076_v48 }
 0x7fd   :  { %v4259_v40 = vadd.f32 %v4219_v30, %v4167_v15  ;;  %v13598_v15 = vld [vmem:[#allocation7_spill] sm:$0xff]  ;;  %v13599_v30 = vld [vmem:[#allocation13_spill] sm:$0xff] }
 0x7fe   :  { %6820 = vmatmul.msk.f32.gmra.mxu3 %vm1067_vm2, %v13592_v12  ;;  %6787 = vmatmul.msk.f32.gmra.mxu1 %vm1067_vm2, %v13594_v43 }
 0x801   :  { %v4311_v49 = vpop.f32.mrf.mxu3  ;;  %6805 = vmatmul.msk.f32.gmra.mxu2 %vm1067_vm2, %v13596_v22 }
 0x802   :  { %v11227_v51 = vadd.f32 %v4311_v49, %v4257_v29  ;;  %v4369_v29 = vrot.slane %v11067_v5, 2 }
 0x803   :  { %v4133_v24 = vpop.f32.mrf.mxu1 }
 0x804   :  { %v4222_v56 = vpop.f32.mrf.mxu2  ;;  %v4169_v48 = vadd.f32 %v4133_v24, %v11089_v37  ;;  %v11246_v20 = vsel %vm3033_vm6, %v4369_v29, %v4370_v47 }
 0x805   :  { %v4260_v59 = vadd.f32 %v4222_v56, %v4168_v25  ;;  %v4465_v25 = vrot.slane %v11067_v5, 3 }
 0x806   :  { %6821 = vmatmul.msk.f32.gmra.mxu3 %vm1067_vm2, %v13595_v28  ;;  %6788 = vmatmul.msk.f32.gmra.mxu1 %vm1067_vm2, %v13597_v8 }
 0x809   :  { %v4314_v46 = vpop.f32.mrf.mxu3  ;;  %6806 = vmatmul.msk.f32.gmra.mxu2 %vm1067_vm2, %v13599_v30  ;;  %v13601_v30 = vld [vmem:[#allocation86_spill] sm:$0xff] }
 0x80a   :  { %v11236_v63 = vadd.f32 %v4314_v46, %v4258_v9  ;;  %v4466_v46 = vrot.slane %v11078_v32, 3 }
 0x80b   :  { %v4136_v49 = vpop.f32.mrf.mxu1 }
 0x80c   :  { %v4225_v9 = vpop.f32.mrf.mxu2  ;;  %v11255_v34 = vsel %vm3368_vm9, %v4465_v25, %v4466_v46  ;;  %v4170_v24 = vadd.f32 %v4136_v49, %v11101_v39  ;;  %v13603_v39 = vld [vmem:[#allocation91_spill] sm:$0xff]  ;;  %v4561_v49 = vrot.slane %v11067_v5, 4 }
 0x80d   :  { %13600 = vst [vmem:[#allocation63_spill] sm:$0xff] %v11255_v34 }
 0x80e   :  { %6822 = vmatmul.msk.f32.gmra.mxu3 %vm1067_vm2, %v13598_v15  ;;  %6789 = vmatmul.msk.f32.gmra.mxu1 %vm1067_vm2, %v11246_v20  ;;  %v4261_v15 = vadd.f32 %v4225_v9, %v4169_v48  ;;  %v13602_v9 = vld [vmem:[#allocation31_spill] sm:$0xff] }
 0x811   :  { %v4317_v22 = vpop.f32.mrf.mxu3  ;;  %6807 = vmatmul.msk.f32.gmra.mxu2 %vm1067_vm2, %v11255_v34 }
 0x812   :  { %v11252_v56 = vadd.f32 %v4317_v22, %v4259_v40 }
 0x813   :  { %v4139_v37 = vpop.f32.mrf.mxu1 }
 0x814   :  { %v4228_v47 = vpop.f32.mrf.mxu2  ;;  %v4171_v25 = vadd.f32 %v4139_v37, %v11110_v4  ;;  %v13605_v4 = vld [vmem:[#allocation34_spill] sm:$0xff] }
 0x815   :  { %v4262_v22 = vadd.f32 %v4228_v47, %v4170_v24 }
 0x816   :  { %6823 = vmatmul.msk.f32.gmra.mxu3 %vm1067_vm2, %v13577_v41  ;;  %6790 = vmatmul.msk.f32.gmra.mxu1 %vm1067_vm2, %v13601_v30  ;;  %v13606_v41 = vld [vmem:[#allocation105_spill] sm:$0xff] }
 0x819   :  { %v4320_v29 = vpop.f32.mrf.mxu3  ;;  %6808 = vmatmul.msk.f32.gmra.mxu2 %vm1067_vm2, %v13602_v9 }
 0x81a   :  { %v11264_v40 = vadd.f32 %v4320_v29, %v4260_v59  ;;  %v4562_v59 = vrot.slane %v11078_v32, 4 }
 0x81b   :  { %v4142_v48 = vpop.f32.mrf.mxu1 }
 0x81c   :  { %v4231_v34 = vpop.f32.mrf.mxu2  ;;  %v11278_v29 = vsel %vm2652_vm7, %v4561_v49, %v4562_v59  ;;  %v4172_v37 = vadd.f32 %v4142_v48, %v11127_v33  ;;  %v13608_v33 = vld [vmem:[#allocation113_spill] sm:$0xff] }
 0x81d   :  { %v4263_v24 = vadd.f32 %v4231_v34, %v4171_v25  ;;  %13604 = vst [vmem:[#allocation89_spill] sm:$0xff] %v11278_v29  ;;  %v13607_v25 = vld [vmem:[#allocation9_spill] sm:$0xff] }
 0x81e   :  { %6824 = vmatmul.msk.f32.gmra.mxu3 %vm1067_vm2, %v11061_v36  ;;  %6791 = vmatmul.msk.f32.gmra.mxu1 %vm1067_vm2, %v13603_v39 }
 0x821   :  { %v4323_v46 = vpop.f32.mrf.mxu3  ;;  %6809 = vmatmul.msk.f32.gmra.mxu2 %vm1067_vm2, %v13605_v4 }
 0x822   :  { %v11275_v30 = vadd.f32 %v4323_v46, %v4261_v15 }
 0x823   :  { %v4145_v47 = vpop.f32.mrf.mxu1 }
 0x824   :  { %v4234_v36 = vpop.f32.mrf.mxu2  ;;  %v4173_v46 = vadd.f32 %v4145_v47, %v11140_v17  ;;  %v6870_v17 = vld [vmem:[%s12480_s2 + $0x88] sm:$0x3f] }
 0x825   :  { %v4264_v34 = vadd.f32 %v4234_v36, %v4172_v37  ;;  %v6852_v36 = vld [vmem:[%s12480_s2 + $0x80] sm:$0x3f]  ;;  %6871 = vmatpush.msk.msra.mxu3 %vm3033_vm6, %v6870_v17  ;;  %v6888_v17 = vld [vmem:[%s12480_s2 + $0x90] sm:$0x3f] }
 0x826   :  { %6825 = vmatmul.msk.f32.gmra.mxu3 %vm1067_vm2, %v11278_v29  ;;  %6792 = vmatmul.msk.f32.gmra.mxu1 %vm1067_vm2, %v13606_v41 }
 0x827   :  { %6853 = vmatpush.msk.msra.mxu2 %vm3033_vm6, %v6852_v36  ;;  %v13611_v36 = vld [vmem:[#allocation37_spill] sm:$0xff]  ;;  %6889 = vmatpush.msk.msra.mxu1 %vm3033_vm6, %v6888_v17 }
 0x829   :  { %v4326_v9 = vpop.f32.mrf.mxu3  ;;  %6810 = vmatmul.msk.f32.gmra.mxu2 %vm1067_vm2, %v13607_v25 }
 0x82a   :  { %v11287_v32 = vadd.f32 %v4326_v9, %v4262_v22  ;;  %v13609_v22 = vld [vmem:[#allocation10_spill] sm:$0xff] }
 0x82b   :  { %v4148_v15 = vpop.f32.mrf.mxu1  ;;  %v13610_v9 = vld [vmem:[#allocation114_spill] sm:$0xff] }
 0x82c   :  { %v4237_v59 = vpop.f32.mrf.mxu2 }
 0x82d   :  { %v4265_v4 = vadd.f32 %v4237_v59, %v4173_v46 }
 0x82e   :  { %6826 = vmatmul.msk.f32.gmra.mxu3 %vm1067_vm2, %v13581_v54  ;;  %6793 = vmatmul.msk.f32.gmra.mxu1 %vm1067_vm2, %v13608_v33 }
 0x831   :  { %v4329_v49 = vpop.f32.mrf.mxu3  ;;  %6811 = vmatmul.msk.f32.gmra.mxu2 %vm1067_vm2, %v13609_v22 }
 0x832   :  { %v11296_v48 = vadd.f32 %v4329_v49, %v4263_v24  ;;  %v4174_v24 = vadd.f32 %v4148_v15, %v11150_v55 }
 0x833   :  { %v4151_v54 = vpop.f32.mrf.mxu1 }
 0x834   :  { %v4240_v37 = vpop.f32.mrf.mxu2  ;;  %v4175_v55 = vadd.f32 %v4151_v54, %v11164_v60  ;;  %v13614_v60 = vld [vmem:[#allocation14_spill] sm:$0xff] }
 0x835   :  { %v4266_v49 = vadd.f32 %v4240_v37, %v4174_v24 }
 0x836   :  { %6827 = vmatmul.msk.f32.gmra.mxu3 %vm1067_vm2, %v13584_v50  ;;  %6794 = vmatmul.msk.f32.gmra.mxu1 %vm1067_vm2, %v13610_v9 }
 0x839   :  { %v4332_v47 = vpop.f32.mrf.mxu3  ;;  %6812 = vmatmul.msk.f32.gmra.mxu2 %vm1067_vm2, %v13611_v36  ;;  %v13613_v36 = vld [vmem:[#allocation39_spill] sm:$0xff] }
 0x83a   :  { %v11313_v46 = vadd.f32 %v4332_v47, %v4264_v34  ;;  %v13612_v34 = vld [vmem:[#allocation96_spill] sm:$0xff] }
 0x83b   :  { %v4154_v59 = vpop.f32.mrf.mxu1 }
 0x83c   :  { %v4243_v22 = vpop.f32.mrf.mxu2 }
 0x83d   :  { %v4267_v47 = vadd.f32 %v4243_v22, %v4175_v55  ;;  %v4373_v22 = vrot.slane %v11177_v27, 2 }
 0x83e   :  { %6828 = vmatmul.msk.f32.gmra.mxu3 %vm1067_vm2, %v13586_v23  ;;  %6795 = vmatmul.msk.f32.gmra.mxu1 %vm1067_vm2, %v13612_v34  ;;  %v4176_v23 = vadd.f32 %v4154_v59, %v11175_v21 }
 0x841   :  { %v4335_v15 = vpop.f32.mrf.mxu3  ;;  %6813 = vmatmul.msk.f32.gmra.mxu2 %vm1067_vm2, %v13613_v36 }
 0x842   :  { %v11326_v24 = vadd.f32 %v4335_v15, %v4265_v4  ;;  %v4372_v4 = vrot.slane %v11166_v2, 2  ;;  %v13615_v15 = vld [vmem:[#allocation15_spill] sm:$0xff] }
 0x843   :  { %v4157_v37 = vpop.f32.mrf.mxu1 }
 0x844   :  { %v4246_v25 = vpop.f32.mrf.mxu2  ;;  %v4177_v21 = vadd.f32 %v4157_v37, %v11188_v26  ;;  %v11345_v59 = vsel %vm3033_vm6, %v4372_v4, %v4373_v22 }
 0x845   :  { %v4268_v50 = vadd.f32 %v4246_v25, %v4176_v23  ;;  %v4468_v23 = vrot.slane %v11166_v2, 3  ;;  %v4469_v25 = vrot.slane %v11177_v27, 3 }
 0x846   :  { %6829 = vmatmul.msk.f32.gmra.mxu3 %vm1067_vm2, %v13588_v3  ;;  %6796 = vmatmul.msk.f32.gmra.mxu1 %vm1067_vm2, %v13614_v60 }
 0x847   :  { %v11354_v3 = vsel %vm3368_vm9, %v4468_v23, %v4469_v25 }
 0x848   :  { %13616 = vst [vmem:[#allocation90_spill] sm:$0xff] %v11354_v3 }
 0x849   :  { %v4338_v17 = vpop.f32.mrf.mxu3  ;;  %6814 = vmatmul.msk.f32.gmra.mxu2 %vm1067_vm2, %v13615_v15  ;;  %v13617_v15 = vld [vmem:[#allocation65_spill] sm:$0xff] }
 0x84a   :  { %v11335_v54 = vadd.f32 %v4338_v17, %v4266_v49 }
 0x84b   :  { %v4160_v55 = vpop.f32.mrf.mxu1 }
 0x84c   :  { %v4249_v49 = vpop.f32.mrf.mxu2  ;;  %v4178_v37 = vadd.f32 %v4160_v55, %v11200_v61  ;;  %v4564_v61 = vrot.slane %v11166_v2, 4  ;;  %v4565_v55 = vrot.slane %v11177_v27, 4 }
 0x84e   :  { %6830 = vmatmul.msk.f32.gmra.mxu3 %vm1067_vm2, %v13589_v53  ;;  %6797 = vmatmul.msk.f32.gmra.mxu1 %vm1067_vm2, %v11345_v59  ;;  %v4269_v53 = vadd.f32 %v4249_v49, %v4177_v21  ;;  %v13618_v49 = vld [vmem:[#allocation66_spill] sm:$0xff] }
 0x851   :  { %v4341_v36 = vpop.f32.mrf.mxu3  ;;  %6815 = vmatmul.msk.f32.gmra.mxu2 %vm1067_vm2, %v11354_v3 }
 0x852   :  { %v11351_v17 = vadd.f32 %v4341_v36, %v4267_v47 }
 0x853   :  { %v4401_v26 = vpop.f32.mrf.mxu1 }
 0x854   :  { %v4252_v22 = vpop.f32.mrf.mxu2  ;;  %v4449_v23 = vadd.f32 %v4401_v26, %v11209_v42  ;;  %v13621_v42 = vld [vmem:[#allocation68_spill] sm:$0xff] }
 0x855   :  { %v4270_v47 = vadd.f32 %v4252_v22, %v4178_v37  ;;  %v11377_v37 = vsel %vm2652_vm7, %v4564_v61, %v4565_v55 }
 0x856   :  { %6831 = vmatmul.msk.f32.gmra.mxu3 %vm1067_vm2, %v13590_v0  ;;  %6836 = vmatmul.msk.f32.vlgmr.msrb.gmra.mxu1 %vm1067_vm2, %v13617_v15  ;;  %v13619_v0 = vld [vmem:[#allocation67_spill] sm:$0xff]  ;;  %13620 = vst [vmem:[#allocation92_spill] sm:$0xff] %v11377_v37 }
 0x859   :  { %v4344_v4 = vpop.f32.mrf.mxu3  ;;  %6854 = vmatmul.msk.f32.vlgmr.msra.gmra.mxu2 %vm1067_vm2, %v13618_v49  ;;  %v13622_v49 = vld [vmem:[#allocation69_spill] sm:$0xff] }
 0x85a   :  { %v11363_v36 = vadd.f32 %v4344_v4, %v4268_v50 }
 0x85b   :  { %v4404_v21 = vpop.f32.mrf.mxu1 }
 0x85c   :  { %v4497_v3 = vpop.f32.mrf.mxu2  ;;  %v4450_v26 = vadd.f32 %v4404_v21, %v11218_v19  ;;  %v13623_v19 = vld [vmem:[#allocation70_spill] sm:$0xff] }
 0x85d   :  { %v4545_v15 = vadd.f32 %v4497_v3, %v4449_v23 }
 0x85e   :  { %6832 = vmatmul.msk.f32.gmra.mxu3 %vm1067_vm2, %v11160_v10  ;;  %6837 = vmatmul.msk.f32.gmra.mxu1 %vm1067_vm2, %v13619_v0 }
 0x861   :  { %v4347_v25 = vpop.f32.mrf.mxu3  ;;  %6855 = vmatmul.msk.f32.gmra.mxu2 %vm1067_vm2, %v13621_v42 }
 0x862   :  { %v11374_v50 = vadd.f32 %v4347_v25, %v4269_v53 }
 0x863   :  { %v4407_v4 = vpop.f32.mrf.mxu1 }
 0x864   :  { %v4500_v27 = vpop.f32.mrf.mxu2  ;;  %v4451_v25 = vadd.f32 %v4407_v4, %v11227_v51 }
 0x865   :  { %v4546_v3 = vadd.f32 %v4500_v27, %v4450_v26  ;;  %v2309_v26 = vld [vmem:[#allocation2 + $0x200] ss:$2 sm:$0xff]  ;;  %v2453_v27 = vld [vmem:[#allocation2 + $0x201] ss:$2 sm:$0xff] }
 0x866   :  { %6833 = vmatmul.msk.f32.gmra.mxu3 %vm1067_vm2, %v11377_v37  ;;  %6838 = vmatmul.msk.f32.gmra.mxu1 %vm1067_vm2, %v13622_v49  ;;  %v13624_v37 = vld [vmem:[#allocation74_spill] sm:$0xff] }
 0x869   :  { %v4350_v22 = vpop.f32.mrf.mxu3  ;;  %6856 = vmatmul.msk.f32.gmra.mxu2 %vm1067_vm2, %v10241_v31 }
 0x86a   :  { %v11386_v53 = vadd.f32 %v4350_v22, %v4270_v47  ;;  %v2451_v22 = vld [vmem:[#allocation2 + $0x1f1] ss:$2 sm:$0xff] }
 0x86b   :  { %v4410_v23 = vpop.f32.mrf.mxu1 }
 0x86c   :  { %v4503_v55 = vpop.f32.mrf.mxu2  ;;  %v4452_v51 = vadd.f32 %v4410_v23, %v11236_v63  ;;  %v2305_v23 = vld [vmem:[#allocation2 + $0x1e0] ss:$2 sm:$0xff] }
 0x86d   :  { %v4547_v42 = vadd.f32 %v4503_v55, %v4451_v25  ;;  %v2564_v55 = vadd.f32 %v2453_v27, %v2309_v26 }
 0x86e   :  { %6872 = vmatmul.msk.f32.vlgmr.msra.gmra.mxu3 %vm1067_vm2, %v10230_v11  ;;  %6839 = vmatmul.msk.f32.gmra.mxu1 %vm1067_vm2, %v13623_v19  ;;  %v2307_v11 = vld [vmem:[#allocation2 + $0x1f0] ss:$2 sm:$0xff]  ;;  %v2449_v19 = vld [vmem:[#allocation2 + $0x1e1] ss:$2 sm:$0xff] }
 0x86f   :  { %v2684_v29 = vrot.slane %v2564_v55, 4 }
 0x871   :  { %v4593_v61 = vpop.f32.mrf.mxu3  ;;  %6857 = vmatmul.msk.f32.gmra.mxu2 %vm1067_vm2, %v13544_v58 }
 0x872   :  { %v11395_v21 = vadd.f32 %v4593_v61, %v4545_v15  ;;  %v2563_v61 = vadd.f32 %v2451_v22, %v2307_v11  ;;  %v2562_v22 = vadd.f32 %v2449_v19, %v2305_v23 }
 0x873   :  { %v4413_v47 = vpop.f32.mrf.mxu1 }
 0x874   :  { %v4506_v31 = vpop.f32.mrf.mxu2  ;;  %v2683_v10 = vrot.slane %v2563_v61, 4  ;;  %v4453_v63 = vadd.f32 %v4413_v47, %v11252_v56  ;;  %v13627_v56 = vld [vmem:[#allocation11_spill] sm:$0xff] }
 0x875   :  { %v4548_v25 = vadd.f32 %v4506_v31, %v4452_v51  ;;  %v2794_v51 = vadd.f32 %v2684_v29, %v2563_v61 }
 0x876   :  { %6873 = vmatmul.msk.f32.gmra.mxu3 %vm1067_vm2, %v10250_v14  ;;  %6840 = vmatmul.msk.f32.gmra.mxu1 %vm1067_vm2, %v13624_v37  ;;  %v13625_v14 = vld [vmem:[#allocation76_spill] sm:$0xff]  ;;  %v2685_v26 = vsel %vm2652_vm7, %v2683_v10, %v2684_v29 }
 0x877   :  { %v2793_v27 = vadd.f32 %v2685_v26, %v2562_v22 }
 0x879   :  { %v4596_v4 = vpop.f32.mrf.mxu3  ;;  %6858 = vmatmul.msk.f32.gmra.mxu2 %vm1067_vm2, %v13625_v14 }
 0x87a   :  { %v11404_v15 = vadd.f32 %v4596_v4, %v4546_v3  ;;  %v13626_v3 = vld [vmem:[#allocation121_spill] sm:$0xff] }
 0x87b   :  { %v4416_v58 = vpop.f32.mrf.mxu1 }
 0x87c   :  { %v4509_v37 = vpop.f32.mrf.mxu2  ;;  %v4454_v47 = vadd.f32 %v4416_v58, %v11264_v40 }
 0x87d   :  { %v4549_v11 = vadd.f32 %v4509_v37, %v4453_v63  ;;  %v2841_v37 = vmul.f32 0.25, %v2793_v27  ;;  %v13628_v63 = vld [vmem:[#allocation50_spill] sm:$0xff] }
 0x87e   :  { %6874 = vmatmul.msk.f32.gmra.mxu3 %vm1067_vm2, %v13543_v52  ;;  %6841 = vmatmul.msk.f32.gmra.mxu1 %vm1067_vm2, %v13626_v3 }
 0x87f   :  { %v11425_v29 = vmax.f32 %v2841_v37, 0.0 }
 0x881   :  { %v4599_v49 = vpop.f32.mrf.mxu3  ;;  %6859 = vmatmul.msk.f32.gmra.mxu2 %vm1067_vm2, %v13627_v56 }
 0x882   :  { %v11413_v31 = vadd.f32 %v4599_v49, %v4547_v42  ;;  %v2842_v42 = vmul.f32 0.25, %v2794_v51 }
 0x883   :  { %v4419_v4 = vpop.f32.mrf.mxu1 }
 0x884   :  { %v4512_v14 = vpop.f32.mrf.mxu2  ;;  %v11427_v19 = vmax.f32 %v2842_v42, 0.0  ;;  %v4455_v58 = vadd.f32 %v4419_v4, %v11275_v30 }
 0x885   :  { %v4550_v49 = vadd.f32 %v4512_v14, %v4454_v47  ;;  %v4751_v14 = vrot.slane %v11425_v29, 1 }
 0x886   :  { %6875 = vmatmul.msk.f32.gmra.mxu3 %vm1067_vm2, %v13545_v35  ;;  %6842 = vmatmul.msk.f32.gmra.mxu1 %vm1067_vm2, %v11067_v5 }
 0x889   :  { %v4602_v55 = vpop.f32.mrf.mxu3  ;;  %6860 = vmatmul.msk.f32.gmra.mxu2 %vm1067_vm2, %v13628_v63 }
 0x88a   :  { %v11423_v10 = vadd.f32 %v4602_v55, %v4548_v25  ;;  %v4752_v25 = vrot.slane %v11427_v19, 1  ;;  %v13630_v55 = vld [vmem:[#allocation83_spill] sm:$0xff] }
 0x88b   :  { %v4422_v61 = vpop.f32.mrf.mxu1 }
 0x88c   :  { %v4515_v23 = vpop.f32.mrf.mxu2  ;;  %v11441_v27 = vsel %vm2950_vm8, %v4751_v14, %v4752_v25  ;;  %v4456_v30 = vadd.f32 %v4422_v61, %v11287_v32  ;;  %v13632_v32 = vld [vmem:[#allocation85_spill] sm:$0xff]  ;;  %v4847_v61 = vrot.slane %v11425_v29, 2 }
 0x88d   :  { %v4551_v22 = vadd.f32 %v4515_v23, %v4455_v58  ;;  %13629 = vst [vmem:[#allocation93_spill] sm:$0xff] %v11441_v27  ;;  %v13631_v58 = vld [vmem:[#allocation84_spill] sm:$0xff] }
 0x88e   :  { %6876 = vmatmul.msk.f32.gmra.mxu3 %vm1067_vm2, %v13594_v43  ;;  %6843 = vmatmul.msk.f32.gmra.mxu1 %vm1067_vm2, %v11425_v29 }
 0x891   :  { %v4605_v40 = vpop.f32.mrf.mxu3  ;;  %6861 = vmatmul.msk.f32.gmra.mxu2 %vm1067_vm2, %v11441_v27  ;;  %v13635_v27 = vld [vmem:[#allocation88_spill] sm:$0xff] }
 0x892   :  { %v11438_v26 = vadd.f32 %v4605_v40, %v4549_v11 }
 0x893   :  { %v4425_v51 = vpop.f32.mrf.mxu1 }
 0x894   :  { %v4518_v47 = vpop.f32.mrf.mxu2  ;;  %v4457_v40 = vadd.f32 %v4425_v51, %v11296_v48  ;;  %v13634_v48 = vld [vmem:[#allocation87_spill] sm:$0xff] }
 0x895   :  { %v4552_v37 = vadd.f32 %v4518_v47, %v4456_v30 }
 0x896   :  { %6877 = vmatmul.msk.f32.gmra.mxu3 %vm1067_vm2, %v13597_v8  ;;  %6844 = vmatmul.msk.f32.gmra.mxu1 %vm1067_vm2, %v13630_v55 }
 0x899   :  { %v4608_v4 = vpop.f32.mrf.mxu3  ;;  %6862 = vmatmul.msk.f32.gmra.mxu2 %vm1067_vm2, %v13631_v58 }
 0x89a   :  { %v11450_v11 = vadd.f32 %v4608_v4, %v4550_v49  ;;  %v4848_v49 = vrot.slane %v11427_v19, 2 }
 0x89b   :  { %v4428_v42 = vpop.f32.mrf.mxu1 }
 0x89c   :  { %v4521_v14 = vpop.f32.mrf.mxu2  ;;  %v11464_v4 = vsel %vm3033_vm6, %v4847_v61, %v4848_v49  ;;  %v4458_v51 = vadd.f32 %v4428_v42, %v11313_v46  ;;  %v13636_v46 = vld [vmem:[#allocation95_spill] sm:$0xff] }
 0x89d   :  { %v4553_v30 = vadd.f32 %v4521_v14, %v4457_v40  ;;  %13633 = vst [vmem:[#allocation94_spill] sm:$0xff] %v11464_v4 }
 0x89e   :  { %6878 = vmatmul.msk.f32.gmra.mxu3 %vm1067_vm2, %v11246_v20  ;;  %6845 = vmatmul.msk.f32.gmra.mxu1 %vm1067_vm2, %v13632_v32 }
 0x8a1   :  { %v4611_v23 = vpop.f32.mrf.mxu3  ;;  %6863 = vmatmul.msk.f32.gmra.mxu2 %vm1067_vm2, %v13634_v48 }
 0x8a2   :  { %v11461_v25 = vadd.f32 %v4611_v23, %v4551_v22 }
 0x8a3   :  { %v4431_v47 = vpop.f32.mrf.mxu1 }
 0x8a4   :  { %v4524_v58 = vpop.f32.mrf.mxu2  ;;  %v4459_v14 = vadd.f32 %v4431_v47, %v11326_v24  ;;  %v2379_v24 = vld [vmem:[#allocation2 + $0x430] ss:$2 sm:$0xff]  ;;  %v2381_v47 = vld [vmem:[#allocation2 + $0x440] ss:$2 sm:$0xff] }
 0x8a5   :  { %v4554_v40 = vadd.f32 %v4524_v58, %v4458_v51  ;;  %v2523_v51 = vld [vmem:[#allocation2 + $0x431] ss:$2 sm:$0xff] }
 0x8a6   :  { %6879 = vmatmul.msk.f32.gmra.mxu3 %vm1067_vm2, %v11464_v4  ;;  %6846 = vmatmul.msk.f32.gmra.mxu1 %vm1067_vm2, %v13635_v27 }
 0x8a9   :  { %v4614_v55 = vpop.f32.mrf.mxu3  ;;  %6864 = vmatmul.msk.f32.gmra.mxu2 %vm1067_vm2, %v13558_v18 }
 0x8aa   :  { %v11473_v22 = vadd.f32 %v4614_v55, %v4552_v37  ;;  %v6906_v37 = vld [vmem:[%s12480_s2 + $0x98] sm:$0x3f]  ;;  %v2525_v55 = vld [vmem:[#allocation2 + $0x441] ss:$2 sm:$0xff] }
 0x8ab   :  { %v4434_v23 = vpop.f32.mrf.mxu1  ;;  %6907 = vmatpush.msk.msrb.mxu2 %vm3033_vm6, %v6906_v37  ;;  %v2600_v18 = vadd.f32 %v2525_v55, %v2381_v47 }
 0x8ac   :  { %v4527_v49 = vpop.f32.mrf.mxu2  ;;  %v4460_v58 = vadd.f32 %v4434_v23, %v11335_v54  ;;  %v6942_v54 = vld [vmem:[%s12480_s2 + $0xa8] sm:$0x3f] }
 0x8ad   :  { %v4555_v48 = vadd.f32 %v4527_v49, %v4459_v14  ;;  %v2720_v4 = vrot.slane %v2600_v18, 4  ;;  %6943 = vmatpush.msk.msrb.mxu1 %vm3033_vm6, %v6942_v54  ;;  %v2377_v23 = vld [vmem:[#allocation2 + $0x420] ss:$2 sm:$0xff] }
 0x8ae   :  { %6880 = vmatmul.msk.f32.gmra.mxu3 %vm1067_vm2, %v13603_v39  ;;  %6847 = vmatmul.msk.f32.gmra.mxu1 %vm1067_vm2, %v13636_v46 }
 0x8b1   :  { %v4617_v61 = vpop.f32.mrf.mxu3  ;;  %6865 = vmatmul.msk.f32.gmra.mxu2 %vm1067_vm2, %v13560_v16  ;;  %v2599_v16 = vadd.f32 %v2523_v51, %v2379_v24  ;;  %v2521_v24 = vld [vmem:[#allocation2 + $0x421] ss:$2 sm:$0xff] }
 0x8b2   :  { %v11482_v42 = vadd.f32 %v4617_v61, %v4553_v30  ;;  %v6924_v30 = vld [vmem:[%s12480_s2 + $0xa0] sm:$0x3f] }
 0x8b3   :  { %v4437_v39 = vpop.f32.mrf.mxu1  ;;  %6925 = vmatpush.msk.msrb.mxu3 %vm3033_vm6, %v6924_v30  ;;  %v2719_v30 = vrot.slane %v2599_v16, 4 }
 0x8b4   :  { %v4530_v61 = vpop.f32.mrf.mxu2 }
 0x8b5   :  { %v4556_v37 = vadd.f32 %v4530_v61, %v4460_v58  ;;  %v2721_v18 = vsel %vm2652_vm7, %v2719_v30, %v2720_v4 }
 0x8b6   :  { %6881 = vmatmul.msk.f32.gmra.mxu3 %vm1067_vm2, %v13606_v41  ;;  %6848 = vmatmul.msk.f32.gmra.mxu1 %vm1067_vm2, %v10133_v1 }
 0x8b9   :  { %v4620_v14 = vpop.f32.mrf.mxu3  ;;  %6866 = vmatmul.msk.f32.gmra.mxu2 %vm1067_vm2, %v13563_v7  ;;  %v2818_v7 = vadd.f32 %v2720_v4, %v2599_v16 }
 0x8ba   :  { %v11499_v49 = vadd.f32 %v4620_v14, %v4554_v40  ;;  %v4461_v40 = vadd.f32 %v4437_v39, %v11351_v17  ;;  %v2598_v14 = vadd.f32 %v2521_v24, %v2377_v23 }
 0x8bb   :  { %v4440_v41 = vpop.f32.mrf.mxu1 }
 0x8bc   :  { %v4533_v51 = vpop.f32.mrf.mxu2  ;;  %v2817_v61 = vadd.f32 %v2721_v18, %v2598_v14  ;;  %v4462_v17 = vadd.f32 %v4440_v41, %v11363_v36 }
 0x8bd   :  { %v4557_v58 = vadd.f32 %v4533_v51, %v4461_v40  ;;  %v2866_v40 = vmul.f32 0.25, %v2818_v7 }
 0x8be   :  { %6882 = vmatmul.msk.f32.gmra.mxu3 %vm1067_vm2, %v13608_v33  ;;  %6849 = vmatmul.msk.f32.gmra.mxu1 %vm1067_vm2, %v10812_v62 }
 0x8bf   :  { %v11526_v4 = vmax.f32 %v2866_v40, 0.0 }
 0x8c1   :  { %v4623_v47 = vpop.f32.mrf.mxu3  ;;  %6867 = vmatmul.msk.f32.gmra.mxu2 %vm1067_vm2, %v10973_v38 }
 0x8c2   :  { %v11512_v55 = vadd.f32 %v4623_v47, %v4555_v48  ;;  %v2865_v48 = vmul.f32 0.25, %v2817_v61 }
 0x8c3   :  { %v4443_v54 = vpop.f32.mrf.mxu1 }
 0x8c4   :  { %v4536_v33 = vpop.f32.mrf.mxu2  ;;  %v11524_v16 = vmax.f32 %v2865_v48, 0.0  ;;  %v4463_v41 = vadd.f32 %v4443_v54, %v11374_v50 }
 0x8c5   :  { %v4558_v23 = vadd.f32 %v4536_v33, %v4462_v17  ;;  %v4755_v33 = vrot.slane %v11526_v4, 1 }
 0x8c6   :  { %6883 = vmatmul.msk.f32.gmra.mxu3 %vm1067_vm2, %v13610_v9  ;;  %6850 = vmatmul.msk.f32.gmra.mxu1 %vm1067_vm2, %v11166_v2  ;;  %v4754_v7 = vrot.slane %v11524_v16, 1 }
 0x8c8   :  { %v11540_v18 = vsel %vm2950_vm8, %v4754_v7, %v4755_v33 }
 0x8c9   :  { %v4626_v39 = vpop.f32.mrf.mxu3  ;;  %6868 = vmatmul.msk.f32.gmra.mxu2 %vm1067_vm2, %v11191_v6  ;;  %13637 = vst [vmem:[#allocation98_spill] sm:$0xff] %v11540_v18 }
 0x8ca   :  { %v11522_v30 = vadd.f32 %v4626_v39, %v4556_v37 }
 0x8cb   :  { %v4446_v24 = vpop.f32.mrf.mxu1 }
 0x8cc   :  { %v4539_v47 = vpop.f32.mrf.mxu2  ;;  %v4464_v50 = vadd.f32 %v4446_v24, %v11386_v53  ;;  %v4850_v53 = vrot.slane %v11524_v16, 2  ;;  %v4851_v24 = vrot.slane %v11526_v4, 2 }
 0x8cd   :  { %v4559_v51 = vadd.f32 %v4539_v47, %v4463_v41 }
 0x8ce   :  { %6884 = vmatmul.msk.f32.gmra.mxu3 %vm1067_vm2, %v13612_v34  ;;  %6851 = vmatmul.msk.f32.gmra.mxu1 %vm1067_vm2, %v11524_v16 }
 0x8d1   :  { %v4629_v36 = vpop.f32.mrf.mxu3  ;;  %6869 = vmatmul.msk.f32.gmra.mxu2 %vm1067_vm2, %v11540_v18 }
 0x8d2   :  { %v11537_v37 = vadd.f32 %v4629_v36, %v4557_v58  ;;  %v11563_v36 = vsel %vm3033_vm6, %v4850_v53, %v4851_v24 }
 0x8d3   :  { %v4685_v14 = vpop.f32.mrf.mxu1  ;;  %13638 = vst [vmem:[#allocation100_spill] sm:$0xff] %v11563_v36 }
 0x8d4   :  { %v4542_v54 = vpop.f32.mrf.mxu2  ;;  %v4733_v48 = vadd.f32 %v4685_v14, %v11395_v21 }
 0x8d5   :  { %v4560_v17 = vadd.f32 %v4542_v54, %v4464_v50 }
 0x8d6   :  { %6885 = vmatmul.msk.f32.gmra.mxu3 %vm1067_vm2, %v13614_v60  ;;  %6890 = vmatmul.msk.f32.vlgmr.msra.gmra.mxu1 %vm1067_vm2, %v10554_v13 }
 0x8d9   :  { %v4632_v61 = vpop.f32.mrf.mxu3  ;;  %6908 = vmatmul.msk.f32.vlgmr.msrb.gmra.mxu2 %vm1067_vm2, %v13571_v44 }
 0x8da   :  { %v11549_v58 = vadd.f32 %v4632_v61, %v4558_v23 }
 0x8db   :  { %v4688_v39 = vpop.f32.mrf.mxu1 }
 0x8dc   :  { %v4783_v41 = vpop.f32.mrf.mxu2  ;;  %v4734_v21 = vadd.f32 %v4688_v39, %v11404_v15  ;;  %v13639_v15 = vld [vmem:[#allocation122_spill] sm:$0xff] }
 0x8dd   :  { %v4831_v23 = vadd.f32 %v4783_v41, %v4733_v48  ;;  %v13641_v41 = vld [vmem:[#allocation7_spill] sm:$0xff] }
 0x8de   :  { %6886 = vmatmul.msk.f32.gmra.mxu3 %vm1067_vm2, %v11345_v59  ;;  %6891 = vmatmul.msk.f32.gmra.mxu1 %vm1067_vm2, %v10572_v45 }
 0x8e1   :  { %v4635_v40 = vpop.f32.mrf.mxu3  ;;  %6909 = vmatmul.msk.f32.gmra.mxu2 %vm1067_vm2, %v13592_v12 }
 0x8e2   :  { %v11560_v13 = vadd.f32 %v4635_v40, %v4559_v51 }
 0x8e3   :  { %v4691_v44 = vpop.f32.mrf.mxu1 }
 0x8e4   :  { %v4786_v7 = vpop.f32.mrf.mxu2  ;;  %v4735_v50 = vadd.f32 %v4691_v44, %v11413_v31  ;;  %v13642_v31 = vld [vmem:[#allocation30_spill] sm:$0xff] }
 0x8e5   :  { %v4832_v51 = vadd.f32 %v4786_v7, %v4734_v21  ;;  %v13644_v7 = vld [vmem:[#allocation123_spill] sm:$0xff] }
 0x8e6   :  { %6887 = vmatmul.msk.f32.gmra.mxu3 %vm1067_vm2, %v11563_v36  ;;  %6892 = vmatmul.msk.f32.gmra.mxu1 %vm1067_vm2, %v10590_v57  ;;  %v13655_v36 = vld [vmem:[#allocation32_spill] sm:$0xff] }
 0x8e9   :  { %v4638_v47 = vpop.f32.mrf.mxu3  ;;  %6910 = vmatmul.msk.f32.gmra.mxu2 %vm1067_vm2, %v13595_v28 }
 0x8ea   :  { %v11572_v33 = vadd.f32 %v4638_v47, %v4560_v17  ;;  %v13640_v17 = vld [vmem:[#allocation69_spill] sm:$0xff] }
 0x8eb   :  { %v4694_v14 = vpop.f32.mrf.mxu1 }
 0x8ec   :  { %v4789_v54 = vpop.f32.mrf.mxu2 }
 0x8ed   :  { %v4833_v48 = vadd.f32 %v4789_v54, %v4735_v50 }
 0x8ee   :  { %6926 = vmatmul.msk.f32.vlgmr.msrb.gmra.mxu3 %vm1067_vm2, %v13619_v0  ;;  %6893 = vmatmul.msk.f32.gmra.mxu1 %vm1067_vm2, %v13639_v15  ;;  %v4736_v0 = vadd.f32 %v4694_v14, %v11423_v10  ;;  %v13645_v10 = vld [vmem:[#allocation13_spill] sm:$0xff] }
 0x8f1   :  { %v4879_v61 = vpop.f32.mrf.mxu3  ;;  %6911 = vmatmul.msk.f32.gmra.mxu2 %vm1067_vm2, %v13641_v41 }
 0x8f2   :  { %v11581_v39 = vadd.f32 %v4879_v61, %v4831_v23  ;;  %v13643_v23 = vld [vmem:[#allocation70_spill] sm:$0xff] }
 0x8f3   :  { %v4697_v40 = vpop.f32.mrf.mxu1 }
 0x8f4   :  { %v4792_v24 = vpop.f32.mrf.mxu2  ;;  %v4737_v50 = vadd.f32 %v4697_v40, %v11438_v26  ;;  %v13648_v26 = vld [vmem:[#allocation63_spill] sm:$0xff] }
 0x8f5   :  { %v4834_v21 = vadd.f32 %v4792_v24, %v4736_v0 }
 0x8f6   :  { %6927 = vmatmul.msk.f32.gmra.mxu3 %vm1067_vm2, %v13640_v17  ;;  %6894 = vmatmul.msk.f32.gmra.mxu1 %vm1067_vm2, %v13642_v31 }
 0x8f9   :  { %v4882_v53 = vpop.f32.mrf.mxu3  ;;  %6912 = vmatmul.msk.f32.gmra.mxu2 %vm1067_vm2, %v13644_v7 }
 0x8fa   :  { %v11590_v44 = vadd.f32 %v4882_v53, %v4832_v51  ;;  %v13646_v51 = vld [vmem:[#allocation74_spill] sm:$0xff]  ;;  %v13647_v53 = vld [vmem:[#allocation49_spill] sm:$0xff] }
 0x8fb   :  { %v4700_v47 = vpop.f32.mrf.mxu1 }
 0x8fc   :  { %v4795_v54 = vpop.f32.mrf.mxu2  ;;  %v4738_v24 = vadd.f32 %v4700_v47, %v11450_v11 }
 0x8fd   :  { %v4835_v17 = vadd.f32 %v4795_v54, %v4737_v50  ;;  %v4944_v50 = vrot.slane %v11427_v19, 3  ;;  %v13649_v54 = vld [vmem:[#allocation89_spill] sm:$0xff] }
 0x8fe   :  { %6928 = vmatmul.msk.f32.gmra.mxu3 %vm1067_vm2, %v13643_v23  ;;  %6895 = vmatmul.msk.f32.gmra.mxu1 %vm1067_vm2, %v13645_v10 }
 0x901   :  { %v4885_v61 = vpop.f32.mrf.mxu3  ;;  %6913 = vmatmul.msk.f32.gmra.mxu2 %vm1067_vm2, %v13647_v53 }
 0x902   :  { %v11599_v14 = vadd.f32 %v4885_v61, %v4833_v48  ;;  %v4943_v48 = vrot.slane %v11425_v29, 3 }
 0x903   :  { %v4703_v0 = vpop.f32.mrf.mxu1 }
 0x904   :  { %v4798_v7 = vpop.f32.mrf.mxu2  ;;  %v4739_v11 = vadd.f32 %v4703_v0, %v11461_v25  ;;  %v11618_v47 = vsel %vm3368_vm9, %v4943_v48, %v4944_v50  ;;  %v2311_v48 = vld [vmem:[#allocation2 + $0x210] ss:$2 sm:$0xff]  ;;  %v2455_v50 = vld [vmem:[#allocation2 + $0x211] ss:$2 sm:$0xff] }
 0x905   :  { %v4836_v41 = vadd.f32 %v4798_v7, %v4738_v24  ;;  %v5039_v7 = vrot.slane %v11425_v29, 4  ;;  %v5040_v24 = vrot.slane %v11427_v19, 4 }
 0x906   :  { %6929 = vmatmul.msk.f32.gmra.mxu3 %vm1067_vm2, %v13646_v51  ;;  %6896 = vmatmul.msk.f32.gmra.mxu1 %vm1067_vm2, %v13648_v26 }
 0x907   :  { %v11627_v53 = vsel %vm2652_vm7, %v5039_v7, %v5040_v24  ;;  %v2565_v24 = vadd.f32 %v2455_v50, %v2311_v48  ;;  %v13657_v48 = vld [vmem:[#allocation35_spill] sm:$0xff] }
 0x908   :  { %13650 = vst [vmem:[#allocation102_spill] sm:$0xff] %v11627_v53 }
 0x909   :  { %v4888_v23 = vpop.f32.mrf.mxu3  ;;  %6914 = vmatmul.msk.f32.gmra.mxu2 %vm1067_vm2, %v13649_v54  ;;  %v13651_v54 = vld [vmem:[#allocation107_spill] sm:$0xff] }
 0x90a   :  { %v11608_v40 = vadd.f32 %v4888_v23, %v4834_v21  ;;  %v2686_v25 = vrot.slane %v13651_v54, 4 }
 0x90b   :  { %v4706_v61 = vpop.f32.mrf.mxu1 }
 0x90c   :  { %v4801_v21 = vpop.f32.mrf.mxu2  ;;  %v4740_v28 = vadd.f32 %v4706_v61, %v11473_v22 }
 0x90e   :  { %6930 = vmatmul.msk.f32.gmra.mxu3 %vm1067_vm2, %v13626_v3  ;;  %6897 = vmatmul.msk.f32.gmra.mxu1 %vm1067_vm2, %v11618_v47  ;;  %v4837_v3 = vadd.f32 %v4801_v21, %v4739_v11  ;;  %v13653_v11 = vld [vmem:[#allocation101_spill] sm:$0xff] }
 0x90f   :  { %v13654_v21 = vrot.slane %v13653_v11, 4  ;;  %v13656_v11 = vld [vmem:[#allocation9_spill] sm:$0xff] }
 0x911   :  { %v4891_v51 = vpop.f32.mrf.mxu3  ;;  %6915 = vmatmul.msk.f32.gmra.mxu2 %vm1067_vm2, %v11627_v53  ;;  %v2688_v54 = vsel %vm2652_vm7, %v2686_v25, %v13654_v21 }
 0x912   :  { %v11624_v23 = vadd.f32 %v4891_v51, %v4835_v17  ;;  %v13652_v51 = vld [vmem:[#allocation34_spill] sm:$0xff]  ;;  %v2795_v12 = vadd.f32 %v2688_v54, %v2565_v24 }
 0x913   :  { %v4709_v0 = vpop.f32.mrf.mxu1 }
 0x914   :  { %v4804_v17 = vpop.f32.mrf.mxu2  ;;  %v4741_v22 = vadd.f32 %v4709_v0, %v11482_v42  ;;  %v2843_v61 = vmul.f32 0.25, %v2795_v12  ;;  %v13658_v0 = vld [vmem:[#allocation10_spill] sm:$0xff] }
 0x916   :  { %6931 = vmatmul.msk.f32.gmra.mxu3 %vm1067_vm2, %v11067_v5  ;;  %6898 = vmatmul.msk.f32.gmra.mxu1 %vm1067_vm2, %v13652_v51  ;;  %v4838_v5 = vadd.f32 %v4804_v17, %v4740_v28  ;;  %v11651_v25 = vmax.f32 %v2843_v61, 0.0 }
 0x919   :  { %v4894_v19 = vpop.f32.mrf.mxu3  ;;  %6916 = vmatmul.msk.f32.gmra.mxu2 %vm1067_vm2, %v13655_v36 }
 0x91a   :  { %v11640_v7 = vadd.f32 %v4894_v19, %v4836_v41  ;;  %v13659_v19 = vld [vmem:[#allocation36_spill] sm:$0xff] }
 0x91b   :  { %v4712_v53 = vpop.f32.mrf.mxu1 }
 0x91c   :  { %v4807_v18 = vpop.f32.mrf.mxu2  ;;  %v4742_v42 = vadd.f32 %v4712_v53, %v11499_v49  ;;  %v13660_v49 = vld [vmem:[#allocation37_spill] sm:$0xff] }
 0x91d   :  { %v4839_v28 = vadd.f32 %v4807_v18, %v4741_v22  ;;  %v13661_v22 = vld [vmem:[#allocation38_spill] sm:$0xff] }
 0x91e   :  { %6932 = vmatmul.msk.f32.gmra.mxu3 %vm1067_vm2, %v11425_v29  ;;  %6899 = vmatmul.msk.f32.gmra.mxu1 %vm1067_vm2, %v13656_v11 }
 0x921   :  { %v4897_v51 = vpop.f32.mrf.mxu3  ;;  %6917 = vmatmul.msk.f32.gmra.mxu2 %vm1067_vm2, %v13657_v48 }
 0x922   :  { %v11649_v41 = vadd.f32 %v4897_v51, %v4837_v3 }
 0x923   :  { %v4715_v29 = vpop.f32.mrf.mxu1 }
 0x924   :  { %v4810_v36 = vpop.f32.mrf.mxu2  ;;  %v4743_v17 = vadd.f32 %v4715_v29, %v11512_v55  ;;  %v6978_v55 = vld [vmem:[%s12480_s2 + $0xb8] sm:$0x3f]  ;;  %v13662_v29 = vld [vmem:[#allocation39_spill] sm:$0xff] }
 0x925   :  { %v4840_v3 = vadd.f32 %v4810_v36, %v4742_v42  ;;  %6979 = vmatpush.msk.msra.mxu3 %vm3033_vm6, %v6978_v55  ;;  %v13663_v36 = vld [vmem:[#allocation40_spill] sm:$0xff] }
 0x926   :  { %6933 = vmatmul.msk.f32.gmra.mxu3 %vm1067_vm2, %v11651_v25  ;;  %6900 = vmatmul.msk.f32.gmra.mxu1 %vm1067_vm2, %v13658_v0  ;;  %v13665_v55 = vld [vmem:[#allocation56_spill] sm:$0xff] }
 0x929   :  { %v4900_v12 = vpop.f32.mrf.mxu3  ;;  %6918 = vmatmul.msk.f32.gmra.mxu2 %vm1067_vm2, %v13659_v19 }
 0x92a   :  { %v11660_v50 = vadd.f32 %v4900_v12, %v4838_v5  ;;  %v6960_v5 = vld [vmem:[%s12480_s2 + $0xb0] sm:$0x3f] }
 0x92b   :  { %v4718_v18 = vpop.f32.mrf.mxu1  ;;  %6961 = vmatpush.msk.msra.mxu2 %vm3033_vm6, %v6960_v5 }
 0x92c   :  { %v4813_v54 = vpop.f32.mrf.mxu2  ;;  %v4744_v61 = vadd.f32 %v4718_v18, %v11522_v30 }
 0x92d   :  { %v4841_v24 = vadd.f32 %v4813_v54, %v4743_v17  ;;  %v6996_v17 = vld [vmem:[%s12480_s2 + $0xc0] sm:$0x3f] }
 0x92e   :  { %6934 = vmatmul.msk.f32.gmra.mxu3 %vm1067_vm2, %v13632_v32  ;;  %6901 = vmatmul.msk.f32.gmra.mxu1 %vm1067_vm2, %v13660_v49 }
 0x92f   :  { %6997 = vmatpush.msk.msra.mxu1 %vm3033_vm6, %v6996_v17 }
 0x931   :  { %v4903_v21 = vpop.f32.mrf.mxu3  ;;  %6919 = vmatmul.msk.f32.gmra.mxu2 %vm1067_vm2, %v13661_v22  ;;  %v13675_v22 = vld [vmem:[#allocation72_spill] sm:$0xff] }
 0x932   :  { %v11669_v53 = vadd.f32 %v4903_v21, %v4839_v28 }
 0x933   :  { %v4721_v32 = vpop.f32.mrf.mxu1 }
 0x934   :  { %v4816_v28 = vpop.f32.mrf.mxu2  ;;  %v4745_v30 = vadd.f32 %v4721_v32, %v11537_v37  ;;  %v13666_v37 = vld [vmem:[#allocation90_spill] sm:$0xff] }
 0x936   :  { %6935 = vmatmul.msk.f32.gmra.mxu3 %vm1067_vm2, %v13635_v27  ;;  %6902 = vmatmul.msk.f32.gmra.mxu1 %vm1067_vm2, %v13662_v29  ;;  %v4842_v27 = vadd.f32 %v4816_v28, %v4744_v61 }
 0x939   :  { %v4906_v51 = vpop.f32.mrf.mxu3  ;;  %6920 = vmatmul.msk.f32.gmra.mxu2 %vm1067_vm2, %v13663_v36 }
 0x93a   :  { %v11686_v42 = vadd.f32 %v4906_v51, %v4840_v3  ;;  %v13664_v3 = vld [vmem:[#allocation15_spill] sm:$0xff] }
 0x93b   :  { %v4724_v12 = vpop.f32.mrf.mxu1 }
 0x93c   :  { %v4819_v21 = vpop.f32.mrf.mxu2  ;;  %v4746_v61 = vadd.f32 %v4724_v12, %v11549_v58 }
 0x93e   :  { %6936 = vmatmul.msk.f32.gmra.mxu3 %vm1067_vm2, %v13636_v46  ;;  %6903 = vmatmul.msk.f32.gmra.mxu1 %vm1067_vm2, %v13664_v3  ;;  %v4843_v46 = vadd.f32 %v4819_v21, %v4745_v30  ;;  %v4947_v30 = vrot.slane %v11526_v4, 3 }
 0x941   :  { %v4909_v18 = vpop.f32.mrf.mxu3  ;;  %6921 = vmatmul.msk.f32.gmra.mxu2 %vm1067_vm2, %v13665_v55 }
 0x942   :  { %v11699_v54 = vadd.f32 %v4909_v18, %v4841_v24  ;;  %v4946_v24 = vrot.slane %v11524_v16, 3  ;;  %v13668_v18 = vld [vmem:[#allocation92_spill] sm:$0xff] }
 0x943   :  { %v4727_v5 = vpop.f32.mrf.mxu1 }
 0x944   :  { %v4822_v28 = vpop.f32.mrf.mxu2  ;;  %v4747_v58 = vadd.f32 %v4727_v5, %v11560_v13  ;;  %v11718_v12 = vsel %vm3368_vm9, %v4946_v24, %v4947_v30  ;;  %v2383_v24 = vld [vmem:[#allocation2 + $0x450] ss:$2 sm:$0xff]  ;;  %v2527_v30 = vld [vmem:[#allocation2 + $0x451] ss:$2 sm:$0xff] }
 0x945   :  { %v4844_v17 = vadd.f32 %v4822_v28, %v4746_v61  ;;  %v5042_v61 = vrot.slane %v11524_v16, 4 }
 0x946   :  { %6937 = vmatmul.msk.f32.gmra.mxu3 %vm1067_vm2, %v10133_v1  ;;  %6904 = vmatmul.msk.f32.gmra.mxu1 %vm1067_vm2, %v13666_v37 }
 0x949   :  { %v4912_v51 = vpop.f32.mrf.mxu3  ;;  %6922 = vmatmul.msk.f32.gmra.mxu2 %vm1067_vm2, %v13668_v18  ;;  %v13671_v18 = vld [vmem:[#allocation108_spill] sm:$0xff] }
 0x94a   :  { %v11708_v32 = vadd.f32 %v4912_v51, %v4842_v27  ;;  %v5043_v51 = vrot.slane %v11526_v4, 4  ;;  %v2722_v13 = vrot.slane %v13671_v18, 4 }
 0x94b   :  { %v4730_v1 = vpop.f32.mrf.mxu1 }
 0x94c   :  { %13667 = vst [vmem:[#allocation104_spill] sm:$0xff] %v11708_v32  ;;  %v4825_v27 = vpop.f32.mrf.mxu2  ;;  %v11727_v55 = vsel %vm2652_vm7, %v5042_v61, %v5043_v51  ;;  %v4748_v36 = vadd.f32 %v4730_v1, %v11572_v33  ;;  %v2601_v51 = vadd.f32 %v2527_v30, %v2383_v24 }
 0x94d   :  { %13670 = vst [vmem:[#allocation110_spill] sm:$0xff] %v11727_v55 }
 0x94e   :  { %6938 = vmatmul.msk.f32.gmra.mxu3 %vm1067_vm2, %v10812_v62  ;;  %6905 = vmatmul.msk.f32.gmra.mxu1 %vm1067_vm2, %v11718_v12  ;;  %v4845_v62 = vadd.f32 %v4825_v27, %v4747_v58  ;;  %v13673_v58 = vld [vmem:[#allocation103_spill] sm:$0xff] }
 0x94f   :  { %v13674_v27 = vrot.slane %v13673_v58, 4  ;;  %v13676_v58 = vld [vmem:[#allocation71_spill] sm:$0xff] }
 0x951   :  { %v4915_v21 = vpop.f32.mrf.mxu3  ;;  %6923 = vmatmul.msk.f32.gmra.mxu2 %vm1067_vm2, %v11727_v55  ;;  %v2724_v18 = vsel %vm2652_vm7, %v2722_v13, %v13674_v27 }
 0x952   :  { %v11724_v28 = vadd.f32 %v4915_v21, %v4843_v46  ;;  %v13672_v21 = vld [vmem:[#allocation68_spill] sm:$0xff] }
 0x953   :  { %v4975_v5 = vpop.f32.mrf.mxu1 }
 0x954   :  { %13669 = vst [vmem:[#allocation106_spill] sm:$0xff] %v11724_v28  ;;  %v4828_v46 = vpop.f32.mrf.mxu2  ;;  %v2819_v28 = vadd.f32 %v2724_v18, %v2601_v51  ;;  %v5023_v33 = vadd.f32 %v4975_v5, %v11581_v39  ;;  %v13677_v5 = vld [vmem:[#allocation73_spill] sm:$0xff] }
 0x956   :  { %6939 = vmatmul.msk.f32.gmra.mxu3 %vm1067_vm2, %v11166_v2  ;;  %6944 = vmatmul.msk.f32.vlgmr.msrb.gmra.mxu1 %vm1067_vm2, %v13672_v21  ;;  %v4846_v2 = vadd.f32 %v4828_v46, %v4748_v36  ;;  %v2867_v1 = vmul.f32 0.25, %v2819_v28 }
 0x958   :  { %v11751_v13 = vmax.f32 %v2867_v1, 0.0  ;;  %v13679_v1 = vld [vmem:[#allocation111_spill] sm:$0xff] }
 0x959   :  { %v4918_v4 = vpop.f32.mrf.mxu3  ;;  %6962 = vmatmul.msk.f32.vlgmr.msra.gmra.mxu2 %vm1067_vm2, %v13675_v22 }
 0x95a   :  { %v11740_v61 = vadd.f32 %v4918_v4, %v4844_v17 }
 0x95b   :  { %v4978_v55 = vpop.f32.mrf.mxu1 }
 0x95c   :  { %v5071_v32 = vpop.f32.mrf.mxu2  ;;  %v5024_v39 = vadd.f32 %v4978_v55, %v11590_v44  ;;  %v13678_v44 = vld [vmem:[#allocation76_spill] sm:$0xff] }
 0x95d   :  { %v5119_v36 = vadd.f32 %v5071_v32, %v5023_v33 }
 0x95e   :  { %6940 = vmatmul.msk.f32.gmra.mxu3 %vm1067_vm2, %v11524_v16  ;;  %6945 = vmatmul.msk.f32.gmra.mxu1 %vm1067_vm2, %v13676_v58 }
 0x961   :  { %v4921_v21 = vpop.f32.mrf.mxu3  ;;  %6963 = vmatmul.msk.f32.gmra.mxu2 %vm1067_vm2, %v13543_v52 }
 0x962   :  { %v11749_v17 = vadd.f32 %v4921_v21, %v4845_v62  ;;  %v2844_v21 = vmul.f32 0.25, %v13679_v1 }
 0x963   :  { %v4981_v16 = vpop.f32.mrf.mxu1 }
 0x964   :  { %v5074_v28 = vpop.f32.mrf.mxu2  ;;  %v5025_v30 = vadd.f32 %v4981_v16, %v11599_v14  ;;  %v13680_v16 = vld [vmem:[#allocation93_spill] sm:$0xff] }
 0x965   :  { %v5120_v62 = vadd.f32 %v5074_v28, %v5024_v39  ;;  %v13681_v28 = vld [vmem:[#allocation94_spill] sm:$0xff] }
 0x966   :  { %6941 = vmatmul.msk.f32.gmra.mxu3 %vm1067_vm2, %v11751_v13  ;;  %6946 = vmatmul.msk.f32.gmra.mxu1 %vm1067_vm2, %v13677_v5 }
 0x969   :  { %v4924_v22 = vpop.f32.mrf.mxu3  ;;  %6964 = vmatmul.msk.f32.gmra.mxu2 %vm1067_vm2, %v13545_v35 }
 0x96a   :  { %v11760_v24 = vadd.f32 %v4924_v22, %v4846_v2  ;;  %v5229_v22 = vrot.slane %v11651_v25, 1 }
 0x96b   :  { %v4984_v32 = vpop.f32.mrf.mxu1 }
 0x96c   :  { %v5077_v4 = vpop.f32.mrf.mxu2 }
 0x96d   :  { %v5121_v46 = vadd.f32 %v5077_v4, %v5025_v30  ;;  %v5325_v30 = vrot.slane %v11651_v25, 2 }
 0x96e   :  { %6980 = vmatmul.msk.f32.vlgmr.msra.gmra.mxu3 %vm1067_vm2, %v10572_v45  ;;  %6947 = vmatmul.msk.f32.gmra.mxu1 %vm1067_vm2, %v13678_v44  ;;  %v5026_v45 = vadd.f32 %v4984_v32, %v11608_v40 }
 0x971   :  { %v5163_v52 = vpop.f32.mrf.mxu3  ;;  %6965 = vmatmul.msk.f32.gmra.mxu2 %vm1067_vm2, %v13594_v43 }
 0x972   :  { %v11769_v55 = vadd.f32 %v5163_v52, %v5119_v36 }
 0x973   :  { %v4987_v27 = vpop.f32.mrf.mxu1 }
 0x974   :  { %v5080_v18 = vpop.f32.mrf.mxu2 }
 0x975   :  { %v5122_v2 = vadd.f32 %v5080_v18, %v5026_v45 }
 0x976   :  { %6981 = vmatmul.msk.f32.gmra.mxu3 %vm1067_vm2, %v10590_v57  ;;  %6948 = vmatmul.msk.f32.gmra.mxu1 %vm1067_vm2, %v13627_v56  ;;  %v5027_v57 = vadd.f32 %v4987_v27, %v11624_v23  ;;  %v11795_v23 = vmax.f32 %v2844_v21, 0.0 }
 0x978   :  { %v5326_v52 = vrot.slane %v11795_v23, 2 }
 0x979   :  { %v5166_v35 = vpop.f32.mrf.mxu3  ;;  %6966 = vmatmul.msk.f32.gmra.mxu2 %vm1067_vm2, %v13597_v8 }
 0x97a   :  { %v11778_v14 = vadd.f32 %v5166_v35, %v5120_v62  ;;  %v13682_v35 = vld [vmem:[#allocation87_spill] sm:$0xff] }
 0x97b   :  { %v4990_v51 = vpop.f32.mrf.mxu1 }
 0x97c   :  { %v5083_v33 = vpop.f32.mrf.mxu2  ;;  %v5028_v8 = vadd.f32 %v4990_v51, %v11640_v7 }
 0x97d   :  { %v5123_v56 = vadd.f32 %v5083_v33, %v5027_v57  ;;  %v5421_v33 = vrot.slane %v11651_v25, 3 }
 0x97e   :  { %6982 = vmatmul.msk.f32.gmra.mxu3 %vm1067_vm2, %v13639_v15  ;;  %6949 = vmatmul.msk.f32.gmra.mxu1 %vm1067_vm2, %v13628_v63 }
 0x981   :  { %v5169_v43 = vpop.f32.mrf.mxu3  ;;  %6967 = vmatmul.msk.f32.gmra.mxu2 %vm1067_vm2, %v11246_v20 }
 0x982   :  { %v11787_v40 = vadd.f32 %v5169_v43, %v5121_v46 }
 0x983   :  { %v4993_v15 = vpop.f32.mrf.mxu1 }
 0x984   :  { %v5086_v36 = vpop.f32.mrf.mxu2  ;;  %v5029_v7 = vadd.f32 %v4993_v15, %v11649_v41  ;;  %v13685_v15 = vld [vmem:[#allocation113_spill] sm:$0xff] }
 0x985   :  { %v5124_v39 = vadd.f32 %v5086_v36, %v5028_v8  ;;  %v13686_v36 = vld [vmem:[#allocation109_spill] sm:$0xff] }
 0x986   :  { %6983 = vmatmul.msk.f32.gmra.mxu3 %vm1067_vm2, %v13642_v31  ;;  %6950 = vmatmul.msk.f32.gmra.mxu1 %vm1067_vm2, %v13680_v16  ;;  %v5230_v31 = vrot.slane %v11795_v23, 1 }
 0x988   :  { %v5231_v5 = vsel %vm2950_vm8, %v5229_v22, %v5230_v31 }
 0x989   :  { %v5172_v58 = vpop.f32.mrf.mxu3  ;;  %6968 = vmatmul.msk.f32.gmra.mxu2 %vm1067_vm2, %v13681_v28 }
 0x98a   :  { %v11799_v63 = vadd.f32 %v5172_v58, %v5122_v2 }
 0x98b   :  { %v4996_v20 = vpop.f32.mrf.mxu1 }
 0x98c   :  { %v5089_v32 = vpop.f32.mrf.mxu2  ;;  %v5030_v41 = vadd.f32 %v4996_v20, %v11660_v50  ;;  %v13684_v50 = vld [vmem:[#allocation99_spill] sm:$0xff]  ;;  %v13687_v20 = vld [vmem:[#allocation62_spill] sm:$0xff] }
 0x98d   :  { %v5125_v44 = vadd.f32 %v5089_v32, %v5029_v7 }
 0x98e   :  { %6984 = vmatmul.msk.f32.gmra.mxu3 %vm1067_vm2, %v13645_v10  ;;  %6951 = vmatmul.msk.f32.gmra.mxu1 %vm1067_vm2, %v5231_v5  ;;  %v5327_v10 = vsel %vm3033_vm6, %v5325_v30, %v5326_v52  ;;  %v13689_v30 = vld [vmem:[#allocation98_spill] sm:$0xff] }
 0x991   :  { %v5175_v62 = vpop.f32.mrf.mxu3  ;;  %6969 = vmatmul.msk.f32.gmra.mxu2 %vm1067_vm2, %v5327_v10 }
 0x992   :  { %v11812_v4 = vadd.f32 %v5175_v62, %v5123_v56  ;;  %v5422_v56 = vrot.slane %v11795_v23, 3 }
 0x993   :  { %v11817_v46 = vpop.f32.mrf.mxu1 }
 0x994   :  { %v5092_v45 = vpop.f32.mrf.mxu2  ;;  %v5423_v21 = vsel %vm3368_vm9, %v5421_v33, %v5422_v56 }
 0x995   :  { %v5126_v2 = vadd.f32 %v5092_v45, %v5030_v41 }
 0x996   :  { %6985 = vmatmul.msk.f32.gmra.mxu3 %vm1067_vm2, %v13648_v26  ;;  %6952 = vmatmul.msk.f32.gmra.mxu1 %vm1067_vm2, %v13682_v35  ;;  %v13683_v26 = vld [vmem:[#allocation105_spill] sm:$0xff] }
 0x999   :  { %v5178_v27 = vpop.f32.mrf.mxu3  ;;  %6970 = vmatmul.msk.f32.gmra.mxu2 %vm1067_vm2, %v13683_v26 }
 0x99a   :  { %v11823_v18 = vadd.f32 %v5178_v27, %v5124_v39  ;;  %v5328_v27 = vrot.slane %v11751_v13, 2 }
 0x99b   :  { %v11827_v51 = vpop.f32.mrf.mxu1 }
 0x99c   :  { %v11831_v43 = vpop.f32.mrf.mxu2 }
 0x99e   :  { %6986 = vmatmul.msk.f32.gmra.mxu3 %vm1067_vm2, %v11618_v47  ;;  %6953 = vmatmul.msk.f32.gmra.mxu1 %vm1067_vm2, %v13684_v50 }
 0x9a1   :  { %v5181_v57 = vpop.f32.mrf.mxu3  ;;  %6971 = vmatmul.msk.f32.gmra.mxu2 %vm1067_vm2, %v13685_v15  ;;  %v13692_v15 = vld [vmem:[#allocation120_spill] sm:$0xff] }
 0x9a2   :  { %v11837_v1 = vadd.f32 %v5181_v57, %v5125_v44  ;;  %v13690_v44 = vld [vmem:[#allocation100_spill] sm:$0xff]  ;;  %v13691_v57 = vld [vmem:[#allocation119_spill] sm:$0xff] }
 0x9a3   :  { %v11841_v47 = vpop.f32.mrf.mxu1 }
 0x9a4   :  { %v11845_v58 = vpop.f32.mrf.mxu2 }
 0x9a6   :  { %6987 = vmatmul.msk.f32.gmra.mxu3 %vm1067_vm2, %v5423_v21  ;;  %6954 = vmatmul.msk.f32.gmra.mxu1 %vm1067_vm2, %v13686_v36 }
 0x9a9   :  { %v5184_v8 = vpop.f32.mrf.mxu3  ;;  %6972 = vmatmul.msk.f32.gmra.mxu2 %vm1067_vm2, %v13610_v9 }
 0x9aa   :  { %v11849_v16 = vadd.f32 %v5184_v8, %v5126_v2 }
 0x9ab   :  { %v11853_v39 = vpop.f32.mrf.mxu1 }
 0x9ac   :  { %v11859_v31 = vpop.f32.mrf.mxu2 }
 0x9ae   :  { %6988 = vmatmul.msk.f32.gmra.mxu3 %vm1067_vm2, %v13656_v11  ;;  %6955 = vmatmul.msk.f32.gmra.mxu1 %vm1067_vm2, %v13687_v20 }
 0x9b1   :  { %v11857_v22 = vpop.f32.mrf.mxu3  ;;  %6973 = vmatmul.msk.f32.gmra.mxu2 %vm1067_vm2, %v13612_v34  ;;  %v13688_v34 = vld [vmem:[#allocation112_spill] sm:$0xff] }
 0x9b2   :  { %v2868_v62 = vmul.f32 0.25, %v13688_v34 }
 0x9b3   :  { %v11865_v28 = vpop.f32.mrf.mxu1 }
 0x9b4   :  { %v11871_v7 = vpop.f32.mrf.mxu2 }
 0x9b6   :  { %6989 = vmatmul.msk.f32.gmra.mxu3 %vm1067_vm2, %v13658_v0  ;;  %6956 = vmatmul.msk.f32.gmra.mxu1 %vm1067_vm2, %v10973_v38 }
 0x9b9   :  { %v11869_v11 = vpop.f32.mrf.mxu3  ;;  %6974 = vmatmul.msk.f32.gmra.mxu2 %vm1067_vm2, %v13614_v60 }
 0x9bb   :  { %v11877_v9 = vpop.f32.mrf.mxu1 }
 0x9bc   :  { %v11883_v5 = vpop.f32.mrf.mxu2 }
 0x9be   :  { %6990 = vmatmul.msk.f32.gmra.mxu3 %vm1067_vm2, %v13660_v49  ;;  %6957 = vmatmul.msk.f32.gmra.mxu1 %vm1067_vm2, %v11191_v6  ;;  %v11894_v49 = vmax.f32 %v2868_v62, 0.0  ;;  %v5232_v6 = vrot.slane %v11751_v13, 1  ;;  %v13693_v62 = vld [vmem:[#allocation7_spill] sm:$0xff] }
 0x9c0   :  { %v5233_v52 = vrot.slane %v11894_v49, 1  ;;  %v5329_v45 = vrot.slane %v11894_v49, 2  ;;  %v5425_v21 = vrot.slane %v11894_v49, 3 }
 0x9c1   :  { %v11881_v0 = vpop.f32.mrf.mxu3  ;;  %6975 = vmatmul.msk.f32.gmra.mxu2 %vm1067_vm2, %v11345_v59 }
 0x9c2   :  { %v5234_v59 = vsel %vm2950_vm8, %v5232_v6, %v5233_v52  ;;  %v5330_v35 = vsel %vm3033_vm6, %v5328_v27, %v5329_v45  ;;  %v13694_v27 = vld [vmem:[#allocation123_spill] sm:$0xff] }
 0x9c3   :  { %v11890_v38 = vpop.f32.mrf.mxu1 }
 0x9c4   :  { %v11898_v32 = vpop.f32.mrf.mxu2 }
 0x9c6   :  { %6991 = vmatmul.msk.f32.gmra.mxu3 %vm1067_vm2, %v13662_v29  ;;  %6958 = vmatmul.msk.f32.gmra.mxu1 %vm1067_vm2, %v13689_v30 }
 0x9c9   :  { %v11896_v60 = vpop.f32.mrf.mxu3  ;;  %6976 = vmatmul.msk.f32.gmra.mxu2 %vm1067_vm2, %v13690_v44 }
 0x9cb   :  { %v11906_v29 = vpop.f32.mrf.mxu1 }
 0x9cc   :  { %v11913_v41 = vpop.f32.mrf.mxu2 }
 0x9ce   :  { %6992 = vmatmul.msk.f32.gmra.mxu3 %vm1067_vm2, %v13664_v3  ;;  %6959 = vmatmul.msk.f32.gmra.mxu1 %vm1067_vm2, %v5234_v59 }
 0x9d1   :  { %v11911_v10 = vpop.f32.mrf.mxu3  ;;  %6977 = vmatmul.msk.f32.gmra.mxu2 %vm1067_vm2, %v5330_v35 }
 0x9d3   :  { %v11921_v3 = vpop.f32.mrf.mxu1 }
 0x9d4   :  { %v11926_v26 = vpop.f32.mrf.mxu2 }
 0x9d6   :  { %6993 = vmatmul.msk.f32.gmra.mxu3 %vm1067_vm2, %v13666_v37  ;;  %6998 = vmatmul.msk.f32.vlgmr.msra.gmra.mxu1 %vm1067_vm2, %v13691_v57  ;;  %v5424_v37 = vrot.slane %v11751_v13, 3 }
 0x9d8   :  { %v5426_v8 = vsel %vm3368_vm9, %v5424_v37, %v5425_v21  ;;  %v13695_v37 = vld [vmem:[#allocation49_spill] sm:$0xff] }
 0x9d9   :  { %v11924_v2 = vpop.f32.mrf.mxu3 }
 0x9db   :  { %v5264_v50 = vpop.f32.mrf.mxu1 }
 0x9dc   :  { %v11934_v56 = vpop.f32.mrf.mxu2  ;;  %v5310_v20 = vadd.f32 %v5264_v50, %v11778_v14 }
 0x9de   :  { %6994 = vmatmul.msk.f32.gmra.mxu3 %vm1067_vm2, %v11718_v12  ;;  %6999 = vmatmul.msk.f32.gmra.mxu1 %vm1067_vm2, %v13692_v15 }
 0x9e1   :  { %v11932_v33 = vpop.f32.mrf.mxu3 }
 0x9e3   :  { %v5267_v36 = vpop.f32.mrf.mxu1 }
 0x9e4   :  { %v5360_v34 = vpop.f32.mrf.mxu2  ;;  %v5311_v52 = vadd.f32 %v5267_v36, %v11787_v40 }
 0x9e5   :  { %v5406_v30 = vadd.f32 %v5360_v34, %v5310_v20  ;;  %v13696_v34 = vld [vmem:[#allocation89_spill] sm:$0xff] }
 0x9e6   :  { %6995 = vmatmul.msk.f32.gmra.mxu3 %vm1067_vm2, %v5426_v8  ;;  %7000 = vmatmul.msk.f32.gmra.mxu1 %vm1067_vm2, %v13693_v62 }
 0x9e9   :  { %v11943_v12 = vpop.f32.mrf.mxu3 }
 0x9eb   :  { %v5270_v6 = vpop.f32.mrf.mxu1 }
 0x9ec   :  { %v5363_v59 = vpop.f32.mrf.mxu2  ;;  %v5312_v14 = vadd.f32 %v5270_v6, %v11799_v63 }
 0x9ed   :  { %v5407_v45 = vadd.f32 %v5363_v59, %v5311_v52  ;;  %v13697_v59 = vld [vmem:[#allocation102_spill] sm:$0xff] }
 0x9ee   :  { %7001 = vmatmul.msk.f32.gmra.mxu1 %vm1067_vm2, %v13694_v27  ;;  %v5517_v27 = vrot.slane %v11651_v25, 4 }
 0x9f1   :  { %v11948_v44 = vpop.f32.mrf.mxu3 }
 0x9f3   :  { %v5273_v35 = vpop.f32.mrf.mxu1 }
 0x9f4   :  { %v5366_v50 = vpop.f32.mrf.mxu2  ;;  %v5313_v40 = vadd.f32 %v5273_v35, %v11812_v4  ;;  %v5518_v4 = vrot.slane %v11795_v23, 4  ;;  %v5032_v23 = vadd.f32 %v11827_v51, %v11686_v42 }
 0x9f5   :  { %v5408_v15 = vadd.f32 %v5366_v50, %v5312_v14 }
 0x9f6   :  { %7002 = vmatmul.msk.f32.gmra.mxu1 %vm1067_vm2, %v13695_v37  ;;  %v5519_v14 = vsel %vm2652_vm7, %v5517_v27, %v5518_v4 }
 0x9f9   :  { %v5456_v57 = vpop.f32.mrf.mxu3 }
 0x9fa   :  { %v11955_v21 = vadd.f32 %v5456_v57, %v5406_v30 }
 0x9fb   :  { %v11957_v8 = vpop.f32.mrf.mxu1 }
 0x9fc   :  { %v5369_v20 = vpop.f32.mrf.mxu2 }
 0x9fd   :  { %v5409_v63 = vadd.f32 %v5369_v20, %v5313_v40 }
 0x9fe   :  { %7003 = vmatmul.msk.f32.gmra.mxu1 %vm1067_vm2, %v13696_v34 }
 0xa01   :  { %v5459_v36 = vpop.f32.mrf.mxu3 }
 0xa02   :  { %v11962_v62 = vadd.f32 %v5459_v36, %v5407_v45  ;;  %v5031_v45 = vadd.f32 %v11817_v46, %v11669_v53  ;;  %v5128_v53 = vadd.f32 %v11845_v58, %v5032_v23 }
 0xa03   :  { %v11964_v6 = vpop.f32.mrf.mxu1 }
 0xa04   :  { %v5127_v37 = vadd.f32 %v11831_v43, %v5031_v45  ;;  %v5220_v46 = vadd.f32 %v11869_v11, %v5128_v53  ;;  %v5033_v43 = vadd.f32 %v11841_v47, %v11699_v54  ;;  %v13699_v11 = vld [vmem:[#allocation38_spill] sm:$0xff] }
 0xa06   :  { %7004 = vmatmul.msk.f32.gmra.mxu1 %vm1067_vm2, %v13697_v59 }
 0xa09   :  { %v5462_v52 = vpop.f32.mrf.mxu3 }
 0xa0a   :  { %v11968_v30 = vadd.f32 %v5462_v52, %v5408_v15  ;;  %v5219_v15 = vadd.f32 %v11857_v22, %v5127_v37  ;;  %v5129_v22 = vadd.f32 %v11859_v31, %v5033_v43 }
 0xa0b   :  { %v11972_v35 = vpop.f32.mrf.mxu1 }
 0xa0c   :  { %v5221_v42 = vadd.f32 %v11881_v0, %v5129_v22  ;;  %v13701_v0 = vld [vmem:[#allocation40_spill] sm:$0xff] }
 0xa0e   :  { %7005 = vmatmul.msk.f32.gmra.mxu1 %vm1067_vm2, %v5519_v14 }
 0xa11   :  { %v5465_v57 = vpop.f32.mrf.mxu3 }
 0xa12   :  { %v11978_v50 = vadd.f32 %v5465_v57, %v5409_v63 }
 0xa13   :  { %v5285_v40 = vpop.f32.mrf.mxu1 }
 0xa14   :  { %v11982_v25 = vadd.f32 %v5285_v40, %v5219_v15 }
 0xa16   :  { %7006 = vmatmul.msk.f32.gmra.mxu1 %vm1067_vm2, %v13657_v48  ;;  %v13698_v48 = vld [vmem:[#allocation104_spill] sm:$0xff] }
 0xa17   :  { %v5034_v58 = vadd.f32 %v11853_v39, %v13698_v48 }
 0xa19   :  { %v5130_v63 = vadd.f32 %v11871_v7, %v5034_v58  ;;  %v5036_v7 = vadd.f32 %v11877_v9, %v11740_v61  ;;  %v5468_v43 = vpop.f32.mrf.mxu3 }
 0xa1b   :  { %v5288_v36 = vpop.f32.mrf.mxu1  ;;  %v5222_v54 = vadd.f32 %v11896_v60, %v5130_v63  ;;  %v13702_v60 = vld [vmem:[#allocation56_spill] sm:$0xff]  ;;  %v5132_v14 = vadd.f32 %v11898_v32, %v5036_v7  ;;  %v5038_v32 = vadd.f32 %v11906_v29, %v11760_v24 }
 0xa1c   :  { %v11990_v20 = vadd.f32 %v5288_v36, %v5220_v46  ;;  %v5309_v46 = vadd.f32 %v11921_v3, %v11769_v55  ;;  %v5372_v36 = vpop.f32.mrf.mxu2 }
 0xa1d   :  { %v5134_v40 = vadd.f32 %v11926_v26, %v5038_v32 }
 0xa1e   :  { %7007 = vmatmul.msk.f32.gmra.mxu1 %vm1067_vm2, %v13659_v19  ;;  %v13700_v19 = vld [vmem:[#allocation106_spill] sm:$0xff]  ;;  %v5405_v24 = vadd.f32 %v11934_v56, %v5309_v46 }
 0xa1f   :  { %v5035_v31 = vadd.f32 %v11865_v28, %v13700_v19  ;;  %v5224_v28 = vadd.f32 %v11924_v2, %v5132_v14  ;;  %v13704_v2 = vld [vmem:[#allocation110_spill] sm:$0xff]  ;;  %v5226_v23 = vadd.f32 %v11943_v12, %v5134_v40  ;;  %v5314_v19 = vadd.f32 %v11957_v8, %v11823_v18 }
 0xa20   :  { %v5501_v29 = vadd.f32 %v11948_v44, %v5405_v24  ;;  %v7015_v44 = vld [vmem:[%s12481_s3 + $0x18] sm:$0xff] }
 0xa21   :  { %v5131_v59 = vadd.f32 %v11883_v5, %v5035_v31  ;;  %v5037_v5 = vadd.f32 %v11890_v38, %v11749_v17  ;;  %v5520_v17 = vrot.slane %v11751_v13, 4  ;;  %v5521_v38 = vrot.slane %v11894_v49, 4  ;;  %v5471_v56 = vpop.f32.mrf.mxu3  ;;  %5880 = vmatpush.msrb.mxu2 %v7015_v44 }
 0xa22   :  { %v5315_v31 = vadd.f32 %v11964_v6, %v11837_v1 }
 0xa23   :  { %v5291_v51 = vpop.f32.mrf.mxu1  ;;  %v5223_v39 = vadd.f32 %v11911_v10, %v5131_v59  ;;  %v13703_v10 = vld [vmem:[#allocation92_spill] sm:$0xff]  ;;  %v5133_v37 = vadd.f32 %v11913_v41, %v5037_v5  ;;  %v5410_v59 = vadd.f32 %v5372_v36, %v5314_v19 }
 0xa24   :  { %v11998_v34 = vadd.f32 %v5291_v51, %v5221_v42  ;;  %v5375_v55 = vpop.f32.mrf.mxu2 }
 0xa25   :  { %v5225_v61 = vadd.f32 %v11932_v33, %v5133_v37  ;;  %v5522_v33 = vsel %vm2652_vm7, %v5520_v17, %v5521_v38 }
 0xa26   :  { %7008 = vmatmul.msk.f32.gmra.mxu1 %vm1067_vm2, %v13699_v11 }
 0xa29   :  { %v5474_v11 = vpop.f32.mrf.mxu3 }
 0xa2b   :  { %v5294_v47 = vpop.f32.mrf.mxu1 }
 0xa2c   :  { %v12006_v52 = vadd.f32 %v5294_v47, %v5222_v54  ;;  %v5378_v58 = vpop.f32.mrf.mxu2 }
 0xa2e   :  { %7009 = vmatmul.msk.f32.gmra.mxu1 %vm1067_vm2, %v13701_v0 }
 0xa31   :  { %v5477_v54 = vpop.f32.mrf.mxu3 }
 0xa33   :  { %v5297_v27 = vpop.f32.mrf.mxu1 }
 0xa34   :  { %v12014_v4 = vadd.f32 %v5297_v27, %v5223_v39  ;;  %v5411_v27 = vadd.f32 %v5375_v55, %v5315_v31 }
 0xa36   :  { %7010 = vmatmul.msk.f32.gmra.mxu1 %vm1067_vm2, %v13702_v60  ;;  %v5507_v6 = vadd.f32 %v5471_v56, %v5411_v27 }
 0xa39   :  { %v5480_v7 = vpop.f32.mrf.mxu3 }
 0xa3b   :  { %v5300_v45 = vpop.f32.mrf.mxu1 }
 0xa3c   :  { %v12022_v57 = vadd.f32 %v5300_v45, %v5224_v28  ;;  %v5506_v28 = vadd.f32 %v5468_v43, %v5410_v59 }
 0xa3e   :  { %7011 = vmatmul.msk.f32.gmra.mxu1 %vm1067_vm2, %v13703_v10 }
 0xa41   :  { %v5483_v44 = vpop.f32.mrf.mxu3 }
 0xa43   :  { %v5303_v9 = vpop.f32.mrf.mxu1 }
 0xa44   :  { %v12030_v15 = vadd.f32 %v5303_v9, %v5225_v61 }
 0xa46   :  { %7012 = vmatmul.msk.f32.gmra.mxu1 %vm1067_vm2, %v13704_v2 }
 0xa4b   :  { %v5306_v41 = vpop.f32.mrf.mxu1 }
 0xa4c   :  { %v12040_v53 = vadd.f32 %v5306_v41, %v5226_v23 }
 0xa4e   :  { %7013 = vmatmul.msk.f32.gmra.mxu1 %vm1067_vm2, %v5522_v33 }
 0xa53   :  { %v5549_v26 = vpop.f32.mrf.mxu1 }
 0xa54   :  { %v12048_v13 = vadd.f32 %v5549_v26, %v5501_v29 }
 0xa56   :  { %v5652_v60 = vmul.f32 %v12048_v13, %v12048_v13  ;;  %v5614_v45 = vsel %vm5613_vm10, %v12048_v13, 0.0 }
 0xa58   :  { %v5668_v9 = vsel %vm5613_vm10, %v5652_v60, 0.0 }
 0xa5b   :  { %v5552_v49 = vpop.f32.mrf.mxu1 }
 0xa5c   :  { %v12051_v12 = vadd.f32 %v5552_v49, %v11955_v21  ;;  %v5855_v21 = vld [vmem:[%s12481_s3 + $0x8] sm:$0xff] }
 0xa5d   :  { %5904 = vmatpush.msrb.mxu3 %v5855_v21 }
 0xa5e   :  { %v5653_v39 = vmul.f32 %v12051_v12, %v12051_v12  ;;  %v5615_v18 = vsel %vm5613_vm10, %v12051_v12, 0.0 }
 0xa5f   :  { %v5616_v32 = vadd.f32 %v5615_v18, %v5614_v45 }
 0xa63   :  { %v5555_v22 = vpop.f32.mrf.mxu1 }
 0xa64   :  { %v12054_v42 = vadd.f32 %v5555_v22, %v11962_v62 }
 0xa66   :  { %v5654_v1 = vmul.f32 %v12054_v42, %v12054_v42 }
 0xa68   :  { %v5671_v2 = vsel %vm5613_vm10, %v5654_v1, 0.0 }
 0xa6b   :  { %v5558_v3 = vpop.f32.mrf.mxu1 }
 0xa6c   :  { %v12057_v51 = vadd.f32 %v5558_v3, %v11968_v30  ;;  %v5381_v30 = vpop.f32.mrf.mxu2 }
 0xa6d   :  { %v5413_v37 = vadd.f32 %v5381_v30, %v11982_v25 }
 0xa6e   :  { %v5655_v5 = vmul.f32 %v12057_v51, %v12057_v51  ;;  %v5619_v40 = vsel %vm5613_vm10, %v12057_v51, 0.0 }
 0xa6f   :  { %v5509_v23 = vadd.f32 %v5477_v54, %v5413_v37 }
 0xa70   :  { %v5673_v46 = vsel %vm5613_vm10, %v5655_v5, 0.0 }
 0xa73   :  { %v5561_v48 = vpop.f32.mrf.mxu1 }
 0xa74   :  { %v12066_v62 = vadd.f32 %v5561_v48, %v11978_v50  ;;  %v5384_v0 = vpop.f32.mrf.mxu2  ;;  %v5316_v50 = vadd.f32 %v11972_v35, %v11849_v16  ;;  %v5669_v16 = vsel %vm5613_vm10, %v5653_v39, 0.0  ;;  %v5617_v35 = vsel %vm5613_vm10, %v12054_v42, 0.0 }
 0xa75   :  { %v5670_v41 = vadd.f32 %v5669_v16, %v5668_v9  ;;  %v5618_v33 = vadd.f32 %v5617_v35, %v5616_v32  ;;  %v5486_v35 = vpop.f32.mrf.mxu3 }
 0xa76   :  { %v5412_v8 = vadd.f32 %v5378_v58, %v5316_v50  ;;  %v5656_v17 = vmul.f32 %v12066_v62, %v12066_v62  ;;  %v5621_v25 = vsel %vm5613_vm10, %v12066_v62, 0.0 }
 0xa77   :  { %v5672_v49 = vadd.f32 %v5671_v2, %v5670_v41  ;;  %v5620_v36 = vadd.f32 %v5619_v40, %v5618_v33 }
 0xa78   :  { %v5508_v61 = vadd.f32 %v5474_v11, %v5412_v8  ;;  %v5675_v22 = vsel %vm5613_vm10, %v5656_v17, 0.0 }
 0xa79   :  { %v5674_v21 = vadd.f32 %v5673_v46, %v5672_v49  ;;  %v5622_v48 = vadd.f32 %v5621_v25, %v5620_v36 }
 0xa7b   :  { %v5564_v63 = vpop.f32.mrf.mxu1  ;;  %v5676_v30 = vadd.f32 %v5675_v22, %v5674_v21 }
 0xa7c   :  { %v12089_v10 = vadd.f32 %v5564_v63, %v5506_v28  ;;  %v5387_v26 = vpop.f32.mrf.mxu2 }
 0xa7e   :  { %v5657_v24 = vmul.f32 %v12089_v10, %v12089_v10  ;;  %v5623_v55 = vsel %vm5613_vm10, %v12089_v10, 0.0 }
 0xa7f   :  { %v5624_v54 = vadd.f32 %v5623_v55, %v5622_v48 }
 0xa80   :  { %v5677_v58 = vsel %vm5613_vm10, %v5657_v24, 0.0 }
 0xa81   :  { %v5678_v39 = vadd.f32 %v5677_v58, %v5676_v30 }
 0xa83   :  { %v5567_v47 = vpop.f32.mrf.mxu1 }
 0xa84   :  { %v12098_v38 = vadd.f32 %v5567_v47, %v5507_v6  ;;  %v5414_v47 = vadd.f32 %v5384_v0, %v11990_v20  ;;  %v5390_v8 = vpop.f32.mrf.mxu2 }
 0xa85   :  { %v5416_v25 = vadd.f32 %v5390_v8, %v12006_v52 }
 0xa86   :  { %v5658_v3 = vmul.f32 %v12098_v38, %v12098_v38  ;;  %v5625_v11 = vsel %vm5613_vm10, %v12098_v38, 0.0  ;;  %v5510_v27 = vadd.f32 %v5480_v7, %v5414_v47 }
 0xa87   :  { %v5626_v50 = vadd.f32 %v5625_v11, %v5624_v54  ;;  %v5512_v49 = vadd.f32 %v5486_v35, %v5416_v25 }
 0xa88   :  { %v5679_v19 = vsel %vm5613_vm10, %v5658_v3, 0.0 }
 0xa89   :  { %v5680_v28 = vadd.f32 %v5679_v19, %v5678_v39 }
 0xa8b   :  { %v5570_v14 = vpop.f32.mrf.mxu1 }
 0xa8c   :  { %v12105_v29 = vadd.f32 %v5570_v14, %v5508_v61  ;;  %v5415_v61 = vadd.f32 %v5387_v26, %v11998_v34  ;;  %v5393_v33 = vpop.f32.mrf.mxu2  ;;  %v5489_v34 = vpop.f32.mrf.mxu3 }
 0xa8d   :  { %v5417_v30 = vadd.f32 %v5393_v33, %v12014_v4 }
 0xa8e   :  { %v5659_v63 = vmul.f32 %v12105_v29, %v12105_v29  ;;  %v5627_v31 = vsel %vm5613_vm10, %v12105_v29, 0.0  ;;  %v5511_v2 = vadd.f32 %v5483_v44, %v5415_v61 }
 0xa8f   :  { %v5628_v18 = vadd.f32 %v5627_v31, %v5626_v50  ;;  %v5513_v19 = vadd.f32 %v5489_v34, %v5417_v30 }
 0xa90   :  { %v5681_v60 = vsel %vm5613_vm10, %v5659_v63, 0.0 }
 0xa91   :  { %v5682_v6 = vadd.f32 %v5681_v60, %v5680_v28 }
 0xa93   :  { %v5573_v43 = vpop.f32.mrf.mxu1 }
 0xa94   :  { %v12112_v56 = vadd.f32 %v5573_v43, %v5509_v23  ;;  %v5396_v21 = vpop.f32.mrf.mxu2  ;;  %v5492_v52 = vpop.f32.mrf.mxu3 }
 0xa95   :  { %v5418_v47 = vadd.f32 %v5396_v21, %v12022_v57  ;;  %v7014_v21 = vld [vmem:[%s12481_s3 + $0x10] sm:$0xff] }
 0xa96   :  { %v5660_v59 = vmul.f32 %v12112_v56, %v12112_v56  ;;  %v5629_v14 = vsel %vm5613_vm10, %v12112_v56, 0.0  ;;  %5881 = vmatpush.msrb.mxu2 %v7014_v21 }
 0xa97   :  { %v5630_v45 = vadd.f32 %v5629_v14, %v5628_v18 }
 0xa98   :  { %v5683_v20 = vsel %vm5613_vm10, %v5660_v59, 0.0  ;;  %v5514_v59 = vadd.f32 %v5492_v52, %v5418_v47 }
 0xa99   :  { %v5684_v5 = vadd.f32 %v5683_v20, %v5682_v6 }
 0xa9b   :  { %v5576_v1 = vpop.f32.mrf.mxu1 }
 0xa9c   :  { %v12129_v0 = vadd.f32 %v5576_v1, %v5510_v27  ;;  %v5399_v11 = vpop.f32.mrf.mxu2  ;;  %v5495_v54 = vpop.f32.mrf.mxu3 }
 0xa9d   :  { %v5419_v31 = vadd.f32 %v5399_v11, %v12030_v15 }
 0xa9e   :  { %v5631_v16 = vsel %vm5613_vm10, %v12129_v0, 0.0  ;;  %v5661_v7 = vmul.f32 %v12129_v0, %v12129_v0 }
 0xa9f   :  { %v5632_v37 = vadd.f32 %v5631_v16, %v5630_v45  ;;  %v5515_v50 = vadd.f32 %v5495_v54, %v5419_v31 }
 0xaa0   :  { %v5685_v9 = vsel %vm5613_vm10, %v5661_v7, 0.0 }
 0xaa1   :  { %v5686_v32 = vadd.f32 %v5685_v9, %v5684_v5 }
 0xaa3   :  { %v5579_v40 = vpop.f32.mrf.mxu1 }
 0xaa4   :  { %v12137_v17 = vadd.f32 %v5579_v40, %v5511_v2  ;;  %v5402_v18 = vpop.f32.mrf.mxu2  ;;  %v5498_v15 = vpop.f32.mrf.mxu3 }
 0xaa5   :  { %v5420_v1 = vadd.f32 %v5402_v18, %v12040_v53 }
 0xaa6   :  { %v5633_v23 = vsel %vm5613_vm10, %v12137_v17, 0.0  ;;  %v5662_v41 = vmul.f32 %v12137_v17, %v12137_v17 }
 0xaa7   :  { %v5634_v46 = vadd.f32 %v5633_v23, %v5632_v37  ;;  %v5516_v16 = vadd.f32 %v5498_v15, %v5420_v1  ;;  %v7019_v15 = vld [vmem:[%s12481_s3 + $0x28] sm:$0xff]  ;;  %v7021_v1 = vld [vmem:[%s12481_s3 + $0x30] sm:$0xff] }
 0xaa8   :  { %v5687_v24 = vsel %vm5613_vm10, %v5662_v41, 0.0  ;;  %5932 = vmatpush.msra.mxu2 %v7019_v15  ;;  %v7027_v15 = vld [vmem:[%s12481_s3 + $0x50] sm:$0xff] }
 0xaa9   :  { %v5688_v26 = vadd.f32 %v5687_v24, %v5686_v32 }
 0xaab   :  { %v5582_v36 = vpop.f32.mrf.mxu1 }
 0xaac   :  { %v12145_v43 = vadd.f32 %v5582_v36, %v5512_v49 }
 0xaae   :  { %v5635_v22 = vsel %vm5613_vm10, %v12145_v43, 0.0  ;;  %v5663_v55 = vmul.f32 %v12145_v43, %v12145_v43 }
 0xaaf   :  { %v5636_v3 = vadd.f32 %v5635_v22, %v5634_v46 }
 0xab0   :  { %v5689_v44 = vsel %vm5613_vm10, %v5663_v55, 0.0 }
 0xab1   :  { %v5690_v48 = vadd.f32 %v5689_v44, %v5688_v26 }
 0xab3   :  { %v5585_v58 = vpop.f32.mrf.mxu1 }
 0xab4   :  { %v12155_v39 = vadd.f32 %v5585_v58, %v5513_v19 }
 0xab6   :  { %v5664_v14 = vmul.f32 %v12155_v39, %v12155_v39  ;;  %v5637_v4 = vsel %vm5613_vm10, %v12155_v39, 0.0 }
 0xab7   :  { %v5638_v45 = vadd.f32 %v5637_v4, %v5636_v3 }
 0xab8   :  { %v5691_v20 = vsel %vm5613_vm10, %v5664_v14, 0.0 }
 0xab9   :  { %v5692_v5 = vadd.f32 %v5691_v20, %v5690_v48  ;;  %v5854_v48 = vld [vmem:[%s12481_s3] sm:$0xff] }
 0xaba   :  { %5905 = vmatpush.msrb.mxu3 %v5854_v48 }
 0xabb   :  { %v5588_v63 = vpop.f32.mrf.mxu1 }
 0xabc   :  { %v12157_v27 = vadd.f32 %v5588_v63, %v5514_v59 }
 0xabe   :  { %v5665_v57 = vmul.f32 %v12157_v27, %v12157_v27  ;;  %v5639_v8 = vsel %vm5613_vm10, %v12157_v27, 0.0 }
 0xabf   :  { %v5640_v37 = vadd.f32 %v5639_v8, %v5638_v45 }
 0xac0   :  { %v5693_v7 = vsel %vm5613_vm10, %v5665_v57, 0.0 }
 0xac1   :  { %v5694_v32 = vadd.f32 %v5693_v7, %v5692_v5 }
 0xac3   :  { %v5591_v60 = vpop.f32.mrf.mxu1 }
 0xac4   :  { %v12161_v28 = vadd.f32 %v5591_v60, %v5515_v50 }
 0xac6   :  { %v5666_v6 = vmul.f32 %v12161_v28, %v12161_v28  ;;  %v5641_v35 = vsel %vm5613_vm10, %v12161_v28, 0.0 }
 0xac7   :  { %v5642_v2 = vadd.f32 %v5641_v35, %v5640_v37 }
 0xac8   :  { %v5695_v53 = vsel %vm5613_vm10, %v5666_v6, 0.0 }
 0xac9   :  { %v5696_v41 = vadd.f32 %v5695_v53, %v5694_v32 }
 0xacb   :  { %v5594_v61 = vpop.f32.mrf.mxu1 }
 0xacc   :  { %v5612_v9 = vadd.f32 %v5594_v61, %v5516_v16 }
 0xace   :  { %v5643_v40 = vsel %vm5613_vm10, %v5612_v9, 0.0  ;;  %v5667_v23 = vmul.f32 %v5612_v9, %v5612_v9 }
 0xacf   :  { %v5644_v33 = vadd.f32 %v5643_v40, %v5642_v2 }
 0xad0   :  { %v5697_v46 = vsel %vm5613_vm10, %v5667_v23, 0.0 }
 0xad1   :  { %v5645_v25 = vrot.slane %v5644_v33, 4  ;;  %v5698_v24 = vadd.f32 %v5697_v46, %v5696_v41 }
 0xad3   :  { %v5646_v34 = vadd.f32 %v5645_v25, %v5644_v33  ;;  %v5699_v26 = vrot.slane %v5698_v24, 4 }
 0xad5   :  { %v5647_v49 = vrot.slane %v5646_v34, 2  ;;  %v5700_v36 = vadd.f32 %v5699_v26, %v5698_v24 }
 0xad7   :  { %v5648_v22 = vadd.f32 %v5647_v49, %v5646_v34  ;;  %v5701_v55 = vrot.slane %v5700_v36, 2 }
 0xad9   :  { %v5649_v3 = vrot.slane %v5648_v22, 1  ;;  %v5702_v44 = vadd.f32 %v5701_v55, %v5700_v36 }
 0xadb   :  { %v5650_v52 = vadd.f32 %v5649_v3, %v5648_v22  ;;  %v5703_v58 = vrot.slane %v5702_v44, 1 }
 0xadd   :  { %v12185_v11 = vmul.f32 0.0078125, %v5650_v52  ;;  %v5704_v63 = vadd.f32 %v5703_v58, %v5702_v44 }
 0xadf   :  { %v5705_v30 = vmul.f32 0.0078125, %v5704_v63  ;;  %v5706_v54 = vmul.f32 %v12185_v11, %v12185_v11  ;;  %v5723_v47 = vsub.f32 %v5612_v9, %v12185_v11  ;;  %v5716_v19 = vsub.f32 %v12112_v56, %v12185_v11  ;;  %v7022_v56 = vld [vmem:[%s12481_s3 + $0x38] sm:$0xff] }
 0xae0   :  { %v5717_v31 = vsub.f32 %v12129_v0, %v12185_v11  ;;  %v7018_v0 = vld [vmem:[%s12481_s3 + $0x20] sm:$0xff]  ;;  %5961 = vmatpush.msra.mxu3 %v7022_v56  ;;  %v5708_v8 = vsub.f32 %v12048_v13, %v12185_v11  ;;  %v5709_v6 = vsub.f32 %v12051_v12, %v12185_v11  ;;  %v5710_v13 = vsub.f32 %v12054_v42, %v12185_v11 }
 0xae1   :  { %v5707_v59 = vsub.f32 %v5705_v30, %v5706_v54  ;;  %5933 = vmatpush.msra.mxu2 %v7018_v0  ;;  %v5711_v12 = vsub.f32 %v12057_v51, %v12185_v11  ;;  %v5718_v61 = vsub.f32 %v12137_v17, %v12185_v11  ;;  %v5719_v53 = vsub.f32 %v12145_v43, %v12185_v11 }
 0xae2   :  { %5962 = vmatpush.msra.mxu3 %v7021_v1  ;;  %v5712_v44 = vsub.f32 %v12066_v62, %v12185_v11  ;;  %v5713_v21 = vsub.f32 %v12089_v10, %v12185_v11  ;;  %v5720_v48 = vsub.f32 %v12155_v39, %v12185_v11  ;;  %v5721_v52 = vsub.f32 %v12157_v27, %v12185_v11  ;;  %v7025_v39 = vld [vmem:[%s12481_s3 + $0x48] sm:$0xff] }
 0xae3   :  { %v5724_v50 = vadd.f32 1e-05, %v5707_v59 }
 0xae5   :  { %7071 = vrsqrt.f32 %v5724_v50  ;;  %vm5731_vm12 = vweird.f32 %v5724_v50 }
 0xaeb   :  { %v7072_v60 = vpop.eup %7071 }
 0xaec   :  { %v5726_v14 = vmul.f32 %v7072_v60, %v5724_v50  ;;  %vm5732_vm11 = vweird.f32 %v7072_v60 }
 0xaed   :  { %vm5733_vm13 = vmor %vm5731_vm12, %vm5732_vm11 }
 0xaee   :  { %v5727_v18 = vmul.f32 %v7072_v60, %v5726_v14  ;;  %v7028_v14 = vld [vmem:[%s12481_s3 + $0x58] sm:$0xff] }
 0xaf0   :  { %v5728_v4 = vmul.f32 0.5, %v5727_v18  ;;  %v7024_v18 = vld [vmem:[%s12481_s3 + $0x40] sm:$0xff] }
 0xaf2   :  { %v5729_v57 = vsub.f32 1.5, %v5728_v4 }
 0xaf4   :  { %v5730_v20 = vmul.f32 %v7072_v60, %v5729_v57 }
 0xaf6   :  { %v12210_v45 = vsel %vm5733_vm13, %v7072_v60, %v5730_v20 }
 0xaf7   :  { %v5750_v16 = vmul.f32 %v12210_v45, %v5723_v47  ;;  %v5735_v7 = vmul.f32 %v12210_v45, %v5708_v8  ;;  %v5736_v35 = vmul.f32 %v12210_v45, %v5709_v6  ;;  %v5743_v5 = vmul.f32 %v12210_v45, %v5716_v19 }
 0xaf8   :  { %v5744_v37 = vmul.f32 %v12210_v45, %v5717_v31  ;;  %v5737_v9 = vmul.f32 %v12210_v45, %v5710_v13  ;;  %v5738_v32 = vmul.f32 %v12210_v45, %v5711_v12  ;;  %v5745_v2 = vmul.f32 %v12210_v45, %v5718_v61  ;;  %v7034_v13 = vld [vmem:[%s12481_s3 + $0x78] sm:$0xff]  ;;  %v7030_v12 = vld [vmem:[%s12481_s3 + $0x60] sm:$0xff] }
 0xaf9   :  { %5766 = vst.msk [vmem:[#allocation3 + $0x78] sm:$0xff] %vm5613_vm10, %v5750_v16  ;;  %v5746_v42 = vmul.f32 %v12210_v45, %v5719_v53  ;;  %v5739_v54 = vmul.f32 %v12210_v45, %v5712_v44  ;;  %v5740_v47 = vmul.f32 %v12210_v45, %v5713_v21  ;;  %v5747_v19 = vmul.f32 %v12210_v45, %v5720_v48  ;;  %v7031_v16 = vld [vmem:[%s12481_s3 + $0x68] sm:$0xff] }
 0xafa   :  { %5751 = vst.msk [vmem:[#allocation3] sm:$0xff] %vm5613_vm10, %v5735_v7  ;;  %v5748_v62 = vmul.f32 %v12210_v45, %v5721_v52  ;;  %v7043_v52 = vld [vmem:[%s12481_s3 + $0xa8] sm:$0xff] }
 0xafb   :  { %5752 = vst.msk [vmem:[#allocation3 + $0x8] sm:$0xff] %vm5613_vm10, %v5736_v35 }
 0xafc   :  { %5759 = vst.msk [vmem:[#allocation3 + $0x40] sm:$0xff] %vm5613_vm10, %v5743_v5 }
 0xafd   :  { %5760 = vst.msk [vmem:[#allocation3 + $0x48] sm:$0xff] %vm5613_vm10, %v5744_v37 }
 0xafe   :  { %5753 = vst.msk [vmem:[#allocation3 + $0x10] sm:$0xff] %vm5613_vm10, %v5737_v9 }
 0xaff   :  { %5754 = vst.msk [vmem:[#allocation3 + $0x18] sm:$0xff] %vm5613_vm10, %v5738_v32 }
 0xb00   :  { %5761 = vst.msk [vmem:[#allocation3 + $0x50] sm:$0xff] %vm5613_vm10, %v5745_v2 }
 0xb01   :  { %5762 = vst.msk [vmem:[#allocation3 + $0x58] sm:$0xff] %vm5613_vm10, %v5746_v42 }
 0xb02   :  { %v5767_v51 = vld [vmem:[#allocation3] ss:$2 sm:$0xff]  ;;  %v5783_v17 = vld [vmem:[#allocation3 + $0x1] ss:$2 sm:$0xff]  ;;  %5755 = vst.msk [vmem:[#allocation3 + $0x20] sm:$0xff] %vm5613_vm10, %v5739_v54 }
 0xb03   :  { %v5798_v43 = vadd.f32 %v5783_v17, %v5767_v51  ;;  %5756 = vst.msk [vmem:[#allocation3 + $0x28] sm:$0xff] %vm5613_vm10, %v5740_v47  ;;  %v7033_v51 = vld [vmem:[%s12481_s3 + $0x70] sm:$0xff]  ;;  %v5714_v17 = vsub.f32 %v12098_v38, %v12185_v11  ;;  %v7037_v38 = vld [vmem:[%s12481_s3 + $0x88] sm:$0xff] }
 0xb04   :  { %v5775_v40 = vld [vmem:[#allocation3 + $0x40] ss:$2 sm:$0xff]  ;;  %v5791_v23 = vld [vmem:[#allocation3 + $0x41] ss:$2 sm:$0xff]  ;;  %5763 = vst.msk [vmem:[#allocation3 + $0x60] sm:$0xff] %vm5613_vm10, %v5747_v19 }
 0xb05   :  { %v5802_v41 = vadd.f32 %v5791_v23, %v5775_v40  ;;  %v5814_v33 = vrot.slane %v5798_v43, 4  ;;  %5764 = vst.msk [vmem:[#allocation3 + $0x68] sm:$0xff] %vm5613_vm10, %v5748_v62  ;;  %v5722_v40 = vsub.f32 %v12161_v28, %v12185_v11  ;;  %v7046_v62 = vld [vmem:[%s12481_s3 + $0xb8] sm:$0xff] }
 0xb06   :  { %v5769_v46 = vld [vmem:[#allocation3 + $0x10] ss:$2 sm:$0xff]  ;;  %v5785_v25 = vld [vmem:[#allocation3 + $0x11] ss:$2 sm:$0xff] }
 0xb07   :  { %v5818_v24 = vrot.slane %v5802_v41, 4  ;;  %v5830_v34 = vadd.f32 %v5814_v33, %v5798_v43  ;;  %v5799_v55 = vadd.f32 %v5785_v25, %v5769_v46  ;;  %v5715_v43 = vsub.f32 %v12105_v29, %v12185_v11  ;;  %v7040_v11 = vld [vmem:[%s12481_s3 + $0x98] sm:$0xff] }
 0xb08   :  { %v5777_v26 = vld [vmem:[#allocation3 + $0x50] ss:$2 sm:$0xff]  ;;  %v5793_v49 = vld [vmem:[#allocation3 + $0x51] ss:$2 sm:$0xff]  ;;  %v5741_v33 = vmul.f32 %v12210_v45, %v5714_v17  ;;  %v5749_v25 = vmul.f32 %v12210_v45, %v5722_v40 }
 0xb09   :  { %v5834_v36 = vadd.f32 %v5818_v24, %v5802_v41  ;;  %v5838_v22 = vmul.f32 0.25, %v5830_v34  ;;  %v5803_v3 = vadd.f32 %v5793_v49, %v5777_v26  ;;  %v5815_v59 = vrot.slane %v5799_v55, 4 }
 0xb0a   :  { %v5771_v7 = vld [vmem:[#allocation3 + $0x20] ss:$2 sm:$0xff]  ;;  %v5787_v35 = vld [vmem:[#allocation3 + $0x21] ss:$2 sm:$0xff]  ;;  %v5742_v46 = vmul.f32 %v12210_v45, %v5715_v43  ;;  %5757 = vst.msk [vmem:[#allocation3 + $0x30] sm:$0xff] %vm5613_vm10, %v5741_v33 }
 0xb0b   :  { %v5842_v58 = vmul.f32 0.25, %v5834_v36  ;;  %v5846_v63 = vmax.f32 %v5838_v22, 0.0  ;;  %v5819_v30 = vrot.slane %v5803_v3, 4  ;;  %v5831_v57 = vadd.f32 %v5815_v59, %v5799_v55  ;;  %v7036_v45 = vld [vmem:[%s12481_s3 + $0x80] sm:$0xff]  ;;  %5765 = vst.msk [vmem:[#allocation3 + $0x70] sm:$0xff] %vm5613_vm10, %v5749_v25  ;;  %v7039_v36 = vld [vmem:[%s12481_s3 + $0x90] sm:$0xff] }
 0xb0c   :  { %v5779_v61 = vld [vmem:[#allocation3 + $0x60] ss:$2 sm:$0xff]  ;;  %v5795_v53 = vld [vmem:[#allocation3 + $0x61] ss:$2 sm:$0xff]  ;;  %v5800_v2 = vadd.f32 %v5787_v35, %v5771_v7  ;;  %5758 = vst.msk [vmem:[#allocation3 + $0x38] sm:$0xff] %vm5613_vm10, %v5742_v46 }
 0xb0d   :  { %v5850_v31 = vmax.f32 %v5842_v58, 0.0  ;;  %v5861_v10 = vrot.slane %v5846_v63, 1  ;;  %v5835_v60 = vadd.f32 %v5819_v30, %v5803_v3  ;;  %v5913_v56 = vrot.slane %v5846_v63, 2 }
 0xb0e   :  { %v5942_v20 = vrot.slane %v5846_v63, 3  ;;  %v5839_v6 = vmul.f32 0.25, %v5831_v57  ;;  %v5804_v42 = vadd.f32 %v5795_v53, %v5779_v61  ;;  %v5816_v34 = vrot.slane %v5800_v2, 4  ;;  %v7049_v57 = vld [vmem:[%s12481_s3 + $0xc8] sm:$0xff] }
 0xb0f   :  { %v5863_v27 = vsel %vm5862_vm14, %v5850_v31, %v5861_v10  ;;  %v5886_v50 = vrot.slane %v5850_v31, 7  ;;  %v5914_v0 = vrot.slane %v5850_v31, 1  ;;  %v5843_v1 = vmul.f32 0.25, %v5835_v60 }
 0xb10   :  { %7016 = vmatmul.msk.f32.vlgmr.msrb.gmra.mxu2 %vm5613_vm10, %v5863_v27  ;;  %v5943_v8 = vrot.slane %v5850_v31, 2  ;;  %v5847_v32 = vmax.f32 %v5839_v6, 0.0  ;;  %v5820_v41 = vrot.slane %v5804_v42, 4  ;;  %v5832_v49 = vadd.f32 %v5816_v34, %v5800_v2  ;;  %v7042_v31 = vld [vmem:[%s12481_s3 + $0xa0] sm:$0xff]  ;;  %v7051_v6 = vld [vmem:[%s12481_s3 + $0xd0] sm:$0xff] }
 0xb11   :  { %v5887_v4 = vsel %vm5862_vm14, %v5886_v50, %v5846_v63  ;;  %5991 = vmatpush.msrb.mxu2 %v7025_v39  ;;  %v5915_v5 = vsel %vm5862_vm14, %v5914_v0, %v5913_v56  ;;  %v5851_v37 = vmax.f32 %v5843_v1, 0.0  ;;  %v7045_v50 = vld [vmem:[%s12481_s3 + $0xb0] sm:$0xff]  ;;  %v7052_v0 = vld [vmem:[%s12481_s3 + $0xd8] sm:$0xff]  ;;  %v7048_v1 = vld [vmem:[%s12481_s3 + $0xc0] sm:$0xff] }
 0xb12   :  { %7017 = vmatmul.msk.f32.vlgmr.msrb.gmra.mxu3 %vm5613_vm10, %v5887_v4  ;;  %v5944_v9 = vsel %vm5862_vm14, %v5943_v8, %v5942_v20  ;;  %v6001_v24 = vrot.slane %v5847_v32, 1  ;;  %v5836_v28 = vadd.f32 %v5820_v41, %v5804_v42  ;;  %v6029_v22 = vrot.slane %v5847_v32, 2  ;;  %v5781_v47 = vld [vmem:[#allocation3 + $0x70] ss:$2 sm:$0xff]  ;;  %v5797_v19 = vld [vmem:[#allocation3 + $0x71] ss:$2 sm:$0xff] }
 0xb13   :  { %6019 = vmatpush.msrb.mxu3 %v7028_v14  ;;  %5992 = vmatpush.msrb.mxu2 %v7024_v18  ;;  %v5973_v23 = vrot.slane %v5851_v37, 7  ;;  %v6030_v55 = vrot.slane %v5851_v37, 1  ;;  %v6058_v44 = vrot.slane %v5847_v32, 3  ;;  %v6059_v21 = vrot.slane %v5851_v37, 2  ;;  %v5773_v58 = vld [vmem:[#allocation3 + $0x30] ss:$2 sm:$0xff] }
 0xb14   :  { %v6002_v26 = vsel %vm5862_vm14, %v5851_v37, %v6001_v24  ;;  %v5844_v3 = vmul.f32 0.25, %v5836_v28  ;;  %v5840_v48 = vmul.f32 0.25, %v5832_v49  ;;  %v5789_v63 = vld [vmem:[#allocation3 + $0x31] ss:$2 sm:$0xff]  ;;  %v5805_v10 = vadd.f32 %v5797_v19, %v5781_v47 }
 0xb15   :  { %6020 = vmatpush.msrb.mxu3 %v7027_v15  ;;  %v5974_v29 = vsel %vm5862_vm14, %v5973_v23, %v5847_v32  ;;  %v6031_v30 = vsel %vm5862_vm14, %v6030_v55, %v6029_v22  ;;  %v6060_v59 = vsel %vm5862_vm14, %v6059_v21, %v6058_v44  ;;  %v5801_v27 = vadd.f32 %v5789_v63, %v5773_v58  ;;  %v7054_v32 = vld [vmem:[%s12481_s3 + $0xe0] sm:$0xff]  ;;  %v6337_v28 = vld [vmem:[%s12483_s5 + $0x78] sm:$0xff]  ;;  %v6332_v55 = vld [vmem:[%s12483_s5 + $0x50] sm:$0xff] }
 0xb16   :  { %v5852_v54 = vmax.f32 %v5844_v3, 0.0  ;;  %v5848_v39 = vmax.f32 %v5840_v48, 0.0  ;;  %v5821_v14 = vrot.slane %v5805_v10, 4  ;;  %v6333_v22 = vld [vmem:[%s12483_s5 + $0x58] sm:$0xff]  ;;  %v6331_v3 = vld [vmem:[%s12483_s5 + $0x48] sm:$0xff] }
 0xb17   :  { %v5817_v4 = vrot.slane %v5801_v27, 4  ;;  %v6329_v58 = vld [vmem:[%s12483_s5 + $0x38] sm:$0xff] }
 0xb18   :  { %7020 = vmatmul.msk.f32.vlgmr.msra.gmra.mxu2 %vm5613_vm10, %v5915_v5  ;;  %v6089_v60 = vrot.slane %v5852_v54, 7  ;;  %v6117_v18 = vrot.slane %v5848_v39, 1  ;;  %v5837_v56 = vadd.f32 %v5821_v14, %v5805_v10  ;;  %v6146_v7 = vrot.slane %v5852_v54, 1  ;;  %v6378_v14 = vld [vmem:[%s12485_s7 + $0x78] sm:$0xff] }
 0xb19   :  { %6048 = vmatpush.msra.mxu2 %v7031_v16  ;;  %v5833_v8 = vadd.f32 %v5817_v4, %v5801_v27  ;;  %v6145_v16 = vrot.slane %v5848_v39, 2  ;;  %v6174_v5 = vrot.slane %v5848_v39, 3  ;;  %v6175_v37 = vrot.slane %v5852_v54, 2 }
 0xb1a   :  { %7023 = vmatmul.msk.f32.vlgmr.msra.gmra.mxu3 %vm5613_vm10, %v5944_v9  ;;  %v6090_v15 = vsel %vm5862_vm14, %v6089_v60, %v5848_v39  ;;  %v6118_v20 = vsel %vm5862_vm14, %v5852_v54, %v6117_v18  ;;  %v5845_v35 = vmul.f32 0.25, %v5837_v56  ;;  %v7058_v9 = vld [vmem:[%s12481_s3 + $0xf8] sm:$0xff]  ;;  %v6327_v54 = vld [vmem:[%s12483_s5 + $0x28] sm:$0xff]  ;;  %v6324_v60 = vld [vmem:[%s12483_s5 + $0x10] sm:$0xff] }
 0xb1b   :  { %6077 = vmatpush.msra.mxu3 %v7034_v13  ;;  %6049 = vmatpush.msra.mxu2 %v7030_v12  ;;  %v5841_v13 = vmul.f32 0.25, %v5833_v8  ;;  %v7055_v12 = vld [vmem:[%s12481_s3 + $0xe8] sm:$0xff]  ;;  %v6147_v61 = vsel %vm5862_vm14, %v6146_v7, %v6145_v16  ;;  %v6176_v2 = vsel %vm5862_vm14, %v6175_v37, %v6174_v5  ;;  %v6325_v39 = vld [vmem:[%s12483_s5 + $0x18] sm:$0xff]  ;;  %v6377_v18 = vld [vmem:[%s12485_s7 + $0x70] sm:$0xff] }
 0xb1c   :  { %v5853_v53 = vmax.f32 %v5845_v35, 0.0  ;;  %v6374_v8 = vld [vmem:[%s12485_s7 + $0x58] sm:$0xff]  ;;  %v6373_v16 = vld [vmem:[%s12485_s7 + $0x50] sm:$0xff]  ;;  %v6372_v5 = vld [vmem:[%s12485_s7 + $0x48] sm:$0xff] }
 0xb1d   :  { %6078 = vmatpush.msra.mxu3 %v7033_v51  ;;  %v5849_v42 = vmax.f32 %v5841_v13, 0.0  ;;  %v7057_v51 = vld [vmem:[%s12481_s3 + $0xf0] sm:$0xff]  ;;  %v6371_v13 = vld [vmem:[%s12485_s7 + $0x40] sm:$0xff] }
 0xb1e   :  { %v6205_v17 = vrot.slane %v5853_v53, 7  ;;  %v6262_v33 = vrot.slane %v5853_v53, 1  ;;  %v6291_v25 = vrot.slane %v5853_v53, 2 }
 0xb1f   :  { %v6233_v43 = vrot.slane %v5849_v42, 1  ;;  %v6261_v41 = vrot.slane %v5849_v42, 2  ;;  %v6290_v46 = vrot.slane %v5849_v42, 3 }
 0xb20   :  { %7026 = vmatmul.msk.f32.vlgmr.msrb.gmra.mxu2 %vm5613_vm10, %v5974_v29  ;;  %v6206_v40 = vsel %vm5862_vm14, %v6205_v17, %v5849_v42  ;;  %v6368_v42 = vld [vmem:[%s12485_s7 + $0x28] sm:$0xff] }
 0xb21   :  { %6107 = vmatpush.msrb.mxu2 %v7037_v38  ;;  %v6234_v23 = vsel %vm5862_vm14, %v5853_v53, %v6233_v43  ;;  %v6263_v24 = vsel %vm5862_vm14, %v6262_v33, %v6261_v41  ;;  %v6292_v34 = vsel %vm5862_vm14, %v6291_v25, %v6290_v46  ;;  %v6366_v43 = vld [vmem:[%s12485_s7 + $0x18] sm:$0xff]  ;;  %v7066_v41 = vld [vmem:[%s12482_s4] ss:$0 sm:$0xff] }
 0xb22   :  { %7029 = vmatmul.msk.f32.vlgmr.msrb.gmra.mxu3 %vm5613_vm10, %v6002_v26 }
 0xb23   :  { %6135 = vmatpush.msrb.mxu3 %v7040_v11  ;;  %6108 = vmatpush.msrb.mxu2 %v7036_v45  ;;  %v6336_v11 = vld [vmem:[%s12483_s5 + $0x70] sm:$0xff]  ;;  %v6335_v45 = vld [vmem:[%s12483_s5 + $0x68] sm:$0xff] }
 0xb25   :  { %6136 = vmatpush.msrb.mxu3 %v7039_v36  ;;  %v6334_v36 = vld [vmem:[%s12483_s5 + $0x60] sm:$0xff] }
 0xb28   :  { %7032 = vmatmul.msk.f32.vlgmr.msra.gmra.mxu2 %vm5613_vm10, %v6031_v30  ;;  %v6328_v30 = vld [vmem:[%s12483_s5 + $0x30] sm:$0xff] }
 0xb29   :  { %6164 = vmatpush.msra.mxu2 %v7043_v52  ;;  %v6330_v52 = vld [vmem:[%s12483_s5 + $0x40] sm:$0xff] }
 0xb2a   :  { %7035 = vmatmul.msk.f32.vlgmr.msra.gmra.mxu3 %vm5613_vm10, %v6060_v59  ;;  %v6326_v59 = vld [vmem:[%s12483_s5 + $0x20] sm:$0xff] }
 0xb2b   :  { %6193 = vmatpush.msra.mxu3 %v7046_v62  ;;  %6165 = vmatpush.msra.mxu2 %v7042_v31 }
 0xb2d   :  { %6194 = vmatpush.msra.mxu3 %v7045_v50 }
 0xb30   :  { %7038 = vmatmul.msk.f32.vlgmr.msrb.gmra.mxu2 %vm5613_vm10, %v6090_v15  ;;  %v6376_v15 = vld [vmem:[%s12485_s7 + $0x68] sm:$0xff] }
 0xb31   :  { %6223 = vmatpush.msrb.mxu2 %v7049_v57  ;;  %v6323_v57 = vld [vmem:[%s12483_s5 + $0x8] sm:$0xff] }
 0xb32   :  { %7041 = vmatmul.msk.f32.vlgmr.msrb.gmra.mxu3 %vm5613_vm10, %v6118_v20 }
 0xb33   :  { %6251 = vmatpush.msrb.mxu3 %v7052_v0  ;;  %6224 = vmatpush.msrb.mxu2 %v7048_v1  ;;  %v6322_v0 = vld [vmem:[%s12483_s5] sm:$0xff]  ;;  %s6409_s5 = sshll.u32 %s7099_s29, 4  ;;  %s6410_s5 = int_to_ptr.vmem [resolvable:$true] %s6409_s5 }
 0xb34   :  { %v6375_v1 = vld [vmem:[%s12485_s7 + $0x60] sm:$0xff] }
 0xb35   :  { %6252 = vmatpush.msrb.mxu3 %v7051_v6 }
 0xb38   :  { %7044 = vmatmul.msk.f32.vlgmr.msra.gmra.mxu2 %vm5613_vm10, %v6147_v61 }
 0xb39   :  { %6280 = vmatpush.msra.mxu2 %v7055_v12  ;;  %v6370_v12 = vld [vmem:[%s12485_s7 + $0x38] sm:$0xff] }
 0xb3a   :  { %7047 = vmatmul.msk.f32.vlgmr.msra.gmra.mxu3 %vm5613_vm10, %v6176_v2 }
 0xb3b   :  { %6309 = vmatpush.msra.mxu3 %v7058_v9  ;;  %6281 = vmatpush.msra.mxu2 %v7054_v32  ;;  %v6369_v9 = vld [vmem:[%s12485_s7 + $0x30] sm:$0xff] }
 0xb3d   :  { %6310 = vmatpush.msra.mxu3 %v7057_v51  ;;  %v6367_v51 = vld [vmem:[%s12485_s7 + $0x20] sm:$0xff] }
 0xb40   :  { %7050 = vmatmul.msk.f32.vlgmr.msrb.gmra.mxu2 %vm5613_vm10, %v6206_v40 }
 0xb41   :  { %6342 = vmatpush.msrb.mxu2 %v6337_v28  ;;  %v7067_v28 = vld [vmem:[%s12484_s6] ss:$0 sm:$0xff] }
 0xb42   :  { %7053 = vmatmul.msk.f32.vlgmr.msrb.gmra.mxu3 %vm5613_vm10, %v6234_v23 }
 0xb43   :  { %6343 = vmatpush.msrb.mxu2 %v6336_v11  ;;  %6383 = vmatpush.msrb.mxu3 %v6378_v14 }
 0xb45   :  { %6344 = vmatpush.msrb.mxu2 %v6335_v45  ;;  %6384 = vmatpush.msrb.mxu3 %v6377_v18 }
 0xb47   :  { %6345 = vmatpush.msrb.mxu2 %v6334_v36  ;;  %6385 = vmatpush.msrb.mxu3 %v6376_v15 }
 0xb48   :  { %7056 = vmatmul.msk.f32.vlgmr.msra.gmra.mxu2 %vm5613_vm10, %v6263_v24 }
 0xb49   :  { %6346 = vmatpush.msrb.mxu2 %v6333_v22  ;;  %6386 = vmatpush.msrb.mxu3 %v6375_v1 }
 0xb4a   :  { %7059 = vmatmul.msk.f32.vlgmr.msra.gmra.mxu3 %vm5613_vm10, %v6292_v34  ;;  %v6365_v34 = vld [vmem:[%s12485_s7 + $0x10] sm:$0xff] }
 0xb4b   :  { %6347 = vmatpush.msrb.mxu2 %v6332_v55  ;;  %6387 = vmatpush.msrb.mxu3 %v6374_v8 }
 0xb4d   :  { %6348 = vmatpush.msrb.mxu2 %v6331_v3  ;;  %6388 = vmatpush.msrb.mxu3 %v6373_v16 }
 0xb4f   :  { %6349 = vmatpush.msrb.mxu2 %v6330_v52  ;;  %6389 = vmatpush.msrb.mxu3 %v6372_v5 }
 0xb51   :  { %6350 = vmatpush.msrb.mxu2 %v6329_v58  ;;  %6390 = vmatpush.msrb.mxu3 %v6371_v13 }
 0xb53   :  { %6351 = vmatpush.msrb.mxu2 %v6328_v30  ;;  %6391 = vmatpush.msrb.mxu3 %v6370_v12 }
 0xb55   :  { %6352 = vmatpush.msrb.mxu2 %v6327_v54  ;;  %6392 = vmatpush.msrb.mxu3 %v6369_v9 }
 0xb57   :  { %6353 = vmatpush.msrb.mxu2 %v6326_v59  ;;  %6393 = vmatpush.msrb.mxu3 %v6368_v42 }
 0xb59   :  { %6354 = vmatpush.msrb.mxu2 %v6325_v39  ;;  %6394 = vmatpush.msrb.mxu3 %v6367_v51 }
 0xb5b   :  { %6355 = vmatpush.msrb.mxu2 %v6324_v60  ;;  %6395 = vmatpush.msrb.mxu3 %v6366_v43 }
 0xb5d   :  { %6356 = vmatpush.msrb.mxu2 %v6323_v57  ;;  %6396 = vmatpush.msrb.mxu3 %v6365_v34 }
 0xb5f   :  { %6357 = vmatpush.msrb.mxu2 %v6322_v0 }
 0xb93   :  { %v5883_v38 = vpop.f32.mrf.mxu2 }
 0xb95   :  { %v5907_v29 = vpop.f32.mrf.mxu3 }
 0xb96   :  { %v5908_v48 = vadd.f32 %v5907_v29, %v5883_v38  ;;  %v6364_v38 = vld [vmem:[%s12485_s7 + $0x8] sm:$0xff]  ;;  %v6363_v29 = vld [vmem:[%s12485_s7] sm:$0xff]  ;;  %s6411_s7 = sshll.u32 %s12487_s9, 4  ;;  %s6412_s7 = int_to_ptr.hbm [resolvable:$true] %s6411_s7 }
 0xb97   :  { %6397 = vmatpush.msrb.mxu3 %v6364_v38 }
 0xb99   :  { %6398 = vmatpush.msrb.mxu3 %v6363_v29 }
 0xb9b   :  { %v5935_v26 = vpop.f32.mrf.mxu2 }
 0xb9c   :  { %v5938_v63 = vadd.f32 %v5935_v26, %v5908_v48 }
 0xb9d   :  { %v5964_v49 = vpop.f32.mrf.mxu3 }
 0xb9e   :  { %v5967_v19 = vadd.f32 %v5964_v49, %v5938_v63  ;;  %v7068_v49 = vld [vmem:[%s12486_s8] ss:$0 sm:$0xff] }
 0xba3   :  { %v5994_v44 = vpop.f32.mrf.mxu2 }
 0xba4   :  { %v5997_v31 = vadd.f32 %v5994_v44, %v5967_v19 }
 0xba5   :  { %v6022_v21 = vpop.f32.mrf.mxu3 }
 0xba6   :  { %v6025_v10 = vadd.f32 %v6022_v21, %v5997_v31 }
 0xbab   :  { %v6051_v47 = vpop.f32.mrf.mxu2 }
 0xbac   :  { %v6054_v50 = vadd.f32 %v6051_v47, %v6025_v10 }
 0xbad   :  { %v6080_v62 = vpop.f32.mrf.mxu3 }
 0xbae   :  { %v6083_v56 = vadd.f32 %v6080_v62, %v6054_v50 }
 0xbb3   :  { %v6110_v27 = vpop.f32.mrf.mxu2 }
 0xbb4   :  { %v6113_v20 = vadd.f32 %v6110_v27, %v6083_v56 }
 0xbb5   :  { %v6138_v4 = vpop.f32.mrf.mxu3 }
 0xbb6   :  { %v6141_v35 = vadd.f32 %v6138_v4, %v6113_v20 }
 0xbbb   :  { %v6167_v6 = vpop.f32.mrf.mxu2 }
 0xbbc   :  { %v6170_v37 = vadd.f32 %v6167_v6, %v6141_v35 }
 0xbbd   :  { %v6196_v7 = vpop.f32.mrf.mxu3 }
 0xbbe   :  { %v6199_v53 = vadd.f32 %v6196_v7, %v6170_v37 }
 0xbc3   :  { %v6226_v61 = vpop.f32.mrf.mxu2 }
 0xbc4   :  { %v6229_v2 = vadd.f32 %v6226_v61, %v6199_v53 }
 0xbc5   :  { %v6254_v32 = vpop.f32.mrf.mxu3 }
 0xbc6   :  { %v6257_v17 = vadd.f32 %v6254_v32, %v6229_v2 }
 0xbcb   :  { %v6283_v40 = vpop.f32.mrf.mxu2 }
 0xbcc   :  { %v6286_v23 = vadd.f32 %v6283_v40, %v6257_v17 }
 0xbcd   :  { %v6312_v33 = vpop.f32.mrf.mxu3 }
 0xbce   :  { %v6315_v46 = vadd.f32 %v6312_v33, %v6286_v23 }
 0xbd0   :  { %v6320_v25 = vadd.f32 %v7066_v41, %v6315_v46 }
 0xbd2   :  { %v6321_v24 = vmax.f32 %v6320_v25, 0.0 }
 0xbd4   :  { %6358 = vmatmul.f32.vlgmr.msrb.gmra.mxu2 %v6321_v24 }
 0xc57   :  { %v6359_v11 = vpop.f32.mrf.mxu2 }
 0xc58   :  { %v6360_v45 = vadd.f32 %v7067_v28, %v6359_v11 }
 0xc5a   :  { %v6362_v26 = vmax.f32 %v6360_v45, 0.0 }
 0xc5c   :  { %6399 = vmatmul.f32.vlgmr.msrb.gmra.mxu3 %v6362_v26 }
 0xcdf   :  { %v6400_v36 = vpop.f32.mrf.mxu3 }
 0xce0   :  { %v6401_v22 = vadd.f32 %v7068_v49, %v6400_v36 }
 0xce2   :  { %6403 = vst [vmem:[#allocation4] sm:$0x3] %v6401_v22 }
 0xce3   :  { %6414 = dma.vmem_to_hbm [thread:$0]  %s6410_s5, 32, %s6412_s7, [#allocation5]  }
 0xce4   :  { %7097 = dma.done.wait [#allocation5], 32  }
 0xce5   :  { %7098 = vsyncadd [#allocation5], 4294967264 }
 0xce6   :  { %6419 = vsyncpa [#allocation5], 1 }

</bundles_post_ra>
